<compile_context>
chip_gen: v6e
topology: v6e:2x2x1
jax: 0.10.0
libtpu: 0.0.40
codegen_flags: <defaults>
</compile_context>

<pallas_src>
import functools

import jax
import jax.numpy as jnp
from jax.experimental import pallas as pl
from jax.experimental.pallas import tpu as pltpu


_POINT_PAD_MULTIPLE = 256   # keep M >= 256 so the v6e/v7x 256x256 MXU stays full


def _pick_tile(n):
    # Prefer the biggest lane/sublane-friendly tile; capped at 1024 so the
    # fused pass stays well inside v7x's 64 MiB VMEM per TensorCore.
    for t in (1024, 512, 256):
        if n % t == 0:
            return t
    raise ValueError("padded point count must be a multiple of 256")


def _has_bf16_vpu():
    """bf16 VALU epilogues only pay off on v6e/v7x (v5e and older lack bf16 VPU)."""
    try:
        kind = jax.devices()[0].device_kind.lower()
    except Exception:
        return True
    return not any(s in kind for s in ("v2", "v3", "v4", "v5"))


# --------------------------------------------------------------------------
# Shared per-tile pieces.
# --------------------------------------------------------------------------
def _bias_relu_bf16(acc_f32, bias_f32, bf16_epilogue):
    """Bias + ReLU after an MXU matmul; result is bf16, ready for the next dot."""
    if bf16_epilogue:
        # v6e/v7x: bf16 VALU packs 2 elems/lane -> halves epilogue slot pressure.
        return jnp.maximum(acc_f32.astype(jnp.bfloat16)
                           + bias_f32.astype(jnp.bfloat16), 0.0)
    return jnp.maximum(acc_f32 + bias_f32, 0.0).astype(jnp.bfloat16)


def _mlp1_tile(x, w1, b1, w2, b2, w3, b3, bf16_epilogue):
    # mlp1: 3 -> 64 -> 128 -> 1024 (BN folded, ReLU).
    # First layer (K=3) stays on the VPU in f32 (too skinny for the MXU).
    # NOTE: the (tn, 3) x block is lane-sparse (pads to 128 lanes in VMEM);
    # accepted -- it is <= 1 MiB even at tn=1024.
    h = (x[:, 0:1] * w1[0:1, :] + x[:, 1:2] * w1[1:2, :]
         + x[:, 2:3] * w1[2:3, :] + b1)
    h = jnp.maximum(h, 0.0).astype(jnp.bfloat16)                      # (TN, 64)
    h = jnp.dot(h, w2, preferred_element_type=jnp.float32)
    h = _bias_relu_bf16(h, b2, bf16_epilogue)                         # (TN, 128)
    h = jnp.dot(h, w3, preferred_element_type=jnp.float32)
    return _bias_relu_bf16(h, b3, bf16_epilogue)                      # (TN, 1024) bf16


# --------------------------------------------------------------------------
# Kernel 1: glob pass -- running max over N of mlp1(x).  No feat hits HBM.
# --------------------------------------------------------------------------
def _glob_kernel(x_ref, w1_ref, b1_ref, w2_ref, b2_ref, w3_ref, b3_ref,
                 glob_ref, *, bf16_epilogue):
    h = _mlp1_tile(x_ref[0], w1_ref[...], b1_ref[...], w2_ref[...], b2_ref[...],
                   w3_ref[...], b3_ref[...], bf16_epilogue)
    tile_max = jnp.max(h, axis=0, keepdims=True).astype(jnp.float32)  # (1, 1024)

    @pl.when(pl.program_id(1) == 0)
    def _():
        glob_ref[0] = tile_max

    @pl.when(pl.program_id(1) > 0)
    def _():
        glob_ref[0] = jnp.maximum(glob_ref[0], tile_max)


def run_glob(x, p, tn, bf16_epilogue):
    # x: (B2, N, 3) -> glob (B2, 1, 1024) = max over N of mlp1(x)
    B2, N, _ = x.shape
    full = lambda shape: pl.BlockSpec(shape, lambda b, n: (0,) * len(shape))
    gs = pltpu.PrefetchScalarGridSpec(
        num_scalar_prefetch=0, grid=(B2, N // tn),
        in_specs=[
            pl.BlockSpec((1, tn, 3), lambda b, n: (b, n, 0)),
            full((3, 64)), full((1, 64)),
            full((64, 128)), full((1, 128)),
            full((128, 1024)), full((1, 1024)),
        ],
        out_specs=pl.BlockSpec((1, 1, 1024), lambda b, n: (b, 0, 0)),
    )
    flops = 2 * (3 * 64 + 64 * 128 + 128 * 1024) * B2 * N
    weight_bytes = (3 * 64 + 64 + 128 + 1024) * 4 + (64 * 128 + 128 * 1024) * 2
    cost = pl.CostEstimate(
        flops=int(flops), transcendentals=0,
        bytes_accessed=int(B2 * N * 3 * 4 + B2 * 1024 * 4 + weight_bytes))
    kern = functools.partial(_glob_kernel, bf16_epilogue=bf16_epilogue)
    return pl.pallas_call(
        kern,
        out_shape=jax.ShapeDtypeStruct((B2, 1, 1024), jnp.float32),
        grid_spec=gs,
        compiler_params=pltpu.CompilerParams(
            dimension_semantics=("parallel", "arbitrary"),
            vmem_limit_bytes=32 * 1024 * 1024),
        cost_estimate=cost,
    )(x, p["w1"], p["b1"], p["w2"], p["b2"], p["w3"], p["b3"])


# --------------------------------------------------------------------------
# Kernel 2: fused pass -- recompute mlp1 per tile, then mlp2 with the global
# branch pre-folded into the per-batch bias b4_eff, then symfn_max over N.
# Final layer padded to 128 output channels (lane-dense stores).
# --------------------------------------------------------------------------
def _fused_kernel(x_ref, w1_ref, b1_ref, w2_ref, b2_ref, w3_ref, b3_ref,
                  b4eff_ref, w4s_ref, w5_ref, b5_ref, w6_ref, b6_ref, out_ref,
                  *, bf16_epilogue):
    h = _mlp1_tile(x_ref[0], w1_ref[...], b1_ref[...], w2_ref[...], b2_ref[...],
                   w3_ref[...], b3_ref[...], bf16_epilogue)           # (TN, 1024)
    h = jnp.dot(h, w4s_ref[...], preferred_element_type=jnp.float32)
    h = _bias_relu_bf16(h, b4eff_ref[0], bf16_epilogue)               # (TN, 512)
    h = jnp.dot(h, w5_ref[...], preferred_element_type=jnp.float32)
    h = _bias_relu_bf16(h, b5_ref[...], bf16_epilogue)                # (TN, 256)
    y = (jnp.dot(h, w6_ref[...], preferred_element_type=jnp.float32)
         + b6_ref[...])                                               # (TN, 128) f32

    tile_max = jnp.max(y, axis=0, keepdims=True)                      # (1, 128)

    @pl.when(pl.program_id(1) == 0)
    def _():
        out_ref[0] = tile_max

    @pl.when(pl.program_id(1) > 0)
    def _():
        out_ref[0] = jnp.maximum(out_ref[0], tile_max)


def run_fused(x, b4_eff, p, tn, bf16_epilogue):
    # x: (B2, N, 3), b4_eff: (B2, 1, 512) -> (B2, 1, 128) (max over N; cols 6.. pad)
    B2, N, _ = x.shape
    full = lambda shape: pl.BlockSpec(shape, lambda b, n: (0,) * len(shape))
    gs = pltpu.PrefetchScalarGridSpec(
        num_scalar_prefetch=0, grid=(B2, N // tn),
        in_specs=[
            pl.BlockSpec((1, tn, 3), lambda b, n: (b, n, 0)),
            full((3, 64)), full((1, 64)),
            full((64, 128)), full((1, 128)),
            full((128, 1024)), full((1, 1024)),
            pl.BlockSpec((1, 1, 512), lambda b, n: (b, 0, 0)),
            full((1024, 512)),
            full((512, 256)), full((1, 256)),
            full((256, 128)), full((1, 128)),
        ],
        out_specs=pl.BlockSpec((1, 1, 128), lambda b, n: (b, 0, 0)),
    )
    flops = 2 * (3 * 64 + 64 * 128 + 128 * 1024
                 + 1024 * 512 + 512 * 256 + 256 * 128) * B2 * N
    weight_bytes = ((3 * 64 + 64 + 128 + 1024 + 256 + 128) * 4
                    + (64 * 128 + 128 * 1024 + 1024 * 512
                       + 512 * 256 + 256 * 128) * 2)
    cost = pl.CostEstimate(
        flops=int(flops), transcendentals=0,
        bytes_accessed=int(B2 * N * 3 * 4 + B2 * 512 * 4 + B2 * 128 * 4
                           + weight_bytes))
    kern = functools.partial(_fused_kernel, bf16_epilogue=bf16_epilogue)
    return pl.pallas_call(
        kern,
        out_shape=jax.ShapeDtypeStruct((B2, 1, 128), jnp.float32),
        grid_spec=gs,
        compiler_params=pltpu.CompilerParams(
            dimension_semantics=("parallel", "arbitrary"),
            vmem_limit_bytes=48 * 1024 * 1024),
        cost_estimate=cost,
    )(x, p["w1"], p["b1"], p["w2"], p["b2"], p["w3"], p["b3"],
      b4_eff, p["w4s"], p["w5"], p["b5"], p["w6"], p["b6"])


# --------------------------------------------------------------------------
# Tiny glue (Euler angles -> rotation matrix), identical math to the reference.
# --------------------------------------------------------------------------
def _axis_rot(axis, a):
    c, s = jnp.cos(a), jnp.sin(a)
    one, zero = jnp.ones_like(a), jnp.zeros_like(a)
    if axis == "X":
        flat = (one, zero, zero, zero, c, -s, zero, s, c)
    elif axis == "Y":
        flat = (c, zero, s, zero, one, zero, -s, zero, c)
    else:  # Z
        flat = (c, -s, zero, s, c, zero, zero, zero, one)
    return jnp.stack(flat, axis=-1).reshape(a.shape + (3, 3))


def euler_zyx_to_matrix(e):  # e: (B, 3), convention 'ZYX'
    return _axis_rot("Z", e[:, 0]) @ _axis_rot("Y", e[:, 1]) @ _axis_rot("X", e[:, 2])


# --------------------------------------------------------------------------
# Full TNet forward (clouds A and B stacked along the batch axis).
# --------------------------------------------------------------------------
def tnet_forward(cloud_a, cloud_b, params):
    # cloud_*: (B, 3, N) -- PyTorch NCW layout.
    assert cloud_a.shape[1] == 3 and cloud_b.shape[1] == 3
    assert cloud_a.shape == cloud_b.shape
    B = cloud_a.shape[0]
    bf16_epilogue = _has_bf16_vpu()

    clouds = jnp.concatenate([cloud_a, cloud_b], axis=0).astype(jnp.float32)  # (2B,3,N)
    x = jnp.transpose(clouds, (0, 2, 1))                                      # (2B,N,3)

    # Pad the point axis with copies of the first point: duplicates leave the
    # max-pool result unchanged and guarantee tiles of >= 256 points so the
    # 256x256 MXU on v6e/v7x is fully occupied.
    n_pad = (-x.shape[1]) % _POINT_PAD_MULTIPLE
    if n_pad:
        pad = jnp.broadcast_to(x[:, :1, :], (x.shape[0], n_pad, 3))
        x = jnp.concatenate([x, pad], axis=1)
    tn = _pick_tile(x.shape[1])

    # Pass 1: per-cloud global max of mlp1 features (no feat written to HBM).
    glob = run_glob(x, params, tn, bf16_epilogue)                     # (2B,1,1024)

    # TODO(synk): FeatureInteraction source was not provided; using the standard
    # cross fusion: fusion_i = concat(feat_self, broadcast(maxpool(feat_other))).
    glob_other = jnp.concatenate([glob[B:], glob[:B]], axis=0)        # swap A<->B
    b4_eff = (jnp.einsum("bik,kj->bij", glob_other.astype(jnp.bfloat16),
                         params["w4g"], preferred_element_type=jnp.float32)
              + params["b4"])                                         # (2B,1,512)

    # Pass 2: fused mlp1-recompute + mlp2 + symfn_max.
    pose = run_fused(x, b4_eff, params, tn, bf16_epilogue)[:, 0, :6]  # (2B, 6)

    rot = euler_zyx_to_matrix(pose[:, :3])                            # (2B,3,3)
    t = pose[:, 3:].reshape(2 * B, 3, 1)

    # Rigid transform (R @ p + t) left to XLA: it is a tiny memory-bound op,
    # a dedicated pallas_call was pure launch/grid overhead.
    y = jnp.einsum("bij,bjn->bin", rot, clouds) + t                   # (2B,3,N)
    return y[:B], y[B:]


# --------------------------------------------------------------------------
# Deterministic synthetic parameters (Conv1d k=1 weights + eval-mode BN folded).
# MXU weights stored in bf16; first-layer weights / biases kept in f32.
# --------------------------------------------------------------------------
def init_params(seed=0):
    keys = iter(jax.random.split(jax.random.PRNGKey(seed), 32))

    def conv_w(cin, cout):
        return jax.random.normal(next(keys), (cin, cout), jnp.float32) / jnp.sqrt(cin)

    def vec(c, scale=0.1):
        return scale * jax.random.normal(next(keys), (c,), jnp.float32)

    def fold_bn(w, b, c, eps=1e-5):
        gamma = 1.0 + 0.1 * jax.random.normal(next(keys), (c,), jnp.float32)
        beta = 0.1 * jax.random.normal(next(keys), (c,), jnp.float32)
        mean = 0.1 * jax.random.normal(next(keys), (c,), jnp.float32)
        var = 1.0 + 0.1 * jax.random.uniform(next(keys), (c,), jnp.float32)
        scale = gamma / jnp.sqrt(var + eps)
        return w * scale[None, :], (b - mean) * scale + beta

    p = {}
    w1, b1 = fold_bn(conv_w(3, 64), vec(64), 64)
    w2, b2 = fold_bn(conv_w(64, 128), vec(128), 128)
    w3, b3 = fold_bn(conv_w(128, 1024), vec(1024), 1024)
    p.update(
        w1=w1, b1=b1.reshape(1, 64),                              # VPU layer: f32
        w2=w2.astype(jnp.bfloat16), b2=b2.reshape(1, 128),
        w3=w3.astype(jnp.bfloat16), b3=b3.reshape(1, 1024),
    )
    # mlp2: Conv1d(2048, 512) split along input channels into self/global halves.
    p["w4s"] = conv_w(1024, 512).astype(jnp.bfloat16)
    p["w4g"] = conv_w(1024, 512).astype(jnp.bfloat16)
    p["b4"] = vec(512).reshape(1, 512)
    p["w5"] = conv_w(512, 256).astype(jnp.bfloat16)
    p["b5"] = vec(256).reshape(1, 256)
    # Final layer padded 6 -> 128 output channels (lane-aligned); wrapper slices [:6].
    w6 = conv_w(256, 6)
    b6 = vec(6)
    p["w6"] = jnp.zeros((256, 128), jnp.float32).at[:, :6].set(w6).astype(jnp.bfloat16)
    p["b6"] = jnp.zeros((1, 128), jnp.float32).at[0, :6].set(b6)
    return p


if __name__ == "__main__":
    B, N = 2, 256
    ka, kb = jax.random.split(jax.random.PRNGKey(0))
    cloud_a = jax.random.normal(ka, (B, 3, N), jnp.float32)
    cloud_b = jax.random.normal(kb, (B, 3, N), jnp.float32)
    params = init_params(0)

    fwd = jax.jit(tnet_forward)
    out_a, out_b = fwd(cloud_a, cloud_b, params)
    jax.block_until_ready((out_a, out_b))

    assert out_a.shape == (B, 3, N) and out_b.shape == (B, 3, N)
    assert out_a.dtype == jnp.float32 and out_b.dtype == jnp.float32
    assert bool(jnp.all(jnp.isfinite(out_a))) and bool(jnp.all(jnp.isfinite(out_b)))
    print("KERNEL_OK")
</pallas_src>

<mosaic_0001>
module attributes {stable_mosaic.version = 11 : i64} {
  func.func @_glob_kernel(%arg0: i32, %arg1: i32, %arg2: memref<1x256x3xf32, #tpu.memory_space<vmem>>, %arg3: memref<3x64xf32, #tpu.memory_space<vmem>>, %arg4: memref<1x64xf32, #tpu.memory_space<vmem>>, %arg5: memref<64x128xbf16, #tpu.memory_space<vmem>>, %arg6: memref<1x128xf32, #tpu.memory_space<vmem>>, %arg7: memref<128x1024xbf16, #tpu.memory_space<vmem>>, %arg8: memref<1x1024xf32, #tpu.memory_space<vmem>>, %arg9: memref<1x1x1024xf32, #tpu.memory_space<vmem>>) attributes {dimension_semantics = [#tpu.dimension_semantics<parallel>, #tpu.dimension_semantics<arbitrary>], iteration_bounds = array<i64: 4, 1>, scalar_prefetch = 0 : i64, scratch_operands = 0 : i64, tpu.core_type = #tpu.core_type<tc>, window_params = [{transform_indices = @transform_0, window_bounds = array<i64: 1, 256, 3>}, {pipeline_mode = #tpu.pipeline_mode<synchronous>, transform_indices = @transform_1, window_bounds = array<i64: 3, 64>}, {pipeline_mode = #tpu.pipeline_mode<synchronous>, transform_indices = @transform_2, window_bounds = array<i64: 1, 64>}, {pipeline_mode = #tpu.pipeline_mode<synchronous>, transform_indices = @transform_3, window_bounds = array<i64: 64, 128>}, {pipeline_mode = #tpu.pipeline_mode<synchronous>, transform_indices = @transform_4, window_bounds = array<i64: 1, 128>}, {pipeline_mode = #tpu.pipeline_mode<synchronous>, transform_indices = @transform_5, window_bounds = array<i64: 128, 1024>}, {pipeline_mode = #tpu.pipeline_mode<synchronous>, transform_indices = @transform_6, window_bounds = array<i64: 1, 1024>}, {transform_indices = @transform_7, window_bounds = array<i64: 1, 1, 1024>}]} {
    %c0 = arith.constant 0 : index
    %c0_0 = arith.constant 0 : index
    %c0_1 = arith.constant 0 : index
    %0 = vector.load %arg2[%c0, %c0_0, %c0_1] : memref<1x256x3xf32, #tpu.memory_space<vmem>>, vector<1x256x3xf32>
    %1 = vector.shape_cast %0 : vector<1x256x3xf32> to vector<256x3xf32>
    %c0_2 = arith.constant 0 : index
    %c0_3 = arith.constant 0 : index
    %2 = vector.load %arg3[%c0_2, %c0_3] : memref<3x64xf32, #tpu.memory_space<vmem>>, vector<3x64xf32>
    %c0_4 = arith.constant 0 : index
    %c0_5 = arith.constant 0 : index
    %3 = vector.load %arg4[%c0_4, %c0_5] : memref<1x64xf32, #tpu.memory_space<vmem>>, vector<1x64xf32>
    %c0_6 = arith.constant 0 : index
    %c0_7 = arith.constant 0 : index
    %4 = vector.load %arg5[%c0_6, %c0_7] : memref<64x128xbf16, #tpu.memory_space<vmem>>, vector<64x128xbf16>
    %c0_8 = arith.constant 0 : index
    %c0_9 = arith.constant 0 : index
    %5 = vector.load %arg6[%c0_8, %c0_9] : memref<1x128xf32, #tpu.memory_space<vmem>>, vector<1x128xf32>
    %c0_10 = arith.constant 0 : index
    %c0_11 = arith.constant 0 : index
    %6 = vector.load %arg7[%c0_10, %c0_11] : memref<128x1024xbf16, #tpu.memory_space<vmem>>, vector<128x1024xbf16>
    %c0_12 = arith.constant 0 : index
    %c0_13 = arith.constant 0 : index
    %7 = vector.load %arg8[%c0_12, %c0_13] : memref<1x1024xf32, #tpu.memory_space<vmem>>, vector<1x1024xf32>
    %8 = vector.extract_strided_slice %1 {offsets = [0, 0], sizes = [256, 1], strides = [1, 1]} : vector<256x3xf32> to vector<256x1xf32>
    %9 = vector.extract_strided_slice %2 {offsets = [0, 0], sizes = [1, 64], strides = [1, 1]} : vector<3x64xf32> to vector<1x64xf32>
    %10 = vector.broadcast %8 : vector<256x1xf32> to vector<256x64xf32>
    %11 = vector.broadcast %9 : vector<1x64xf32> to vector<256x64xf32>
    %12 = arith.mulf %10, %11 : vector<256x64xf32>
    %13 = vector.extract_strided_slice %1 {offsets = [0, 1], sizes = [256, 1], strides = [1, 1]} : vector<256x3xf32> to vector<256x1xf32>
    %14 = vector.extract_strided_slice %2 {offsets = [1, 0], sizes = [1, 64], strides = [1, 1]} : vector<3x64xf32> to vector<1x64xf32>
    %15 = vector.broadcast %13 : vector<256x1xf32> to vector<256x64xf32>
    %16 = vector.broadcast %14 : vector<1x64xf32> to vector<256x64xf32>
    %17 = arith.mulf %15, %16 : vector<256x64xf32>
    %18 = arith.addf %12, %17 : vector<256x64xf32>
    %19 = vector.extract_strided_slice %1 {offsets = [0, 2], sizes = [256, 1], strides = [1, 1]} : vector<256x3xf32> to vector<256x1xf32>
    %20 = vector.extract_strided_slice %2 {offsets = [2, 0], sizes = [1, 64], strides = [1, 1]} : vector<3x64xf32> to vector<1x64xf32>
    %21 = vector.broadcast %19 : vector<256x1xf32> to vector<256x64xf32>
    %22 = vector.broadcast %20 : vector<1x64xf32> to vector<256x64xf32>
    %23 = arith.mulf %21, %22 : vector<256x64xf32>
    %24 = arith.addf %18, %23 : vector<256x64xf32>
    %25 = vector.broadcast %3 : vector<1x64xf32> to vector<256x64xf32>
    %26 = arith.addf %24, %25 : vector<256x64xf32>
    %cst = arith.constant 0.000000e+00 : f32
    %27 = vector.broadcast %cst : f32 to vector<256x64xf32>
    %28 = arith.maximumf %26, %27 : vector<256x64xf32>
    %29 = arith.truncf %28 : vector<256x64xf32> to vector<256x64xbf16>
    %cst_14 = arith.constant dense<0.000000e+00> : vector<256x128xf32>
    %30 = tpu.matmul %29, %4, %cst_14 {dimension_numbers = #tpu.dot_dimension_numbers<[1], [0], [0], [1], [0, 0, 1, 1], [], []>} : vector<256x64xbf16>, vector<64x128xbf16>, vector<256x128xf32> -> vector<256x128xf32>
    %31 = arith.truncf %30 : vector<256x128xf32> to vector<256x128xbf16>
    %32 = arith.truncf %5 : vector<1x128xf32> to vector<1x128xbf16>
    %33 = vector.broadcast %32 : vector<1x128xbf16> to vector<256x128xbf16>
    %34 = arith.addf %31, %33 : vector<256x128xbf16>
    %cst_15 = arith.constant 0.000000e+00 : bf16
    %35 = vector.broadcast %cst_15 : bf16 to vector<256x128xbf16>
    %36 = arith.maximumf %34, %35 : vector<256x128xbf16>
    %cst_16 = arith.constant dense<0.000000e+00> : vector<256x1024xf32>
    %37 = tpu.matmul %36, %6, %cst_16 {dimension_numbers = #tpu.dot_dimension_numbers<[1], [0], [0], [1], [0, 0, 1, 1], [], []>} : vector<256x128xbf16>, vector<128x1024xbf16>, vector<256x1024xf32> -> vector<256x1024xf32>
    %38 = arith.truncf %37 : vector<256x1024xf32> to vector<256x1024xbf16>
    %39 = arith.truncf %7 : vector<1x1024xf32> to vector<1x1024xbf16>
    %40 = vector.broadcast %39 : vector<1x1024xbf16> to vector<256x1024xbf16>
    %41 = arith.addf %38, %40 : vector<256x1024xbf16>
    %cst_17 = arith.constant 0.000000e+00 : bf16
    %42 = vector.broadcast %cst_17 : bf16 to vector<256x1024xbf16>
    %43 = arith.maximumf %41, %42 : vector<256x1024xbf16>
    %cst_18 = arith.constant dense<0xFF80> : vector<1024xbf16>
    %44 = vector.multi_reduction <maximumf>, %43, %cst_18 [0] : vector<256x1024xbf16> to vector<1024xbf16>
    %45 = vector.shape_cast %44 : vector<1024xbf16> to vector<1x1024xbf16>
    %46 = arith.extf %45 : vector<1x1024xbf16> to vector<1x1024xf32>
    %c0_i32 = arith.constant 0 : i32
    %47 = arith.cmpi eq, %arg1, %c0_i32 : i32
    %48 = arith.extui %47 : i1 to i32
    %c0_i32_19 = arith.constant 0 : i32
    %49 = arith.cmpi ne, %48, %c0_i32_19 : i32
    scf.if %49 {
      %c0_22 = arith.constant 0 : index
      %c0_23 = arith.constant 0 : index
      %c0_24 = arith.constant 0 : index
      %53 = vector.load %arg9[%c0_22, %c0_23, %c0_24] : memref<1x1x1024xf32, #tpu.memory_space<vmem>>, vector<1x1x1024xf32>
      %54 = vector.shape_cast %53 : vector<1x1x1024xf32> to vector<1x1024xf32>
      %55 = vector.shape_cast %46 : vector<1x1024xf32> to vector<1x1x1024xf32>
      tpu.vector_store %arg9[%c0_22, %c0_23, %c0_24], %55 {strides = array<i32>} : memref<1x1x1024xf32, #tpu.memory_space<vmem>>, vector<1x1x1024xf32>,
    } else {
    }
    %c0_i32_20 = arith.constant 0 : i32
    %50 = arith.cmpi sgt, %arg1, %c0_i32_20 : i32
    %51 = arith.extui %50 : i1 to i32
    %c0_i32_21 = arith.constant 0 : i32
    %52 = arith.cmpi ne, %51, %c0_i32_21 : i32
    scf.if %52 {
      %c0_22 = arith.constant 0 : index
      %c0_23 = arith.constant 0 : index
      %c0_24 = arith.constant 0 : index
      %53 = vector.load %arg9[%c0_22, %c0_23, %c0_24] : memref<1x1x1024xf32, #tpu.memory_space<vmem>>, vector<1x1x1024xf32>
      %54 = vector.shape_cast %53 : vector<1x1x1024xf32> to vector<1x1024xf32>
      %55 = arith.maximumf %54, %46 : vector<1x1024xf32>
      %c0_25 = arith.constant 0 : index
      %c0_26 = arith.constant 0 : index
      %c0_27 = arith.constant 0 : index
      %56 = vector.load %arg9[%c0_25, %c0_26, %c0_27] : memref<1x1x1024xf32, #tpu.memory_space<vmem>>, vector<1x1x1024xf32>
      %57 = vector.shape_cast %56 : vector<1x1x1024xf32> to vector<1x1024xf32>
      %58 = vector.shape_cast %55 : vector<1x1024xf32> to vector<1x1x1024xf32>
      tpu.vector_store %arg9[%c0_25, %c0_26, %c0_27], %58 {strides = array<i32>} : memref<1x1x1024xf32, #tpu.memory_space<vmem>>, vector<1x1x1024xf32>,
    } else {
    }
    return
  }
  func.func @transform_0(%arg0: i32, %arg1: i32) -> (i32, i32, i32) {
    %c0_i32 = arith.constant 0 : i32
    %c0_i32_0 = arith.constant 0 : i32
    return %arg0, %arg1, %c0_i32 : i32, i32, i32
  }
  func.func @transform_1(%arg0: i32, %arg1: i32) -> (i32, i32) {
    %c0_i32 = arith.constant 0 : i32
    %c0_i32_0 = arith.constant 0 : i32
    %c0_i32_1 = arith.constant 0 : i32
    return %c0_i32, %c0_i32_0 : i32, i32
  }
  func.func @transform_2(%arg0: i32, %arg1: i32) -> (i32, i32) {
    %c0_i32 = arith.constant 0 : i32
    %c0_i32_0 = arith.constant 0 : i32
    %c0_i32_1 = arith.constant 0 : i32
    return %c0_i32, %c0_i32_0 : i32, i32
  }
  func.func @transform_3(%arg0: i32, %arg1: i32) -> (i32, i32) {
    %c0_i32 = arith.constant 0 : i32
    %c0_i32_0 = arith.constant 0 : i32
    %c0_i32_1 = arith.constant 0 : i32
    return %c0_i32, %c0_i32_0 : i32, i32
  }
  func.func @transform_4(%arg0: i32, %arg1: i32) -> (i32, i32) {
    %c0_i32 = arith.constant 0 : i32
    %c0_i32_0 = arith.constant 0 : i32
    %c0_i32_1 = arith.constant 0 : i32
    return %c0_i32, %c0_i32_0 : i32, i32
  }
  func.func @transform_5(%arg0: i32, %arg1: i32) -> (i32, i32) {
    %c0_i32 = arith.constant 0 : i32
    %c0_i32_0 = arith.constant 0 : i32
    %c0_i32_1 = arith.constant 0 : i32
    return %c0_i32, %c0_i32_0 : i32, i32
  }
  func.func @transform_6(%arg0: i32, %arg1: i32) -> (i32, i32) {
    %c0_i32 = arith.constant 0 : i32
    %c0_i32_0 = arith.constant 0 : i32
    %c0_i32_1 = arith.constant 0 : i32
    return %c0_i32, %c0_i32_0 : i32, i32
  }
  func.func @transform_7(%arg0: i32, %arg1: i32) -> (i32, i32, i32) {
    %c0_i32 = arith.constant 0 : i32
    %c0_i32_0 = arith.constant 0 : i32
    %c0_i32_1 = arith.constant 0 : i32
    return %arg0, %c0_i32, %c0_i32_0 : i32, i32, i32
  }
}

module attributes {stable_mosaic.version = 11 : i64} {
  func.func @_fused_kernel(%arg0: i32, %arg1: i32, %arg2: memref<1x256x3xf32, #tpu.memory_space<vmem>>, %arg3: memref<3x64xf32, #tpu.memory_space<vmem>>, %arg4: memref<1x64xf32, #tpu.memory_space<vmem>>, %arg5: memref<64x128xbf16, #tpu.memory_space<vmem>>, %arg6: memref<1x128xf32, #tpu.memory_space<vmem>>, %arg7: memref<128x1024xbf16, #tpu.memory_space<vmem>>, %arg8: memref<1x1024xf32, #tpu.memory_space<vmem>>, %arg9: memref<1x1x512xf32, #tpu.memory_space<vmem>>, %arg10: memref<1024x512xbf16, #tpu.memory_space<vmem>>, %arg11: memref<512x256xbf16, #tpu.memory_space<vmem>>, %arg12: memref<1x256xf32, #tpu.memory_space<vmem>>, %arg13: memref<256x128xbf16, #tpu.memory_space<vmem>>, %arg14: memref<1x128xf32, #tpu.memory_space<vmem>>, %arg15: memref<1x1x128xf32, #tpu.memory_space<vmem>>) attributes {dimension_semantics = [#tpu.dimension_semantics<parallel>, #tpu.dimension_semantics<arbitrary>], iteration_bounds = array<i64: 4, 1>, scalar_prefetch = 0 : i64, scratch_operands = 0 : i64, tpu.core_type = #tpu.core_type<tc>, window_params = [{transform_indices = @transform_0, window_bounds = array<i64: 1, 256, 3>}, {pipeline_mode = #tpu.pipeline_mode<synchronous>, transform_indices = @transform_1, window_bounds = array<i64: 3, 64>}, {pipeline_mode = #tpu.pipeline_mode<synchronous>, transform_indices = @transform_2, window_bounds = array<i64: 1, 64>}, {pipeline_mode = #tpu.pipeline_mode<synchronous>, transform_indices = @transform_3, window_bounds = array<i64: 64, 128>}, {pipeline_mode = #tpu.pipeline_mode<synchronous>, transform_indices = @transform_4, window_bounds = array<i64: 1, 128>}, {pipeline_mode = #tpu.pipeline_mode<synchronous>, transform_indices = @transform_5, window_bounds = array<i64: 128, 1024>}, {pipeline_mode = #tpu.pipeline_mode<synchronous>, transform_indices = @transform_6, window_bounds = array<i64: 1, 1024>}, {transform_indices = @transform_7, window_bounds = array<i64: 1, 1, 512>}, {pipeline_mode = #tpu.pipeline_mode<synchronous>, transform_indices = @transform_8, window_bounds = array<i64: 1024, 512>}, {pipeline_mode = #tpu.pipeline_mode<synchronous>, transform_indices = @transform_9, window_bounds = array<i64: 512, 256>}, {pipeline_mode = #tpu.pipeline_mode<synchronous>, transform_indices = @transform_10, window_bounds = array<i64: 1, 256>}, {pipeline_mode = #tpu.pipeline_mode<synchronous>, transform_indices = @transform_11, window_bounds = array<i64: 256, 128>}, {pipeline_mode = #tpu.pipeline_mode<synchronous>, transform_indices = @transform_12, window_bounds = array<i64: 1, 128>}, {transform_indices = @transform_13, window_bounds = array<i64: 1, 1, 128>}]} {
    %c0 = arith.constant 0 : index
    %c0_0 = arith.constant 0 : index
    %c0_1 = arith.constant 0 : index
    %0 = vector.load %arg2[%c0, %c0_0, %c0_1] : memref<1x256x3xf32, #tpu.memory_space<vmem>>, vector<1x256x3xf32>
    %1 = vector.shape_cast %0 : vector<1x256x3xf32> to vector<256x3xf32>
    %c0_2 = arith.constant 0 : index
    %c0_3 = arith.constant 0 : index
    %2 = vector.load %arg3[%c0_2, %c0_3] : memref<3x64xf32, #tpu.memory_space<vmem>>, vector<3x64xf32>
    %c0_4 = arith.constant 0 : index
    %c0_5 = arith.constant 0 : index
    %3 = vector.load %arg4[%c0_4, %c0_5] : memref<1x64xf32, #tpu.memory_space<vmem>>, vector<1x64xf32>
    %c0_6 = arith.constant 0 : index
    %c0_7 = arith.constant 0 : index
    %4 = vector.load %arg5[%c0_6, %c0_7] : memref<64x128xbf16, #tpu.memory_space<vmem>>, vector<64x128xbf16>
    %c0_8 = arith.constant 0 : index
    %c0_9 = arith.constant 0 : index
    %5 = vector.load %arg6[%c0_8, %c0_9] : memref<1x128xf32, #tpu.memory_space<vmem>>, vector<1x128xf32>
    %c0_10 = arith.constant 0 : index
    %c0_11 = arith.constant 0 : index
    %6 = vector.load %arg7[%c0_10, %c0_11] : memref<128x1024xbf16, #tpu.memory_space<vmem>>, vector<128x1024xbf16>
    %c0_12 = arith.constant 0 : index
    %c0_13 = arith.constant 0 : index
    %7 = vector.load %arg8[%c0_12, %c0_13] : memref<1x1024xf32, #tpu.memory_space<vmem>>, vector<1x1024xf32>
    %8 = vector.extract_strided_slice %1 {offsets = [0, 0], sizes = [256, 1], strides = [1, 1]} : vector<256x3xf32> to vector<256x1xf32>
    %9 = vector.extract_strided_slice %2 {offsets = [0, 0], sizes = [1, 64], strides = [1, 1]} : vector<3x64xf32> to vector<1x64xf32>
    %10 = vector.broadcast %8 : vector<256x1xf32> to vector<256x64xf32>
    %11 = vector.broadcast %9 : vector<1x64xf32> to vector<256x64xf32>
    %12 = arith.mulf %10, %11 : vector<256x64xf32>
    %13 = vector.extract_strided_slice %1 {offsets = [0, 1], sizes = [256, 1], strides = [1, 1]} : vector<256x3xf32> to vector<256x1xf32>
    %14 = vector.extract_strided_slice %2 {offsets = [1, 0], sizes = [1, 64], strides = [1, 1]} : vector<3x64xf32> to vector<1x64xf32>
    %15 = vector.broadcast %13 : vector<256x1xf32> to vector<256x64xf32>
    %16 = vector.broadcast %14 : vector<1x64xf32> to vector<256x64xf32>
    %17 = arith.mulf %15, %16 : vector<256x64xf32>
    %18 = arith.addf %12, %17 : vector<256x64xf32>
    %19 = vector.extract_strided_slice %1 {offsets = [0, 2], sizes = [256, 1], strides = [1, 1]} : vector<256x3xf32> to vector<256x1xf32>
    %20 = vector.extract_strided_slice %2 {offsets = [2, 0], sizes = [1, 64], strides = [1, 1]} : vector<3x64xf32> to vector<1x64xf32>
    %21 = vector.broadcast %19 : vector<256x1xf32> to vector<256x64xf32>
    %22 = vector.broadcast %20 : vector<1x64xf32> to vector<256x64xf32>
    %23 = arith.mulf %21, %22 : vector<256x64xf32>
    %24 = arith.addf %18, %23 : vector<256x64xf32>
    %25 = vector.broadcast %3 : vector<1x64xf32> to vector<256x64xf32>
    %26 = arith.addf %24, %25 : vector<256x64xf32>
    %cst = arith.constant 0.000000e+00 : f32
    %27 = vector.broadcast %cst : f32 to vector<256x64xf32>
    %28 = arith.maximumf %26, %27 : vector<256x64xf32>
    %29 = arith.truncf %28 : vector<256x64xf32> to vector<256x64xbf16>
    %cst_14 = arith.constant dense<0.000000e+00> : vector<256x128xf32>
    %30 = tpu.matmul %29, %4, %cst_14 {dimension_numbers = #tpu.dot_dimension_numbers<[1], [0], [0], [1], [0, 0, 1, 1], [], []>} : vector<256x64xbf16>, vector<64x128xbf16>, vector<256x128xf32> -> vector<256x128xf32>
    %31 = arith.truncf %30 : vector<256x128xf32> to vector<256x128xbf16>
    %32 = arith.truncf %5 : vector<1x128xf32> to vector<1x128xbf16>
    %33 = vector.broadcast %32 : vector<1x128xbf16> to vector<256x128xbf16>
    %34 = arith.addf %31, %33 : vector<256x128xbf16>
    %cst_15 = arith.constant 0.000000e+00 : bf16
    %35 = vector.broadcast %cst_15 : bf16 to vector<256x128xbf16>
    %36 = arith.maximumf %34, %35 : vector<256x128xbf16>
    %cst_16 = arith.constant dense<0.000000e+00> : vector<256x1024xf32>
    %37 = tpu.matmul %36, %6, %cst_16 {dimension_numbers = #tpu.dot_dimension_numbers<[1], [0], [0], [1], [0, 0, 1, 1], [], []>} : vector<256x128xbf16>, vector<128x1024xbf16>, vector<256x1024xf32> -> vector<256x1024xf32>
    %38 = arith.truncf %37 : vector<256x1024xf32> to vector<256x1024xbf16>
    %39 = arith.truncf %7 : vector<1x1024xf32> to vector<1x1024xbf16>
    %40 = vector.broadcast %39 : vector<1x1024xbf16> to vector<256x1024xbf16>
    %41 = arith.addf %38, %40 : vector<256x1024xbf16>
    %cst_17 = arith.constant 0.000000e+00 : bf16
    %42 = vector.broadcast %cst_17 : bf16 to vector<256x1024xbf16>
    %43 = arith.maximumf %41, %42 : vector<256x1024xbf16>
    %c0_18 = arith.constant 0 : index
    %c0_19 = arith.constant 0 : index
    %44 = vector.load %arg10[%c0_18, %c0_19] : memref<1024x512xbf16, #tpu.memory_space<vmem>>, vector<1024x512xbf16>
    %cst_20 = arith.constant dense<0.000000e+00> : vector<256x512xf32>
    %45 = tpu.matmul %43, %44, %cst_20 {dimension_numbers = #tpu.dot_dimension_numbers<[1], [0], [0], [1], [0, 0, 1, 1], [], []>} : vector<256x1024xbf16>, vector<1024x512xbf16>, vector<256x512xf32> -> vector<256x512xf32>
    %c0_21 = arith.constant 0 : index
    %c0_22 = arith.constant 0 : index
    %c0_23 = arith.constant 0 : index
    %46 = vector.load %arg9[%c0_21, %c0_22, %c0_23] : memref<1x1x512xf32, #tpu.memory_space<vmem>>, vector<1x1x512xf32>
    %47 = vector.shape_cast %46 : vector<1x1x512xf32> to vector<1x512xf32>
    %48 = arith.truncf %45 : vector<256x512xf32> to vector<256x512xbf16>
    %49 = arith.truncf %47 : vector<1x512xf32> to vector<1x512xbf16>
    %50 = vector.broadcast %49 : vector<1x512xbf16> to vector<256x512xbf16>
    %51 = arith.addf %48, %50 : vector<256x512xbf16>
    %cst_24 = arith.constant 0.000000e+00 : bf16
    %52 = vector.broadcast %cst_24 : bf16 to vector<256x512xbf16>
    %53 = arith.maximumf %51, %52 : vector<256x512xbf16>
    %c0_25 = arith.constant 0 : index
    %c0_26 = arith.constant 0 : index
    %54 = vector.load %arg11[%c0_25, %c0_26] : memref<512x256xbf16, #tpu.memory_space<vmem>>, vector<512x256xbf16>
    %cst_27 = arith.constant dense<0.000000e+00> : vector<256x256xf32>
    %55 = tpu.matmul %53, %54, %cst_27 {dimension_numbers = #tpu.dot_dimension_numbers<[1], [0], [0], [1], [0, 0, 1, 1], [], []>} : vector<256x512xbf16>, vector<512x256xbf16>, vector<256x256xf32> -> vector<256x256xf32>
    %c0_28 = arith.constant 0 : index
    %c0_29 = arith.constant 0 : index
    %56 = vector.load %arg12[%c0_28, %c0_29] : memref<1x256xf32, #tpu.memory_space<vmem>>, vector<1x256xf32>
    %57 = arith.truncf %55 : vector<256x256xf32> to vector<256x256xbf16>
    %58 = arith.truncf %56 : vector<1x256xf32> to vector<1x256xbf16>
    %59 = vector.broadcast %58 : vector<1x256xbf16> to vector<256x256xbf16>
    %60 = arith.addf %57, %59 : vector<256x256xbf16>
    %cst_30 = arith.constant 0.000000e+00 : bf16
    %61 = vector.broadcast %cst_30 : bf16 to vector<256x256xbf16>
    %62 = arith.maximumf %60, %61 : vector<256x256xbf16>
    %c0_31 = arith.constant 0 : index
    %c0_32 = arith.constant 0 : index
    %63 = vector.load %arg13[%c0_31, %c0_32] : memref<256x128xbf16, #tpu.memory_space<vmem>>, vector<256x128xbf16>
    %cst_33 = arith.constant dense<0.000000e+00> : vector<256x128xf32>
    %64 = tpu.matmul %62, %63, %cst_33 {dimension_numbers = #tpu.dot_dimension_numbers<[1], [0], [0], [1], [0, 0, 1, 1], [], []>} : vector<256x256xbf16>, vector<256x128xbf16>, vector<256x128xf32> -> vector<256x128xf32>
    %c0_34 = arith.constant 0 : index
    %c0_35 = arith.constant 0 : index
    %65 = vector.load %arg14[%c0_34, %c0_35] : memref<1x128xf32, #tpu.memory_space<vmem>>, vector<1x128xf32>
    %66 = vector.broadcast %65 : vector<1x128xf32> to vector<256x128xf32>
    %67 = arith.addf %64, %66 : vector<256x128xf32>
    %cst_36 = arith.constant dense<0xFF800000> : vector<128xf32>
    %68 = vector.multi_reduction <maximumf>, %67, %cst_36 [0] : vector<256x128xf32> to vector<128xf32>
    %69 = vector.shape_cast %68 : vector<128xf32> to vector<1x128xf32>
    %c0_i32 = arith.constant 0 : i32
    %70 = arith.cmpi eq, %arg1, %c0_i32 : i32
    %71 = arith.extui %70 : i1 to i32
    %c0_i32_37 = arith.constant 0 : i32
    %72 = arith.cmpi ne, %71, %c0_i32_37 : i32
    scf.if %72 {
      %c0_40 = arith.constant 0 : index
      %c0_41 = arith.constant 0 : index
      %c0_42 = arith.constant 0 : index
      %76 = vector.load %arg15[%c0_40, %c0_41, %c0_42] : memref<1x1x128xf32, #tpu.memory_space<vmem>>, vector<1x1x128xf32>
      %77 = vector.shape_cast %76 : vector<1x1x128xf32> to vector<1x128xf32>
      %78 = vector.shape_cast %69 : vector<1x128xf32> to vector<1x1x128xf32>
      tpu.vector_store %arg15[%c0_40, %c0_41, %c0_42], %78 {strides = array<i32>} : memref<1x1x128xf32, #tpu.memory_space<vmem>>, vector<1x1x128xf32>,
    } else {
    }
    %c0_i32_38 = arith.constant 0 : i32
    %73 = arith.cmpi sgt, %arg1, %c0_i32_38 : i32
    %74 = arith.extui %73 : i1 to i32
    %c0_i32_39 = arith.constant 0 : i32
    %75 = arith.cmpi ne, %74, %c0_i32_39 : i32
    scf.if %75 {
      %c0_40 = arith.constant 0 : index
      %c0_41 = arith.constant 0 : index
      %c0_42 = arith.constant 0 : index
      %76 = vector.load %arg15[%c0_40, %c0_41, %c0_42] : memref<1x1x128xf32, #tpu.memory_space<vmem>>, vector<1x1x128xf32>
      %77 = vector.shape_cast %76 : vector<1x1x128xf32> to vector<1x128xf32>
      %78 = arith.maximumf %77, %69 : vector<1x128xf32>
      %c0_43 = arith.constant 0 : index
      %c0_44 = arith.constant 0 : index
      %c0_45 = arith.constant 0 : index
      %79 = vector.load %arg15[%c0_43, %c0_44, %c0_45] : memref<1x1x128xf32, #tpu.memory_space<vmem>>, vector<1x1x128xf32>
      %80 = vector.shape_cast %79 : vector<1x1x128xf32> to vector<1x128xf32>
      %81 = vector.shape_cast %78 : vector<1x128xf32> to vector<1x1x128xf32>
      tpu.vector_store %arg15[%c0_43, %c0_44, %c0_45], %81 {strides = array<i32>} : memref<1x1x128xf32, #tpu.memory_space<vmem>>, vector<1x1x128xf32>,
    } else {
    }
    return
  }
  func.func @transform_0(%arg0: i32, %arg1: i32) -> (i32, i32, i32) {
    %c0_i32 = arith.constant 0 : i32
    %c0_i32_0 = arith.constant 0 : i32
    return %arg0, %arg1, %c0_i32 : i32, i32, i32
  }
  func.func @transform_1(%arg0: i32, %arg1: i32) -> (i32, i32) {
    %c0_i32 = arith.constant 0 : i32
    %c0_i32_0 = arith.constant 0 : i32
    %c0_i32_1 = arith.constant 0 : i32
    return %c0_i32, %c0_i32_0 : i32, i32
  }
  func.func @transform_2(%arg0: i32, %arg1: i32) -> (i32, i32) {
    %c0_i32 = arith.constant 0 : i32
    %c0_i32_0 = arith.constant 0 : i32
    %c0_i32_1 = arith.constant 0 : i32
    return %c0_i32, %c0_i32_0 : i32, i32
  }
  func.func @transform_3(%arg0: i32, %arg1: i32) -> (i32, i32) {
    %c0_i32 = arith.constant 0 : i32
    %c0_i32_0 = arith.constant 0 : i32
    %c0_i32_1 = arith.constant 0 : i32
    return %c0_i32, %c0_i32_0 : i32, i32
  }
  func.func @transform_4(%arg0: i32, %arg1: i32) -> (i32, i32) {
    %c0_i32 = arith.constant 0 : i32
    %c0_i32_0 = arith.constant 0 : i32
    %c0_i32_1 = arith.constant 0 : i32
    return %c0_i32, %c0_i32_0 : i32, i32
  }
  func.func @transform_5(%arg0: i32, %arg1: i32) -> (i32, i32) {
    %c0_i32 = arith.constant 0 : i32
    %c0_i32_0 = arith.constant 0 : i32
    %c0_i32_1 = arith.constant 0 : i32
    return %c0_i32, %c0_i32_0 : i32, i32
  }
  func.func @transform_6(%arg0: i32, %arg1: i32) -> (i32, i32) {
    %c0_i32 = arith.constant 0 : i32
    %c0_i32_0 = arith.constant 0 : i32
    %c0_i32_1 = arith.constant 0 : i32
    return %c0_i32, %c0_i32_0 : i32, i32
  }
  func.func @transform_7(%arg0: i32, %arg1: i32) -> (i32, i32, i32) {
    %c0_i32 = arith.constant 0 : i32
    %c0_i32_0 = arith.constant 0 : i32
    %c0_i32_1 = arith.constant 0 : i32
    return %arg0, %c0_i32, %c0_i32_0 : i32, i32, i32
  }
  func.func @transform_8(%arg0: i32, %arg1: i32) -> (i32, i32) {
    %c0_i32 = arith.constant 0 : i32
    %c0_i32_0 = arith.constant 0 : i32
    %c0_i32_1 = arith.constant 0 : i32
    return %c0_i32, %c0_i32_0 : i32, i32
  }
  func.func @transform_9(%arg0: i32, %arg1: i32) -> (i32, i32) {
    %c0_i32 = arith.constant 0 : i32
    %c0_i32_0 = arith.constant 0 : i32
    %c0_i32_1 = arith.constant 0 : i32
    return %c0_i32, %c0_i32_0 : i32, i32
  }
  func.func @transform_10(%arg0: i32, %arg1: i32) -> (i32, i32) {
    %c0_i32 = arith.constant 0 : i32
    %c0_i32_0 = arith.constant 0 : i32
    %c0_i32_1 = arith.constant 0 : i32
    return %c0_i32, %c0_i32_0 : i32, i32
  }
  func.func @transform_11(%arg0: i32, %arg1: i32) -> (i32, i32) {
    %c0_i32 = arith.constant 0 : i32
    %c0_i32_0 = arith.constant 0 : i32
    %c0_i32_1 = arith.constant 0 : i32
    return %c0_i32, %c0_i32_0 : i32, i32
  }
  func.func @transform_12(%arg0: i32, %arg1: i32) -> (i32, i32) {
    %c0_i32 = arith.constant 0 : i32
    %c0_i32_0 = arith.constant 0 : i32
    %c0_i32_1 = arith.constant 0 : i32
    return %c0_i32, %c0_i32_0 : i32, i32
  }
  func.func @transform_13(%arg0: i32, %arg1: i32) -> (i32, i32, i32) {
    %c0_i32 = arith.constant 0 : i32
    %c0_i32_0 = arith.constant 0 : i32
    %c0_i32_1 = arith.constant 0 : i32
    return %arg0, %c0_i32, %c0_i32_0 : i32, i32, i32
  }
}

</mosaic_0001>

<bundles_post_ra>
// kernel: tnet_forward.2
= control target key start
LH: loop header
LB: loop body
LE: loop exit
PB: predicated region body
PF: predicated region fallthrough
CT: control target
= control target key end

     0   :  { %s3673_s24 = smov 0   ;;  %s3675_s25 = smov 0   ;;  %s5065_s0 = inlined_call_operand.vmem [shape: f32[4,256,3], index: 0, kind: input, shape index: {}]   ;;  %s5066_s1 = inlined_call_operand.vmem [shape: f32[3,64], index: 1, kind: input, shape index: {}]   ;;  %s5067_s2 = inlined_call_operand.vmem [shape: f32[1,64], index: 2, kind: input, shape index: {}]   ;;  %s5068_s3 = inlined_call_operand.vmem [shape: bf16[64,128], index: 3, kind: input, shape index: {}]   ;;  %s5069_s4 = inlined_call_operand.vmem [shape: f32[1,128], index: 4, kind: input, shape index: {}]   ;;  %s5070_s5 = inlined_call_operand.vmem [shape: bf16[128,1024], index: 5, kind: input, shape index: {}]   ;;  %s5071_s6 = inlined_call_operand.vmem [shape: f32[1,1024], index: 6, kind: input, shape index: {}]   ;;  %s5072_s7 = inlined_call_operand.vmem [shape: f32[4,1,1024], index: 7, kind: output, shape index: {}]  }
   0x1   :  { %s3677_s26 = smov 0  }
   0x2 LB: > { %s29_s27 = sadd.s32 1, %s3623_s25  ;;  %p3366_p0 = scmp.ge.s32.totalorder %s3627_s26, 1  ;;  %s3627_s26 = sphi %s3677_s26, %s17_s26   ;;  %s3623_s25 = sphi %s3675_s25, %s5092_s25   ;;  %s3619_s24 = sphi %s3673_s24, %s5091_s24  }
   0x3   : > { %p31_p1 = scmp.ge.s32.totalorder %s29_s27, 4  ;;  %p256_p2 = scmp.lt.s32.totalorder %s3627_s26, 5 }
   0x5   : > { %s5094_s27 = smov (%p31_p1, %s29_s27), 0  ;;  %p257_p3 = pnand %p3366_p0, %p256_p2 }
   0x7   : > { %260 = sbr.rel (%p257_p3) target bundleno = 1002 (0x3ea), region = 48 }
   0xc   : > { %p292_p4 = scmp.lt.s32.totalorder %s3619_s24, 3  ;;  %v3629_v0 = vmov 1   ;;  %v3630_v4 = vmov 2   ;;  %v5073_v7 = vmov 0   ;;  %v3601_v10 = vld [vmem:[%s5068_s3 + $0x18] sm:$0xff]   ;;  %v3602_v11 = vld [vmem:[%s5068_s3 + $0x10] sm:$0xff]   ;;  %v574_v36 = vlaneseq }
   0xd   : > { %3556 = vset.pattern.permute.xlu0 %v3629_v0  ;;  %3554 = vset.pattern.permute.xlu1 %v3629_v0  ;;  %v3603_v12 = vld [vmem:[%s5068_s3 + $0x8] sm:$0xff]   ;;  %v3604_v14 = vld [vmem:[%s5068_s3] sm:$0xff]   ;;  %vm1112_vm0 = vcmask 523264  }
   0xe   : > { %s5096_s24 = smov (!%p292_p4, %s3619_s24), 3  ;;  %3478 = vmatprep.subr.bf16.mxu0 %v3601_v10  ;;  %3518 = vmatprep.subr.bf16.mxu1 %v3601_v10  ;;  %v3803_v40 = vshrl.u32 %v574_v36, 7  ;;  %v338_v45 = vld [vmem:[%s5066_s1] sm:$0x7] }
   0xf   : > { %s3457_s28 = sshll.u32 %s5096_s24, 8  ;;  %3479 = vmatpush3.bf16.msra.mxu0 %v3601_v10  ;;  %3522 = vmatpush3.bf16.msra.mxu1 %v3601_v10  ;;  %s3369_s20 = sshll.u32 %s5096_s24, 3 }
  0x10   : > { %s3699_s8 = scalar_lea.vmem %s5065_s0, %s3457_s28  ;;  %3480 = vmatprep.subr.bf16.mxu0 %v3602_v11  ;;  %3519 = vmatprep.subr.bf16.mxu1 %v3602_v11  ;;  %v740_v44 = vsub.s32 1, %v3803_v40  ;;  %v936_v47 = vsub.s32 2, %v3803_v40  ;;  %v3824_v48 = vsub.s32 0, %v3803_v40  ;;  %s304_s23 = scalar_lea.vmem %s5072_s7, %s3369_s20 }
  0x11   : > { %v308_v1 = vld [vmem:[%s3699_s8 + $0x10] sm:$0xff]  ;;  %v306_v2 = vld [vmem:[%s3699_s8] sm:$0xff]  ;;  %v307_v3 = vld [vmem:[%s3699_s8 + $0x8] sm:$0xff] }
  0x12   : > { %619 = vperm.xlu0 %3556, %v308_v1   ;;  %611 = vperm.xlu1 %3554, %v306_v2   ;;  %v310_v5 = vld [vmem:[%s3699_s8 + $0x20] sm:$0xff]  ;;  %v309_v6 = vld [vmem:[%s3699_s8 + $0x18] sm:$0xff]  ;;  %v3711_v9 = vld [vmem:[%s3699_s8 + $0x48] sm:$0xff]  ;;  %v3831_v50 = vrot.slane %v338_v45, %v740_v44  ;;  %v3836_v52 = vrot.slane %v338_v45, %v936_v47  ;;  %v3839_v53 = vrot.slane %v338_v45, %v3824_v48 }
  0x13   : > { %v313_v8 = vld [vmem:[%s3699_s8 + $0x38] sm:$0xff]  ;;  %3481 = vmatpush3.bf16.msra.mxu0 %v3602_v11  ;;  %v311_v13 = vld [vmem:[%s3699_s8 + $0x28] sm:$0xff]  ;;  %3523 = vmatpush3.bf16.msra.mxu1 %v3602_v11  ;;  %v316_v15 = vld [vmem:[%s3699_s8 + $0x50] sm:$0xff] }
  0x14   : > { %3482 = vmatprep.subr.bf16.mxu0 %v3603_v12  ;;  %3520 = vmatprep.subr.bf16.mxu1 %v3603_v12  ;;  %v312_v16 = vld [vmem:[%s3699_s8 + $0x30] sm:$0xff]  ;;  %v318_v17 = vld [vmem:[%s3699_s8 + $0x60] sm:$0xff]  ;;  %v3737_v18 = vld [vmem:[%s3699_s8 + $0x88] sm:$0xff] }
  0x15   : > { %v3742_v19 = vld [vmem:[%s3699_s8 + $0x90] sm:$0xff]  ;;  %v314_v20 = vld [vmem:[%s3699_s8 + $0x40] sm:$0xff]  ;;  %v319_v21 = vld [vmem:[%s3699_s8 + $0x68] sm:$0xff] }
  0x16   : > { %3559 = vset.pattern.permute.xlu0 %v3630_v4  ;;  %615 = vperm.xlu1 %3554, %v307_v3   ;;  %v320_v22 = vld [vmem:[%s3699_s8 + $0x70] sm:$0xff]  ;;  %v317_v23 = vld [vmem:[%s3699_s8 + $0x58] sm:$0xff]  ;;  %v3757_v24 = vld [vmem:[%s3699_s8 + $0xa8] sm:$0xff] }
  0x17   : > { %811 = vperm.xlu0 %3559, %v307_v3   ;;  %3483 = vmatpush3.bf16.msra.mxu0 %v3603_v12  ;;  %v3762_v25 = vld [vmem:[%s3699_s8 + $0xb0] sm:$0xff]  ;;  %v321_v26 = vld [vmem:[%s3699_s8 + $0x78] sm:$0xff]  ;;  %v3771_v27 = vld [vmem:[%s3699_s8 + $0xa0] sm:$0xff] }
  0x18   : > { %3524 = vmatpush3.bf16.msra.mxu1 %v3603_v12  ;;  %3484 = vmatprep.subr.bf16.mxu0 %v3604_v14  ;;  %v3775_v28 = vld [vmem:[%s3699_s8 + $0xb8] sm:$0xff]  ;;  %v3780_v29 = vld [vmem:[%s3699_s8 + $0xc8] sm:$0xff]  ;;  %v3789_v30 = vld [vmem:[%s3699_s8 + $0xd0] sm:$0xff] }
  0x19   : > { %3521 = vmatprep.subr.bf16.mxu1 %v3604_v14  ;;  %v3794_v33 = vld [vmem:[%s3699_s8 + $0xe0] sm:$0xff]  ;;  %v3809_v41 = vld [vmem:[%s3699_s8 + $0xe8] sm:$0xff]  ;;  %v3820_v46 = vld [vmem:[%s3699_s8 + $0xf0] sm:$0xff] }
  0x1a   : > { %3555 = vset.pattern.permute.xlu1 %v5073_v7  ;;  %v3800_v39 = vld [vmem:[%s3699_s8 + $0x80] sm:$0xff]  ;;  %v325_v58 = vld [vmem:[%s3699_s8 + $0x98] sm:$0xff] }
  0x1b   : > { %823 = vperm.xlu0 %3559, %v310_v5   ;;  %431 = vperm.xlu1 %3555, %v309_v6  }
  0x1c   : > { %3485 = vmatpush3.bf16.msra.mxu0 %v3604_v14  ;;  %3525 = vmatpush3.bf16.msra.mxu1 %v3604_v14 }
  0x1f   : > { %835 = vperm.xlu0 %3559, %v313_v8   ;;  %3557 = vset.pattern.permute.xlu1 %v3629_v0 }
  0x20   : > { %623 = vperm.xlu1 %3557, %v309_v6  }
  0x23   : > { %843 = vperm.xlu0 %3559, %v3711_v9  }
  0x24   : > { %3558 = vset.pattern.permute.xlu1 %v3630_v4 }
  0x25   : > { %807 = vperm.xlu1 %3558, %v306_v2  }
  0x27   : > { %3570 = vset.pattern.permute.xlu0 %v5073_v7 }
  0x28   : > { %416 = vperm.xlu0 %3570, %v306_v2  }
  0x29   : > { %815 = vperm.xlu1 %3558, %v308_v1  }
  0x2c   : > { %421 = vperm.xlu0 %3570, %v307_v3  }
  0x2d   : > { %819 = vperm.xlu1 %3558, %v309_v6  }
  0x30   : > { %426 = vperm.xlu0 %3570, %v308_v1  }
  0x31   : > { %3560 = vset.pattern.permute.xlu1 %v5073_v7 }
  0x32   : > { %441 = vperm.xlu1 %3560, %v311_v13  }
  0x34   : > { %436 = vperm.xlu0 %3570, %v310_v5  }
  0x36   : > { %3561 = vset.pattern.permute.xlu1 %v3629_v0 }
  0x37   : > { %627 = vperm.xlu1 %3561, %v310_v5  }
  0x38   : > { %461 = vperm.xlu0 %3570, %v3711_v9  }
  0x3b   : > { %3562 = vset.pattern.permute.xlu1 %v5073_v7 }
  0x3c   : > { %466 = vperm.xlu0 %3570, %v316_v15   ;;  %446 = vperm.xlu1 %3562, %v312_v16  }
  0x40   : > { %476 = vperm.xlu0 %3570, %v318_v17   ;;  %451 = vperm.xlu1 %3562, %v313_v8  }
  0x44   : > { %501 = vperm.xlu0 %3570, %v3737_v18   ;;  %3563 = vset.pattern.permute.xlu1 %v3629_v0 }
  0x45   : > { %639 = vperm.xlu1 %3563, %v313_v8   ;;  %v3855_v8 = vld [vmem:[%s3699_s8 + $0xf8] sm:$0xff] }
  0x48   : > { %506 = vperm.xlu0 %3570, %v3742_v19  }
  0x49   : > { %3564 = vset.pattern.permute.xlu1 %v3630_v4 }
  0x4a   : > { %827 = vperm.xlu1 %3564, %v311_v13  }
  0x4c   : > { %3578 = vset.pattern.permute.xlu0 %v3629_v0 }
  0x4d   : > { %631 = vperm.xlu0 %3578, %v311_v13  }
  0x4e   : > { %831 = vperm.xlu1 %3564, %v312_v16  }
  0x51   : > { %635 = vperm.xlu0 %3578, %v312_v16  }
  0x52   : > { %3565 = vset.pattern.permute.xlu1 %v5073_v7 }
  0x53   : > { %456 = vperm.xlu1 %3565, %v314_v20  }
  0x55   : > { %651 = vperm.xlu0 %3578, %v316_v15  }
  0x57   : > { %3566 = vset.pattern.permute.xlu1 %v3629_v0 }
  0x58   : > { %643 = vperm.xlu1 %3566, %v314_v20  }
  0x59   : > { %663 = vperm.xlu0 %3578, %v319_v21  }
  0x5c   : > { %647 = vperm.xlu1 %3566, %v3711_v9   ;;  %v3860_v9 = vld [vmem:[%s5067_s2] ss:$0 sm:$0xff] }
  0x5d   : > { %667 = vperm.xlu0 %3578, %v320_v22  }
  0x60   : > { %3567 = vset.pattern.permute.xlu1 %v5073_v7 }
  0x61   : > { %471 = vperm.xlu1 %3567, %v317_v23   ;;  %683 = vperm.xlu0 %3578, %v3742_v19  }
  0x65   : > { %3568 = vset.pattern.permute.xlu1 %v3629_v0  ;;  %695 = vperm.xlu0 %3578, %v3757_v24  }
  0x66   : > { %655 = vperm.xlu1 %3568, %v317_v23  }
  0x69   : > { %699 = vperm.xlu0 %3578, %v3762_v25  }
  0x6a   : > { %3569 = vset.pattern.permute.xlu1 %v3630_v4 }
  0x6b   : > { %839 = vperm.xlu1 %3569, %v314_v20  }
  0x6d   : > { %3585 = vset.pattern.permute.xlu0 %v3630_v4 }
  0x6e   : > { %855 = vperm.xlu0 %3585, %v318_v17  }
  0x6f   : > { %847 = vperm.xlu1 %3569, %v316_v15  }
  0x72   : > { %867 = vperm.xlu0 %3585, %v321_v26  }
  0x73   : > { %851 = vperm.xlu1 %3569, %v317_v23  }
  0x76   : > { %875 = vperm.xlu0 %3585, %v3737_v18  }
  0x77   : > { %3571 = vset.pattern.permute.xlu1 %v5073_v7 }
  0x78   : > { %481 = vperm.xlu1 %3571, %v319_v21  }
  0x7a   : > { %887 = vperm.xlu0 %3585, %v3771_v27  }
  0x7c   : > { %3572 = vset.pattern.permute.xlu1 %v3629_v0 }
  0x7d   : > { %659 = vperm.xlu1 %3572, %v318_v17  }
  0x7e   : > { %899 = vperm.xlu0 %3585, %v3775_v28  }
  0x81   : > { %3573 = vset.pattern.permute.xlu1 %v5073_v7 }
  0x82   : > { %486 = vperm.xlu1 %3573, %v320_v22   ;;  %907 = vperm.xlu0 %3585, %v3780_v29  }
  0x86   : > { %491 = vperm.xlu1 %3573, %v321_v26   ;;  %3593 = vset.pattern.permute.xlu0 %v5073_v7 }
  0x87   : > { %516 = vperm.xlu0 %3593, %v3771_v27  }
  0x8a   : > { %3574 = vset.pattern.permute.xlu1 %v3629_v0 }
  0x8b   : > { %671 = vperm.xlu1 %3574, %v321_v26   ;;  %541 = vperm.xlu0 %3593, %v3780_v29  }
  0x8d   : > { %v612_v31 = vpop.permute.xlu1 %611  ;;  %v620_v32 = vpop.permute.xlu0 %619 }
  0x8e   : > { %v742_v55 = vmul.f32 %v3831_v50, %v612_v31  ;;  %v744_v11 = vmul.f32 %v3831_v50, %v620_v32 }
  0x8f   : > { %3575 = vset.pattern.permute.xlu1 %v3630_v4  ;;  %546 = vperm.xlu0 %3593, %v3789_v30  }
  0x90   : > { %859 = vperm.xlu1 %3575, %v319_v21  }
  0x91   : > { %v616_v34 = vpop.permute.xlu1 %615 }
  0x92   : > { %v812_v35 = vpop.permute.xlu0 %811  ;;  %v743_v62 = vmul.f32 %v3831_v50, %v616_v34 }
  0x93   : > { %556 = vperm.xlu0 %3593, %v3794_v33   ;;  %v939_v1 = vmul.f32 %v3836_v52, %v812_v35 }
  0x94   : > { %863 = vperm.xlu1 %3575, %v320_v22  }
  0x96   : > { %v432_v37 = vpop.permute.xlu1 %431  ;;  %v3797_v38 = vpop.permute.xlu0 %823 }
  0x97   : > { %3594 = vset.pattern.permute.xlu0 %v3629_v0  ;;  %v581_v2 = vmul.f32 %v3839_v53, %v432_v37 }
  0x98   : > { %3576 = vset.pattern.permute.xlu1 %v5073_v7  ;;  %715 = vperm.xlu0 %3594, %v3789_v30  }
  0x99   : > { %496 = vperm.xlu1 %3576, %v3800_v39  }
  0x9a   : > { %v3811_v42 = vpop.permute.xlu0 %835 }
  0x9b   : > { %v624_v43 = vpop.permute.xlu1 %623 }
  0x9c   : > { %727 = vperm.xlu0 %3594, %v3809_v41   ;;  %v745_v59 = vmul.f32 %v3831_v50, %v624_v43 }
  0x9d   : > { %3577 = vset.pattern.permute.xlu1 %v3629_v0 }
  0x9e   : > { %675 = vperm.xlu1 %3577, %v3800_v39   ;;  %v3827_v49 = vpop.permute.xlu0 %843  ;;  %v777_v12 = vadd.f32 %v745_v59, %v581_v2 }
  0xa0   : > { %v808_v51 = vpop.permute.xlu1 %807  ;;  %731 = vperm.xlu0 %3594, %v3820_v46  }
  0xa1   : > { %v938_v60 = vmul.f32 %v3836_v52, %v808_v51 }
  0xa2   : > { %679 = vperm.xlu1 %3577, %v3737_v18  }
  0xa3   : > { %v417_v54 = vpop.permute.xlu0 %416 }
  0xa4   : > { %v578_v56 = vmul.f32 %v3839_v53, %v417_v54  ;;  %v816_v57 = vpop.permute.xlu1 %815  ;;  %3599 = vset.pattern.permute.xlu0 %v3630_v4 }
  0xa5   : > { %919 = vperm.xlu0 %3599, %v3794_v33   ;;  %v940_v21 = vmul.f32 %v3836_v52, %v816_v57 }
  0xa6   : > { %v774_v61 = vadd.f32 %v742_v55, %v578_v56  ;;  %3579 = vset.pattern.permute.xlu1 %v5073_v7 }
  0xa7   : > { %v422_v63 = vpop.permute.xlu0 %421  ;;  %511 = vperm.xlu1 %3579, %v325_v58  }
  0xa8   : > { %v970_v3 = vadd.f32 %v938_v60, %v774_v61  ;;  %v579_v5 = vmul.f32 %v3839_v53, %v422_v63  ;;  %v820_v6 = vpop.permute.xlu1 %819 }
  0xa9   : > { %v941_v10 = vmul.f32 %v3836_v52, %v820_v6  ;;  %931 = vperm.xlu0 %3599, %v3855_v8   ;;  %v945_v6 = vmul.f32 %v3836_v52, %v3811_v42 }
  0xaa   : > { %v775_v13 = vadd.f32 %v743_v62, %v579_v5  ;;  %v1008_v18 = vadd.f32 %v3860_v9, %v970_v3 }
  0xab   : > { %v427_v14 = vpop.permute.xlu0 %426  ;;  %3580 = vset.pattern.permute.xlu1 %v3629_v0  ;;  %v973_v16 = vadd.f32 %v941_v10, %v777_v12 }
  0xac   : > { %v971_v15 = vadd.f32 %v939_v1, %v775_v13  ;;  %v580_v17 = vmul.f32 %v3839_v53, %v427_v14  ;;  %687 = vperm.xlu1 %3580, %v325_v58   ;;  %v1040_v34 = vmax.f32 %v1008_v18, 0.0 }
  0xad   : > { %v442_v20 = vpop.permute.xlu1 %441  ;;  %v1011_v31 = vadd.f32 %v3860_v9, %v973_v16 }
  0xae   : > { %v776_v22 = vadd.f32 %v744_v11, %v580_v17  ;;  %v1009_v23 = vadd.f32 %v3860_v9, %v971_v15 }
  0xaf   : > { %v437_v26 = vpop.permute.xlu0 %436  ;;  %v1043_v51 = vmax.f32 %v1011_v31, 0.0 }
  0xb0   : > { %v972_v32 = vadd.f32 %v940_v21, %v776_v22  ;;  %3581 = vset.pattern.permute.xlu1 %v3630_v4  ;;  %v1041_v35 = vmax.f32 %v1009_v23, 0.0  ;;  %v582_v62 = vmul.f32 %v3839_v53, %v437_v26 }
  0xb1   : > { %871 = vperm.xlu1 %3581, %v3800_v39  }
  0xb2   : > { %v1010_v36 = vadd.f32 %v3860_v9, %v972_v32  ;;  %v628_v37 = vpop.permute.xlu1 %627  ;;  %v1072_v43 = vpack.c.bf16 %v1041_v35, %v1040_v34 }
  0xb3   : > { %v3874_v45 = vpop.permute.xlu0 %461 }
  0xb4   : > { %v1042_v54 = vmax.f32 %v1010_v36, 0.0  ;;  %3486 = vmatprep.mubr.msk.bf16.mxu0 %vm1112_vm0, %v1072_v43 }
  0xb5   : > { %879 = vperm.xlu1 %3581, %v3742_v19   ;;  %v746_v19 = vmul.f32 %v3831_v50, %v628_v37 }
  0xb6   : > { %v1073_v55 = vpack.c.bf16 %v1043_v51, %v1042_v54 }
  0xb7   : > { %v447_v56 = vpop.permute.xlu1 %446  ;;  %v3878_v57 = vpop.permute.xlu0 %466  ;;  %v778_v1 = vadd.f32 %v746_v19, %v582_v62  ;;  %v587_v62 = vmul.f32 %v3839_v53, %v3874_v45  ;;  %v410_v45 = vld [vmem:[%s5070_s5 + $0x1e8] sm:$0xff] }
  0xb8   : > { %3487 = vmatmul.mubr.msk.bf16.vlgmr.msra.gmra.mxu0 %vm1112_vm0, %v1073_v55  ;;  %v584_v16 = vmul.f32 %v3839_v53, %v447_v56 }
  0xb9   : > { %883 = vperm.xlu1 %3581, %v325_v58   ;;  %v942_v58 = vmul.f32 %v3836_v52, %v3797_v38 }
  0xbb   : > { %v452_v39 = vpop.permute.xlu1 %451  ;;  %v3881_v59 = vpop.permute.xlu0 %476  ;;  %v974_v11 = vadd.f32 %v942_v58, %v778_v1 }
  0xbc   : > { %v585_v5 = vmul.f32 %v3839_v53, %v452_v39 }
  0xbd   : > { %3582 = vset.pattern.permute.xlu1 %v5073_v7  ;;  %v1012_v42 = vadd.f32 %v3860_v9, %v974_v11 }
  0xbe   : > { %521 = vperm.xlu1 %3582, %v3757_v24  }
  0xbf   : > { %v3885_v60 = vpop.permute.xlu0 %501  ;;  %v1044_v32 = vmax.f32 %v1012_v42, 0.0 }
  0xc0   : > { %v640_v61 = vpop.permute.xlu1 %639 }
  0xc1   : > { %v749_v2 = vmul.f32 %v3831_v50, %v640_v61 }
  0xc2   : > { %3583 = vset.pattern.permute.xlu1 %v3629_v0 }
  0xc3   : > { %691 = vperm.xlu1 %3583, %v3771_v27   ;;  %v3891_v63 = vpop.permute.xlu0 %506  ;;  %v583_v27 = vmul.f32 %v3839_v53, %v442_v20  ;;  %v781_v12 = vadd.f32 %v749_v2, %v585_v5 }
  0xc5   : > { %v828_v3 = vpop.permute.xlu1 %827  ;;  %v977_v18 = vadd.f32 %v945_v6, %v781_v12 }
  0xc6   : > { %v943_v14 = vmul.f32 %v3836_v52, %v828_v3 }
  0xc7   : > { %3584 = vset.pattern.permute.xlu1 %v5073_v7  ;;  %v1015_v34 = vadd.f32 %v3860_v9, %v977_v18 }
  0xc8   : > { %v632_v10 = vpop.permute.xlu0 %631  ;;  %526 = vperm.xlu1 %3584, %v3762_v25  }
  0xc9   : > { %v747_v38 = vmul.f32 %v3831_v50, %v632_v10  ;;  %v832_v13 = vpop.permute.xlu1 %831  ;;  %v1047_v54 = vmax.f32 %v1015_v34, 0.0 }
  0xca   : > { %v944_v26 = vmul.f32 %v3836_v52, %v832_v13  ;;  %v398_v13 = vld [vmem:[%s5070_s5 + $0x188] sm:$0xff] }
  0xcb   : > { %v779_v15 = vadd.f32 %v747_v38, %v583_v27 }
  0xcc   : > { %v636_v17 = vpop.permute.xlu0 %635  ;;  %531 = vperm.xlu1 %3584, %v3775_v28  }
  0xcd   : > { %v975_v21 = vadd.f32 %v943_v14, %v779_v15  ;;  %v748_v22 = vmul.f32 %v3831_v50, %v636_v17  ;;  %v402_v14 = vld [vmem:[%s5070_s5 + $0x1a8] sm:$0xff] }
  0xce   : > { %v457_v20 = vpop.permute.xlu1 %456  ;;  %v3441_v17 = vcombine.low %v398_v13, %v402_v14 }
  0xcf   : > { %v1013_v23 = vadd.f32 %v3860_v9, %v975_v21  ;;  %v780_v31 = vadd.f32 %v748_v22, %v584_v16  ;;  %v586_v10 = vmul.f32 %v3839_v53, %v457_v20  ;;  %v3442_v16 = vcombine.high %v398_v13, %v402_v14  ;;  %v3954_v20 = vld [vmem:[%s3699_s8 + $0xd8] sm:$0xff]  ;;  %v370_v13 = vld [vmem:[%s5070_s5 + $0xa8] sm:$0xff] }
  0xd0   : > { %3586 = vset.pattern.permute.xlu1 %v3629_v0  ;;  %v652_v58 = vpop.permute.xlu0 %651 }
  0xd1   : > { %v1045_v35 = vmax.f32 %v1013_v23, 0.0  ;;  %v976_v36 = vadd.f32 %v944_v26, %v780_v31  ;;  %703 = vperm.xlu1 %3586, %v3775_v28   ;;  %v3920_v28 = vld [vmem:[%s3699_s8 + $0xc0] sm:$0xff]  ;;  %v752_v11 = vmul.f32 %v3831_v50, %v652_v58  ;;  %v390_v23 = vld [vmem:[%s5070_s5 + $0x148] sm:$0xff] }
  0xd2   : > { %v394_v26 = vld [vmem:[%s5070_s5 + $0x168] sm:$0xff] }
  0xd3   : > { %v1014_v37 = vadd.f32 %v3860_v9, %v976_v36  ;;  %v644_v43 = vpop.permute.xlu1 %643  ;;  %v1074_v51 = vpack.c.bf16 %v1045_v35, %v1044_v32  ;;  %v3434_v35 = vcombine.high %v390_v23, %v394_v26  ;;  %v3433_v36 = vcombine.low %v390_v23, %v394_v26  ;;  %v350_v26 = vld [vmem:[%s5070_s5 + $0x8] sm:$0xff] }
  0xd4   : > { %v750_v3 = vmul.f32 %v3831_v50, %v644_v43  ;;  %v3942_v12 = vpop.permute.xlu0 %663 }
  0xd5   : > { %v1046_v55 = vmax.f32 %v1014_v37, 0.0  ;;  %3587 = vset.pattern.permute.xlu1 %v3630_v4  ;;  %3490 = vmatprep.mubr.msk.bf16.mxu0 %vm1112_vm0, %v1074_v51 }
  0xd6   : > { %891 = vperm.xlu1 %3587, %v3757_v24   ;;  %v947_v24 = vmul.f32 %v3836_v52, %v3827_v49  ;;  %v588_v49 = vmul.f32 %v3839_v53, %v3878_v57  ;;  %v782_v57 = vadd.f32 %v750_v3, %v586_v10  ;;  %v378_v3 = vld [vmem:[%s5070_s5 + $0xe8] sm:$0xff] }
  0xd7   : > { %v648_v56 = vpop.permute.xlu1 %647  ;;  %v1075_v39 = vpack.c.bf16 %v1047_v54, %v1046_v55 }
  0xd8   : > { %v751_v19 = vmul.f32 %v3831_v50, %v648_v56  ;;  %v784_v18 = vadd.f32 %v752_v11, %v588_v49  ;;  %v3964_v32 = vpop.permute.xlu0 %667  ;;  %v382_v56 = vld [vmem:[%s5070_s5 + $0x108] sm:$0xff] }
  0xd9   : > { %3491 = vmatmul.mubr.msk.bf16.gmra.mxu0 %vm1112_vm0, %v1075_v39  ;;  %v386_v39 = vld [vmem:[%s5070_s5 + $0x128] sm:$0xff] }
  0xda   : > { %895 = vperm.xlu1 %3587, %v3762_v25   ;;  %v783_v1 = vadd.f32 %v751_v19, %v587_v62  ;;  %v406_v25 = vld [vmem:[%s5070_s5 + $0x1c8] sm:$0xff] }
  0xdb   : > { %v3450_v5 = vcombine.high %v406_v25, %v410_v45  ;;  %v3449_v6 = vcombine.low %v406_v25, %v410_v45  ;;  %v374_v45 = vld [vmem:[%s5070_s5 + $0xc8] sm:$0xff] }
  0xdc   : > { %v472_v61 = vpop.permute.xlu1 %471  ;;  %v979_v27 = vadd.f32 %v947_v24, %v783_v1  ;;  %v3425_v24 = vcombine.low %v382_v56, %v386_v39  ;;  %v3418_v49 = vcombine.high %v374_v45, %v378_v3  ;;  %v3417_v10 = vcombine.low %v374_v45, %v378_v3 }
  0xdd   : > { %1891 = vmatprep.subr.bf16.mxu0 %v3450_v5  ;;  %v589_v43 = vmul.f32 %v3839_v53, %v472_v61  ;;  %v3426_v61 = vcombine.high %v382_v56, %v386_v39  ;;  %v755_v56 = vmul.f32 %v3831_v50, %v3942_v12  ;;  %v4036_v12 = vld [vmem:[%s5070_s5 + $0x1c0] sm:$0xff] }
  0xde   : > { %3588 = vset.pattern.permute.xlu1 %v5073_v7  ;;  %1892 = vmatpush1.bf16.msra.mxu0 %v3449_v6  ;;  %v1017_v42 = vadd.f32 %v3860_v9, %v979_v27 }
  0xdf   : > { %536 = vperm.xlu1 %3588, %v3920_v28   ;;  %1893 = vmatprep.subr.bf16.mxu0 %v3442_v16 }
  0xe0   : > { %v1049_v37 = vmax.f32 %v1017_v42, 0.0  ;;  %v358_v42 = vld [vmem:[%s5070_s5 + $0x48] sm:$0xff] }
  0xe1   : > { %v656_v2 = vpop.permute.xlu1 %655 }
  0xe2   : > { %1894 = vmatpush1.bf16.msra.mxu0 %v3441_v17 }
  0xe3   : > { %3589 = vset.pattern.permute.xlu1 %v3629_v0  ;;  %1895 = vmatprep.subr.bf16.mxu0 %v3434_v35  ;;  %v590_v35 = vmul.f32 %v3839_v53, %v3881_v59 }
  0xe4   : > { %707 = vperm.xlu1 %3589, %v3920_v28  }
  0xe6   : > { %v840_v38 = vpop.permute.xlu1 %839  ;;  %1896 = vmatpush1.bf16.msra.mxu0 %v3433_v36 }
  0xe7   : > { %v946_v15 = vmul.f32 %v3836_v52, %v840_v38  ;;  %1897 = vmatprep.subr.bf16.mxu0 %v3426_v61  ;;  %v366_v38 = vld [vmem:[%s5070_s5 + $0x88] sm:$0xff]  ;;  %v756_v61 = vmul.f32 %v3831_v50, %v3964_v32 }
  0xe8   : > { %711 = vperm.xlu1 %3589, %v3780_v29   ;;  %v753_v29 = vmul.f32 %v3831_v50, %v656_v2  ;;  %v3978_v2 = vpop.permute.xlu0 %683  ;;  %v3409_v17 = vcombine.low %v366_v38, %v370_v13 }
  0xe9   : > { %v978_v21 = vadd.f32 %v946_v15, %v782_v57  ;;  %v3410_v15 = vcombine.high %v366_v38, %v370_v13 }
  0xea   : > { %v848_v22 = vpop.permute.xlu1 %847  ;;  %v785_v62 = vadd.f32 %v753_v29, %v589_v43  ;;  %1898 = vmatpush1.bf16.msra.mxu0 %v3425_v24  ;;  %v354_v29 = vld [vmem:[%s5070_s5 + $0x28] sm:$0xff] }
  0xeb   : > { %v1016_v31 = vadd.f32 %v3860_v9, %v978_v21  ;;  %v948_v34 = vmul.f32 %v3836_v52, %v848_v22  ;;  %1899 = vmatprep.subr.bf16.mxu0 %v3418_v49 }
  0xec   : > { %3590 = vset.pattern.permute.xlu1 %v5073_v7  ;;  %v3997_v57 = vpop.permute.xlu0 %695 }
  0xed   : > { %v1048_v51 = vmax.f32 %v1016_v31, 0.0  ;;  %v980_v54 = vadd.f32 %v948_v34, %v784_v18  ;;  %551 = vperm.xlu1 %3590, %v3954_v20   ;;  %v362_v18 = vld [vmem:[%s5070_s5 + $0x68] sm:$0xff]  ;;  %v3394_v31 = vcombine.high %v350_v26, %v354_v29 }
  0xee   : > { %v852_v55 = vpop.permute.xlu1 %851  ;;  %1900 = vmatpush1.bf16.msra.mxu0 %v3417_v10  ;;  %v3402_v21 = vcombine.high %v358_v42, %v362_v18 }
  0xef   : > { %v1076_v19 = vpack.c.bf16 %v1049_v37, %v1048_v51  ;;  %v949_v58 = vmul.f32 %v3836_v52, %v852_v55  ;;  %v1018_v1 = vadd.f32 %v3860_v9, %v980_v54  ;;  %1901 = vmatprep.subr.bf16.mxu0 %v3410_v15 }
  0xf0   : > { %v4008_v22 = vpop.permute.xlu0 %699 }
  0xf1   : > { %v981_v25 = vadd.f32 %v949_v58, %v785_v62  ;;  %3591 = vset.pattern.permute.xlu1 %v3629_v0  ;;  %3494 = vmatprep.mubr.msk.bf16.mxu0 %vm1112_vm0, %v1076_v19  ;;  %v1050_v27 = vmax.f32 %v1018_v1, 0.0  ;;  %v4041_v1 = vld [vmem:[%s5070_s5 + $0x1e0] sm:$0xff] }
  0xf2   : > { %719 = vperm.xlu1 %3591, %v3954_v20   ;;  %1902 = vmatpush1.bf16.msra.mxu0 %v3409_v17  ;;  %v3448_v3 = vcombine.high %v4036_v12, %v4041_v1 }
  0xf3   : > { %v1019_v5 = vadd.f32 %v3860_v9, %v981_v25  ;;  %v482_v6 = vpop.permute.xlu1 %481  ;;  %1903 = vmatprep.subr.bf16.mxu0 %v3402_v21 }
  0xf4   : > { %v856_v37 = vpop.permute.xlu0 %855  ;;  %v591_v59 = vmul.f32 %v3839_v53, %v482_v6  ;;  %1698 = vmatprep.subr.bf16.mxu1 %v3448_v3 }
  0xf5   : > { %v1051_v11 = vmax.f32 %v1019_v5, 0.0  ;;  %v950_v51 = vmul.f32 %v3836_v52, %v856_v37 }
  0xf6   : > { %3592 = vset.pattern.permute.xlu1 %v3630_v4  ;;  %v787_v25 = vadd.f32 %v755_v56, %v591_v59 }
  0xf7   : > { %v1077_v14 = vpack.c.bf16 %v1051_v11, %v1050_v27  ;;  %903 = vperm.xlu1 %3592, %v3920_v28   ;;  %v3401_v28 = vcombine.low %v358_v42, %v362_v18 }
  0xf8   : > { %v660_v16 = vpop.permute.xlu1 %659  ;;  %v868_v55 = vpop.permute.xlu0 %867 }
  0xf9   : > { %3495 = vmatmul.mubr.msk.bf16.gmra.mxu0 %vm1112_vm0, %v1077_v14  ;;  %v754_v36 = vmul.f32 %v3831_v50, %v660_v16  ;;  %v953_v58 = vmul.f32 %v3836_v52, %v868_v55 }
  0xfa   : > { %1904 = vmatpush1.bf16.msra.mxu0 %v3401_v28 }
  0xfb   : > { %911 = vperm.xlu1 %3592, %v3789_v30   ;;  %v3393_v30 = vcombine.low %v350_v26, %v354_v29  ;;  %1905 = vmatprep.subr.bf16.mxu0 %v3394_v31  ;;  %v786_v43 = vadd.f32 %v754_v36, %v590_v35 }
  0xfc   : > { %v876_v31 = vpop.permute.xlu0 %875 }
  0xfd   : > { %v487_v23 = vpop.permute.xlu1 %486  ;;  %v982_v62 = vadd.f32 %v950_v51, %v786_v43  ;;  %v760_v43 = vmul.f32 %v3831_v50, %v3978_v2 }
  0xfe   : > { %1906 = vmatpush1.bf16.msra.mxu0 %v3393_v30 }
  0xff   : > { %915 = vperm.xlu1 %3592, %v3954_v20   ;;  %v1020_v32 = vadd.f32 %v3860_v9, %v982_v62 }
 0x101   : > { %v492_v34 = vpop.permute.xlu1 %491  ;;  %v1052_v38 = vmax.f32 %v1020_v32, 0.0 }
 0x102   : > { %v593_v39 = vmul.f32 %v3839_v53, %v492_v34  ;;  %v955_v34 = vmul.f32 %v3836_v52, %v876_v31  ;;  %v373_v31 = vld [vmem:[%s5070_s5 + $0xc0] sm:$0xff] }
 0x103   : > { %3595 = vset.pattern.permute.xlu1 %v5073_v7 }
 0x104   : > { %561 = vperm.xlu1 %3595, %v3809_v41  }
 0x106   : > { %v672_v20 = vpop.permute.xlu1 %671 }
 0x107   : > { %v757_v54 = vmul.f32 %v3831_v50, %v672_v20 }
 0x108   : > { %3596 = vset.pattern.permute.xlu1 %v3629_v0 }
 0x109   : > { %723 = vperm.xlu1 %3596, %v3794_v33   ;;  %v789_v19 = vadd.f32 %v757_v54, %v593_v39  ;;  %v592_v33 = vmul.f32 %v3839_v53, %v487_v23 }
 0x10b   : > { %v860_v24 = vpop.permute.xlu1 %859  ;;  %v985_v5 = vadd.f32 %v953_v58, %v789_v19  ;;  %v788_v10 = vadd.f32 %v756_v61, %v592_v33  ;;  %v888_v58 = vpop.permute.xlu0 %887 }
 0x10c   : > { %v951_v45 = vmul.f32 %v3836_v52, %v860_v24 }
 0x10d   : > { %3597 = vset.pattern.permute.xlu1 %v5073_v7  ;;  %v1023_v13 = vadd.f32 %v3860_v9, %v985_v5 }
 0x10e   : > { %v983_v6 = vadd.f32 %v951_v45, %v787_v25  ;;  %566 = vperm.xlu1 %3597, %v3820_v46  }
 0x10f   : > { %v864_v49 = vpop.permute.xlu1 %863  ;;  %v1055_v18 = vmax.f32 %v1023_v13, 0.0  ;;  %v3447_v13 = vcombine.low %v4036_v12, %v4041_v1  ;;  %v381_v12 = vld [vmem:[%s5070_s5 + $0x100] sm:$0xff] }
 0x110   : > { %v1021_v27 = vadd.f32 %v3860_v9, %v983_v6  ;;  %v952_v11 = vmul.f32 %v3836_v52, %v864_v49  ;;  %v900_v6 = vpop.permute.xlu0 %899  ;;  %v385_v1 = vld [vmem:[%s5070_s5 + $0x120] sm:$0xff] }
 0x112   : > { %v1053_v14 = vmax.f32 %v1021_v27, 0.0  ;;  %v984_v15 = vadd.f32 %v952_v11, %v788_v10  ;;  %571 = vperm.xlu1 %3597, %v3855_v8   ;;  %v397_v10 = vld [vmem:[%s5070_s5 + $0x180] sm:$0xff] }
 0x113   : > { %v401_v27 = vld [vmem:[%s5070_s5 + $0x1a0] sm:$0xff] }
 0x114   : > { %v1078_v16 = vpack.c.bf16 %v1053_v14, %v1052_v38  ;;  %v1022_v17 = vadd.f32 %v3860_v9, %v984_v15  ;;  %v497_v42 = vpop.permute.xlu1 %496  ;;  %v3440_v15 = vcombine.high %v397_v10, %v401_v27 }
 0x115   : > { %v594_v36 = vmul.f32 %v3839_v53, %v497_v42  ;;  %v393_v42 = vld [vmem:[%s5070_s5 + $0x160] sm:$0xff] }
 0x116   : > { %v1054_v21 = vmax.f32 %v1022_v17, 0.0  ;;  %3598 = vset.pattern.permute.xlu1 %v3629_v0  ;;  %3498 = vmatprep.mubr.msk.bf16.mxu0 %vm1112_vm0, %v1078_v16  ;;  %v389_v17 = vld [vmem:[%s5070_s5 + $0x140] sm:$0xff] }
 0x117   : > { %735 = vperm.xlu1 %3598, %v3855_v8   ;;  %v595_v8 = vmul.f32 %v3839_v53, %v3885_v60 }
 0x118   : > { %v1079_v28 = vpack.c.bf16 %v1055_v18, %v1054_v21  ;;  %v4097_v18 = vpop.permute.xlu0 %907  ;;  %v3439_v21 = vcombine.low %v397_v10, %v401_v27 }
 0x119   : > { %v676_v23 = vpop.permute.xlu1 %675 }
 0x11a   : > { %3499 = vmatmul.mubr.msk.bf16.gmra.mxu0 %vm1112_vm0, %v1079_v28  ;;  %v3432_v28 = vcombine.high %v389_v17, %v393_v42 }
 0x11b   : > { %3600 = vset.pattern.permute.xlu1 %v3630_v4  ;;  %1923 = vmatprep.mubr.bf16.mxu0 %v5073_v7  ;;  %v758_v4 = vmul.f32 %v3831_v50, %v676_v23 }
 0x11c   : > { %923 = vperm.xlu1 %3600, %v3809_v41  }
 0x11d   : > { %v680_v26 = vpop.permute.xlu1 %679  ;;  %v790_v51 = vadd.f32 %v758_v4, %v594_v36  ;;  %v3423_v4 = vcombine.low %v381_v12, %v385_v1 }
 0x11e   : > { %v759_v0 = vmul.f32 %v3831_v50, %v680_v26  ;;  %v3431_v26 = vcombine.low %v389_v17, %v393_v42 }
 0x120   : > { %927 = vperm.xlu1 %3600, %v3820_v46   ;;  %v791_v30 = vadd.f32 %v759_v0, %v595_v8  ;;  %v596_v46 = vmul.f32 %v3839_v53, %v3891_v63  ;;  %v3424_v0 = vcombine.high %v381_v12, %v385_v1  ;;  %v377_v8 = vld [vmem:[%s5070_s5 + $0xe0] sm:$0xff] }
 0x121   : > { %v3416_v36 = vcombine.high %v373_v31, %v377_v8 }
 0x122   : > { %v512_v29 = vpop.permute.xlu1 %511  ;;  %v987_v37 = vadd.f32 %v955_v34, %v791_v30  ;;  %v792_v56 = vadd.f32 %v760_v43, %v596_v46  ;;  %v958_v46 = vmul.f32 %v3836_v52, %v888_v58 }
 0x123   : > { %v597_v19 = vmul.f32 %v3839_v53, %v512_v29  ;;  %v517_v29 = vpop.permute.xlu0 %516 }
 0x124   : > { %v1025_v54 = vadd.f32 %v3860_v9, %v987_v37  ;;  %v598_v34 = vmul.f32 %v3839_v53, %v517_v29  ;;  %v365_v37 = vld [vmem:[%s5070_s5 + $0x80] sm:$0xff] }
 0x126   : > { %v1057_v2 = vmax.f32 %v1025_v54, 0.0 }
 0x127   : > { %v688_v35 = vpop.permute.xlu1 %687  ;;  %v542_v29 = vpop.permute.xlu0 %541 }
 0x128   : > { %v761_v59 = vmul.f32 %v3831_v50, %v688_v35 }
 0x12a   : > { %v793_v25 = vadd.f32 %v761_v59, %v597_v19  ;;  %v357_v59 = vld [vmem:[%s5070_s5 + $0x40] sm:$0xff]  ;;  %v961_v19 = vmul.f32 %v3836_v52, %v900_v6 }
 0x12c   : > { %v872_v41 = vpop.permute.xlu1 %871 }
 0x12d   : > { %v954_v20 = vmul.f32 %v3836_v52, %v872_v41  ;;  %v369_v41 = vld [vmem:[%s5070_s5 + $0xa0] sm:$0xff] }
 0x12e   : > { %v3408_v54 = vcombine.high %v365_v37, %v369_v41 }
 0x12f   : > { %v986_v60 = vadd.f32 %v954_v20, %v790_v51  ;;  %v3415_v20 = vcombine.low %v373_v31, %v377_v8  ;;  %v547_v31 = vpop.permute.xlu0 %546 }
 0x130   : > { %v880_v55 = vpop.permute.xlu1 %879 }
 0x131   : > { %v956_v39 = vmul.f32 %v3836_v52, %v880_v55  ;;  %v1024_v62 = vadd.f32 %v3860_v9, %v986_v60 }
 0x133   : > { %v988_v63 = vadd.f32 %v956_v39, %v792_v56  ;;  %v1056_v61 = vmax.f32 %v1024_v62, 0.0  ;;  %v361_v39 = vld [vmem:[%s5070_s5 + $0x60] sm:$0xff]  ;;  %v763_v62 = vmul.f32 %v3831_v50, %v3997_v57 }
 0x134   : > { %v884_v24 = vpop.permute.xlu1 %883  ;;  %v353_v57 = vld [vmem:[%s5070_s5 + $0x20] sm:$0xff]  ;;  %v3399_v10 = vcombine.low %v357_v59, %v361_v39 }
 0x135   : > { %v957_v33 = vmul.f32 %v3836_v52, %v884_v24  ;;  %v1080_v45 = vpack.c.bf16 %v1057_v2, %v1056_v61  ;;  %v1026_v3 = vadd.f32 %v3860_v9, %v988_v63  ;;  %v3407_v61 = vcombine.low %v365_v37, %v369_v41 }
 0x136   : > { %v3400_v24 = vcombine.high %v357_v59, %v361_v39  ;;  %v348_v39 = vld [vmem:[%s5069_s4] sm:$0x1] }
 0x137   : > { %v989_v32 = vadd.f32 %v957_v33, %v793_v25  ;;  %3502 = vmatprep.mubr.msk.bf16.mxu1 %vm1112_vm0, %v1080_v45  ;;  %v1058_v11 = vmax.f32 %v1026_v3, 0.0  ;;  %v349_v3 = vld [vmem:[%s5070_s5] sm:$0xff] }
 0x139   : > { %v1027_v5 = vadd.f32 %v3860_v9, %v989_v32  ;;  %v522_v49 = vpop.permute.xlu1 %521  ;;  %v764_v32 = vmul.f32 %v3831_v50, %v4008_v22 }
 0x13a   : > { %v599_v55 = vmul.f32 %v3839_v53, %v522_v49 }
 0x13b   : > { %v1059_v38 = vmax.f32 %v1027_v5, 0.0 }
 0x13c   : > { %v795_v25 = vadd.f32 %v763_v62, %v599_v55 }
 0x13d   : > { %v1081_v14 = vpack.c.bf16 %v1059_v38, %v1058_v11  ;;  %v3392_v11 = vcombine.high %v349_v3, %v353_v57 }
 0x13e   : > { %v692_v16 = vpop.permute.xlu1 %691 }
 0x13f   : > { %3503 = vmatmul.mubr.msk.bf16.vlgmr.msra.gmra.mxu1 %vm1112_vm0, %v1081_v14  ;;  %v762_v35 = vmul.f32 %v3831_v50, %v692_v16 }
 0x140   : > { %1699 = vmatpush1.bf16.msra.mxu1 %v3447_v13 }
 0x141   : > { %1700 = vmatprep.subr.bf16.mxu1 %v3440_v15  ;;  %v794_v43 = vadd.f32 %v762_v35, %v598_v34  ;;  %v3391_v15 = vcombine.low %v349_v3, %v353_v57  ;;  %v4150_v34 = vpop.permute.xlu0 %556  ;;  %v603_v35 = vmul.f32 %v3839_v53, %v542_v29 }
 0x143   : > { %v527_v23 = vpop.permute.xlu1 %526  ;;  %v990_v63 = vadd.f32 %v958_v46, %v794_v43  ;;  %v963_v46 = vmul.f32 %v3836_v52, %v4097_v18 }
 0x144   : > { %1701 = vmatpush1.bf16.msra.mxu1 %v3439_v21  ;;  %v600_v33 = vmul.f32 %v3839_v53, %v527_v23 }
 0x145   : > { %1702 = vmatprep.subr.bf16.mxu1 %v3432_v28  ;;  %v1028_v5 = vadd.f32 %v3860_v9, %v990_v63  ;;  %v716_v41 = vpop.permute.xlu0 %715 }
 0x146   : > { %v796_v38 = vadd.f32 %v764_v32, %v600_v33 }
 0x147   : > { %v532_v30 = vpop.permute.xlu1 %531  ;;  %v1060_v16 = vmax.f32 %v1028_v5, 0.0 }
 0x148   : > { %1703 = vmatpush1.bf16.msra.mxu1 %v3431_v26  ;;  %v601_v56 = vmul.f32 %v3839_v53, %v532_v30 }
 0x149   : > { %1704 = vmatprep.subr.bf16.mxu1 %v3424_v0 }
 0x14c   : > { %v704_v51 = vpop.permute.xlu1 %703  ;;  %1705 = vmatpush1.bf16.msra.mxu1 %v3423_v4 }
 0x14d   : > { %v765_v60 = vmul.f32 %v3831_v50, %v704_v51  ;;  %1706 = vmatprep.subr.bf16.mxu1 %v3416_v36 }
 0x14f   : > { %v797_v58 = vadd.f32 %v765_v60, %v601_v56  ;;  %v604_v60 = vmul.f32 %v3839_v53, %v547_v31 }
 0x150   : > { %1707 = vmatpush1.bf16.msra.mxu1 %v3415_v20 }
 0x151   : > { %v892_v2 = vpop.permute.xlu1 %891  ;;  %1708 = vmatprep.subr.bf16.mxu1 %v3408_v54  ;;  %v993_v6 = vadd.f32 %v961_v19, %v797_v58  ;;  %v768_v54 = vmul.f32 %v3831_v50, %v716_v41 }
 0x152   : > { %v959_v45 = vmul.f32 %v3836_v52, %v892_v2 }
 0x153   : > { %v1031_v17 = vadd.f32 %v3860_v9, %v993_v6  ;;  %v800_v19 = vadd.f32 %v768_v54, %v604_v60  ;;  %v404_v60 = vld [vmem:[%s5070_s5 + $0x1b8] sm:$0xff] }
 0x154   : > { %v991_v49 = vadd.f32 %v959_v45, %v795_v25  ;;  %1709 = vmatpush1.bf16.msra.mxu1 %v3407_v61 }
 0x155   : > { %v896_v27 = vpop.permute.xlu1 %895  ;;  %1710 = vmatprep.subr.bf16.mxu1 %v3400_v24  ;;  %v1063_v1 = vmax.f32 %v1031_v17, 0.0  ;;  %v1338_v24 = vpack.c.bf16 %v348_v39, %v348_v39  ;;  %v606_v39 = vmul.f32 %v3839_v53, %v4150_v34 }
 0x156   : > { %v1029_v13 = vadd.f32 %v3860_v9, %v991_v49  ;;  %v960_v14 = vmul.f32 %v3836_v52, %v896_v27 }
 0x157   : > { %v1340_v27 = vpack.i.b16 %v1338_v24, %v1338_v24 }
 0x158   : > { %v1061_v42 = vmax.f32 %v1029_v13, 0.0  ;;  %v992_v22 = vadd.f32 %v960_v14, %v796_v38  ;;  %1711 = vmatpush1.bf16.msra.mxu1 %v3399_v10 }
 0x159   : > { %1712 = vmatprep.subr.bf16.mxu1 %v3392_v11 }
 0x15a   : > { %v1082_v21 = vpack.c.bf16 %v1061_v42, %v1060_v16  ;;  %v1030_v28 = vadd.f32 %v3860_v9, %v992_v22  ;;  %v537_v12 = vpop.permute.xlu1 %536  ;;  %v4174_v16 = vrot.slane %v1340_v27, %v3824_v48 }
 0x15b   : > { %v602_v51 = vmul.f32 %v3839_v53, %v537_v12  ;;  %v4180_v12 = vld [vmem:[%s5070_s5 + $0x1d0] sm:$0xff] }
 0x15c   : > { %v1062_v23 = vmax.f32 %v1030_v28, 0.0  ;;  %3506 = vmatprep.mubr.msk.bf16.mxu1 %vm1112_vm0, %v1082_v21  ;;  %1713 = vmatpush1.bf16.msra.mxu1 %v3391_v15 }
 0x15e   : > { %v1083_v26 = vpack.c.bf16 %v1063_v1, %v1062_v23  ;;  %v4185_v1 = vld [vmem:[%s5070_s5 + $0x1f0] sm:$0xff]  ;;  %v408_v23 = vld [vmem:[%s5070_s5 + $0x1d8] sm:$0xff] }
 0x15f   : > { %v708_v0 = vpop.permute.xlu1 %707  ;;  %v3452_v29 = vcombine.high %v4180_v12, %v4185_v1 }
 0x160   : > { %3507 = vmatmul.mubr.msk.bf16.gmra.mxu1 %vm1112_vm0, %v1083_v26  ;;  %v766_v43 = vmul.f32 %v3831_v50, %v708_v0  ;;  %v412_v0 = vld [vmem:[%s5070_s5 + $0x1f8] sm:$0xff] }
 0x161   : > { %2084 = vmatprep.subr.bf16.mxu1 %v3452_v29 }
 0x162   : > { %v798_v56 = vadd.f32 %v766_v43, %v602_v51  ;;  %v400_v51 = vld [vmem:[%s5070_s5 + $0x198] sm:$0xff] }
 0x163   : > { %v712_v8 = vpop.permute.xlu1 %711 }
 0x164   : > { %v767_v4 = vmul.f32 %v3831_v50, %v712_v8  ;;  %v728_v8 = vpop.permute.xlu0 %727 }
 0x166   : > { %v799_v36 = vadd.f32 %v767_v4, %v603_v35  ;;  %v3453_v35 = vcombine.low %v408_v23, %v412_v0  ;;  %v3454_v4 = vcombine.high %v408_v23, %v412_v0 }
 0x168   : > { %v552_v30 = vpop.permute.xlu1 %551  ;;  %v995_v20 = vadd.f32 %v963_v46, %v799_v36  ;;  %2277 = vmatprep.subr.bf16.mxu0 %v3454_v4  ;;  %v732_v41 = vpop.permute.xlu0 %731 }
 0x169   : > { %v605_v45 = vmul.f32 %v3839_v53, %v552_v30 }
 0x16a   : > { %v1033_v62 = vadd.f32 %v3860_v9, %v995_v20 }
 0x16c   : > { %v1065_v33 = vmax.f32 %v1033_v62, 0.0 }
 0x16d   : > { %v720_v37 = vpop.permute.xlu1 %719 }
 0x16e   : > { %v769_v58 = vmul.f32 %v3831_v50, %v720_v37 }
 0x170   : > { %v801_v6 = vadd.f32 %v769_v58, %v605_v45 }
 0x172   : > { %v904_v55 = vpop.permute.xlu1 %903 }
 0x173   : > { %v962_v59 = vmul.f32 %v3836_v52, %v904_v55  ;;  %v3445_v55 = vcombine.low %v400_v51, %v404_v60 }
 0x175   : > { %v994_v18 = vadd.f32 %v962_v59, %v798_v56  ;;  %v3446_v56 = vcombine.high %v400_v51, %v404_v60  ;;  %v920_v59 = vpop.permute.xlu0 %919  ;;  %v403_v51 = vld [vmem:[%s5070_s5 + $0x1b0] sm:$0xff]  ;;  %v3451_v60 = vcombine.low %v4180_v12, %v4185_v1  ;;  %v388_v12 = vld [vmem:[%s5070_s5 + $0x138] sm:$0xff] }
 0x176   : > { %v912_v63 = vpop.permute.xlu1 %911 }
 0x177   : > { %v1032_v61 = vadd.f32 %v3860_v9, %v994_v18  ;;  %v964_v2 = vmul.f32 %v3836_v52, %v912_v63  ;;  %v966_v18 = vmul.f32 %v3836_v52, %v920_v59  ;;  %v395_v59 = vld [vmem:[%s5070_s5 + $0x170] sm:$0xff] }
 0x178   : > { %v3488_v25 = vpop.f32.mrf.mxu0 }
 0x179   : > { %v1064_v3 = vmax.f32 %v1032_v61, 0.0  ;;  %v996_v57 = vadd.f32 %v964_v2, %v800_v19  ;;  %v932_v58 = vpop.permute.xlu0 %931  ;;  %v771_v61 = vmul.f32 %v3831_v50, %v728_v8  ;;  %v396_v8 = vld [vmem:[%s5070_s5 + $0x178] sm:$0xff] }
 0x17a   : > { %v1195_v32 = vpop.f32.mrf.mxu0  ;;  %v916_v5 = vpop.permute.xlu1 %915  ;;  %v969_v45 = vmul.f32 %v3836_v52, %v932_v58 }
 0x17b   : > { %v1084_v49 = vpack.c.bf16 %v1065_v33, %v1064_v3  ;;  %v965_v10 = vmul.f32 %v3836_v52, %v916_v5  ;;  %v1034_v38 = vadd.f32 %v3860_v9, %v996_v57  ;;  %v772_v57 = vmul.f32 %v3831_v50, %v732_v41 }
 0x17c   : > { %v3489_v11 = vpop.f32.mrf.mxu0 }
 0x17d   : > { %v997_v13 = vadd.f32 %v965_v10, %v801_v6  ;;  %3510 = vmatprep.mubr.msk.bf16.mxu1 %vm1112_vm0, %v1084_v49  ;;  %v1066_v22 = vmax.f32 %v1034_v38, 0.0  ;;  %v1323_v26 = vpack.c.bf16 %v3489_v11, %v3488_v25 }
 0x17e   : > { %v1198_v14 = vpop.f32.mrf.mxu0 }
 0x17f   : > { %v1035_v15 = vadd.f32 %v3860_v9, %v997_v13  ;;  %v1322_v17 = vpack.c.bf16 %v1198_v14, %v1195_v32  ;;  %v562_v42 = vpop.permute.xlu1 %561  ;;  %v1347_v37 = vadd.bf16 %v4174_v16, %v1323_v26 }
 0x180   : > { %v607_v2 = vmul.f32 %v3839_v53, %v562_v42 }
 0x181   : > { %v1067_v21 = vmax.f32 %v1035_v15, 0.0  ;;  %v1346_v28 = vadd.bf16 %v4174_v16, %v1322_v17  ;;  %v4203_v43 = vmax.bf16 %v5073_v7, %v1347_v37 }
 0x182   : > { %v803_v3 = vadd.f32 %v771_v61, %v607_v2  ;;  %v376_v2 = vld [vmem:[%s5070_s5 + $0xd8] sm:$0xff] }
 0x183   : > { %v1085_v31 = vpack.c.bf16 %v1067_v21, %v1066_v22  ;;  %v4196_v30 = vmax.bf16 %v5073_v7, %v1346_v28 }
 0x184   : > { %v724_v36 = vpop.permute.xlu1 %723 }
 0x185   : > { %3511 = vmatmul.mubr.msk.bf16.gmra.mxu1 %vm1112_vm0, %v1085_v31  ;;  %1924 = vmatmul.mubr.bf16.vlgmr.msra.gmra.mxu0 %v4196_v30  ;;  %v770_v54 = vmul.f32 %v3831_v50, %v724_v36 }
 0x186   : > { %1933 = vmatprep.mubr.bf16.mxu0 %v5073_v7  ;;  %2278 = vmatpush1.bf16.msra.mxu0 %v3453_v35 }
 0x187   : > { %2279 = vmatprep.subr.bf16.mxu0 %v3446_v56  ;;  %v802_v62 = vadd.f32 %v770_v54, %v606_v39  ;;  %v391_v56 = vld [vmem:[%s5070_s5 + $0x150] sm:$0xff] }
 0x188   : > { %v3435_v58 = vcombine.low %v391_v56, %v395_v59 }
 0x189   : > { %v567_v46 = vpop.permute.xlu1 %566  ;;  %v998_v25 = vadd.f32 %v966_v18, %v802_v62  ;;  %v3436_v18 = vcombine.high %v391_v56, %v395_v59 }
 0x18a   : > { %2280 = vmatpush1.bf16.msra.mxu0 %v3445_v55  ;;  %v608_v32 = vmul.f32 %v3839_v53, %v567_v46  ;;  %v399_v46 = vld [vmem:[%s5070_s5 + $0x190] sm:$0xff]  ;;  %v384_v55 = vld [vmem:[%s5070_s5 + $0x118] sm:$0xff] }
 0x18b   : > { %v1036_v49 = vadd.f32 %v3860_v9, %v998_v25  ;;  %v3444_v54 = vcombine.high %v399_v46, %v403_v51  ;;  %v3429_v1 = vcombine.low %v384_v55, %v388_v12  ;;  %v3430_v39 = vcombine.high %v384_v55, %v388_v12  ;;  %v379_v25 = vld [vmem:[%s5070_s5 + $0xf0] sm:$0xff] }
 0x18c   : > { %v804_v13 = vadd.f32 %v772_v57, %v608_v32  ;;  %v3443_v62 = vcombine.low %v399_v46, %v403_v51  ;;  %v351_v12 = vld [vmem:[%s5070_s5 + $0x10] sm:$0xff] }
 0x18d   : > { %1934 = vmatmul.mubr.bf16.gmra.mxu0 %v4203_v43  ;;  %v572_v20 = vpop.permute.xlu1 %571  ;;  %v1068_v42 = vmax.f32 %v1036_v49, 0.0 }
 0x18e   : > { %1943 = vmatprep.mubr.bf16.mxu0 %v5073_v7  ;;  %v609_v24 = vmul.f32 %v3839_v53, %v572_v20 }
 0x192   : > { %v736_v19 = vpop.permute.xlu1 %735 }
 0x193   : > { %v773_v63 = vmul.f32 %v3831_v50, %v736_v19  ;;  %v383_v19 = vld [vmem:[%s5070_s5 + $0x110] sm:$0xff] }
 0x195   : > { %v805_v33 = vadd.f32 %v773_v63, %v609_v24  ;;  %v387_v63 = vld [vmem:[%s5070_s5 + $0x130] sm:$0xff] }
 0x196   : > { %v3428_v61 = vcombine.high %v383_v19, %v387_v63  ;;  %v375_v24 = vld [vmem:[%s5070_s5 + $0xd0] sm:$0xff] }
 0x197   : > { %v924_v34 = vpop.permute.xlu1 %923  ;;  %v1001_v10 = vadd.f32 %v969_v45, %v805_v33  ;;  %v380_v33 = vld [vmem:[%s5070_s5 + $0xf8] sm:$0xff]  ;;  %v3420_v32 = vcombine.high %v375_v24, %v379_v25 }
 0x198   : > { %v967_v5 = vmul.f32 %v3836_v52, %v924_v34  ;;  %v3421_v45 = vcombine.low %v376_v2, %v380_v33  ;;  %v3422_v34 = vcombine.high %v376_v2, %v380_v33 }
 0x199   : > { %v3492_v6 = vpop.f32.mrf.mxu0  ;;  %v1039_v50 = vadd.f32 %v3860_v9, %v1001_v10 }
 0x19a   : > { %v999_v27 = vadd.f32 %v967_v5, %v803_v3  ;;  %v3427_v3 = vcombine.low %v383_v19, %v387_v63  ;;  %v356_v19 = vld [vmem:[%s5070_s5 + $0x38] sm:$0xff] }
 0x19b   : > { %v1211_v11 = vpop.f32.mrf.mxu0  ;;  %v928_v38 = vpop.permute.xlu1 %927  ;;  %v1071_v29 = vmax.f32 %v1039_v50, 0.0  ;;  %v368_v50 = vld [vmem:[%s5070_s5 + $0x98] sm:$0xff] }
 0x19c   : > { %v1037_v14 = vadd.f32 %v3860_v9, %v999_v27  ;;  %v968_v15 = vmul.f32 %v3836_v52, %v928_v38  ;;  %v392_v52 = vld [vmem:[%s5070_s5 + $0x158] sm:$0xff] }
 0x19d   : > { %v3493_v17 = vpop.f32.mrf.mxu0  ;;  %v3437_v37 = vcombine.low %v392_v52, %v396_v8 }
 0x19e   : > { %v1069_v22 = vmax.f32 %v1037_v14, 0.0  ;;  %v1000_v53 = vadd.f32 %v968_v15, %v804_v13  ;;  %v1325_v4 = vpack.c.bf16 %v3493_v17, %v3492_v6  ;;  %v3419_v6 = vcombine.low %v375_v24, %v379_v25  ;;  %v367_v17 = vld [vmem:[%s5070_s5 + $0x90] sm:$0xff] }
 0x19f   : > { %v1214_v21 = vpop.f32.mrf.mxu0 }
 0x1a0   : > { %v1086_v28 = vpack.c.bf16 %v1069_v22, %v1068_v42  ;;  %v1038_v23 = vadd.f32 %v3860_v9, %v1000_v53  ;;  %v1324_v26 = vpack.c.bf16 %v1214_v21, %v1211_v11  ;;  %v3438_v9 = vcombine.high %v392_v52, %v396_v8  ;;  %v371_v42 = vld [vmem:[%s5070_s5 + $0xb0] sm:$0xff]  ;;  %v372_v21 = vld [vmem:[%s5070_s5 + $0xb8] sm:$0xff] }
 0x1a1   : > { %v1349_v41 = vadd.bf16 %v4174_v16, %v1325_v4  ;;  %v3411_v22 = vcombine.low %v367_v17, %v371_v42  ;;  %v3412_v53 = vcombine.high %v367_v17, %v371_v42  ;;  %v364_v8 = vld [vmem:[%s5070_s5 + $0x78] sm:$0xff] }
 0x1a2   : > { %v1070_v0 = vmax.f32 %v1038_v23, 0.0  ;;  %v1348_v31 = vadd.bf16 %v4174_v16, %v1324_v26  ;;  %3514 = vmatprep.mubr.msk.bf16.mxu1 %vm1112_vm0, %v1086_v28  ;;  %2281 = vmatprep.subr.bf16.mxu0 %v3438_v9  ;;  %v3413_v23 = vcombine.low %v368_v50, %v372_v21  ;;  %v3414_v26 = vcombine.high %v368_v50, %v372_v21  ;;  %v4400_v50 = vld [vmem:[%s5071_s6] sm:$0xff] }
 0x1a3   : > { %2282 = vmatpush1.bf16.msra.mxu0 %v3437_v37  ;;  %v4253_v20 = vmax.bf16 %v5073_v7, %v1349_v41 }
 0x1a4   : > { %v1087_v35 = vpack.c.bf16 %v1071_v29, %v1070_v0  ;;  %v4239_v36 = vmax.bf16 %v5073_v7, %v1348_v31  ;;  %2283 = vmatprep.subr.bf16.mxu0 %v3430_v39  ;;  %v359_v29 = vld [vmem:[%s5070_s5 + $0x50] sm:$0xff]  ;;  %v360_v31 = vld [vmem:[%s5070_s5 + $0x58] sm:$0xff] }
 0x1a5   : > { %v363_v0 = vld [vmem:[%s5070_s5 + $0x70] sm:$0xff]  ;;  %v3406_v9 = vcombine.high %v360_v31, %v364_v8  ;;  %v3405_v37 = vcombine.low %v360_v31, %v364_v8  ;;  %v352_v39 = vld [vmem:[%s5070_s5 + $0x18] sm:$0xff] }
 0x1a6   : > { %3515 = vmatmul.mubr.msk.bf16.gmra.mxu1 %vm1112_vm0, %v1087_v35  ;;  %1944 = vmatmul.mubr.bf16.gmra.mxu0 %v4239_v36  ;;  %v3404_v52 = vcombine.high %v359_v29, %v363_v0  ;;  %v3403_v4 = vcombine.low %v359_v29, %v363_v0  ;;  %v3397_v63 = vcombine.low %v352_v39, %v356_v19 }
 0x1a7   : > { %1730 = vmatprep.mubr.bf16.mxu1 %v5073_v7  ;;  %1953 = vmatprep.mubr.bf16.mxu0 %v5073_v7 }
 0x1a8   : > { %2284 = vmatpush1.bf16.msra.mxu0 %v3429_v1  ;;  %v355_v1 = vld [vmem:[%s5070_s5 + $0x30] sm:$0xff] }
 0x1a9   : > { %2285 = vmatprep.subr.bf16.mxu0 %v3422_v34 }
 0x1ac   : > { %2286 = vmatpush1.bf16.msra.mxu0 %v3421_v45 }
 0x1ad   : > { %2287 = vmatprep.subr.bf16.mxu0 %v3414_v26 }
 0x1ae   : > { %1731 = vmatmul.mubr.bf16.vlgmr.msra.gmra.mxu1 %v4196_v30  ;;  %1954 = vmatmul.mubr.bf16.gmra.mxu0 %v4253_v20 }
 0x1af   : > { %1740 = vmatprep.mubr.bf16.mxu1 %v5073_v7  ;;  %1963 = vmatprep.mubr.bf16.mxu0 %v5073_v7 }
 0x1b0   : > { %2085 = vmatpush1.bf16.msra.mxu1 %v3451_v60  ;;  %2288 = vmatpush1.bf16.msra.mxu0 %v3413_v23 }
 0x1b1   : > { %2086 = vmatprep.subr.bf16.mxu1 %v3444_v54  ;;  %2289 = vmatprep.subr.bf16.mxu0 %v3406_v9 }
 0x1b4   : > { %2087 = vmatpush1.bf16.msra.mxu1 %v3443_v62  ;;  %2290 = vmatpush1.bf16.msra.mxu0 %v3405_v37  ;;  %v3395_v62 = vcombine.low %v351_v12, %v355_v1 }
 0x1b5   : > { %2088 = vmatprep.subr.bf16.mxu1 %v3436_v18  ;;  %v3396_v18 = vcombine.high %v351_v12, %v355_v1 }
 0x1b6   : > { %1741 = vmatmul.mubr.bf16.gmra.mxu1 %v4203_v43 }
 0x1b7   : > { %1750 = vmatprep.mubr.bf16.mxu1 %v5073_v7 }
 0x1b8   : > { %2089 = vmatpush1.bf16.msra.mxu1 %v3435_v58  ;;  %v3398_v58 = vcombine.high %v352_v39, %v356_v19 }
 0x1b9   : > { %v3496_v57 = vpop.f32.mrf.mxu0  ;;  %2090 = vmatprep.subr.bf16.mxu1 %v3428_v61 }
 0x1ba   : > { %2291 = vmatprep.subr.bf16.mxu0 %v3398_v58 }
 0x1bb   : > { %v1227_v5 = vpop.f32.mrf.mxu0  ;;  %2292 = vmatpush1.bf16.msra.mxu0 %v3397_v63 }
 0x1bc   : > { %2091 = vmatpush1.bf16.msra.mxu1 %v3427_v3 }
 0x1bd   : > { %v3497_v49 = vpop.f32.mrf.mxu0  ;;  %2092 = vmatprep.subr.bf16.mxu1 %v3420_v32 }
 0x1be   : > { %1751 = vmatmul.mubr.bf16.gmra.mxu1 %v4239_v36  ;;  %v1327_v38 = vpack.c.bf16 %v3497_v49, %v3496_v57 }
 0x1bf   : > { %v1230_v10 = vpop.f32.mrf.mxu0  ;;  %1760 = vmatprep.mubr.bf16.mxu1 %v5073_v7 }
 0x1c0   : > { %v1326_v27 = vpack.c.bf16 %v1230_v10, %v1227_v5  ;;  %2093 = vmatpush1.bf16.msra.mxu1 %v3419_v6  ;;  %v1351_v14 = vadd.bf16 %v4174_v16, %v1327_v38 }
 0x1c1   : > { %2094 = vmatprep.subr.bf16.mxu1 %v3412_v53  ;;  %v2610_v53 = vrot.slane %v4400_v50, %v936_v47 }
 0x1c2   : > { %v1350_v11 = vadd.bf16 %v4174_v16, %v1326_v27  ;;  %v4305_v15 = vmax.bf16 %v5073_v7, %v1351_v14 }
 0x1c3   : > { %v2641_v26 = vpack.c.bf16 %v2610_v53, %v2610_v53  ;;  %v2602_v53 = vrot.slane %v4400_v50, %v3824_v48 }
 0x1c4   : > { %v4297_v13 = vmax.bf16 %v5073_v7, %v1350_v11  ;;  %2095 = vmatpush1.bf16.msra.mxu1 %v3411_v22  ;;  %v2613_v22 = vsub.s32 3, %v3803_v40 }
 0x1c5   : > { %2096 = vmatprep.subr.bf16.mxu1 %v3404_v52 }
 0x1c6   : > { %1761 = vmatmul.mubr.bf16.gmra.mxu1 %v4253_v20  ;;  %1964 = vmatmul.mubr.bf16.gmra.mxu0 %v4297_v13  ;;  %v2614_v21 = vrot.slane %v4400_v50, %v2613_v22 }
 0x1c7   : > { %1770 = vmatprep.mubr.bf16.mxu1 %v5073_v7  ;;  %1973 = vmatprep.mubr.bf16.mxu0 %v5073_v7 }
 0x1c8   : > { %2097 = vmatpush1.bf16.msra.mxu1 %v3403_v4  ;;  %v2642_v31 = vpack.c.bf16 %v2614_v21, %v2614_v21  ;;  %v2662_v4 = vpack.i.b16 %v2641_v26, %v2641_v26  ;;  %v2606_v26 = vrot.slane %v4400_v50, %v740_v44 }
 0x1c9   : > { %2098 = vmatprep.subr.bf16.mxu1 %v3396_v18 }
 0x1cc   : > { %2099 = vmatpush1.bf16.msra.mxu1 %v3395_v62 }
 0x1ce   : > { %1771 = vmatmul.mubr.bf16.gmra.mxu1 %v4297_v13  ;;  %1974 = vmatmul.mubr.bf16.gmra.mxu0 %v4305_v15 }
 0x1cf   : > { %1780 = vmatprep.mubr.bf16.mxu1 %v5073_v7  ;;  %1983 = vmatprep.mubr.bf16.mxu0 %v5073_v7 }
 0x1d6   : > { %1781 = vmatmul.mubr.bf16.gmra.mxu1 %v4305_v15 }
 0x1d7   : > { %1790 = vmatprep.mubr.bf16.mxu1 %v5073_v7 }
 0x1da   : > { %v3500_v28 = vpop.f32.mrf.mxu0 }
 0x1dc   : > { %v1243_v35 = vpop.f32.mrf.mxu0 }
 0x1de   : > { %v3501_v41 = vpop.f32.mrf.mxu0 }
 0x1df   : > { %v1329_v54 = vpack.c.bf16 %v3501_v41, %v3500_v28 }
 0x1e0   : > { %v1246_v46 = vpop.f32.mrf.mxu0 }
 0x1e1   : > { %v1328_v51 = vpack.c.bf16 %v1246_v46, %v1243_v35  ;;  %v1353_v56 = vadd.bf16 %v4174_v16, %v1329_v54  ;;  %v2669_v46 = vpack.i.b16 %v2642_v31, %v2642_v31 }
 0x1e3   : > { %v1352_v60 = vadd.bf16 %v4174_v16, %v1328_v51  ;;  %v4347_v59 = vmax.bf16 %v5073_v7, %v1353_v56  ;;  %v4415_v39 = vrot.slane %v2669_v46, %v3824_v48 }
 0x1e5   : > { %v4339_v55 = vmax.bf16 %v5073_v7, %v1352_v60  ;;  %v4408_v60 = vrot.slane %v2662_v4, %v3824_v48 }
 0x1e7   : > { %1791 = vmatmul.mubr.bf16.gmra.mxu1 %v4339_v55  ;;  %1984 = vmatmul.mubr.bf16.gmra.mxu0 %v4339_v55 }
 0x1e8   : > { %1800 = vmatprep.mubr.bf16.mxu1 %v5073_v7  ;;  %1993 = vmatprep.mubr.bf16.mxu0 %v5073_v7 }
 0x1ef   : > { %1801 = vmatmul.mubr.bf16.gmra.mxu1 %v4347_v59  ;;  %1994 = vmatmul.mubr.bf16.gmra.mxu0 %v4347_v59 }
 0x1f0   : > { %1810 = vmatprep.mubr.bf16.mxu1 %v5073_v7  ;;  %2003 = vmatprep.mubr.bf16.mxu0 %v5073_v7 }
 0x1ff   : > { %v3504_v61 = vpop.f32.mrf.mxu1 }
 0x201   : > { %v1259_v2 = vpop.f32.mrf.mxu1 }
 0x203   : > { %v3505_v24 = vpop.f32.mrf.mxu1 }
 0x204   : > { %v1331_v34 = vpack.c.bf16 %v3505_v24, %v3504_v61 }
 0x205   : > { %v1262_v25 = vpop.f32.mrf.mxu1 }
 0x206   : > { %v1330_v33 = vpack.c.bf16 %v1262_v25, %v1259_v2  ;;  %v1355_v57 = vadd.bf16 %v4174_v16, %v1331_v34 }
 0x208   : > { %v1354_v45 = vadd.bf16 %v4174_v16, %v1330_v33  ;;  %v4375_v32 = vmax.bf16 %v5073_v7, %v1355_v57 }
 0x20a   : > { %v4367_v3 = vmax.bf16 %v5073_v7, %v1354_v45 }
 0x20c   : > { %1811 = vmatmul.mubr.bf16.gmra.mxu1 %v4367_v3  ;;  %2004 = vmatmul.mubr.bf16.gmra.mxu0 %v4367_v3 }
 0x20d   : > { %1820 = vmatprep.mubr.bf16.mxu1 %v5073_v7  ;;  %2013 = vmatprep.mubr.bf16.mxu0 %v5073_v7 }
 0x214   : > { %1821 = vmatmul.mubr.bf16.gmra.mxu1 %v4375_v32  ;;  %2014 = vmatmul.mubr.bf16.gmra.mxu0 %v4375_v32 }
 0x215   : > { %1830 = vmatprep.mubr.bf16.mxu1 %v5073_v7  ;;  %2023 = vmatprep.mubr.bf16.mxu0 %v5073_v7 }
 0x220   : > { %v3508_v5 = vpop.f32.mrf.mxu1 }
 0x222   : > { %v1275_v6 = vpop.f32.mrf.mxu1 }
 0x224   : > { %v3509_v49 = vpop.f32.mrf.mxu1 }
 0x225   : > { %v1333_v38 = vpack.c.bf16 %v3509_v49, %v3508_v5 }
 0x226   : > { %v1278_v10 = vpop.f32.mrf.mxu1 }
 0x227   : > { %v1332_v27 = vpack.c.bf16 %v1278_v10, %v1275_v6  ;;  %v1357_v17 = vadd.bf16 %v4174_v16, %v1333_v38 }
 0x229   : > { %v1356_v11 = vadd.bf16 %v4174_v16, %v1332_v27  ;;  %v4391_v42 = vmax.bf16 %v5073_v7, %v1357_v17 }
 0x22b   : > { %v4383_v14 = vmax.bf16 %v5073_v7, %v1356_v11 }
 0x22d   : > { %1831 = vmatmul.mubr.bf16.gmra.mxu1 %v4383_v14  ;;  %2024 = vmatmul.mubr.bf16.gmra.mxu0 %v4383_v14 }
 0x22e   : > { %1840 = vmatprep.mubr.bf16.mxu1 %v5073_v7  ;;  %2033 = vmatprep.mubr.bf16.mxu0 %v5073_v7 }
 0x235   : > { %1841 = vmatmul.mubr.bf16.gmra.mxu1 %v4391_v42  ;;  %2034 = vmatmul.mubr.bf16.gmra.mxu0 %v4391_v42 }
 0x236   : > { %1850 = vmatprep.mubr.bf16.mxu1 %v5073_v7  ;;  %2043 = vmatprep.mubr.bf16.mxu0 %v5073_v7 }
 0x245   : > { %v3512_v28 = vpop.f32.mrf.mxu1  ;;  %v1925_v23 = vpop.f32.mrf.mxu0 }
 0x247   : > { %v1291_v29 = vpop.f32.mrf.mxu1  ;;  %v1927_v0 = vpop.f32.mrf.mxu0 }
 0x249   : > { %v3513_v52 = vpop.f32.mrf.mxu1  ;;  %v1929_v8 = vpop.f32.mrf.mxu0 }
 0x24a   : > { %v2472_v35 = vpack.c.bf16 %v1929_v8, %v1925_v23  ;;  %v1335_v56 = vpack.c.bf16 %v3513_v52, %v3512_v28 }
 0x24b   : > { %v1294_v9 = vpop.f32.mrf.mxu1  ;;  %v1931_v37 = vpop.f32.mrf.mxu0 }
 0x24c   : > { %v1334_v41 = vpack.c.bf16 %v1294_v9, %v1291_v29  ;;  %v2473_v1 = vpack.c.bf16 %v1931_v37, %v1927_v0  ;;  %v2705_v18 = vadd.bf16 %v4408_v60, %v2472_v35  ;;  %v1359_v58 = vadd.bf16 %v4174_v16, %v1335_v56 }
 0x24d   : > { %v1935_v51 = vpop.f32.mrf.mxu0  ;;  %v2639_v35 = vpack.c.bf16 %v2602_v53, %v2602_v53 }
 0x24e   : > { %v1358_v47 = vadd.bf16 %v4174_v16, %v1334_v41  ;;  %v2706_v61 = vadd.bf16 %v4415_v39, %v2473_v1  ;;  %v2833_v25 = vmax.bf16 %v5073_v7, %v2705_v18  ;;  %v4429_v34 = vmax.bf16 %v5073_v7, %v1359_v58 }
 0x24f   : > { %v1937_v54 = vpop.f32.mrf.mxu0 }
 0x250   : > { %v4412_v12 = vmax.bf16 %v5073_v7, %v1358_v47  ;;  %v2834_v57 = vmax.bf16 %v5073_v7, %v2706_v61 }
 0x251   : > { %v1939_v62 = vpop.f32.mrf.mxu0 }
 0x252   : > { %v2480_v19 = vpack.c.bf16 %v1939_v62, %v1935_v51  ;;  %1851 = vmatmul.mubr.bf16.gmra.mxu1 %v4412_v12  ;;  %2044 = vmatmul.mubr.bf16.gmra.mxu0 %v4412_v12  ;;  %v2640_v51 = vpack.c.bf16 %v2606_v26, %v2606_v26  ;;  %v2648_v62 = vpack.i.b16 %v2639_v35, %v2639_v35 }
 0x253   : > { %v1941_v63 = vpop.f32.mrf.mxu0  ;;  %1860 = vmatprep.mubr.bf16.mxu1 %v5073_v7  ;;  %2053 = vmatprep.mubr.bf16.mxu0 %v5073_v7 }
 0x254   : > { %v2713_v2 = vadd.bf16 %v4408_v60, %v2480_v19  ;;  %v2481_v24 = vpack.c.bf16 %v1941_v63, %v1937_v54 }
 0x256   : > { %v2841_v33 = vmax.bf16 %v5073_v7, %v2713_v2  ;;  %v2714_v45 = vadd.bf16 %v4415_v39, %v2481_v24  ;;  %v2655_v2 = vpack.i.b16 %v2640_v51, %v2640_v51 }
 0x258   : > { %v3009_v5 = vmax.bf16 %v2841_v33, %v2833_v25  ;;  %v2842_v6 = vmax.bf16 %v5073_v7, %v2714_v45 }
 0x25a   : > { %v3034_v49 = vmax.bf16 %v2842_v6, %v2834_v57  ;;  %1861 = vmatmul.mubr.bf16.gmra.mxu1 %v4429_v34  ;;  %2054 = vmatmul.mubr.bf16.gmra.mxu0 %v4429_v34 }
 0x25b   : > { %1870 = vmatprep.mubr.bf16.mxu1 %v5073_v7  ;;  %2063 = vmatprep.mubr.bf16.mxu0 %v5073_v7 }
 0x266   : > { %v3516_v10 = vpop.f32.mrf.mxu1  ;;  %v1945_v27 = vpop.f32.mrf.mxu0 }
 0x268   : > { %v1307_v11 = vpop.f32.mrf.mxu1  ;;  %v1947_v38 = vpop.f32.mrf.mxu0 }
 0x26a   : > { %v3517_v17 = vpop.f32.mrf.mxu1  ;;  %v1949_v22 = vpop.f32.mrf.mxu0 }
 0x26b   : > { %v2488_v21 = vpack.c.bf16 %v1949_v22, %v1945_v27  ;;  %v1337_v47 = vpack.c.bf16 %v3517_v17, %v3516_v10  ;;  %v4468_v10 = vrot.slane %v2655_v2, %v3824_v48 }
 0x26c   : > { %v1310_v28 = vpop.f32.mrf.mxu1  ;;  %v1951_v23 = vpop.f32.mrf.mxu0 }
 0x26d   : > { %v2721_v29 = vadd.bf16 %v4408_v60, %v2488_v21  ;;  %v1336_v0 = vpack.c.bf16 %v1310_v28, %v1307_v11  ;;  %v2489_v31 = vpack.c.bf16 %v1951_v23, %v1947_v38  ;;  %v1361_v25 = vadd.bf16 %v4174_v16, %v1337_v47 }
 0x26e   : > { %v1732_v52 = vpop.f32.mrf.mxu1  ;;  %v1955_v8 = vpop.f32.mrf.mxu0 }
 0x26f   : > { %v2849_v4 = vmax.bf16 %v5073_v7, %v2721_v29  ;;  %v1360_v9 = vadd.bf16 %v4174_v16, %v1336_v0  ;;  %v2722_v37 = vadd.bf16 %v4415_v39, %v2489_v31  ;;  %v4471_v11 = vmax.bf16 %v5073_v7, %v1361_v25 }
 0x270   : > { %v1734_v41 = vpop.f32.mrf.mxu1  ;;  %v1957_v46 = vpop.f32.mrf.mxu0 }
 0x271   : > { %v4446_v54 = vmax.bf16 %v3009_v5, %v2849_v4  ;;  %v4449_v44 = vmax.bf16 %v5073_v7, %v1360_v9  ;;  %v2850_v56 = vmax.bf16 %v5073_v7, %v2722_v37  ;;  %v4461_v5 = vrot.slane %v2648_v62, %v3824_v48 }
 0x272   : > { %v1736_v1 = vpop.f32.mrf.mxu1  ;;  %v1959_v18 = vpop.f32.mrf.mxu0 }
 0x273   : > { %v4452_v19 = vmax.bf16 %v3034_v49, %v2850_v56  ;;  %v2470_v63 = vpack.c.bf16 %v1736_v1, %v1732_v52  ;;  %v2496_v58 = vpack.c.bf16 %v1959_v18, %v1955_v8  ;;  %1871 = vmatmul.mubr.bf16.gmra.mxu1 %v4449_v44  ;;  %2064 = vmatmul.mubr.bf16.gmra.mxu0 %v4449_v44 }
 0x274   : > { %v1738_v61 = vpop.f32.mrf.mxu1  ;;  %v1961_v24 = vpop.f32.mrf.mxu0  ;;  %1880 = vmatprep.mubr.bf16.mxu1 %v5073_v7  ;;  %2073 = vmatprep.mubr.bf16.mxu0 %v5073_v7 }
 0x275   : > { %v2729_v33 = vadd.bf16 %v4408_v60, %v2496_v58  ;;  %v2497_v45 = vpack.c.bf16 %v1961_v24, %v1957_v46  ;;  %v2471_v38 = vpack.c.bf16 %v1738_v61, %v1734_v41  ;;  %v2703_v53 = vadd.bf16 %v4461_v5, %v2470_v63 }
 0x276   : > { %v1742_v57 = vpop.f32.mrf.mxu1 }
 0x277   : > { %v4464_v6 = vmax.bf16 %v5073_v7, %v2729_v33  ;;  %v2730_v49 = vadd.bf16 %v4415_v39, %v2497_v45  ;;  %v2704_v26 = vadd.bf16 %v4468_v10, %v2471_v38  ;;  %v2831_v52 = vmax.bf16 %v5073_v7, %v2703_v53 }
 0x278   : > { %v1744_v27 = vpop.f32.mrf.mxu1 }
 0x279   : > { %v3011_v16 = vmax.bf16 %v4446_v54, %v4464_v6  ;;  %v4476_v17 = vmax.bf16 %v5073_v7, %v2730_v49  ;;  %v2832_v9 = vmax.bf16 %v5073_v7, %v2704_v26 }
 0x27a   : > { %v1746_v22 = vpop.f32.mrf.mxu1 }
 0x27b   : > { %v3036_v21 = vmax.bf16 %v4452_v19, %v4476_v17  ;;  %v2478_v28 = vpack.c.bf16 %v1746_v22, %v1742_v57  ;;  %1881 = vmatmul.mubr.bf16.gmra.mxu1 %v4471_v11  ;;  %2074 = vmatmul.mubr.bf16.gmra.mxu0 %v4471_v11 }
 0x27c   : > { %v1748_v23 = vpop.f32.mrf.mxu1  ;;  %2116 = vmatprep.mubr.bf16.mxu1 %v5073_v7  ;;  %2309 = vmatprep.mubr.bf16.mxu0 %v5073_v7 }
 0x27d   : > { %v2711_v29 = vadd.bf16 %v4461_v5, %v2478_v28  ;;  %v2479_v0 = vpack.c.bf16 %v1748_v23, %v1744_v27 }
 0x27e   : > { %v1752_v31 = vpop.f32.mrf.mxu1 }
 0x27f   : > { %v2839_v8 = vmax.bf16 %v5073_v7, %v2711_v29  ;;  %v2712_v35 = vadd.bf16 %v4468_v10, %v2479_v0 }
 0x280   : > { %v1754_v4 = vpop.f32.mrf.mxu1 }
 0x281   : > { %v2959_v37 = vmax.bf16 %v2839_v8, %v2831_v52  ;;  %v2840_v41 = vmax.bf16 %v5073_v7, %v2712_v35 }
 0x282   : > { %v1756_v46 = vpop.f32.mrf.mxu1 }
 0x283   : > { %v2984_v51 = vmax.bf16 %v2840_v41, %v2832_v9  ;;  %v2486_v47 = vpack.c.bf16 %v1756_v46, %v1752_v31  ;;  %2117 = vmatmul.mubr.bf16.vlgmr.msra.gmra.mxu1 %v4196_v30  ;;  %2310 = vmatmul.mubr.bf16.vlgmr.msra.gmra.mxu0 %v4196_v30 }
 0x284   : > { %v1758_v56 = vpop.f32.mrf.mxu1  ;;  %2126 = vmatprep.mubr.bf16.mxu1 %v5073_v7  ;;  %2319 = vmatprep.mubr.bf16.mxu0 %v5073_v7 }
 0x285   : > { %v2719_v1 = vadd.bf16 %v4461_v5, %v2486_v47  ;;  %v2487_v62 = vpack.c.bf16 %v1758_v56, %v1754_v4 }
 0x286   : > { %v1762_v18 = vpop.f32.mrf.mxu1  ;;  %v1965_v63 = vpop.f32.mrf.mxu0 }
 0x287   : > { %v2847_v58 = vmax.bf16 %v5073_v7, %v2719_v1  ;;  %v2720_v61 = vadd.bf16 %v4468_v10, %v2487_v62 }
 0x288   : > { %v1764_v2 = vpop.f32.mrf.mxu1  ;;  %v1967_v24 = vpop.f32.mrf.mxu0 }
 0x289   : > { %v2960_v25 = vmax.bf16 %v2959_v37, %v2847_v58  ;;  %v2848_v33 = vmax.bf16 %v5073_v7, %v2720_v61 }
 0x28a   : > { %v1766_v30 = vpop.f32.mrf.mxu1  ;;  %v1969_v45 = vpop.f32.mrf.mxu0 }
 0x28b   : > { %v2985_v57 = vmax.bf16 %v2984_v51, %v2848_v33  ;;  %v2494_v49 = vpack.c.bf16 %v1766_v30, %v1762_v18  ;;  %v2504_v27 = vpack.c.bf16 %v1969_v45, %v1965_v63  ;;  %2127 = vmatmul.mubr.bf16.gmra.mxu1 %v4203_v43  ;;  %2320 = vmatmul.mubr.bf16.gmra.mxu0 %v4203_v43 }
 0x28c   : > { %v1768_v38 = vpop.f32.mrf.mxu1  ;;  %v1971_v22 = vpop.f32.mrf.mxu0  ;;  %2136 = vmatprep.mubr.bf16.mxu1 %v5073_v7  ;;  %2329 = vmatprep.mubr.bf16.mxu0 %v5073_v7 }
 0x28d   : > { %v2727_v53 = vadd.bf16 %v4461_v5, %v2494_v49  ;;  %v2737_v28 = vadd.bf16 %v4408_v60, %v2504_v27  ;;  %v2495_v23 = vpack.c.bf16 %v1768_v38, %v1764_v2  ;;  %v2505_v26 = vpack.c.bf16 %v1971_v22, %v1967_v24 }
 0x28e   : > { %v1772_v29 = vpop.f32.mrf.mxu1  ;;  %v1975_v0 = vpop.f32.mrf.mxu0 }
 0x28f   : > { %v2855_v31 = vmax.bf16 %v5073_v7, %v2727_v53  ;;  %v2865_v52 = vmax.bf16 %v5073_v7, %v2737_v28  ;;  %v2728_v43 = vadd.bf16 %v4468_v10, %v2495_v23  ;;  %v2738_v8 = vadd.bf16 %v4415_v39, %v2505_v26 }
 0x290   : > { %v1774_v35 = vpop.f32.mrf.mxu1  ;;  %v1977_v4 = vpop.f32.mrf.mxu0 }
 0x291   : > { %v2961_v9 = vmax.bf16 %v2960_v25, %v2855_v31  ;;  %v4513_v37 = vmax.bf16 %v3011_v16, %v2865_v52  ;;  %v2856_v41 = vmax.bf16 %v5073_v7, %v2728_v43  ;;  %v2866_v46 = vmax.bf16 %v5073_v7, %v2738_v8 }
 0x292   : > { %v1776_v51 = vpop.f32.mrf.mxu1  ;;  %v1979_v47 = vpop.f32.mrf.mxu0 }
 0x293   : > { %v2986_v56 = vmax.bf16 %v2985_v57, %v2856_v41  ;;  %v4520_v1 = vmax.bf16 %v3036_v21, %v2866_v46  ;;  %v2502_v62 = vpack.c.bf16 %v1776_v51, %v1772_v29  ;;  %v2512_v18 = vpack.c.bf16 %v1979_v47, %v1975_v0  ;;  %2137 = vmatmul.mubr.bf16.gmra.mxu1 %v4239_v36 }
 0x294   : > { %2330 = vmatmul.mubr.bf16.gmra.mxu0 %v4239_v36  ;;  %v1778_v54 = vpop.f32.mrf.mxu1  ;;  %v1981_v6 = vpop.f32.mrf.mxu0  ;;  %2146 = vmatprep.mubr.bf16.mxu1 %v5073_v7 }
 0x295   : > { %v2735_v16 = vadd.bf16 %v4461_v5, %v2502_v62  ;;  %v2745_v63 = vadd.bf16 %v4408_v60, %v2512_v18  ;;  %v2503_v58 = vpack.c.bf16 %v1778_v54, %v1774_v35  ;;  %v2513_v61 = vpack.c.bf16 %v1981_v6, %v1977_v4  ;;  %2339 = vmatprep.mubr.bf16.mxu0 %v5073_v7 }
 0x296   : > { %v1782_v19 = vpop.f32.mrf.mxu1 }
 0x297   : > { %v2863_v17 = vmax.bf16 %v5073_v7, %v2735_v16  ;;  %v2873_v21 = vmax.bf16 %v5073_v7, %v2745_v63  ;;  %v2736_v2 = vadd.bf16 %v4468_v10, %v2503_v58  ;;  %v2746_v36 = vadd.bf16 %v4415_v39, %v2513_v61 }
 0x298   : > { %v1784_v24 = vpop.f32.mrf.mxu1 }
 0x299   : > { %v2962_v25 = vmax.bf16 %v2961_v9, %v2863_v17  ;;  %v3013_v33 = vmax.bf16 %v4513_v37, %v2873_v21  ;;  %v2864_v30 = vmax.bf16 %v5073_v7, %v2736_v2  ;;  %v2874_v45 = vmax.bf16 %v5073_v7, %v2746_v36 }
 0x29a   : > { %v1786_v57 = vpop.f32.mrf.mxu1 }
 0x29b   : > { %v2987_v49 = vmax.bf16 %v2986_v56, %v2864_v30  ;;  %v3038_v27 = vmax.bf16 %v4520_v1, %v2874_v45  ;;  %v2510_v38 = vpack.c.bf16 %v1786_v57, %v1782_v19  ;;  %2147 = vmatmul.mubr.bf16.gmra.mxu1 %v4253_v20 }
 0x29c   : > { %2340 = vmatmul.mubr.bf16.gmra.mxu0 %v4253_v20  ;;  %v1788_v22 = vpop.f32.mrf.mxu1  ;;  %2156 = vmatprep.mubr.bf16.mxu1 %v5073_v7 }
 0x29d   : > { %v2743_v53 = vadd.bf16 %v4461_v5, %v2510_v38  ;;  %v2511_v28 = vpack.c.bf16 %v1788_v22, %v1784_v24  ;;  %2349 = vmatprep.mubr.bf16.mxu0 %v5073_v7 }
 0x29f   : > { %v2871_v23 = vmax.bf16 %v5073_v7, %v2743_v53  ;;  %v2744_v26 = vadd.bf16 %v4468_v10, %v2511_v28 }
 0x2a1   : > { %v2963_v29 = vmax.bf16 %v2962_v25, %v2871_v23  ;;  %v2872_v0 = vmax.bf16 %v5073_v7, %v2744_v26 }
 0x2a3   : > { %v2988_v31 = vmax.bf16 %v2987_v49, %v2872_v0  ;;  %2157 = vmatmul.mubr.bf16.gmra.mxu1 %v4297_v13 }
 0x2a4   : > { %2350 = vmatmul.mubr.bf16.gmra.mxu0 %v4297_v13  ;;  %2166 = vmatprep.mubr.bf16.mxu1 %v5073_v7 }
 0x2a5   : > { %2359 = vmatprep.mubr.bf16.mxu0 %v5073_v7 }
 0x2a7   : > { %v1792_v20 = vpop.f32.mrf.mxu1  ;;  %v1985_v52 = vpop.f32.mrf.mxu0 }
 0x2a9   : > { %v1794_v43 = vpop.f32.mrf.mxu1  ;;  %v1987_v8 = vpop.f32.mrf.mxu0 }
 0x2ab   : > { %v1796_v35 = vpop.f32.mrf.mxu1  ;;  %v1989_v4 = vpop.f32.mrf.mxu0  ;;  %2167 = vmatmul.mubr.bf16.gmra.mxu1 %v4305_v15 }
 0x2ac   : > { %v2518_v9 = vpack.c.bf16 %v1796_v35, %v1792_v20  ;;  %v2520_v37 = vpack.c.bf16 %v1989_v4, %v1985_v52  ;;  %2360 = vmatmul.mubr.bf16.gmra.mxu0 %v4305_v15  ;;  %2176 = vmatprep.mubr.bf16.mxu1 %v5073_v7 }
 0x2ad   : > { %v1798_v41 = vpop.f32.mrf.mxu1  ;;  %v1991_v13 = vpop.f32.mrf.mxu0  ;;  %2369 = vmatprep.mubr.bf16.mxu0 %v5073_v7 }
 0x2ae   : > { %v2751_v46 = vadd.bf16 %v4461_v5, %v2518_v9  ;;  %v2753_v51 = vadd.bf16 %v4408_v60, %v2520_v37  ;;  %v2519_v47 = vpack.c.bf16 %v1798_v41, %v1794_v43  ;;  %v2521_v56 = vpack.c.bf16 %v1991_v13, %v1987_v8 }
 0x2af   : > { %v1802_v1 = vpop.f32.mrf.mxu1  ;;  %v1995_v62 = vpop.f32.mrf.mxu0 }
 0x2b0   : > { %v2879_v18 = vmax.bf16 %v5073_v7, %v2751_v46  ;;  %v2881_v54 = vmax.bf16 %v5073_v7, %v2753_v51  ;;  %v2752_v15 = vadd.bf16 %v4468_v10, %v2519_v47  ;;  %v2754_v6 = vadd.bf16 %v4415_v39, %v2521_v56 }
 0x2b1   : > { %v1804_v16 = vpop.f32.mrf.mxu1  ;;  %v1997_v63 = vpop.f32.mrf.mxu0 }
 0x2b2   : > { %v4558_v58 = vmax.bf16 %v2963_v29, %v2879_v18  ;;  %v4560_v61 = vmax.bf16 %v3013_v33, %v2881_v54  ;;  %v2880_v19 = vmax.bf16 %v5073_v7, %v2752_v15  ;;  %v2882_v17 = vmax.bf16 %v5073_v7, %v2754_v6 }
 0x2b3   : > { %v1806_v21 = vpop.f32.mrf.mxu1  ;;  %v1999_v2 = vpop.f32.mrf.mxu0  ;;  %2177 = vmatmul.mubr.bf16.gmra.mxu1 %v4339_v55 }
 0x2b4   : > { %v4565_v36 = vmax.bf16 %v2988_v31, %v2880_v19  ;;  %v4567_v24 = vmax.bf16 %v3038_v27, %v2882_v17  ;;  %v2526_v25 = vpack.c.bf16 %v1806_v21, %v1802_v1  ;;  %v2528_v30 = vpack.c.bf16 %v1999_v2, %v1995_v62  ;;  %2370 = vmatmul.mubr.bf16.gmra.mxu0 %v4339_v55 }
 0x2b5   : > { %v1808_v45 = vpop.f32.mrf.mxu1  ;;  %v2001_v57 = vpop.f32.mrf.mxu0  ;;  %2186 = vmatprep.mubr.bf16.mxu1 %v5073_v7  ;;  %2379 = vmatprep.mubr.bf16.mxu0 %v5073_v7 }
 0x2b6   : > { %v2759_v33 = vadd.bf16 %v4461_v5, %v2526_v25  ;;  %v2761_v49 = vadd.bf16 %v4408_v60, %v2528_v30  ;;  %v2527_v38 = vpack.c.bf16 %v1808_v45, %v1804_v16  ;;  %v2529_v22 = vpack.c.bf16 %v2001_v57, %v1997_v63 }
 0x2b8   : > { %v2887_v53 = vmax.bf16 %v5073_v7, %v2759_v33  ;;  %v2889_v27 = vmax.bf16 %v5073_v7, %v2761_v49  ;;  %v2760_v28 = vadd.bf16 %v4468_v10, %v2527_v38  ;;  %v2762_v55 = vadd.bf16 %v4415_v39, %v2529_v22 }
 0x2ba   : > { %v2965_v23 = vmax.bf16 %v4558_v58, %v2887_v53  ;;  %v3015_v26 = vmax.bf16 %v4560_v61, %v2889_v27  ;;  %v2888_v29 = vmax.bf16 %v5073_v7, %v2760_v28  ;;  %v2890_v0 = vmax.bf16 %v5073_v7, %v2762_v55 }
 0x2bb   : > { %2187 = vmatmul.mubr.bf16.gmra.mxu1 %v4347_v59 }
 0x2bc   : > { %v2990_v31 = vmax.bf16 %v4565_v36, %v2888_v29  ;;  %v3040_v20 = vmax.bf16 %v4567_v24, %v2890_v0  ;;  %2380 = vmatmul.mubr.bf16.gmra.mxu0 %v4347_v59  ;;  %2196 = vmatprep.mubr.bf16.mxu1 %v5073_v7 }
 0x2bd   : > { %2389 = vmatprep.mubr.bf16.mxu0 %v5073_v7 }
 0x2c3   : > { %2197 = vmatmul.mubr.bf16.gmra.mxu1 %v4367_v3 }
 0x2c4   : > { %2390 = vmatmul.mubr.bf16.gmra.mxu0 %v4367_v3  ;;  %2206 = vmatprep.mubr.bf16.mxu1 %v5073_v7 }
 0x2c5   : > { %2399 = vmatprep.mubr.bf16.mxu0 %v5073_v7 }
 0x2cb   : > { %2207 = vmatmul.mubr.bf16.gmra.mxu1 %v4375_v32 }
 0x2cc   : > { %2400 = vmatmul.mubr.bf16.gmra.mxu0 %v4375_v32  ;;  %v1812_v52 = vpop.f32.mrf.mxu1  ;;  %v2005_v43 = vpop.f32.mrf.mxu0  ;;  %2216 = vmatprep.mubr.bf16.mxu1 %v5073_v7 }
 0x2cd   : > { %2409 = vmatprep.mubr.bf16.mxu0 %v5073_v7 }
 0x2ce   : > { %v1814_v59 = vpop.f32.mrf.mxu1  ;;  %v2007_v8 = vpop.f32.mrf.mxu0 }
 0x2d0   : > { %v1816_v35 = vpop.f32.mrf.mxu1  ;;  %v2009_v4 = vpop.f32.mrf.mxu0 }
 0x2d1   : > { %v2534_v9 = vpack.c.bf16 %v1816_v35, %v1812_v52  ;;  %v2536_v3 = vpack.c.bf16 %v2009_v4, %v2005_v43 }
 0x2d2   : > { %v1818_v37 = vpop.f32.mrf.mxu1  ;;  %v2011_v41 = vpop.f32.mrf.mxu0 }
 0x2d3   : > { %v2767_v13 = vadd.bf16 %v4461_v5, %v2534_v9  ;;  %v2769_v46 = vadd.bf16 %v4408_v60, %v2536_v3  ;;  %v2535_v51 = vpack.c.bf16 %v1818_v37, %v1814_v59  ;;  %v2537_v32 = vpack.c.bf16 %v2011_v41, %v2007_v8  ;;  %2217 = vmatmul.mubr.bf16.gmra.mxu1 %v4383_v14 }
 0x2d4   : > { %2410 = vmatmul.mubr.bf16.gmra.mxu0 %v4383_v14  ;;  %v1822_v47 = vpop.f32.mrf.mxu1  ;;  %v2015_v56 = vpop.f32.mrf.mxu0  ;;  %2226 = vmatprep.mubr.bf16.mxu1 %v5073_v7 }
 0x2d5   : > { %v2895_v1 = vmax.bf16 %v5073_v7, %v2767_v13  ;;  %v2897_v62 = vmax.bf16 %v5073_v7, %v2769_v46  ;;  %v2768_v18 = vadd.bf16 %v4468_v10, %v2535_v51  ;;  %v2770_v54 = vadd.bf16 %v4415_v39, %v2537_v32  ;;  %2419 = vmatprep.mubr.bf16.mxu0 %v5073_v7 }
 0x2d6   : > { %v1824_v15 = vpop.f32.mrf.mxu1  ;;  %v2017_v6 = vpop.f32.mrf.mxu0 }
 0x2d7   : > { %v4606_v16 = vmax.bf16 %v2965_v23, %v2895_v1  ;;  %v4608_v63 = vmax.bf16 %v3015_v26, %v2897_v62  ;;  %v2896_v14 = vmax.bf16 %v5073_v7, %v2768_v18  ;;  %v2898_v58 = vmax.bf16 %v5073_v7, %v2770_v54 }
 0x2d8   : > { %v1826_v61 = vpop.f32.mrf.mxu1  ;;  %v2019_v19 = vpop.f32.mrf.mxu0 }
 0x2d9   : > { %v4612_v17 = vmax.bf16 %v2990_v31, %v2896_v14  ;;  %v4614_v21 = vmax.bf16 %v3040_v20, %v2898_v58  ;;  %v2542_v2 = vpack.c.bf16 %v1826_v61, %v1822_v47  ;;  %v2544_v36 = vpack.c.bf16 %v2019_v19, %v2015_v56 }
 0x2da   : > { %v1828_v24 = vpop.f32.mrf.mxu1  ;;  %v2021_v25 = vpop.f32.mrf.mxu0 }
 0x2db   : > { %v2775_v30 = vadd.bf16 %v4461_v5, %v2542_v2  ;;  %v2777_v45 = vadd.bf16 %v4408_v60, %v2544_v36  ;;  %v2543_v57 = vpack.c.bf16 %v1828_v24, %v1824_v15  ;;  %v2545_v33 = vpack.c.bf16 %v2021_v25, %v2017_v6  ;;  %2227 = vmatmul.mubr.bf16.gmra.mxu1 %v4391_v42 }
 0x2dc   : > { %2420 = vmatmul.mubr.bf16.gmra.mxu0 %v4391_v42  ;;  %2236 = vmatprep.mubr.bf16.mxu1 %v5073_v7 }
 0x2dd   : > { %v2903_v49 = vmax.bf16 %v5073_v7, %v2775_v30  ;;  %v2905_v38 = vmax.bf16 %v5073_v7, %v2777_v45  ;;  %v2776_v22 = vadd.bf16 %v4468_v10, %v2543_v57  ;;  %v2778_v53 = vadd.bf16 %v4415_v39, %v2545_v33  ;;  %2429 = vmatprep.mubr.bf16.mxu0 %v5073_v7 }
 0x2df   : > { %v2967_v27 = vmax.bf16 %v4606_v16, %v2903_v49  ;;  %v3017_v28 = vmax.bf16 %v4608_v63, %v2905_v38  ;;  %v2904_v55 = vmax.bf16 %v5073_v7, %v2776_v22  ;;  %v2906_v42 = vmax.bf16 %v5073_v7, %v2778_v53 }
 0x2e1   : > { %v2992_v23 = vmax.bf16 %v4612_v17, %v2904_v55  ;;  %v3042_v26 = vmax.bf16 %v4614_v21, %v2906_v42 }
 0x2e3   : > { %2237 = vmatmul.mubr.bf16.gmra.mxu1 %v4412_v12 }
 0x2e4   : > { %2430 = vmatmul.mubr.bf16.gmra.mxu0 %v4412_v12  ;;  %2246 = vmatprep.mubr.bf16.mxu1 %v5073_v7 }
 0x2e5   : > { %2439 = vmatprep.mubr.bf16.mxu0 %v5073_v7 }
 0x2eb   : > { %2247 = vmatmul.mubr.bf16.gmra.mxu1 %v4429_v34 }
 0x2ec   : > { %2440 = vmatmul.mubr.bf16.gmra.mxu0 %v4429_v34  ;;  %2256 = vmatprep.mubr.bf16.mxu1 %v5073_v7 }
 0x2ed   : > { %v1832_v29 = vpop.f32.mrf.mxu1  ;;  %v2025_v0 = vpop.f32.mrf.mxu0  ;;  %2449 = vmatprep.mubr.bf16.mxu0 %v5073_v7 }
 0x2ef   : > { %v1834_v31 = vpop.f32.mrf.mxu1  ;;  %v2027_v20 = vpop.f32.mrf.mxu0 }
 0x2f1   : > { %v1836_v52 = vpop.f32.mrf.mxu1  ;;  %v2029_v43 = vpop.f32.mrf.mxu0 }
 0x2f2   : > { %v2550_v59 = vpack.c.bf16 %v1836_v52, %v1832_v29  ;;  %v2552_v12 = vpack.c.bf16 %v2029_v43, %v2025_v0 }
 0x2f3   : > { %v1838_v8 = vpop.f32.mrf.mxu1  ;;  %v2031_v35 = vpop.f32.mrf.mxu0  ;;  %2257 = vmatmul.mubr.bf16.gmra.mxu1 %v4449_v44 }
 0x2f4   : > { %v2783_v4 = vadd.bf16 %v4461_v5, %v2550_v59  ;;  %v2785_v34 = vadd.bf16 %v4408_v60, %v2552_v12  ;;  %v2551_v9 = vpack.c.bf16 %v1838_v8, %v1834_v31  ;;  %v2553_v3 = vpack.c.bf16 %v2031_v35, %v2027_v20  ;;  %2450 = vmatmul.mubr.bf16.gmra.mxu0 %v4449_v44 }
 0x2f5   : > { %v1842_v37 = vpop.f32.mrf.mxu1  ;;  %v2035_v41 = vpop.f32.mrf.mxu0  ;;  %2266 = vmatprep.mubr.bf16.mxu1 %v5073_v7  ;;  %2459 = vmatprep.mubr.bf16.mxu0 %v5073_v7 }
 0x2f6   : > { %v2911_v13 = vmax.bf16 %v5073_v7, %v2783_v4  ;;  %v2913_v46 = vmax.bf16 %v5073_v7, %v2785_v34  ;;  %v2784_v51 = vadd.bf16 %v4468_v10, %v2551_v9  ;;  %v2786_v32 = vadd.bf16 %v4415_v39, %v2553_v3 }
 0x2f7   : > { %v1844_v47 = vpop.f32.mrf.mxu1  ;;  %v2037_v56 = vpop.f32.mrf.mxu0 }
 0x2f8   : > { %v2968_v1 = vmax.bf16 %v2967_v27, %v2911_v13  ;;  %v3018_v62 = vmax.bf16 %v3017_v28, %v2913_v46  ;;  %v2912_v44 = vmax.bf16 %v5073_v7, %v2784_v51  ;;  %v2914_v18 = vmax.bf16 %v5073_v7, %v2786_v32 }
 0x2f9   : > { %v1846_v54 = vpop.f32.mrf.mxu1  ;;  %v2039_v15 = vpop.f32.mrf.mxu0 }
 0x2fa   : > { %v2993_v6 = vmax.bf16 %v2992_v23, %v2912_v44  ;;  %v3043_v16 = vmax.bf16 %v3042_v26, %v2914_v18  ;;  %v2558_v63 = vpack.c.bf16 %v1846_v54, %v1842_v37  ;;  %v2560_v14 = vpack.c.bf16 %v2039_v15, %v2035_v41 }
 0x2fb   : > { %v1848_v58 = vpop.f32.mrf.mxu1  ;;  %v2041_v61 = vpop.f32.mrf.mxu0  ;;  %2267 = vmatmul.mubr.bf16.gmra.mxu1 %v4471_v11 }
 0x2fc   : > { %v2791_v19 = vadd.bf16 %v4461_v5, %v2558_v63  ;;  %v2793_v17 = vadd.bf16 %v4408_v60, %v2560_v14  ;;  %v2559_v21 = vpack.c.bf16 %v1848_v58, %v1844_v47  ;;  %v2561_v2 = vpack.c.bf16 %v2041_v61, %v2037_v56  ;;  %2460 = vmatmul.mubr.bf16.gmra.mxu0 %v4471_v11 }
 0x2fe   : > { %v2919_v36 = vmax.bf16 %v5073_v7, %v2791_v19  ;;  %v2921_v24 = vmax.bf16 %v5073_v7, %v2793_v17  ;;  %v2792_v25 = vadd.bf16 %v4468_v10, %v2559_v21  ;;  %v2794_v30 = vadd.bf16 %v4415_v39, %v2561_v2 }
 0x300   : > { %v2969_v45 = vmax.bf16 %v2968_v1, %v2919_v36  ;;  %v3019_v57 = vmax.bf16 %v3018_v62, %v2921_v24  ;;  %v2920_v33 = vmax.bf16 %v5073_v7, %v2792_v25  ;;  %v2922_v49 = vmax.bf16 %v5073_v7, %v2794_v30 }
 0x302   : > { %v2994_v38 = vmax.bf16 %v2993_v6, %v2920_v33  ;;  %v3044_v22 = vmax.bf16 %v3043_v16, %v2922_v49  ;;  %v2617_v33 = vsub.s32 4, %v3803_v40 }
 0x312   : > { %v1852_v53 = vpop.f32.mrf.mxu1  ;;  %v2045_v27 = vpop.f32.mrf.mxu0 }
 0x314   : > { %v1854_v28 = vpop.f32.mrf.mxu1  ;;  %v2047_v11 = vpop.f32.mrf.mxu0 }
 0x316   : > { %v1856_v55 = vpop.f32.mrf.mxu1  ;;  %v2049_v42 = vpop.f32.mrf.mxu0 }
 0x317   : > { %v2566_v23 = vpack.c.bf16 %v1856_v55, %v1852_v53  ;;  %v2568_v26 = vpack.c.bf16 %v2049_v42, %v2045_v27  ;;  %v2621_v53 = vsub.s32 5, %v3803_v40  ;;  %v2629_v27 = vsub.s32 7, %v3803_v40 }
 0x318   : > { %v1858_v29 = vpop.f32.mrf.mxu1  ;;  %v2051_v0 = vpop.f32.mrf.mxu0 }
 0x319   : > { %v2799_v31 = vadd.bf16 %v4461_v5, %v2566_v23  ;;  %v2801_v20 = vadd.bf16 %v4408_v60, %v2568_v26  ;;  %v2567_v52 = vpack.c.bf16 %v1858_v29, %v1854_v28  ;;  %v2569_v43 = vpack.c.bf16 %v2051_v0, %v2047_v11 }
 0x31a   : > { %v1862_v59 = vpop.f32.mrf.mxu1  ;;  %v2055_v12 = vpop.f32.mrf.mxu0  ;;  %v2618_v23 = vrot.slane %v4400_v50, %v2617_v33 }
 0x31b   : > { %v2927_v8 = vmax.bf16 %v5073_v7, %v2799_v31  ;;  %v2929_v35 = vmax.bf16 %v5073_v7, %v2801_v20  ;;  %v2800_v4 = vadd.bf16 %v4468_v10, %v2567_v52  ;;  %v2802_v34 = vadd.bf16 %v4415_v39, %v2569_v43 }
 0x31c   : > { %v1864_v9 = vpop.f32.mrf.mxu1  ;;  %v2057_v3 = vpop.f32.mrf.mxu0 }
 0x31d   : > { %v2970_v37 = vmax.bf16 %v2969_v45, %v2927_v8  ;;  %v3020_v41 = vmax.bf16 %v3019_v57, %v2929_v35  ;;  %v2928_v13 = vmax.bf16 %v5073_v7, %v2800_v4  ;;  %v2930_v46 = vmax.bf16 %v5073_v7, %v2802_v34 }
 0x31e   : > { %v1866_v51 = vpop.f32.mrf.mxu1  ;;  %v2059_v32 = vpop.f32.mrf.mxu0 }
 0x31f   : > { %v2995_v47 = vmax.bf16 %v2994_v38, %v2928_v13  ;;  %v3045_v56 = vmax.bf16 %v3044_v22, %v2930_v46  ;;  %v2574_v1 = vpack.c.bf16 %v1866_v51, %v1862_v59  ;;  %v2576_v62 = vpack.c.bf16 %v2059_v32, %v2055_v12 }
 0x320   : > { %v1868_v44 = vpop.f32.mrf.mxu1  ;;  %v2061_v18 = vpop.f32.mrf.mxu0  ;;  %v2625_v22 = vsub.s32 6, %v3803_v40  ;;  %v2622_v59 = vrot.slane %v4400_v50, %v2621_v53  ;;  %v2630_v12 = vrot.slane %v4400_v50, %v2629_v27  ;;  %v3632_v53 = vmov 1966171168  }
 0x321   : > { %v2807_v54 = vadd.bf16 %v4461_v5, %v2574_v1  ;;  %v2809_v15 = vadd.bf16 %v4408_v60, %v2576_v62  ;;  %v2575_v6 = vpack.c.bf16 %v1868_v44, %v1864_v9  ;;  %v2577_v16 = vpack.c.bf16 %v2061_v18, %v2057_v3 }
 0x322   : > { %v2626_v43 = vrot.slane %v4400_v50, %v2625_v22  ;;  %v2646_v1 = vpack.c.bf16 %v2630_v12, %v2630_v12  ;;  %v4705_v27 = vunpack.c.l.s4 %v3632_v53 }
 0x323   : > { %v2935_v63 = vmax.bf16 %v5073_v7, %v2807_v54  ;;  %v2937_v14 = vmax.bf16 %v5073_v7, %v2809_v15  ;;  %v2808_v58 = vadd.bf16 %v4468_v10, %v2575_v6  ;;  %v2810_v61 = vadd.bf16 %v4415_v39, %v2577_v16 }
 0x324   : > { %v2645_v50 = vpack.c.bf16 %v2626_v43, %v2626_v43 }
 0x325   : > { %v2971_v19 = vmax.bf16 %v2970_v37, %v2935_v63  ;;  %v3021_v17 = vmax.bf16 %v3020_v41, %v2937_v14  ;;  %v2936_v21 = vmax.bf16 %v5073_v7, %v2808_v58  ;;  %v2938_v2 = vmax.bf16 %v5073_v7, %v2810_v61 }
 0x326   : > { %v2643_v37 = vpack.c.bf16 %v2618_v23, %v2618_v23 }
 0x327   : > { %v2996_v36 = vmax.bf16 %v2995_v47, %v2936_v21  ;;  %v3046_v24 = vmax.bf16 %v3045_v56, %v2938_v2  ;;  %v2644_v56 = vpack.c.bf16 %v2622_v59, %v2622_v59  ;;  %v2690_v21 = vpack.i.b16 %v2645_v50, %v2645_v50 }
 0x328   : > { %v2676_v16 = vpack.i.b16 %v2643_v37, %v2643_v37 }
 0x329   : > { %v2683_v2 = vpack.i.b16 %v2644_v56, %v2644_v56 }
 0x333   : > { %v1872_v25 = vpop.f32.mrf.mxu1  ;;  %v2065_v30 = vpop.f32.mrf.mxu0 }
 0x335   : > { %v1874_v45 = vpop.f32.mrf.mxu1  ;;  %v2067_v57 = vpop.f32.mrf.mxu0 }
 0x337   : > { %v1876_v49 = vpop.f32.mrf.mxu1  ;;  %v2069_v38 = vpop.f32.mrf.mxu0 }
 0x338   : > { %v2582_v28 = vpack.c.bf16 %v1876_v49, %v1872_v25  ;;  %v2584_v11 = vpack.c.bf16 %v2069_v38, %v2065_v30  ;;  %v2697_v25 = vpack.i.b16 %v2646_v1, %v2646_v1 }
 0x339   : > { %v1878_v55 = vpop.f32.mrf.mxu1  ;;  %v2071_v42 = vpop.f32.mrf.mxu0 }
 0x33a   : > { %v2815_v26 = vadd.bf16 %v4461_v5, %v2582_v28  ;;  %v2817_v29 = vadd.bf16 %v4408_v60, %v2584_v11  ;;  %v2583_v0 = vpack.c.bf16 %v1878_v55, %v1874_v45  ;;  %v2585_v31 = vpack.c.bf16 %v2071_v42, %v2067_v57 }
 0x33b   : > { %v1882_v20 = vpop.f32.mrf.mxu1  ;;  %v2075_v52 = vpop.f32.mrf.mxu0  ;;  %v4714_v55 = vrot.slane %v2697_v25, %v3824_v48 }
 0x33c   : > { %v2943_v8 = vmax.bf16 %v5073_v7, %v2815_v26  ;;  %v2945_v35 = vmax.bf16 %v5073_v7, %v2817_v29  ;;  %v2816_v4 = vadd.bf16 %v4468_v10, %v2583_v0  ;;  %v2818_v34 = vadd.bf16 %v4415_v39, %v2585_v31 }
 0x33d   : > { %v1884_v9 = vpop.f32.mrf.mxu1  ;;  %v2077_v3 = vpop.f32.mrf.mxu0 }
 0x33e   : > { %v2972_v41 = vmax.bf16 %v2971_v19, %v2943_v8  ;;  %v3022_v13 = vmax.bf16 %v3021_v17, %v2945_v35  ;;  %v2944_v46 = vmax.bf16 %v5073_v7, %v2816_v4  ;;  %v2946_v51 = vmax.bf16 %v5073_v7, %v2818_v34 }
 0x33f   : > { %v1886_v32 = vpop.f32.mrf.mxu1  ;;  %v2079_v47 = vpop.f32.mrf.mxu0 }
 0x340   : > { %v2997_v62 = vmax.bf16 %v2996_v36, %v2944_v46  ;;  %v3047_v44 = vmax.bf16 %v3046_v24, %v2946_v51  ;;  %v2590_v18 = vpack.c.bf16 %v1886_v32, %v1882_v20  ;;  %v2592_v54 = vpack.c.bf16 %v2079_v47, %v2075_v52 }
 0x341   : > { %v1888_v15 = vpop.f32.mrf.mxu1  ;;  %v2081_v6 = vpop.f32.mrf.mxu0 }
 0x342   : > { %v2823_v63 = vadd.bf16 %v4461_v5, %v2590_v18  ;;  %v2825_v14 = vadd.bf16 %v4408_v60, %v2592_v54  ;;  %v2591_v58 = vpack.c.bf16 %v1888_v15, %v1884_v9  ;;  %v2593_v61 = vpack.c.bf16 %v2081_v6, %v2077_v3 }
 0x343   : > { %v2118_v19 = vpop.f32.mrf.mxu1  ;;  %v2311_v17 = vpop.f32.mrf.mxu0  ;;  %v4701_v5 = vrot.slane %v2676_v16, %v3824_v48  ;;  %v3185_v15 = vunpack.c.0.s8 %v4705_v27 }
 0x344   : > { %v2951_v30 = vmax.bf16 %v5073_v7, %v2823_v63  ;;  %v2953_v36 = vmax.bf16 %v5073_v7, %v2825_v14  ;;  %v2824_v24 = vadd.bf16 %v4468_v10, %v2591_v58  ;;  %v2826_v45 = vadd.bf16 %v4415_v39, %v2593_v61 }
 0x345   : > { %v2120_v57 = vpop.f32.mrf.mxu1  ;;  %v2313_v33 = vpop.f32.mrf.mxu0  ;;  %v4708_v10 = vrot.slane %v2690_v21, %v3824_v48  ;;  %v4711_v39 = vrot.slane %v2683_v2, %v3824_v48 }
 0x346   : > { %v2973_v60 = vmax.bf16 %v2972_v41, %v2951_v30  ;;  %v3023_v49 = vmax.bf16 %v3022_v13, %v2953_v36  ;;  %v2952_v38 = vmax.bf16 %v5073_v7, %v2824_v24  ;;  %v2954_v22 = vmax.bf16 %v5073_v7, %v2826_v45 }
 0x347   : > { %v2122_v28 = vpop.f32.mrf.mxu1  ;;  %v2315_v11 = vpop.f32.mrf.mxu0 }
 0x348   : > { %v2974_v42 = vunpack.i.l.bf16 %v2973_v60  ;;  %v2975_v23 = vunpack.i.h.bf16 %v2973_v60  ;;  %v3024_v26 = vunpack.i.l.bf16 %v3023_v49  ;;  %v3025_v29 = vunpack.i.h.bf16 %v3023_v49 }
 0x349   : > { %v2998_v0 = vmax.bf16 %v2997_v62, %v2952_v38  ;;  %v3048_v31 = vmax.bf16 %v3047_v44, %v2954_v22  ;;  %v2474_v20 = vpack.c.bf16 %v2122_v28, %v2118_v19  ;;  %v2476_v52 = vpack.c.bf16 %v2315_v11, %v2311_v17  ;;  %v2124_v43 = vpop.f32.mrf.mxu1  ;;  %v2317_v59 = vpop.f32.mrf.mxu0 }
 0x34a   : > { %v2976_v12 = vmax.f32 %v2974_v42, %v2975_v23  ;;  %v3026_v8 = vmax.f32 %v3024_v26, %v3025_v29  ;;  %v2475_v35 = vpack.c.bf16 %v2124_v43, %v2120_v57  ;;  %v2477_v4 = vpack.c.bf16 %v2317_v59, %v2313_v33 }
 0x34b   : > { %v2999_v34 = vunpack.i.l.bf16 %v2998_v0  ;;  %v3000_v9 = vunpack.i.h.bf16 %v2998_v0  ;;  %v3049_v3 = vunpack.i.l.bf16 %v3048_v31  ;;  %v3050_v37 = vunpack.i.h.bf16 %v3048_v31  ;;  %v2128_v48 = vpop.f32.mrf.mxu1  ;;  %v2321_v41 = vpop.f32.mrf.mxu0 }
 0x34c   : > { %v2977_v13 = vrot.slane %v2976_v12, 4  ;;  %v3027_v46 = vrot.slane %v3026_v8, 4  ;;  %v2707_v51 = vadd.bf16 %v4701_v5, %v2474_v20  ;;  %v2709_v32 = vadd.bf16 %v4708_v10, %v2476_v52 }
 0x34d   : > { %v3001_v47 = vmax.f32 %v2999_v34, %v3000_v9  ;;  %v3051_v50 = vmax.f32 %v3049_v3, %v3050_v37  ;;  %v2708_v56 = vadd.bf16 %v4711_v39, %v2475_v35  ;;  %v2710_v1 = vadd.bf16 %v4714_v55, %v2477_v4  ;;  %v2130_v62 = vpop.f32.mrf.mxu1  ;;  %v2323_v44 = vpop.f32.mrf.mxu0 }
 0x34e   : > { %v2978_v18 = vmax.f32 %v2976_v12, %v2977_v13  ;;  %v3028_v54 = vmax.f32 %v3026_v8, %v3027_v46  ;;  %v4722_v63 = vmax.bf16 %v5073_v7, %v2707_v51  ;;  %v4725_v14 = vmax.bf16 %v5073_v7, %v2709_v32 }
 0x34f   : > { %v3002_v6 = vrot.slane %v3001_v47, 4  ;;  %v3052_v16 = vrot.slane %v3051_v50, 4  ;;  %v2132_v58 = vpop.f32.mrf.mxu1  ;;  %v2325_v61 = vpop.f32.mrf.mxu0  ;;  %v4728_v36 = vmax.bf16 %v5073_v7, %v2708_v56  ;;  %v4731_v24 = vmax.bf16 %v5073_v7, %v2710_v1 }
 0x350   : > { %v2979_v19 = vrot.slane %v2978_v18, 2  ;;  %v3029_v17 = vrot.slane %v3028_v54, 2  ;;  %v2482_v21 = vpack.c.bf16 %v2132_v58, %v2128_v48  ;;  %v2484_v2 = vpack.c.bf16 %v2325_v61, %v2321_v41 }
 0x351   : > { %v3003_v25 = vmax.f32 %v3001_v47, %v3002_v6  ;;  %v3053_v30 = vmax.f32 %v3051_v50, %v3052_v16  ;;  %v2134_v45 = vpop.f32.mrf.mxu1  ;;  %v2327_v57 = vpop.f32.mrf.mxu0 }
 0x352   : > { %v2980_v33 = vmax.f32 %v2978_v18, %v2979_v19  ;;  %v3030_v60 = vmax.f32 %v3028_v54, %v3029_v17  ;;  %v2715_v49 = vadd.bf16 %v4701_v5, %v2482_v21  ;;  %v2717_v38 = vadd.bf16 %v4708_v10, %v2484_v2 }
 0x353   : > { %v3004_v22 = vrot.slane %v3003_v25, 2  ;;  %v3054_v53 = vrot.slane %v3053_v30, 2  ;;  %v2483_v27 = vpack.c.bf16 %v2134_v45, %v2130_v62  ;;  %v2485_v28 = vpack.c.bf16 %v2327_v57, %v2323_v44  ;;  %v2138_v11 = vpop.f32.mrf.mxu1 }
 0x354   : > { %v2981_v42 = vrot.slane %v2980_v33, 1  ;;  %v3031_v23 = vrot.slane %v3030_v60, 1  ;;  %v2843_v26 = vmax.bf16 %v5073_v7, %v2715_v49  ;;  %v2845_v29 = vmax.bf16 %v5073_v7, %v2717_v38  ;;  %v2331_v0 = vpop.f32.mrf.mxu0 }
 0x355   : > { %v3005_v31 = vmax.f32 %v3003_v25, %v3004_v22  ;;  %v3055_v20 = vmax.f32 %v3053_v30, %v3054_v53  ;;  %v2716_v52 = vadd.bf16 %v4711_v39, %v2483_v27  ;;  %v2718_v43 = vadd.bf16 %v4714_v55, %v2485_v28  ;;  %v2140_v59 = vpop.f32.mrf.mxu1 }
 0x356   : > { %v2982_v12 = vmax.f32 %v2980_v33, %v2981_v42  ;;  %v3032_v8 = vmax.f32 %v3030_v60, %v3031_v23  ;;  %v3059_v35 = vmax.bf16 %v2843_v26, %v4722_v63  ;;  %v3109_v4 = vmax.bf16 %v2845_v29, %v4725_v14  ;;  %v2333_v34 = vpop.f32.mrf.mxu0 }
 0x357   : > { %v3006_v9 = vrot.slane %v3005_v31, 1  ;;  %v3056_v3 = vrot.slane %v3055_v20, 1  ;;  %v2844_v37 = vmax.bf16 %v5073_v7, %v2716_v52  ;;  %v2846_v48 = vmax.bf16 %v5073_v7, %v2718_v43  ;;  %v2142_v41 = vpop.f32.mrf.mxu1 }
 0x358   : > { %v2983_v13 = vpack.i.bf16 %v2982_v12, %v2982_v12  ;;  %v3033_v46 = vpack.i.bf16 %v3032_v8, %v3032_v8  ;;  %v2490_v51 = vpack.c.bf16 %v2142_v41, %v2138_v11  ;;  %v2335_v32 = vpop.f32.mrf.mxu0  ;;  %v4746_v44 = vsub.s32 %v3185_v15, %v3803_v40 }
 0x359   : > { %v3007_v47 = vmax.f32 %v3005_v31, %v3006_v9  ;;  %v3057_v50 = vmax.f32 %v3055_v20, %v3056_v3  ;;  %v3084_v56 = vmax.bf16 %v2844_v37, %v4728_v36  ;;  %v3134_v1 = vmax.bf16 %v2846_v48, %v4731_v24  ;;  %v2144_v62 = vpop.f32.mrf.mxu1 }
 0x35a   : > { %5079 = vst [vmem:[#allocation2_spill] sm:$0xff] %v4746_v44  ;;  %v2723_v18 = vadd.bf16 %v4701_v5, %v2490_v51  ;;  %v2492_v54 = vpack.c.bf16 %v2335_v32, %v2331_v0  ;;  %v2337_v6 = vpop.f32.mrf.mxu0  ;;  %v2491_v14 = vpack.c.bf16 %v2144_v62, %v2140_v59  ;;  %v3159_v19 = vunpack.c.l.bf16 %v2983_v13 }
 0x35b   : > { %v3008_v16 = vpack.i.bf16 %v3007_v47, %v3007_v47  ;;  %v3058_v63 = vpack.i.bf16 %v3057_v50, %v3057_v50  ;;  %v2493_v58 = vpack.c.bf16 %v2337_v6, %v2333_v34  ;;  %v2148_v61 = vpop.f32.mrf.mxu1  ;;  %v3161_v17 = vunpack.c.l.bf16 %v3033_v46 }
 0x35c   : > { %v2851_v21 = vmax.bf16 %v5073_v7, %v2723_v18  ;;  %v2725_v2 = vadd.bf16 %v4708_v10, %v2492_v54  ;;  %v2341_v25 = vpop.f32.mrf.mxu0  ;;  %v2724_v40 = vadd.bf16 %v4711_v39, %v2491_v14 }
 0x35d   : > { %v3160_v30 = vunpack.c.l.bf16 %v3008_v16  ;;  %v3162_v36 = vunpack.c.l.bf16 %v3058_v63  ;;  %v2726_v15 = vadd.bf16 %v4714_v55, %v2493_v58  ;;  %v2150_v24 = vpop.f32.mrf.mxu1 }
 0x35e   : > { %v3060_v45 = vmax.bf16 %v3059_v35, %v2851_v21  ;;  %v2853_v57 = vmax.bf16 %v5073_v7, %v2725_v2  ;;  %v2343_v33 = vpop.f32.mrf.mxu0  ;;  %v2852_v38 = vmax.bf16 %v5073_v7, %v2724_v40 }
 0x35f   : > { %v3179_v60 = vcombine.low %v3159_v19, %v3160_v30  ;;  %v3180_v49 = vcombine.low %v3161_v17, %v3162_v36  ;;  %v2854_v22 = vmax.bf16 %v5073_v7, %v2726_v15  ;;  %v2152_v53 = vpop.f32.mrf.mxu1 }
 0x360   : > { %v3110_v27 = vmax.bf16 %v3109_v4, %v2853_v57  ;;  %v2498_v28 = vpack.c.bf16 %v2152_v53, %v2148_v61  ;;  %v2345_v11 = vpop.f32.mrf.mxu0  ;;  %v3085_v26 = vmax.bf16 %v3084_v56, %v2852_v38 }
 0x361   : > { %v4757_v42 = vrot.slane %v3179_v60, %v4746_v44  ;;  %v4760_v23 = vrot.slane %v3180_v49, %v4746_v44  ;;  %v3135_v29 = vmax.bf16 %v3134_v1, %v2854_v22  ;;  %v2154_v0 = vpop.f32.mrf.mxu1  ;;  %v2500_v20 = vpack.c.bf16 %v2345_v11, %v2341_v25 }
 0x362   : > { %v2731_v31 = vadd.bf16 %v4701_v5, %v2498_v28  ;;  %v2499_v52 = vpack.c.bf16 %v2154_v0, %v2150_v24  ;;  %v2347_v43 = vpop.f32.mrf.mxu0 }
 0x363   : > { %5080 = vst [vmem:[#allocation3_spill] sm:$0xff] %v4757_v42  ;;  %5081 = vst [vmem:[#allocation4_spill] sm:$0xff] %v4760_v23  ;;  %v2501_v12 = vpack.c.bf16 %v2347_v43, %v2343_v33  ;;  %v2158_v8 = vpop.f32.mrf.mxu1  ;;  %v2733_v4 = vadd.bf16 %v4708_v10, %v2500_v20 }
 0x364   : > { %v2859_v35 = vmax.bf16 %v5073_v7, %v2731_v31  ;;  %v2732_v34 = vadd.bf16 %v4711_v39, %v2499_v52  ;;  %v2351_v9 = vpop.f32.mrf.mxu0 }
 0x365   : > { %v2734_v3 = vadd.bf16 %v4714_v55, %v2501_v12  ;;  %v2160_v37 = vpop.f32.mrf.mxu1  ;;  %v2861_v41 = vmax.bf16 %v5073_v7, %v2733_v4 }
 0x366   : > { %v3061_v48 = vmax.bf16 %v3060_v45, %v2859_v35  ;;  %v2860_v13 = vmax.bf16 %v5073_v7, %v2732_v34  ;;  %v2353_v46 = vpop.f32.mrf.mxu0 }
 0x367   : > { %v2862_v51 = vmax.bf16 %v5073_v7, %v2734_v3  ;;  %v2162_v32 = vpop.f32.mrf.mxu1  ;;  %v3111_v47 = vmax.bf16 %v3110_v27, %v2861_v41 }
 0x368   : > { %v3086_v50 = vmax.bf16 %v3085_v26, %v2860_v13  ;;  %v2506_v56 = vpack.c.bf16 %v2162_v32, %v2158_v8  ;;  %v2355_v1 = vpop.f32.mrf.mxu0 }
 0x369   : > { %v3136_v62 = vmax.bf16 %v3135_v29, %v2862_v51  ;;  %v2508_v18 = vpack.c.bf16 %v2355_v1, %v2351_v9  ;;  %v2164_v54 = vpop.f32.mrf.mxu1 }
 0x36a   : > { %v2739_v6 = vadd.bf16 %v4701_v5, %v2506_v56  ;;  %v2507_v16 = vpack.c.bf16 %v2164_v54, %v2160_v37  ;;  %v2357_v63 = vpop.f32.mrf.mxu0 }
 0x36b   : > { %v2741_v14 = vadd.bf16 %v4708_v10, %v2508_v18  ;;  %v2509_v58 = vpack.c.bf16 %v2357_v63, %v2353_v46  ;;  %v2168_v61 = vpop.f32.mrf.mxu1 }
 0x36c   : > { %v2867_v19 = vmax.bf16 %v5073_v7, %v2739_v6  ;;  %v2740_v17 = vadd.bf16 %v4711_v39, %v2507_v16  ;;  %v2361_v21 = vpop.f32.mrf.mxu0 }
 0x36d   : > { %v2869_v2 = vmax.bf16 %v5073_v7, %v2741_v14  ;;  %v2742_v25 = vadd.bf16 %v4714_v55, %v2509_v58  ;;  %v2170_v30 = vpop.f32.mrf.mxu1 }
 0x36e   : > { %v4778_v36 = vmax.bf16 %v3061_v48, %v2867_v19  ;;  %v2868_v40 = vmax.bf16 %v5073_v7, %v2740_v17  ;;  %v2363_v15 = vpop.f32.mrf.mxu0 }
 0x36f   : > { %v4781_v24 = vmax.bf16 %v3111_v47, %v2869_v2  ;;  %v2870_v45 = vmax.bf16 %v5073_v7, %v2742_v25  ;;  %v2172_v57 = vpop.f32.mrf.mxu1 }
 0x370   : > { %v4784_v33 = vmax.bf16 %v3086_v50, %v2868_v40  ;;  %v2514_v60 = vpack.c.bf16 %v2172_v57, %v2168_v61  ;;  %v2365_v49 = vpop.f32.mrf.mxu0 }
 0x371   : > { %v4786_v38 = vmax.bf16 %v3136_v62, %v2870_v45  ;;  %v2516_v22 = vpack.c.bf16 %v2365_v49, %v2361_v21  ;;  %v2174_v53 = vpop.f32.mrf.mxu1 }
 0x372   : > { %v2747_v27 = vadd.bf16 %v4701_v5, %v2514_v60  ;;  %v2515_v28 = vpack.c.bf16 %v2174_v53, %v2170_v30  ;;  %v2367_v11 = vpop.f32.mrf.mxu0 }
 0x373   : > { %v2749_v26 = vadd.bf16 %v4708_v10, %v2516_v22  ;;  %v2517_v29 = vpack.c.bf16 %v2367_v11, %v2363_v15  ;;  %v2178_v0 = vpop.f32.mrf.mxu1 }
 0x374   : > { %v4791_v31 = vmax.bf16 %v5073_v7, %v2747_v27  ;;  %v2748_v20 = vadd.bf16 %v4711_v39, %v2515_v28  ;;  %v2371_v52 = vpop.f32.mrf.mxu0 }
 0x375   : > { %v4795_v43 = vmax.bf16 %v5073_v7, %v2749_v26  ;;  %v2750_v12 = vadd.bf16 %v4714_v55, %v2517_v29  ;;  %v2180_v8 = vpop.f32.mrf.mxu1 }
 0x376   : > { %v4801_v4 = vmax.bf16 %v5073_v7, %v2748_v20  ;;  %v2373_v34 = vpop.f32.mrf.mxu0 }
 0x377   : > { %v4806_v3 = vmax.bf16 %v5073_v7, %v2750_v12  ;;  %v2182_v37 = vpop.f32.mrf.mxu1 }
 0x378   : > { %v2375_v41 = vpop.f32.mrf.mxu0  ;;  %v2522_v11 = vpack.c.bf16 %v2182_v37, %v2178_v0 }
 0x379   : > { %v2184_v46 = vpop.f32.mrf.mxu1  ;;  %v2524_v26 = vpack.c.bf16 %v2375_v41, %v2371_v52  ;;  %v5082_v41 = vmov 0  }
 0x37a   : > { %v2377_v51 = vpop.f32.mrf.mxu0  ;;  %v2523_v20 = vpack.c.bf16 %v2184_v46, %v2180_v8  ;;  %v2755_v9 = vadd.bf16 %v4701_v5, %v2522_v11 }
 0x37b   : > { %v2188_v32 = vpop.f32.mrf.mxu1  ;;  %v2525_v59 = vpack.c.bf16 %v2377_v51, %v2373_v34  ;;  %v2757_v35 = vadd.bf16 %v4708_v10, %v2524_v26 }
 0x37c   : > { %v4812_v47 = vpop.f32.mrf.mxu0  ;;  %v2756_v23 = vadd.bf16 %v4711_v39, %v2523_v20  ;;  %v2883_v46 = vmax.bf16 %v5082_v41, %v2755_v9 }
 0x37d   : > { %v4814_v50 = vpop.f32.mrf.mxu1  ;;  %v2758_v52 = vadd.bf16 %v4714_v55, %v2525_v59  ;;  %v2885_v51 = vmax.bf16 %v5082_v41, %v2757_v35 }
 0x37e   : > { %v4816_v56 = vpop.f32.mrf.mxu0  ;;  %v2884_v42 = vmax.bf16 %v5082_v41, %v2756_v23 }
 0x37f   : > { %v2192_v1 = vpop.f32.mrf.mxu1 }
 0x380   : > { %v2385_v62 = vpop.f32.mrf.mxu0  ;;  %v2530_v37 = vpack.c.bf16 %v2192_v1, %v2188_v32  ;;  %v2886_v32 = vmax.bf16 %v5082_v41, %v2758_v52 }
 0x381   : > { %v4818_v18 = vpop.f32.mrf.mxu1  ;;  %v2532_v11 = vpack.c.bf16 %v2385_v62, %v4812_v47 }
 0x382   : > { %v4820_v54 = vpop.f32.mrf.mxu0  ;;  %v2531_v20 = vpack.c.bf16 %v4818_v18, %v4814_v50  ;;  %v2763_v47 = vadd.bf16 %v4701_v5, %v2530_v37  ;;  %v5083_v50 = vmax.bf16 %v4778_v36, %v4791_v31  ;;  %v5084_v18 = vmax.bf16 %v4781_v24, %v4795_v43 }
 0x383   : > { %v4822_v6 = vpop.f32.mrf.mxu1  ;;  %v2533_v59 = vpack.c.bf16 %v4820_v54, %v4816_v56  ;;  %v5086_v43 = vmax.bf16 %v4786_v38, %v4806_v3 }
 0x384   : > { %v4824_v16 = vpop.f32.mrf.mxu0  ;;  %v3064_v56 = vmax.bf16 %v5083_v50, %v2883_v46  ;;  %v3114_v54 = vmax.bf16 %v5084_v18, %v2885_v51 }
 0x385   : > { %v4826_v63 = vpop.f32.mrf.mxu1  ;;  %v2766_v36 = vadd.bf16 %v4714_v55, %v2533_v59  ;;  %v3139_v52 = vmax.bf16 %v5086_v43, %v2886_v32 }
 0x386   : > { %v4828_v14 = vpop.f32.mrf.mxu0 }
 0x387   : > { %v2202_v58 = vpop.f32.mrf.mxu1 }
 0x388   : > { %v2395_v61 = vpop.f32.mrf.mxu0  ;;  %v2538_v9 = vpack.c.bf16 %v2202_v58, %v4822_v6  ;;  %v2765_v6 = vadd.bf16 %v4708_v10, %v2532_v11 }
 0x389   : > { %v4830_v19 = vpop.f32.mrf.mxu1  ;;  %v2540_v35 = vpack.c.bf16 %v2395_v61, %v4824_v16 }
 0x38a   : > { %v4832_v17 = vpop.f32.mrf.mxu0  ;;  %v2539_v23 = vpack.c.bf16 %v4830_v19, %v4826_v63  ;;  %v5085_v63 = vmax.bf16 %v4784_v33, %v4801_v4  ;;  %v2764_v19 = vadd.bf16 %v4711_v39, %v2531_v20  ;;  %v2891_v4 = vmax.bf16 %v5082_v41, %v2763_v47 }
 0x38b   : > { %v4834_v21 = vpop.f32.mrf.mxu1  ;;  %v2541_v16 = vpack.c.bf16 %v4832_v17, %v4828_v14  ;;  %v2771_v14 = vadd.bf16 %v4701_v5, %v2538_v9  ;;  %v2773_v17 = vadd.bf16 %v4708_v10, %v2540_v35 }
 0x38c   : > { %v4836_v2 = vpop.f32.mrf.mxu0  ;;  %v3089_v61 = vmax.bf16 %v5085_v63, %v2884_v42  ;;  %v2772_v37 = vadd.bf16 %v4711_v39, %v2539_v23  ;;  %v2892_v11 = vmax.bf16 %v5082_v41, %v2764_v19  ;;  %v3065_v59 = vmax.bf16 %v3064_v56, %v2891_v4 }
 0x38d   : > { %v4838_v25 = vpop.f32.mrf.mxu1  ;;  %v2774_v46 = vadd.bf16 %v4714_v55, %v2541_v16  ;;  %v2899_v20 = vmax.bf16 %v5082_v41, %v2771_v14 }
 0x38e   : > { %v4840_v30 = vpop.f32.mrf.mxu0  ;;  %v2900_v32 = vmax.bf16 %v5082_v41, %v2772_v37 }
 0x38f   : > { %v4842_v40 = vpop.f32.mrf.mxu1  ;;  %v2902_v47 = vmax.bf16 %v5082_v41, %v2774_v46  ;;  %v3066_v63 = vmax.bf16 %v3065_v59, %v2899_v20 }
 0x390   : > { %v4844_v15 = vpop.f32.mrf.mxu0  ;;  %v2546_v31 = vpack.c.bf16 %v4842_v40, %v4834_v21  ;;  %v2893_v40 = vmax.bf16 %v5082_v41, %v2765_v6 }
 0x391   : > { %v4846_v45 = vpop.f32.mrf.mxu1  ;;  %v2548_v42 = vpack.c.bf16 %v4844_v15, %v4836_v2 }
 0x392   : > { %v4848_v57 = vpop.f32.mrf.mxu0  ;;  %v2547_v21 = vpack.c.bf16 %v4846_v45, %v4838_v25  ;;  %v2894_v25 = vmax.bf16 %v5082_v41, %v2766_v36  ;;  %v3115_v35 = vmax.bf16 %v3114_v54, %v2893_v40 }
 0x393   : > { %v4850_v60 = vpop.f32.mrf.mxu1  ;;  %v2549_v38 = vpack.c.bf16 %v4848_v57, %v4840_v30  ;;  %v2779_v30 = vadd.bf16 %v4701_v5, %v2546_v31 }
 0x394   : > { %v4852_v49 = vpop.f32.mrf.mxu0  ;;  %v2780_v9 = vadd.bf16 %v4711_v39, %v2547_v21 }
 0x395   : > { %v4854_v22 = vpop.f32.mrf.mxu1  ;;  %v2907_v56 = vmax.bf16 %v5082_v41, %v2779_v30 }
 0x396   : > { %v4856_v53 = vpop.f32.mrf.mxu0  ;;  %v2908_v14 = vmax.bf16 %v5082_v41, %v2780_v9 }
 0x397   : > { %v4858_v27 = vpop.f32.mrf.mxu1  ;;  %v3067_v40 = vmax.bf16 %v3066_v63, %v2907_v56 }
 0x398   : > { %v4860_v28 = vpop.f32.mrf.mxu0  ;;  %v2554_v2 = vpack.c.bf16 %v4858_v27, %v4850_v60  ;;  %v2901_v60 = vmax.bf16 %v5082_v41, %v2773_v17  ;;  %v2781_v27 = vadd.bf16 %v4708_v10, %v2548_v42 }
 0x399   : > { %v4862_v29 = vpop.f32.mrf.mxu1  ;;  %v2556_v15 = vpack.c.bf16 %v4860_v28, %v4852_v49 }
 0x39a   : > { %v4864_v12 = vpop.f32.mrf.mxu0  ;;  %v2555_v45 = vpack.c.bf16 %v4862_v29, %v4854_v22  ;;  %v2782_v22 = vadd.bf16 %v4714_v55, %v2549_v38  ;;  %v2787_v23 = vadd.bf16 %v4701_v5, %v2554_v2  ;;  %v3116_v19 = vmax.bf16 %v3115_v35, %v2901_v60 }
 0x39b   : > { %v4866_v13 = vpop.f32.mrf.mxu1  ;;  %v2557_v49 = vpack.c.bf16 %v4864_v12, %v4856_v53  ;;  %v2789_v50 = vadd.bf16 %v4708_v10, %v2556_v15  ;;  %v3090_v53 = vmax.bf16 %v3089_v61, %v2892_v11  ;;  %v3140_v12 = vmax.bf16 %v3139_v52, %v2894_v25 }
 0x39c   : > { %v4868_v48 = vpop.f32.mrf.mxu0  ;;  %v2788_v6 = vadd.bf16 %v4711_v39, %v2555_v45  ;;  %v2909_v54 = vmax.bf16 %v5082_v41, %v2781_v27  ;;  %v2910_v17 = vmax.bf16 %v5082_v41, %v2782_v22  ;;  %v2915_v4 = vmax.bf16 %v5082_v41, %v2787_v23 }
 0x39d   : > { %v4872_v7 = vpop.f32.mrf.mxu1  ;;  %v2790_v36 = vadd.bf16 %v4714_v55, %v2557_v49  ;;  %v3091_v43 = vmax.bf16 %v3090_v53, %v2900_v32  ;;  %v3141_v42 = vmax.bf16 %v3140_v12, %v2902_v47  ;;  %v2917_v37 = vmax.bf16 %v5082_v41, %v2789_v50 }
 0x39e   : > { %v4875_v0 = vpop.f32.mrf.mxu0  ;;  %v2916_v46 = vmax.bf16 %v5082_v41, %v2788_v6 }
 0x39f   : > { %v4878_v8 = vpop.f32.mrf.mxu1  ;;  %v2918_v11 = vmax.bf16 %v5082_v41, %v2790_v36  ;;  %v3092_v30 = vmax.bf16 %v3091_v43, %v2908_v14  ;;  %v3142_v45 = vmax.bf16 %v3141_v42, %v2910_v17 }
 0x3a0   : > { %v4880_v34 = vpop.f32.mrf.mxu0  ;;  %v2562_v61 = vpack.c.bf16 %v4878_v8, %v4866_v13  ;;  %v3117_v8 = vmax.bf16 %v3116_v19, %v2909_v54 }
 0x3a1   : > { %v4885_v26 = vpop.f32.mrf.mxu1  ;;  %v2564_v21 = vpack.c.bf16 %v4880_v34, %v4868_v48  ;;  %v3143_v32 = vmax.bf16 %v3142_v45, %v2918_v11 }
 0x3a2   : > { %v4892_v44 = vpop.f32.mrf.mxu0  ;;  %v2563_v2 = vpack.c.bf16 %v4885_v26, %v4872_v7  ;;  %v2795_v20 = vadd.bf16 %v4701_v5, %v2562_v61 }
 0x3a3   : > { %v4897_v1 = vpop.f32.mrf.mxu1  ;;  %v2565_v15 = vpack.c.bf16 %v4892_v44, %v4875_v0  ;;  %v3068_v44 = vmax.bf16 %v3067_v40, %v2915_v4  ;;  %v3118_v0 = vmax.bf16 %v3117_v8, %v2917_v37  ;;  %v2797_v60 = vadd.bf16 %v4708_v10, %v2564_v21 }
 0x3a4   : > { %v4902_v62 = vpop.f32.mrf.mxu0  ;;  %v2923_v35 = vmax.bf16 %v5082_v41, %v2795_v20 }
 0x3a5   : > { %v4913_v58 = vpop.f32.mrf.mxu1  ;;  %v2925_v50 = vmax.bf16 %v5082_v41, %v2797_v60 }
 0x3a6   : > { %v4922_v24 = vpop.f32.mrf.mxu0  ;;  %v3069_v17 = vmax.bf16 %v3068_v44, %v2923_v35 }
 0x3a7   : > { %v4931_v33 = vpop.f32.mrf.mxu1  ;;  %v3119_v4 = vmax.bf16 %v3118_v0, %v2925_v50 }
 0x3a8   : > { %v4939_v3 = vpop.f32.mrf.mxu0  ;;  %v2570_v25 = vpack.c.bf16 %v4931_v33, %v4897_v1  ;;  %v3093_v33 = vmax.bf16 %v3092_v30, %v2916_v46 }
 0x3a9   : > { %v4947_v51 = vpop.f32.mrf.mxu1  ;;  %v2572_v48 = vpack.c.bf16 %v4939_v3, %v4902_v62  ;;  %v2796_v62 = vadd.bf16 %v4711_v39, %v2563_v2  ;;  %v2798_v3 = vadd.bf16 %v4714_v55, %v2565_v15 }
 0x3aa   : > { %v4954_v57 = vpop.f32.mrf.mxu0  ;;  %v2571_v7 = vpack.c.bf16 %v4947_v51, %v4913_v58  ;;  %v2803_v58 = vadd.bf16 %v4701_v5, %v2570_v25 }
 0x3ab   : > { %v4961_v28 = vpop.f32.mrf.mxu1  ;;  %v2573_v27 = vpack.c.bf16 %v4954_v57, %v4922_v24  ;;  %v2805_v51 = vadd.bf16 %v4708_v10, %v2572_v48  ;;  %v2924_v6 = vmax.bf16 %v5082_v41, %v2796_v62 }
 0x3ac   : > { %v4966_v29 = vpop.f32.mrf.mxu0  ;;  %v2804_v24 = vadd.bf16 %v4711_v39, %v2571_v7 }
 0x3ad   : > { %v4971_v18 = vpop.f32.mrf.mxu1  ;;  %v2933_v36 = vmax.bf16 %v5082_v41, %v2805_v51  ;;  %v3094_v46 = vmax.bf16 %v3093_v33, %v2924_v6 }
 0x3ae   : > { %v4975_v16 = vpop.f32.mrf.mxu0 }
 0x3af   : > { %v2252_v31 = vpop.f32.mrf.mxu1  ;;  %v3120_v25 = vmax.bf16 %v3119_v4, %v2933_v36 }
 0x3b0   : > { %v2445_v52 = vpop.f32.mrf.mxu0  ;;  %v2578_v49 = vpack.c.bf16 %v2252_v31, %v4961_v28  ;;  %v2806_v28 = vadd.bf16 %v4714_v55, %v2573_v27 }
 0x3b1   : > { %v2254_v38 = vpop.f32.mrf.mxu1  ;;  %v2580_v9 = vpack.c.bf16 %v2445_v52, %v4966_v29  ;;  %v2926_v29 = vmax.bf16 %v5082_v41, %v2798_v3 }
 0x3b2   : > { %v2447_v13 = vpop.f32.mrf.mxu0  ;;  %v2579_v57 = vpack.c.bf16 %v2254_v38, %v4971_v18  ;;  %v2811_v63 = vadd.bf16 %v4701_v5, %v2578_v49  ;;  %v2931_v18 = vmax.bf16 %v5082_v41, %v2803_v58  ;;  %v2934_v37 = vmax.bf16 %v5082_v41, %v2806_v28 }
 0x3b3   : > { %v2258_v34 = vpop.f32.mrf.mxu1  ;;  %v2581_v53 = vpack.c.bf16 %v2447_v13, %v4975_v16  ;;  %v2813_v31 = vadd.bf16 %v4708_v10, %v2580_v9  ;;  %v2932_v16 = vmax.bf16 %v5082_v41, %v2804_v24  ;;  %v3144_v2 = vmax.bf16 %v3143_v32, %v2926_v29 }
 0x3b4   : > { %v2451_v26 = vpop.f32.mrf.mxu0  ;;  %v2812_v61 = vadd.bf16 %v4711_v39, %v2579_v57  ;;  %v2939_v15 = vmax.bf16 %v5082_v41, %v2811_v63  ;;  %v3070_v11 = vmax.bf16 %v3069_v17, %v2931_v18 }
 0x3b5   : > { %v2260_v1 = vpop.f32.mrf.mxu1  ;;  %v2814_v21 = vadd.bf16 %v4714_v55, %v2581_v53  ;;  %v2941_v48 = vmax.bf16 %v5082_v41, %v2813_v31  ;;  %v3095_v45 = vmax.bf16 %v3094_v46, %v2932_v16  ;;  %v3145_v0 = vmax.bf16 %v3144_v2, %v2934_v37 }
 0x3b6   : > { %v2453_v59 = vpop.f32.mrf.mxu0  ;;  %v2940_v20 = vmax.bf16 %v5082_v41, %v2812_v61  ;;  %v3071_v62 = vmax.bf16 %v3070_v11, %v2939_v15 }
 0x3b7   : > { %v2262_v22 = vpop.f32.mrf.mxu1  ;;  %v2942_v60 = vmax.bf16 %v5082_v41, %v2814_v21  ;;  %v3121_v58 = vmax.bf16 %v3120_v25, %v2941_v48 }
 0x3b8   : > { %v2586_v47 = vpack.c.bf16 %v2262_v22, %v2258_v34  ;;  %v2455_v23 = vpop.f32.mrf.mxu0  ;;  %v3096_v35 = vmax.bf16 %v3095_v45, %v2940_v20 }
 0x3b9   : > { %v2588_v12 = vpack.c.bf16 %v2455_v23, %v2451_v26  ;;  %v2264_v56 = vpop.f32.mrf.mxu1  ;;  %v3146_v23 = vmax.bf16 %v3145_v0, %v2942_v60 }
 0x3ba   : > { %v2587_v19 = vpack.c.bf16 %v2264_v56, %v2260_v1  ;;  %v2457_v54 = vpop.f32.mrf.mxu0  ;;  %v2819_v52 = vadd.bf16 %v4701_v5, %v2586_v47 }
 0x3bb   : > { %v2589_v43 = vpack.c.bf16 %v2457_v54, %v2453_v59  ;;  %v2268_v14 = vpop.f32.mrf.mxu1  ;;  %v2821_v38 = vadd.bf16 %v4708_v10, %v2588_v12 }
 0x3bc   : > { %v2461_v42 = vpop.f32.mrf.mxu0  ;;  %v2820_v13 = vadd.bf16 %v4711_v39, %v2587_v19  ;;  %v2947_v7 = vmax.bf16 %v5082_v41, %v2819_v52 }
 0x3bd   : > { %v2270_v40 = vpop.f32.mrf.mxu1  ;;  %v2822_v34 = vadd.bf16 %v4714_v55, %v2589_v43  ;;  %v2949_v27 = vmax.bf16 %v5082_v41, %v2821_v38 }
 0x3be   : > { %v2463_v8 = vpop.f32.mrf.mxu0  ;;  %v2948_v3 = vmax.bf16 %v5082_v41, %v2820_v13  ;;  %v3072_v24 = vmax.bf16 %v3071_v62, %v2947_v7 }
 0x3bf   : > { %v2272_v30 = vpop.f32.mrf.mxu1  ;;  %v2950_v51 = vmax.bf16 %v5082_v41, %v2822_v34  ;;  %v3122_v50 = vmax.bf16 %v3121_v58, %v2949_v27 }
 0x3c0   : > { %v2594_v26 = vpack.c.bf16 %v2272_v30, %v2268_v14  ;;  %v2465_v44 = vpop.f32.mrf.mxu0  ;;  %v3097_v53 = vmax.bf16 %v3096_v35, %v2948_v3 }
 0x3c1   : > { %v2596_v1 = vpack.c.bf16 %v2465_v44, %v2461_v42  ;;  %v2274_v33 = vpop.f32.mrf.mxu1  ;;  %v3147_v6 = vmax.bf16 %v3146_v23, %v2950_v51 }
 0x3c2   : > { %v2827_v49 = vadd.bf16 %v4701_v5, %v2594_v26  ;;  %v2595_v59 = vpack.c.bf16 %v2274_v33, %v2270_v40  ;;  %v2467_v32 = vpop.f32.mrf.mxu0 }
 0x3c3   : > { %v2829_v9 = vadd.bf16 %v4708_v10, %v2596_v1  ;;  %v2597_v22 = vpack.c.bf16 %v2467_v32, %v2463_v8 }
 0x3c4   : > { %v2955_v57 = vmax.bf16 %v5082_v41, %v2827_v49  ;;  %v2828_v47 = vadd.bf16 %v4711_v39, %v2595_v59 }
 0x3c5   : > { %v2957_v28 = vmax.bf16 %v5082_v41, %v2829_v9  ;;  %v2830_v5 = vadd.bf16 %v4714_v55, %v2597_v22  ;;  %v5087_v9 = vld [vmem:[#allocation2_spill] sm:$0xff] }
 0x3c6   : > { %v3073_v12 = vmax.bf16 %v3072_v24, %v2955_v57  ;;  %v2956_v56 = vmax.bf16 %v5082_v41, %v2828_v47  ;;  %v5088_v57 = vld [vmem:[#allocation3_spill] sm:$0xff]  ;;  %v5089_v47 = vld [vmem:[#allocation4_spill] sm:$0xff] }
 0x3c7   : > { %v3123_v29 = vmax.bf16 %v3122_v50, %v2957_v28  ;;  %v2958_v10 = vmax.bf16 %v5082_v41, %v2830_v5  ;;  %v5090_v23 = vcombine.low %v5088_v57, %v5089_v47 }
 0x3c8   : > { %v3074_v63 = vunpack.i.l.bf16 %v3073_v12  ;;  %v3075_v19 = vunpack.i.h.bf16 %v3073_v12  ;;  %v3098_v54 = vmax.bf16 %v3097_v53, %v2956_v56 }
 0x3c9   : > { %v3124_v18 = vunpack.i.l.bf16 %v3123_v29  ;;  %v3125_v36 = vunpack.i.h.bf16 %v3123_v29  ;;  %v3148_v39 = vmax.bf16 %v3147_v6, %v2958_v10  ;;  %v3219_v50 = vrot.slane %v5090_v23, %v5087_v9 }
 0x3ca   : > { %v3076_v31 = vmax.f32 %v3074_v63, %v3075_v19  ;;  %v3099_v43 = vunpack.i.l.bf16 %v3098_v54  ;;  %v3100_v14 = vunpack.i.h.bf16 %v3098_v54 }
 0x3cb   : > { %v3126_v17 = vmax.f32 %v3124_v18, %v3125_v36  ;;  %v3149_v16 = vunpack.i.l.bf16 %v3148_v39  ;;  %v3150_v55 = vunpack.i.h.bf16 %v3148_v39 }
 0x3cc   : > { %v3077_v61 = vrot.slane %v3076_v31, 4  ;;  %v3101_v52 = vmax.f32 %v3099_v43, %v3100_v14 }
 0x3cd   : > { %v3127_v42 = vrot.slane %v3126_v17, 4  ;;  %v3151_v4 = vmax.f32 %v3149_v16, %v3150_v55 }
 0x3ce   : > { %v3078_v37 = vmax.f32 %v3076_v31, %v3077_v61  ;;  %v3102_v21 = vrot.slane %v3101_v52, 4 }
 0x3cf   : > { %v3128_v38 = vmax.f32 %v3126_v17, %v3127_v42  ;;  %v3152_v41 = vrot.slane %v3151_v4, 4 }
 0x3d0   : > { %v3079_v40 = vrot.slane %v3078_v37, 2  ;;  %v3103_v46 = vmax.f32 %v3101_v52, %v3102_v21 }
 0x3d1   : > { %v3129_v2 = vrot.slane %v3128_v38, 2  ;;  %v3153_v15 = vmax.f32 %v3151_v4, %v3152_v41 }
 0x3d2   : > { %v3080_v13 = vmax.f32 %v3078_v37, %v3079_v40  ;;  %v3104_v8 = vrot.slane %v3103_v46, 2 }
 0x3d3   : > { %v3130_v11 = vmax.f32 %v3128_v38, %v3129_v2  ;;  %v3154_v25 = vrot.slane %v3153_v15, 2 }
 0x3d4   : > { %v3081_v48 = vrot.slane %v3080_v13, 1  ;;  %v3105_v34 = vmax.f32 %v3103_v46, %v3104_v8 }
 0x3d5   : > { %v3131_v30 = vrot.slane %v3130_v11, 1  ;;  %v3155_v45 = vmax.f32 %v3153_v15, %v3154_v25 }
 0x3d6   : > { %v3082_v20 = vmax.f32 %v3080_v13, %v3081_v48  ;;  %v3106_v7 = vrot.slane %v3105_v34, 1 }
 0x3d7   : > { %v3132_v26 = vmax.f32 %v3130_v11, %v3131_v30  ;;  %v3156_v44 = vrot.slane %v3155_v45, 1 }
 0x3d8   : > { %v3083_v0 = vpack.i.bf16 %v3082_v20, %v3082_v20  ;;  %v3107_v60 = vmax.f32 %v3105_v34, %v3106_v7 }
 0x3d9   : > { %v3133_v27 = vpack.i.bf16 %v3132_v26, %v3132_v26  ;;  %v3157_v1 = vmax.f32 %v3155_v45, %v3156_v44 }
 0x3da   : > { %v3108_v33 = vpack.i.bf16 %v3107_v60, %v3107_v60  ;;  %v3163_v3 = vunpack.c.l.bf16 %v3083_v0 }
 0x3db   : > { %v3158_v62 = vpack.i.bf16 %v3157_v1, %v3157_v1  ;;  %v3165_v59 = vunpack.c.l.bf16 %v3133_v27 }
 0x3dc   : > { %v3164_v49 = vunpack.c.l.bf16 %v3108_v33 }
 0x3dd   : > { %v3166_v32 = vunpack.c.l.bf16 %v3158_v62 }
 0x3de   : > { %v3181_v58 = vcombine.low %v3163_v3, %v3164_v49 }
 0x3df   : > { %v3182_v51 = vcombine.low %v3165_v59, %v3166_v32 }
 0x3e0   : > { %v3203_v22 = vrot.slane %v3181_v58, %v5087_v9 }
 0x3e1   : > { %v3210_v35 = vrot.slane %v3182_v51, %v5087_v9 }
 0x3e3   : > { %v3212_v24 = vcombine.low %v3203_v22, %v3210_v35 }
 0x3e5   : > { %v3226_v28 = vrot.slane %v3212_v24, %v5087_v9 }
 0x3e7   : > { %v3227_v5 = vcombine.low %v3219_v50, %v3226_v28 }
 0x3e9   : > { %3229 = vst [vmem:[%s304_s23] sm:$0xff] %v3227_v5 }
 0x3ea PF: > { %s17_s26 = sadd.s32 1, %s3627_s26   ;;  %s5091_s24 = smov %s3623_s25 }
 0x3eb   : > { %p14_p5 = scmp.ge.s32.totalorder %s17_s26, 6   ;;  %s5092_s25 = smov %s5094_s27 }
 0x3ed   :  { %16 = sbr.rel (!%p14_p5) target bundleno = 2 (0x2), region = 86 }

// kernel: tnet_forward.3
= control target key start
LH: loop header
LB: loop body
LE: loop exit
PB: predicated region body
PF: predicated region fallthrough
CT: control target
= control target key end

     0   :  { %s9070_s25 = smov 0   ;;  %s9072_s26 = smov 0   ;;  %s13599_s0 = inlined_call_operand.vmem [shape: f32[4,256,3], index: 0, kind: input, shape index: {}]   ;;  %s13600_s1 = inlined_call_operand.vmem [shape: f32[3,64], index: 1, kind: input, shape index: {}]   ;;  %s13601_s2 = inlined_call_operand.vmem [shape: f32[1,64], index: 2, kind: input, shape index: {}]   ;;  %s13602_s3 = inlined_call_operand.vmem [shape: bf16[64,128], index: 3, kind: input, shape index: {}]   ;;  %s13603_s4 = inlined_call_operand.vmem [shape: f32[1,128], index: 4, kind: input, shape index: {}]   ;;  %s13604_s5 = inlined_call_operand.vmem [shape: bf16[128,1024], index: 5, kind: input, shape index: {}]   ;;  %s13605_s6 = inlined_call_operand.vmem [shape: f32[1,1024], index: 6, kind: input, shape index: {}]   ;;  %s13606_s7 = inlined_call_operand.vmem [shape: f32[4,1,512], index: 7, kind: input, shape index: {}]   ;;  %s13607_s8 = inlined_call_operand.vmem [shape: bf16[1024,512], index: 8, kind: input, shape index: {}]   ;;  %s13608_s9 = inlined_call_operand.vmem [shape: bf16[512,256], index: 9, kind: input, shape index: {}]   ;;  %s13609_s10 = inlined_call_operand.vmem [shape: f32[1,256], index: 10, kind: input, shape index: {}]   ;;  %s13610_s11 = inlined_call_operand.vmem [shape: bf16[256,128], index: 11, kind: input, shape index: {}]   ;;  %s13611_s12 = inlined_call_operand.vmem [shape: f32[1,128], index: 12, kind: input, shape index: {}]   ;;  %s13612_s13 = inlined_call_operand.vmem [shape: f32[4,1,128], index: 13, kind: output, shape index: {}]  }
   0x1   :  { %s9074_s27 = smov 0  }
   0x2 LB: > { %s35_s28 = sadd.s32 1, %s8991_s26  ;;  %p7778_p0 = scmp.ge.s32.totalorder %s8995_s27, 1  ;;  %s8995_s27 = sphi %s9074_s27, %s23_s27   ;;  %s8991_s26 = sphi %s9072_s26, %s14354_s26   ;;  %s8987_s25 = sphi %s9070_s25, %s14353_s25  }
   0x3   : > { %p37_p1 = scmp.ge.s32.totalorder %s35_s28, 4  ;;  %p415_p2 = scmp.lt.s32.totalorder %s8995_s27, 5 }
   0x5   : > { %s14356_s28 = smov (%p37_p1, %s35_s28), 0  ;;  %p416_p3 = pnand %p7778_p0, %p415_p2 }
   0x7   : > { %419 = sbr.rel (%p416_p3) target bundleno = 1915 (0x77b), region = 72 }
   0xc   : > { %p466_p4 = scmp.lt.s32.totalorder %s8987_s25, 3  ;;  %v8997_v0 = vmov 1   ;;  %v13613_v1 = vmov 0   ;;  %v8473_v7 = vld [vmem:[%s13602_s3 + $0x18] sm:$0xff]   ;;  %v8999_v9 = vmov 2   ;;  %v8474_v10 = vld [vmem:[%s13602_s3 + $0x10] sm:$0xff]   ;;  %v751_v32 = vlaneseq }
   0xd   : > { %8423 = vset.pattern.permute.xlu1 %v8997_v0  ;;  %8422 = vset.pattern.permute.xlu0 %v13613_v1  ;;  %v8475_v11 = vld [vmem:[%s13602_s3 + $0x8] sm:$0xff]   ;;  %v8476_v13 = vld [vmem:[%s13602_s3] sm:$0xff]   ;;  %vm1289_vm0 = vcmask 523264  }
   0xe   : > { %s14358_s25 = smov (!%p466_p4, %s8987_s25), 3  ;;  %1957 = vmatprep.mubr.bf16.mxu1 %v13613_v1  ;;  %8339 = vmatprep.subr.bf16.mxu0 %v8473_v7  ;;  %v9190_v36 = vshrl.u32 %v751_v32, 7  ;;  %v515_v43 = vld [vmem:[%s13600_s1] sm:$0x7] }
   0xf   : > { %s8206_s29 = sshll.u32 %s14358_s25, 8  ;;  %8340 = vmatpush3.bf16.msra.mxu0 %v8473_v7  ;;  %s7781_s20 = sshll.u32 %s14358_s25, 2 }
  0x10   : > { %s9097_s15 = scalar_lea.vmem %s13599_s0, %s8206_s29  ;;  %8341 = vmatprep.subr.bf16.mxu0 %v8474_v10  ;;  %13780 = vst [vmem:[#allocation2_spill] sm:$0xff] %v9190_v36  ;;  %v9200_v41 = vsub.s32 1, %v9190_v36  ;;  %v9203_v42 = vsub.s32 0, %v9190_v36  ;;  %v9211_v45 = vsub.s32 2, %v9190_v36  ;;  %s478_s23 = scalar_lea.vmem %s13606_s7, %s7781_s20 }
  0x11   : > { %v483_v2 = vld [vmem:[%s9097_s15] sm:$0xff]  ;;  %v484_v3 = vld [vmem:[%s9097_s15 + $0x8] sm:$0xff]  ;;  %v485_v4 = vld [vmem:[%s9097_s15 + $0x10] sm:$0xff] }
  0x12   : > { %788 = vperm.xlu1 %8423, %v483_v2   ;;  %593 = vperm.xlu0 %8422, %v483_v2   ;;  %v486_v5 = vld [vmem:[%s9097_s15 + $0x18] sm:$0xff]  ;;  %v488_v6 = vld [vmem:[%s9097_s15 + $0x28] sm:$0xff]  ;;  %v489_v8 = vld [vmem:[%s9097_s15 + $0x30] sm:$0xff]  ;;  %13781 = vst [vmem:[#allocation3_spill] sm:$0xff] %v9200_v41  ;;  %v9215_v47 = vrot.slane %v515_v43, %v9200_v41  ;;  %v9218_v48 = vrot.slane %v515_v43, %v9203_v42 }
  0x13   : > { %8342 = vmatpush3.bf16.msra.mxu0 %v8474_v10  ;;  %v487_v12 = vld [vmem:[%s9097_s15 + $0x20] sm:$0xff]  ;;  %v490_v14 = vld [vmem:[%s9097_s15 + $0x38] sm:$0xff]  ;;  %v492_v15 = vld [vmem:[%s9097_s15 + $0x48] sm:$0xff]  ;;  %13782 = vst [vmem:[#allocation4_spill] sm:$0xff] %v9203_v42  ;;  %v9229_v51 = vrot.slane %v515_v43, %v9211_v45 }
  0x14   : > { %8343 = vmatprep.subr.bf16.mxu0 %v8475_v11  ;;  %v493_v16 = vld [vmem:[%s9097_s15 + $0x50] sm:$0xff]  ;;  %v495_v17 = vld [vmem:[%s9097_s15 + $0x60] sm:$0xff]  ;;  %v9138_v19 = vld [vmem:[%s9097_s15 + $0x88] sm:$0xff]  ;;  %13783 = vst [vmem:[#allocation5_spill] sm:$0xff] %v9211_v45 }
  0x15   : > { %v491_v18 = vld [vmem:[%s9097_s15 + $0x40] sm:$0xff]  ;;  %v9142_v20 = vld [vmem:[%s9097_s15 + $0x90] sm:$0xff]  ;;  %v496_v21 = vld [vmem:[%s9097_s15 + $0x68] sm:$0xff] }
  0x16   : > { %792 = vperm.xlu1 %8423, %v484_v3   ;;  %598 = vperm.xlu0 %8422, %v484_v3   ;;  %v494_v22 = vld [vmem:[%s9097_s15 + $0x58] sm:$0xff]  ;;  %v497_v23 = vld [vmem:[%s9097_s15 + $0x70] sm:$0xff]  ;;  %v9153_v24 = vld [vmem:[%s9097_s15 + $0xa8] sm:$0xff] }
  0x17   : > { %8344 = vmatpush3.bf16.msra.mxu0 %v8475_v11  ;;  %v9158_v25 = vld [vmem:[%s9097_s15 + $0xb0] sm:$0xff]  ;;  %v498_v26 = vld [vmem:[%s9097_s15 + $0x78] sm:$0xff]  ;;  %v9167_v27 = vld [vmem:[%s9097_s15 + $0xa0] sm:$0xff] }
  0x18   : > { %8345 = vmatprep.subr.bf16.mxu0 %v8476_v13  ;;  %v9172_v28 = vld [vmem:[%s9097_s15 + $0xb8] sm:$0xff]  ;;  %v9177_v29 = vld [vmem:[%s9097_s15 + $0xc8] sm:$0xff]  ;;  %v9187_v33 = vld [vmem:[%s9097_s15 + $0xd0] sm:$0xff] }
  0x19   : > { %v9193_v37 = vld [vmem:[%s9097_s15 + $0xe0] sm:$0xff]  ;;  %v9223_v49 = vld [vmem:[%s9097_s15 + $0xe8] sm:$0xff]  ;;  %v9237_v57 = vld [vmem:[%s9097_s15 + $0xf0] sm:$0xff] }
  0x1a   : > { %8424 = vset.pattern.permute.xlu1 %v13613_v1  ;;  %603 = vperm.xlu0 %8422, %v485_v4   ;;  %v9196_v40 = vld [vmem:[%s9097_s15 + $0x80] sm:$0xff] }
  0x1b   : > { %608 = vperm.xlu1 %8424, %v486_v5   ;;  %8346 = vmatpush3.bf16.msra.mxu0 %v8476_v13 }
  0x1e   : > { %8425 = vset.pattern.permute.xlu0 %v8997_v0 }
  0x1f   : > { %8426 = vset.pattern.permute.xlu1 %v8997_v0  ;;  %796 = vperm.xlu0 %8425, %v485_v4  }
  0x20   : > { %800 = vperm.xlu1 %8426, %v486_v5  }
  0x23   : > { %808 = vperm.xlu0 %8425, %v488_v6  }
  0x24   : > { %8427 = vset.pattern.permute.xlu1 %v8999_v9 }
  0x25   : > { %984 = vperm.xlu1 %8427, %v483_v2  }
  0x27   : > { %812 = vperm.xlu0 %8425, %v489_v8  }
  0x29   : > { %992 = vperm.xlu1 %8427, %v485_v4  }
  0x2b   : > { %8431 = vset.pattern.permute.xlu0 %v8999_v9 }
  0x2c   : > { %988 = vperm.xlu0 %8431, %v484_v3   ;;  %v502_v3 = vld [vmem:[%s9097_s15 + $0x98] sm:$0xff] }
  0x2d   : > { %996 = vperm.xlu1 %8427, %v486_v5  }
  0x30   : > { %1000 = vperm.xlu0 %8431, %v487_v12  }
  0x31   : > { %8428 = vset.pattern.permute.xlu1 %v13613_v1 }
  0x32   : > { %618 = vperm.xlu1 %8428, %v488_v6  }
  0x34   : > { %1012 = vperm.xlu0 %8431, %v490_v14  }
  0x36   : > { %8429 = vset.pattern.permute.xlu1 %v8997_v0 }
  0x37   : > { %804 = vperm.xlu1 %8429, %v487_v12  }
  0x38   : > { %8434 = vset.pattern.permute.xlu0 %v13613_v1 }
  0x39   : > { %613 = vperm.xlu0 %8434, %v487_v12  }
  0x3b   : > { %8430 = vset.pattern.permute.xlu1 %v13613_v1 }
  0x3c   : > { %623 = vperm.xlu1 %8430, %v489_v8  }
  0x3d   : > { %638 = vperm.xlu0 %8434, %v492_v15  }
  0x40   : > { %628 = vperm.xlu1 %8430, %v490_v14  }
  0x41   : > { %643 = vperm.xlu0 %8434, %v493_v16  }
  0x44   : > { %8432 = vset.pattern.permute.xlu1 %v8997_v0 }
  0x45   : > { %816 = vperm.xlu1 %8432, %v490_v14   ;;  %8438 = vset.pattern.permute.xlu0 %v8997_v0 }
  0x46   : > { %828 = vperm.xlu0 %8438, %v493_v16  }
  0x49   : > { %8433 = vset.pattern.permute.xlu1 %v8999_v9 }
  0x4a   : > { %1004 = vperm.xlu1 %8433, %v488_v6   ;;  %8441 = vset.pattern.permute.xlu0 %v8999_v9 }
  0x4b   : > { %1020 = vperm.xlu0 %8441, %v492_v15  }
  0x4e   : > { %1008 = vperm.xlu1 %8433, %v489_v8   ;;  %v9254_v8 = vld [vmem:[%s13601_s2] ss:$0 sm:$0xff] }
  0x4f   : > { %8442 = vset.pattern.permute.xlu0 %v13613_v1 }
  0x50   : > { %653 = vperm.xlu0 %8442, %v495_v17  }
  0x52   : > { %8435 = vset.pattern.permute.xlu1 %v13613_v1 }
  0x53   : > { %633 = vperm.xlu1 %8435, %v491_v18  }
  0x54   : > { %678 = vperm.xlu0 %8442, %v9138_v19  }
  0x57   : > { %8436 = vset.pattern.permute.xlu1 %v8997_v0 }
  0x58   : > { %820 = vperm.xlu1 %8436, %v491_v18   ;;  %683 = vperm.xlu0 %8442, %v9142_v20  }
  0x5c   : > { %824 = vperm.xlu1 %8436, %v492_v15   ;;  %8450 = vset.pattern.permute.xlu0 %v8997_v0 }
  0x5d   : > { %840 = vperm.xlu0 %8450, %v496_v21  }
  0x60   : > { %8437 = vset.pattern.permute.xlu1 %v13613_v1 }
  0x61   : > { %648 = vperm.xlu1 %8437, %v494_v22   ;;  %844 = vperm.xlu0 %8450, %v497_v23  }
  0x65   : > { %8439 = vset.pattern.permute.xlu1 %v8997_v0  ;;  %860 = vperm.xlu0 %8450, %v9142_v20  }
  0x66   : > { %832 = vperm.xlu1 %8439, %v494_v22  }
  0x69   : > { %872 = vperm.xlu0 %8450, %v9153_v24  }
  0x6a   : > { %8440 = vset.pattern.permute.xlu1 %v8999_v9 }
  0x6b   : > { %1016 = vperm.xlu1 %8440, %v491_v18  }
  0x6d   : > { %876 = vperm.xlu0 %8450, %v9158_v25  }
  0x6f   : > { %1024 = vperm.xlu1 %8440, %v493_v16  }
  0x71   : > { %8457 = vset.pattern.permute.xlu0 %v8999_v9 }
  0x72   : > { %1032 = vperm.xlu0 %8457, %v495_v17  }
  0x73   : > { %1028 = vperm.xlu1 %8440, %v494_v22  }
  0x76   : > { %1044 = vperm.xlu0 %8457, %v498_v26  }
  0x77   : > { %8443 = vset.pattern.permute.xlu1 %v13613_v1 }
  0x78   : > { %658 = vperm.xlu1 %8443, %v496_v21  }
  0x7a   : > { %1052 = vperm.xlu0 %8457, %v9138_v19  }
  0x7c   : > { %8444 = vset.pattern.permute.xlu1 %v8997_v0 }
  0x7d   : > { %836 = vperm.xlu1 %8444, %v495_v17  }
  0x7e   : > { %1064 = vperm.xlu0 %8457, %v9167_v27  }
  0x81   : > { %8445 = vset.pattern.permute.xlu1 %v13613_v1 }
  0x82   : > { %663 = vperm.xlu1 %8445, %v497_v23   ;;  %1076 = vperm.xlu0 %8457, %v9172_v28  }
  0x86   : > { %668 = vperm.xlu1 %8445, %v498_v26   ;;  %1084 = vperm.xlu0 %8457, %v9177_v29  }
  0x8a   : > { %8446 = vset.pattern.permute.xlu1 %v8997_v0  ;;  %8465 = vset.pattern.permute.xlu0 %v13613_v1 }
  0x8b   : > { %848 = vperm.xlu1 %8446, %v498_v26   ;;  %693 = vperm.xlu0 %8465, %v9167_v27   ;;  %v9265_v26 = vld [vmem:[%s9097_s15 + $0xf8] sm:$0xff] }
  0x8d   : > { %v789_v30 = vpop.permute.xlu1 %788  ;;  %v594_v31 = vpop.permute.xlu0 %593 }
  0x8e   : > { %v919_v54 = vmul.f32 %v9215_v47, %v789_v30  ;;  %v755_v55 = vmul.f32 %v9218_v48, %v594_v31 }
  0x8f   : > { %8447 = vset.pattern.permute.xlu1 %v8999_v9  ;;  %718 = vperm.xlu0 %8465, %v9177_v29  }
  0x90   : > { %1036 = vperm.xlu1 %8447, %v496_v21   ;;  %v951_v61 = vadd.f32 %v919_v54, %v755_v55 }
  0x91   : > { %v793_v34 = vpop.permute.xlu1 %792  ;;  %v599_v35 = vpop.permute.xlu0 %598 }
  0x92   : > { %v920_v62 = vmul.f32 %v9215_v47, %v793_v34  ;;  %v756_v63 = vmul.f32 %v9218_v48, %v599_v35 }
  0x93   : > { %723 = vperm.xlu0 %8465, %v9187_v33  }
  0x94   : > { %1040 = vperm.xlu1 %8447, %v497_v23   ;;  %v952_v12 = vadd.f32 %v920_v62, %v756_v63 }
  0x95   : > { %v604_v38 = vpop.permute.xlu0 %603 }
  0x96   : > { %v609_v39 = vpop.permute.xlu1 %608  ;;  %v757_v52 = vmul.f32 %v9218_v48, %v604_v38 }
  0x97   : > { %733 = vperm.xlu0 %8465, %v9193_v37   ;;  %v758_v7 = vmul.f32 %v9218_v48, %v609_v39 }
  0x98   : > { %8448 = vset.pattern.permute.xlu1 %v13613_v1 }
  0x99   : > { %673 = vperm.xlu1 %8448, %v9196_v40  }
  0x9a   : > { %v797_v44 = vpop.permute.xlu0 %796 }
  0x9b   : > { %v801_v46 = vpop.permute.xlu1 %800  ;;  %8466 = vset.pattern.permute.xlu0 %v8997_v0  ;;  %v921_v53 = vmul.f32 %v9215_v47, %v797_v44 }
  0x9c   : > { %892 = vperm.xlu0 %8466, %v9187_v33   ;;  %v922_v4 = vmul.f32 %v9215_v47, %v801_v46 }
  0x9d   : > { %8449 = vset.pattern.permute.xlu1 %v8997_v0  ;;  %v953_v60 = vadd.f32 %v921_v53, %v757_v52 }
  0x9e   : > { %852 = vperm.xlu1 %8449, %v9196_v40   ;;  %v9226_v50 = vpop.permute.xlu0 %808  ;;  %v954_v15 = vadd.f32 %v922_v4, %v758_v7 }
  0x9f   : > { %v924_v63 = vmul.f32 %v9215_v47, %v9226_v50 }
  0xa0   : > { %v985_v56 = vpop.permute.xlu1 %984  ;;  %904 = vperm.xlu0 %8466, %v9223_v49  }
  0xa1   : > { %v1115_v58 = vmul.f32 %v9229_v51, %v985_v56 }
  0xa2   : > { %856 = vperm.xlu1 %8449, %v9138_v19   ;;  %v9241_v59 = vpop.permute.xlu0 %812 }
  0xa3   : > { %v1147_v6 = vadd.f32 %v1115_v58, %v951_v61 }
  0xa4   : > { %v993_v2 = vpop.permute.xlu1 %992  ;;  %908 = vperm.xlu0 %8466, %v9237_v57  }
  0xa5   : > { %v1117_v5 = vmul.f32 %v9229_v51, %v993_v2  ;;  %v1185_v18 = vadd.f32 %v9254_v8, %v1147_v6 }
  0xa6   : > { %8451 = vset.pattern.permute.xlu1 %v13613_v1 }
  0xa7   : > { %v1149_v10 = vadd.f32 %v1117_v5, %v953_v60  ;;  %688 = vperm.xlu1 %8451, %v502_v3   ;;  %v989_v11 = vpop.permute.xlu0 %988  ;;  %v1217_v32 = vmax.f32 %v1185_v18, 0.0 }
  0xa8   : > { %v1116_v13 = vmul.f32 %v9229_v51, %v989_v11  ;;  %v997_v14 = vpop.permute.xlu1 %996  ;;  %8471 = vset.pattern.permute.xlu0 %v8999_v9 }
  0xa9   : > { %v1118_v16 = vmul.f32 %v9229_v51, %v997_v14  ;;  %1096 = vperm.xlu0 %8471, %v9193_v37   ;;  %v1187_v19 = vadd.f32 %v9254_v8, %v1149_v10  ;;  %v925_v10 = vmul.f32 %v9215_v47, %v9241_v59 }
  0xaa   : > { %v1148_v17 = vadd.f32 %v1116_v13, %v952_v12 }
  0xab   : > { %v1150_v21 = vadd.f32 %v1118_v16, %v954_v15  ;;  %8452 = vset.pattern.permute.xlu1 %v8997_v0  ;;  %v1001_v22 = vpop.permute.xlu0 %1000  ;;  %v1219_v35 = vmax.f32 %v1187_v19, 0.0 }
  0xac   : > { %864 = vperm.xlu1 %8452, %v502_v3   ;;  %v1186_v23 = vadd.f32 %v9254_v8, %v1148_v17 }
  0xad   : > { %v1188_v30 = vadd.f32 %v9254_v8, %v1150_v21  ;;  %v619_v31 = vpop.permute.xlu1 %618  ;;  %1108 = vperm.xlu0 %8471, %v9265_v26  }
  0xae   : > { %v1218_v34 = vmax.f32 %v1186_v23, 0.0  ;;  %v760_v2 = vmul.f32 %v9218_v48, %v619_v31 }
  0xaf   : > { %v1220_v38 = vmax.f32 %v1188_v30, 0.0  ;;  %v1013_v43 = vpop.permute.xlu0 %1012 }
  0xb0   : > { %8453 = vset.pattern.permute.xlu1 %v8999_v9  ;;  %v1249_v39 = vpack.c.bf16 %v1218_v34, %v1217_v32  ;;  %v1122_v4 = vmul.f32 %v9229_v51, %v1013_v43  ;;  %v956_v11 = vadd.f32 %v924_v63, %v760_v2 }
  0xb1   : > { %1048 = vperm.xlu1 %8453, %v9196_v40   ;;  %v1250_v44 = vpack.c.bf16 %v1220_v38, %v1219_v35  ;;  %v1119_v40 = vmul.f32 %v9229_v51, %v1001_v22 }
  0xb2   : > { %v805_v46 = vpop.permute.xlu1 %804  ;;  %8347 = vmatprep.mubr.msk.bf16.mxu0 %vm1289_vm0, %v1249_v39 }
  0xb3   : > { %8348 = vmatmul.mubr.msk.bf16.vlgmr.msra.gmra.mxu0 %vm1289_vm0, %v1250_v44  ;;  %v923_v58 = vmul.f32 %v9215_v47, %v805_v46 }
  0xb4   : > { %v614_v52 = vpop.permute.xlu0 %613 }
  0xb5   : > { %1056 = vperm.xlu1 %8453, %v9142_v20   ;;  %v759_v56 = vmul.f32 %v9218_v48, %v614_v52 }
  0xb7   : > { %v624_v53 = vpop.permute.xlu1 %623  ;;  %v955_v60 = vadd.f32 %v923_v58, %v759_v56 }
  0xb8   : > { %v639_v55 = vpop.permute.xlu0 %638  ;;  %v761_v12 = vmul.f32 %v9218_v48, %v624_v53 }
  0xb9   : > { %1060 = vperm.xlu1 %8453, %v502_v3   ;;  %v1151_v5 = vadd.f32 %v1119_v40, %v955_v60  ;;  %v764_v56 = vmul.f32 %v9218_v48, %v639_v55 }
  0xba   : > { %v957_v17 = vadd.f32 %v925_v10, %v761_v12  ;;  %v510_v12 = vld [vmem:[%s9097_s15 + $0xd8] sm:$0xff] }
  0xbb   : > { %v629_v54 = vpop.permute.xlu1 %628  ;;  %v1189_v14 = vadd.f32 %v9254_v8, %v1151_v5 }
  0xbc   : > { %v644_v20 = vpop.permute.xlu0 %643  ;;  %v762_v3 = vmul.f32 %v9218_v48, %v629_v54  ;;  %v507_v54 = vld [vmem:[%s9097_s15 + $0xc0] sm:$0xff] }
  0xbd   : > { %8454 = vset.pattern.permute.xlu1 %v13613_v1  ;;  %v1221_v19 = vmax.f32 %v1189_v14, 0.0  ;;  %v765_v55 = vmul.f32 %v9218_v48, %v644_v20 }
  0xbe   : > { %698 = vperm.xlu1 %8454, %v9153_v24  }
  0xc0   : > { %v817_v61 = vpop.permute.xlu1 %816 }
  0xc1   : > { %v926_v62 = vmul.f32 %v9215_v47, %v817_v61  ;;  %v829_v13 = vpop.permute.xlu0 %828 }
  0xc2   : > { %8455 = vset.pattern.permute.xlu1 %v8997_v0 }
  0xc3   : > { %868 = vperm.xlu1 %8455, %v9167_v27   ;;  %v958_v6 = vadd.f32 %v926_v62, %v762_v3  ;;  %v929_v62 = vmul.f32 %v9215_v47, %v829_v13 }
  0xc5   : > { %v1005_v7 = vpop.permute.xlu1 %1004  ;;  %v1154_v15 = vadd.f32 %v1122_v4, %v958_v6  ;;  %v961_v6 = vadd.f32 %v929_v62, %v765_v55 }
  0xc6   : > { %v1120_v50 = vmul.f32 %v9229_v51, %v1005_v7  ;;  %v1021_v30 = vpop.permute.xlu0 %1020 }
  0xc7   : > { %8456 = vset.pattern.permute.xlu1 %v13613_v1  ;;  %v1192_v21 = vadd.f32 %v9254_v8, %v1154_v15  ;;  %v1124_v40 = vmul.f32 %v9229_v51, %v1021_v30 }
  0xc8   : > { %v1152_v27 = vadd.f32 %v1120_v50, %v956_v11  ;;  %703 = vperm.xlu1 %8456, %v9158_v25  }
  0xc9   : > { %v1009_v16 = vpop.permute.xlu1 %1008  ;;  %v1224_v35 = vmax.f32 %v1192_v21, 0.0 }
  0xca   : > { %v1190_v18 = vadd.f32 %v9254_v8, %v1152_v27  ;;  %v1121_v59 = vmul.f32 %v9229_v51, %v1009_v16 }
  0xcb   : > { %v9302_v44 = vpop.permute.xlu0 %653 }
  0xcc   : > { %v1222_v22 = vmax.f32 %v1190_v18, 0.0  ;;  %v1153_v23 = vadd.f32 %v1121_v59, %v957_v17  ;;  %708 = vperm.xlu1 %8456, %v9172_v28  }
  0xce   : > { %v1251_v31 = vpack.c.bf16 %v1222_v22, %v1221_v19  ;;  %v1191_v32 = vadd.f32 %v9254_v8, %v1153_v23  ;;  %v634_v34 = vpop.permute.xlu1 %633 }
  0xcf   : > { %v9307_v52 = vpop.permute.xlu0 %678 }
  0xd0   : > { %v1223_v38 = vmax.f32 %v1191_v32, 0.0  ;;  %8458 = vset.pattern.permute.xlu1 %v8997_v0  ;;  %8351 = vmatprep.mubr.msk.bf16.mxu0 %vm1289_vm0, %v1251_v31 }
  0xd1   : > { %880 = vperm.xlu1 %8458, %v9172_v28  }
  0xd2   : > { %v1252_v39 = vpack.c.bf16 %v1224_v35, %v1223_v38 }
  0xd3   : > { %v821_v43 = vpop.permute.xlu1 %820  ;;  %v9314_v58 = vpop.permute.xlu0 %683 }
  0xd4   : > { %8352 = vmatmul.mubr.msk.bf16.gmra.mxu0 %vm1289_vm0, %v1252_v39  ;;  %v927_v61 = vmul.f32 %v9215_v47, %v821_v43 }
  0xd5   : > { %8459 = vset.pattern.permute.xlu1 %v8999_v9 }
  0xd6   : > { %1068 = vperm.xlu1 %8459, %v9153_v24  }
  0xd7   : > { %v825_v46 = vpop.permute.xlu1 %824 }
  0xd8   : > { %v928_v28 = vmul.f32 %v9215_v47, %v825_v46  ;;  %v841_v2 = vpop.permute.xlu0 %840 }
  0xda   : > { %1072 = vperm.xlu1 %8459, %v9158_v25   ;;  %v960_v60 = vadd.f32 %v928_v28, %v764_v56  ;;  %v763_v25 = vmul.f32 %v9218_v48, %v634_v34  ;;  %v767_v56 = vmul.f32 %v9218_v48, %v9302_v44 }
  0xdc   : > { %v649_v53 = vpop.permute.xlu1 %648  ;;  %v1156_v63 = vadd.f32 %v1124_v40, %v960_v60  ;;  %v959_v4 = vadd.f32 %v927_v61, %v763_v25  ;;  %v845_v14 = vpop.permute.xlu0 %844  ;;  %v932_v25 = vmul.f32 %v9215_v47, %v841_v2  ;;  %v586_v2 = vld [vmem:[%s13604_s5 + $0x1e0] sm:$0xff] }
  0xdd   : > { %v766_v27 = vmul.f32 %v9218_v48, %v649_v53 }
  0xde   : > { %8460 = vset.pattern.permute.xlu1 %v13613_v1  ;;  %v1194_v7 = vadd.f32 %v9254_v8, %v1156_v63 }
  0xdf   : > { %713 = vperm.xlu1 %8460, %v507_v54  }
  0xe0   : > { %v1226_v15 = vmax.f32 %v1194_v7, 0.0  ;;  %v9333_v23 = vpop.permute.xlu0 %860 }
  0xe1   : > { %v833_v24 = vpop.permute.xlu1 %832 }
  0xe2   : > { %v930_v50 = vmul.f32 %v9215_v47, %v833_v24 }
  0xe3   : > { %8461 = vset.pattern.permute.xlu1 %v8997_v0 }
  0xe4   : > { %884 = vperm.xlu1 %8461, %v507_v54   ;;  %v962_v18 = vadd.f32 %v930_v50, %v766_v27  ;;  %v9339_v38 = vpop.permute.xlu0 %872  ;;  %v578_v27 = vld [vmem:[%s13604_s5 + $0x1a0] sm:$0xff] }
  0xe6   : > { %v1017_v3 = vpop.permute.xlu1 %1016 }
  0xe7   : > { %v1123_v5 = vmul.f32 %v9229_v51, %v1017_v3 }
  0xe8   : > { %888 = vperm.xlu1 %8461, %v9177_v29   ;;  %v9343_v43 = vpop.permute.xlu0 %876 }
  0xe9   : > { %v1155_v10 = vadd.f32 %v1123_v5, %v959_v4  ;;  %v933_v4 = vmul.f32 %v9215_v47, %v845_v14 }
  0xea   : > { %v1025_v11 = vpop.permute.xlu1 %1024 }
  0xeb   : > { %v1193_v20 = vadd.f32 %v9254_v8, %v1155_v10  ;;  %v1125_v13 = vmul.f32 %v9229_v51, %v1025_v11 }
  0xec   : > { %8462 = vset.pattern.permute.xlu1 %v13613_v1 }
  0xed   : > { %v1225_v16 = vmax.f32 %v1193_v20, 0.0  ;;  %v1157_v29 = vadd.f32 %v1125_v13, %v961_v6  ;;  %728 = vperm.xlu1 %8462, %v510_v12   ;;  %v1033_v40 = vpop.permute.xlu0 %1032  ;;  %v582_v6 = vld [vmem:[%s13604_s5 + $0x1c0] sm:$0xff] }
  0xee   : > { %v1029_v17 = vpop.permute.xlu1 %1028  ;;  %v1127_v60 = vmul.f32 %v9229_v51, %v1033_v40  ;;  %v7860_v11 = vcombine.high %v582_v6, %v586_v2  ;;  %v558_v40 = vld [vmem:[%s13604_s5 + $0x100] sm:$0xff] }
  0xef   : > { %v1253_v59 = vpack.c.bf16 %v1226_v15, %v1225_v16  ;;  %v1126_v19 = vmul.f32 %v9229_v51, %v1029_v17  ;;  %v1195_v21 = vadd.f32 %v9254_v8, %v1157_v29  ;;  %v574_v15 = vld [vmem:[%s13604_s5 + $0x180] sm:$0xff] }
  0xf0   : > { %1875 = vmatprep.subr.bf16.mxu0 %v7860_v11  ;;  %8379 = vmatprep.subr.bf16.mxu1 %v7860_v11 }
  0xf1   : > { %v1158_v22 = vadd.f32 %v1126_v19, %v962_v18  ;;  %8463 = vset.pattern.permute.xlu1 %v8997_v0  ;;  %8355 = vmatprep.mubr.msk.bf16.mxu0 %vm1289_vm0, %v1253_v59  ;;  %v1227_v32 = vmax.f32 %v1195_v21, 0.0  ;;  %v1045_v61 = vpop.permute.xlu0 %1044  ;;  %v7852_v18 = vcombine.high %v574_v15, %v578_v27  ;;  %v7851_v59 = vcombine.low %v574_v15, %v578_v27 }
  0xf2   : > { %896 = vperm.xlu1 %8463, %v510_v12   ;;  %v1130_v3 = vmul.f32 %v9229_v51, %v1045_v61  ;;  %v773_v15 = vmul.f32 %v9218_v48, %v9314_v58  ;;  %v937_v27 = vmul.f32 %v9215_v47, %v9333_v23 }
  0xf3   : > { %v1196_v30 = vadd.f32 %v9254_v8, %v1158_v22  ;;  %v659_v31 = vpop.permute.xlu1 %658 }
  0xf4   : > { %v768_v55 = vmul.f32 %v9218_v48, %v659_v31  ;;  %v566_v31 = vld [vmem:[%s13604_s5 + $0x140] sm:$0xff] }
  0xf5   : > { %v1228_v34 = vmax.f32 %v1196_v30, 0.0 }
  0xf6   : > { %8464 = vset.pattern.permute.xlu1 %v8999_v9  ;;  %v964_v7 = vadd.f32 %v932_v25, %v768_v55 }
  0xf7   : > { %v1254_v35 = vpack.c.bf16 %v1228_v34, %v1227_v32  ;;  %1080 = vperm.xlu1 %8464, %v507_v54   ;;  %v570_v32 = vld [vmem:[%s13604_s5 + $0x160] sm:$0xff] }
  0xf8   : > { %v837_v39 = vpop.permute.xlu1 %836 }
  0xf9   : > { %8356 = vmatmul.mubr.msk.bf16.gmra.mxu0 %vm1289_vm0, %v1254_v35  ;;  %v931_v28 = vmul.f32 %v9215_v47, %v837_v39 }
  0xfb   : > { %1088 = vperm.xlu1 %8464, %v9187_v33   ;;  %v963_v54 = vadd.f32 %v931_v28, %v767_v56 }
  0xfd   : > { %v664_v46 = vpop.permute.xlu1 %663  ;;  %v1159_v62 = vadd.f32 %v1127_v60, %v963_v54  ;;  %v562_v54 = vld [vmem:[%s13604_s5 + $0x120] sm:$0xff] }
  0xfe   : > { %v769_v10 = vmul.f32 %v9218_v48, %v664_v46  ;;  %v7844_v46 = vcombine.high %v566_v31, %v570_v32  ;;  %v7835_v61 = vcombine.low %v558_v40, %v562_v54 }
  0xff   : > { %1092 = vperm.xlu1 %8464, %v510_v12   ;;  %v7859_v12 = vcombine.low %v582_v6, %v586_v2  ;;  %v1197_v50 = vadd.f32 %v9254_v8, %v1159_v62  ;;  %v546_v62 = vld [vmem:[%s13604_s5 + $0xa0] sm:$0xff]  ;;  %v1053_v2 = vpop.permute.xlu0 %1052 }
 0x100   : > { %v965_v16 = vadd.f32 %v933_v4, %v769_v10  ;;  %v772_v4 = vmul.f32 %v9218_v48, %v9307_v52  ;;  %v534_v6 = vld [vmem:[%s13604_s5 + $0x40] sm:$0xff] }
 0x101   : > { %v669_v53 = vpop.permute.xlu1 %668  ;;  %1876 = vmatpush1.bf16.msra.mxu0 %v7859_v12  ;;  %8387 = vmatpush1.bf16.msra.mxu1 %v7859_v12  ;;  %v1229_v19 = vmax.f32 %v1197_v50, 0.0  ;;  %v526_v52 = vld [vmem:[%s13604_s5] sm:$0xff]  ;;  %v1132_v12 = vmul.f32 %v9229_v51, %v1053_v2 }
 0x102   : > { %v770_v44 = vmul.f32 %v9218_v48, %v669_v53  ;;  %1877 = vmatprep.subr.bf16.mxu0 %v7852_v18  ;;  %8380 = vmatprep.subr.bf16.mxu1 %v7852_v18  ;;  %v7843_v53 = vcombine.low %v566_v31, %v570_v32 }
 0x103   : > { %8467 = vset.pattern.permute.xlu1 %v13613_v1 }
 0x104   : > { %738 = vperm.xlu1 %8467, %v9223_v49  }
 0x105   : > { %1878 = vmatpush1.bf16.msra.mxu0 %v7851_v59  ;;  %8388 = vmatpush1.bf16.msra.mxu1 %v7851_v59 }
 0x106   : > { %v849_v24 = vpop.permute.xlu1 %848  ;;  %1879 = vmatprep.subr.bf16.mxu0 %v7844_v46  ;;  %8381 = vmatprep.subr.bf16.mxu1 %v7844_v46  ;;  %v1065_v46 = vpop.permute.xlu0 %1064 }
 0x107   : > { %v934_v33 = vmul.f32 %v9215_v47, %v849_v24  ;;  %v7836_v24 = vcombine.high %v558_v40, %v562_v54  ;;  %v1135_v2 = vmul.f32 %v9229_v51, %v1065_v46 }
 0x108   : > { %8468 = vset.pattern.permute.xlu1 %v8997_v0 }
 0x109   : > { %900 = vperm.xlu1 %8468, %v9193_v37   ;;  %v966_v63 = vadd.f32 %v934_v33, %v770_v44  ;;  %1880 = vmatpush1.bf16.msra.mxu0 %v7843_v53 }
 0x10a   : > { %8389 = vmatpush1.bf16.msra.mxu1 %v7843_v53  ;;  %1881 = vmatprep.subr.bf16.mxu0 %v7836_v24  ;;  %v9446_v53 = vld [vmem:[%s13604_s5 + $0x1c8] sm:$0xff] }
 0x10b   : > { %v1037_v5 = vpop.permute.xlu1 %1036  ;;  %v1162_v20 = vadd.f32 %v1130_v3, %v966_v63  ;;  %8382 = vmatprep.subr.bf16.mxu1 %v7836_v24 }
 0x10c   : > { %v1128_v37 = vmul.f32 %v9229_v51, %v1037_v5 }
 0x10d   : > { %8469 = vset.pattern.permute.xlu1 %v13613_v1  ;;  %v1200_v21 = vadd.f32 %v9254_v8, %v1162_v20  ;;  %1882 = vmatpush1.bf16.msra.mxu0 %v7835_v61 }
 0x10e   : > { %v1160_v13 = vadd.f32 %v1128_v37, %v964_v7  ;;  %743 = vperm.xlu1 %8469, %v9237_v57   ;;  %8390 = vmatpush1.bf16.msra.mxu1 %v7835_v61  ;;  %v530_v37 = vld [vmem:[%s13604_s5 + $0x20] sm:$0xff] }
 0x10f   : > { %v1041_v14 = vpop.permute.xlu1 %1040  ;;  %v1232_v56 = vmax.f32 %v1200_v21, 0.0  ;;  %v7804_v20 = vcombine.high %v526_v52, %v530_v37 }
 0x110   : > { %v1198_v29 = vadd.f32 %v9254_v8, %v1160_v13  ;;  %v1129_v17 = vmul.f32 %v9229_v51, %v1041_v14  ;;  %v7803_v13 = vcombine.low %v526_v52, %v530_v37  ;;  %v940_v37 = vmul.f32 %v9215_v47, %v9339_v38 }
 0x112   : > { %v1230_v22 = vmax.f32 %v1198_v29, 0.0  ;;  %v1161_v30 = vadd.f32 %v1129_v17, %v965_v16  ;;  %748 = vperm.xlu1 %8469, %v9265_v26  }
 0x114   : > { %v1255_v34 = vpack.c.bf16 %v1230_v22, %v1229_v19  ;;  %v1199_v35 = vadd.f32 %v9254_v8, %v1161_v30  ;;  %v9387_v39 = vpop.permute.xlu1 %673  ;;  %v969_v19 = vadd.f32 %v937_v27, %v773_v15  ;;  %v941_v15 = vmul.f32 %v9215_v47, %v9343_v43 }
 0x115   : > { %v771_v16 = vmul.f32 %v9218_v48, %v9387_v39 }
 0x116   : > { %v1231_v28 = vmax.f32 %v1199_v35, 0.0  ;;  %8470 = vset.pattern.permute.xlu1 %v8997_v0  ;;  %8359 = vmatprep.mubr.msk.bf16.mxu0 %vm1289_vm0, %v1255_v34  ;;  %v550_v0 = vld [vmem:[%s13604_s5 + $0xc0] sm:$0xff] }
 0x117   : > { %912 = vperm.xlu1 %8470, %v9265_v26   ;;  %v554_v26 = vld [vmem:[%s13604_s5 + $0xe0] sm:$0xff] }
 0x118   : > { %v1256_v60 = vpack.c.bf16 %v1232_v56, %v1231_v28  ;;  %v7828_v25 = vcombine.high %v550_v0, %v554_v26  ;;  %v7827_v44 = vcombine.low %v550_v0, %v554_v26  ;;  %v9451_v56 = vld [vmem:[%s13604_s5 + $0x1e8] sm:$0xff] }
 0x119   : > { %v853_v33 = vpop.permute.xlu1 %852  ;;  %v7862_v40 = vcombine.high %v9446_v53, %v9451_v56 }
 0x11a   : > { %8360 = vmatmul.mubr.msk.bf16.gmra.mxu0 %vm1289_vm0, %v1256_v60  ;;  %1883 = vmatprep.subr.bf16.mxu0 %v7828_v25  ;;  %v935_v14 = vmul.f32 %v9215_v47, %v853_v33  ;;  %v7861_v33 = vcombine.low %v9446_v53, %v9451_v56 }
 0x11b   : > { %8472 = vset.pattern.permute.xlu1 %v8999_v9  ;;  %8383 = vmatprep.subr.bf16.mxu1 %v7828_v25  ;;  %v542_v9 = vld [vmem:[%s13604_s5 + $0x80] sm:$0xff]  ;;  %v1077_v25 = vpop.permute.xlu0 %1076 }
 0x11c   : > { %1100 = vperm.xlu1 %8472, %v9223_v49   ;;  %1884 = vmatpush1.bf16.msra.mxu0 %v7827_v44  ;;  %v7820_v63 = vcombine.high %v542_v9, %v546_v62  ;;  %v7819_v49 = vcombine.low %v542_v9, %v546_v62  ;;  %v967_v18 = vadd.f32 %v935_v14, %v771_v16 }
 0x11d   : > { %v857_v55 = vpop.permute.xlu1 %856  ;;  %8391 = vmatpush1.bf16.msra.mxu1 %v7827_v44 }
 0x11e   : > { %1885 = vmatprep.subr.bf16.mxu0 %v7820_v63  ;;  %8384 = vmatprep.subr.bf16.mxu1 %v7820_v63  ;;  %v936_v5 = vmul.f32 %v9215_v47, %v857_v55 }
 0x120   : > { %1104 = vperm.xlu1 %8472, %v9237_v57   ;;  %v538_v57 = vld [vmem:[%s13604_s5 + $0x60] sm:$0xff]  ;;  %1886 = vmatpush1.bf16.msra.mxu0 %v7819_v49  ;;  %v968_v11 = vadd.f32 %v936_v5, %v772_v4 }
 0x121   : > { %v7812_v7 = vcombine.high %v534_v6, %v538_v57  ;;  %v7811_v10 = vcombine.low %v534_v6, %v538_v57  ;;  %8392 = vmatpush1.bf16.msra.mxu1 %v7819_v49  ;;  %v1085_v49 = vpop.permute.xlu0 %1084 }
 0x122   : > { %v689_v3 = vpop.permute.xlu1 %688  ;;  %v1164_v29 = vadd.f32 %v1132_v12, %v968_v11 }
 0x123   : > { %1887 = vmatprep.subr.bf16.mxu0 %v7812_v7  ;;  %8385 = vmatprep.subr.bf16.mxu1 %v7812_v7  ;;  %v774_v34 = vmul.f32 %v9218_v48, %v689_v3 }
 0x124   : > { %1888 = vmatpush1.bf16.msra.mxu0 %v7811_v10  ;;  %v1202_v21 = vadd.f32 %v9254_v8, %v1164_v29 }
 0x125   : > { %1889 = vmatprep.subr.bf16.mxu0 %v7804_v20  ;;  %8393 = vmatpush1.bf16.msra.mxu1 %v7811_v10  ;;  %v694_v4 = vpop.permute.xlu0 %693 }
 0x126   : > { %8386 = vmatprep.subr.bf16.mxu1 %v7804_v20  ;;  %v1234_v32 = vmax.f32 %v1202_v21, 0.0  ;;  %v775_v57 = vmul.f32 %v9218_v48, %v694_v4 }
 0x127   : > { %v865_v50 = vpop.permute.xlu1 %864 }
 0x128   : > { %1890 = vmatpush1.bf16.msra.mxu0 %v7803_v13  ;;  %v938_v58 = vmul.f32 %v9215_v47, %v865_v50  ;;  %v1138_v50 = vmul.f32 %v9229_v51, %v1077_v25 }
 0x129   : > { %8394 = vmatpush1.bf16.msra.mxu1 %v7803_v13  ;;  %2068 = vmatprep.subr.bf16.mxu0 %v7862_v40 }
 0x12a   : > { %v970_v54 = vadd.f32 %v938_v58, %v774_v34 }
 0x12c   : > { %v1049_v17 = vpop.permute.xlu1 %1048 }
 0x12d   : > { %v1131_v59 = vmul.f32 %v9229_v51, %v1049_v17 }
 0x12f   : > { %v1163_v22 = vadd.f32 %v1131_v59, %v967_v18 }
 0x130   : > { %v1057_v30 = vpop.permute.xlu1 %1056 }
 0x131   : > { %v1201_v31 = vadd.f32 %v9254_v8, %v1163_v22  ;;  %v1133_v23 = vmul.f32 %v9229_v51, %v1057_v30 }
 0x133   : > { %v1233_v35 = vmax.f32 %v1201_v31, 0.0  ;;  %v1165_v39 = vadd.f32 %v1133_v23, %v969_v19 }
 0x134   : > { %v1061_v28 = vpop.permute.xlu1 %1060 }
 0x135   : > { %v1257_v60 = vpack.c.bf16 %v1234_v32, %v1233_v35  ;;  %v1134_v24 = vmul.f32 %v9229_v51, %v1061_v28  ;;  %v1203_v61 = vadd.f32 %v9254_v8, %v1165_v39  ;;  %v719_v28 = vpop.permute.xlu0 %718 }
 0x137   : > { %v1166_v0 = vadd.f32 %v1134_v24, %v970_v54  ;;  %8363 = vmatprep.mubr.msk.bf16.mxu0 %vm1289_vm0, %v1257_v60  ;;  %v1235_v44 = vmax.f32 %v1203_v61, 0.0 }
 0x139   : > { %v1204_v26 = vadd.f32 %v9254_v8, %v1166_v0  ;;  %v699_v55 = vpop.permute.xlu1 %698  ;;  %v724_v54 = vpop.permute.xlu0 %723 }
 0x13a   : > { %v776_v11 = vmul.f32 %v9218_v48, %v699_v55  ;;  %v781_v4 = vmul.f32 %v9218_v48, %v724_v54 }
 0x13b   : > { %v1236_v9 = vmax.f32 %v1204_v26, 0.0  ;;  %v780_v26 = vmul.f32 %v9218_v48, %v719_v28 }
 0x13c   : > { %v972_v27 = vadd.f32 %v940_v37, %v776_v11 }
 0x13d   : > { %v1258_v62 = vpack.c.bf16 %v1236_v9, %v1235_v44  ;;  %v734_v61 = vpop.permute.xlu0 %733  ;;  %v1140_v9 = vmul.f32 %v9229_v51, %v1085_v49 }
 0x13e   : > { %v869_v63 = vpop.permute.xlu1 %868 }
 0x13f   : > { %8364 = vmatmul.mubr.msk.bf16.gmra.mxu0 %vm1289_vm0, %v1258_v62  ;;  %v939_v6 = vmul.f32 %v9215_v47, %v869_v63 }
 0x141   : > { %v971_v7 = vadd.f32 %v939_v6, %v775_v57  ;;  %v893_v44 = vpop.permute.xlu0 %892 }
 0x143   : > { %v704_v3 = vpop.permute.xlu1 %703  ;;  %v1167_v20 = vadd.f32 %v1135_v2, %v971_v7 }
 0x144   : > { %v777_v16 = vmul.f32 %v9218_v48, %v704_v3 }
 0x145   : > { %v1205_v17 = vadd.f32 %v9254_v8, %v1167_v20 }
 0x146   : > { %v973_v19 = vadd.f32 %v941_v15, %v777_v16 }
 0x147   : > { %v709_v5 = vpop.permute.xlu1 %708  ;;  %v1237_v30 = vmax.f32 %v1205_v17, 0.0 }
 0x148   : > { %v778_v12 = vmul.f32 %v9218_v48, %v709_v5  ;;  %v945_v5 = vmul.f32 %v9215_v47, %v893_v44 }
 0x14c   : > { %v881_v10 = vpop.permute.xlu1 %880 }
 0x14d   : > { %v942_v52 = vmul.f32 %v9215_v47, %v881_v10 }
 0x14f   : > { %v974_v13 = vadd.f32 %v942_v52, %v778_v12  ;;  %v977_v52 = vadd.f32 %v945_v5, %v781_v4  ;;  %v525_v5 = vld [vmem:[%s13603_s4] sm:$0x1] }
 0x151   : > { %v1069_v14 = vpop.permute.xlu1 %1068  ;;  %v1170_v38 = vadd.f32 %v1138_v50, %v974_v13 }
 0x152   : > { %v1136_v29 = vmul.f32 %v9229_v51, %v1069_v14 }
 0x153   : > { %v1208_v58 = vadd.f32 %v9254_v8, %v1170_v38 }
 0x154   : > { %v1168_v18 = vadd.f32 %v1136_v29, %v972_v27 }
 0x155   : > { %v1073_v59 = vpop.permute.xlu1 %1072  ;;  %v1240_v35 = vmax.f32 %v1208_v58, 0.0 }
 0x156   : > { %v1206_v21 = vadd.f32 %v9254_v8, %v1168_v18  ;;  %v1137_v22 = vmul.f32 %v9229_v51, %v1073_v59 }
 0x158   : > { %v1238_v31 = vmax.f32 %v1206_v21, 0.0  ;;  %v1169_v43 = vadd.f32 %v1137_v22, %v973_v19 }
 0x15a   : > { %v1259_v23 = vpack.c.bf16 %v1238_v31, %v1237_v30  ;;  %v1207_v32 = vadd.f32 %v9254_v8, %v1169_v43  ;;  %v714_v34 = vpop.permute.xlu1 %713  ;;  %v905_v30 = vpop.permute.xlu0 %904 }
 0x15b   : > { %v779_v63 = vmul.f32 %v9218_v48, %v714_v34 }
 0x15c   : > { %v1239_v39 = vmax.f32 %v1207_v32, 0.0  ;;  %8367 = vmatprep.mubr.msk.bf16.mxu0 %vm1289_vm0, %v1259_v23 }
 0x15e   : > { %v1260_v46 = vpack.c.bf16 %v1240_v35, %v1239_v39  ;;  %v909_v31 = vpop.permute.xlu0 %908  ;;  %v783_v35 = vmul.f32 %v9218_v48, %v734_v61 }
 0x15f   : > { %v885_v40 = vpop.permute.xlu1 %884 }
 0x160   : > { %8368 = vmatmul.mubr.msk.bf16.gmra.mxu0 %vm1289_vm0, %v1260_v46  ;;  %v943_v62 = vmul.f32 %v9215_v47, %v885_v40 }
 0x162   : > { %v975_v57 = vadd.f32 %v943_v62, %v779_v63  ;;  %v1097_v34 = vpop.permute.xlu0 %1096  ;;  %v949_v62 = vmul.f32 %v9215_v47, %v909_v31 }
 0x163   : > { %v889_v60 = vpop.permute.xlu1 %888  ;;  %v1143_v46 = vmul.f32 %v9229_v51, %v1097_v34  ;;  %v571_v34 = vld [vmem:[%s13604_s5 + $0x168] sm:$0xff] }
 0x164   : > { %v944_v0 = vmul.f32 %v9215_v47, %v889_v60  ;;  %v948_v60 = vmul.f32 %v9215_v47, %v905_v30 }
 0x166   : > { %v976_v25 = vadd.f32 %v944_v0, %v780_v26  ;;  %v1109_v54 = vpop.permute.xlu0 %1108 }
 0x167   : > { %v1146_v44 = vmul.f32 %v9229_v51, %v1109_v54  ;;  %v563_v54 = vld [vmem:[%s13604_s5 + $0x128] sm:$0xff] }
 0x168   : > { %v729_v24 = vpop.permute.xlu1 %728  ;;  %v1172_v3 = vadd.f32 %v1140_v9, %v976_v25 }
 0x169   : > { %v782_v20 = vmul.f32 %v9218_v48, %v729_v24 }
 0x16a   : > { %v1210_v7 = vadd.f32 %v9254_v8, %v1172_v3 }
 0x16c   : > { %v1242_v50 = vmax.f32 %v1210_v7, 0.0 }
 0x16d   : > { %v897_v55 = vpop.permute.xlu1 %896 }
 0x16e   : > { %v946_v49 = vmul.f32 %v9215_v47, %v897_v55 }
 0x170   : > { %v978_v27 = vadd.f32 %v946_v49, %v782_v20  ;;  %v1515_v49 = vpack.c.bf16 %v525_v5, %v525_v5 }
 0x172   : > { %v1081_v6 = vpop.permute.xlu1 %1080 }
 0x173   : > { %v1139_v2 = vmul.f32 %v9229_v51, %v1081_v6  ;;  %v8349_v26 = vpop.f32.mrf.mxu0 }
 0x175   : > { %v1171_v10 = vadd.f32 %v1139_v2, %v975_v57  ;;  %v1372_v4 = vpop.f32.mrf.mxu0 }
 0x176   : > { %v1089_v37 = vpop.permute.xlu1 %1088 }
 0x177   : > { %v1209_v11 = vadd.f32 %v9254_v8, %v1171_v10  ;;  %v1141_v12 = vmul.f32 %v9229_v51, %v1089_v37 }
 0x179   : > { %v1241_v13 = vmax.f32 %v1209_v11, 0.0  ;;  %v1173_v14 = vadd.f32 %v1141_v12, %v977_v52 }
 0x17a   : > { %v1093_v15 = vpop.permute.xlu1 %1092 }
 0x17b   : > { %v1261_v16 = vpack.c.bf16 %v1242_v50, %v1241_v13  ;;  %v1142_v29 = vmul.f32 %v9229_v51, %v1093_v15  ;;  %v1211_v17 = vadd.f32 %v9254_v8, %v1173_v14  ;;  %v1517_v15 = vpack.i.b16 %v1515_v49, %v1515_v49 }
 0x17d   : > { %v1174_v38 = vadd.f32 %v1142_v29, %v978_v27  ;;  %8371 = vmatprep.mubr.msk.bf16.mxu0 %vm1289_vm0, %v1261_v16  ;;  %v1243_v19 = vmax.f32 %v1211_v17, 0.0 }
 0x17f   : > { %v1212_v18 = vadd.f32 %v9254_v8, %v1174_v38  ;;  %v739_v59 = vpop.permute.xlu1 %738 }
 0x180   : > { %v784_v24 = vmul.f32 %v9218_v48, %v739_v59  ;;  %v575_v59 = vld [vmem:[%s13604_s5 + $0x188] sm:$0xff] }
 0x181   : > { %v1244_v21 = vmax.f32 %v1212_v18, 0.0 }
 0x182   : > { %v980_v61 = vadd.f32 %v948_v60, %v784_v24 }
 0x183   : > { %v1262_v22 = vpack.c.bf16 %v1244_v21, %v1243_v19  ;;  %v579_v19 = vld [vmem:[%s13604_s5 + $0x1a8] sm:$0xff]  ;;  %v9537_v21 = vld [vmem:[%s13604_s5 + $0x1d0] sm:$0xff] }
 0x184   : > { %v901_v58 = vpop.permute.xlu1 %900  ;;  %v7854_v31 = vcombine.high %v575_v59, %v579_v19 }
 0x185   : > { %8372 = vmatmul.mubr.msk.bf16.gmra.mxu0 %vm1289_vm0, %v1262_v22  ;;  %v947_v32 = vmul.f32 %v9215_v47, %v901_v58  ;;  %v9542_v22 = vld [vmem:[%s13604_s5 + $0x1f0] sm:$0xff] }
 0x187   : > { %v979_v39 = vadd.f32 %v947_v32, %v783_v35  ;;  %v567_v32 = vld [vmem:[%s13604_s5 + $0x148] sm:$0xff]  ;;  %v7853_v35 = vcombine.low %v575_v59, %v579_v19 }
 0x188   : > { %v7845_v60 = vcombine.low %v567_v32, %v571_v34 }
 0x189   : > { %v744_v43 = vpop.permute.xlu1 %743  ;;  %v1175_v25 = vadd.f32 %v1143_v46, %v979_v39  ;;  %v7846_v46 = vcombine.high %v567_v32, %v571_v34  ;;  %v564_v32 = vld [vmem:[%s13604_s5 + $0x130] sm:$0xff]  ;;  %v577_v34 = vld [vmem:[%s13604_s5 + $0x198] sm:$0xff] }
 0x18a   : > { %v785_v63 = vmul.f32 %v9218_v48, %v744_v43  ;;  %v7864_v43 = vcombine.high %v9537_v21, %v9542_v22 }
 0x18b   : > { %v1213_v6 = vadd.f32 %v9254_v8, %v1175_v25 }
 0x18c   : > { %v981_v10 = vadd.f32 %v949_v62, %v785_v63  ;;  %2261 = vmatprep.subr.bf16.mxu1 %v7864_v43 }
 0x18d   : > { %v749_v23 = vpop.permute.xlu1 %748 }
 0x18e   : > { %v786_v0 = vmul.f32 %v9218_v48, %v749_v23  ;;  %v1245_v48 = vmax.f32 %v1213_v6, 0.0 }
 0x192   : > { %v913_v28 = vpop.permute.xlu1 %912 }
 0x193   : > { %v950_v40 = vmul.f32 %v9215_v47, %v913_v28  ;;  %v8350_v47 = vpop.f32.mrf.mxu0 }
 0x194   : > { %v1500_v30 = vpack.c.bf16 %v8350_v47, %v8349_v26 }
 0x195   : > { %v982_v55 = vadd.f32 %v950_v40, %v786_v0  ;;  %v1375_v14 = vpop.f32.mrf.mxu0  ;;  %v559_v40 = vld [vmem:[%s13604_s5 + $0x108] sm:$0xff] }
 0x196   : > { %v1499_v29 = vpack.c.bf16 %v1375_v14, %v1372_v4  ;;  %v7838_v56 = vcombine.high %v559_v40, %v563_v54  ;;  %v555_v0 = vld [vmem:[%s13604_s5 + $0xe8] sm:$0xff]  ;;  %v7837_v26 = vcombine.low %v559_v40, %v563_v54  ;;  %v556_v54 = vld [vmem:[%s13604_s5 + $0xf0] sm:$0xff] }
 0x197   : > { %v1101_v9 = vpop.permute.xlu1 %1100  ;;  %v1178_v57 = vadd.f32 %v1146_v44, %v982_v55  ;;  %v9520_v38 = vpop.f32.mrf.mxu0 }
 0x198   : > { %v1144_v3 = vmul.f32 %v9229_v51, %v1101_v9  ;;  %v543_v9 = vld [vmem:[%s13604_s5 + $0x88] sm:$0xff] }
 0x199   : > { %v1216_v11 = vadd.f32 %v9254_v8, %v1178_v57  ;;  %v535_v57 = vld [vmem:[%s13604_s5 + $0x48] sm:$0xff] }
 0x19a   : > { %v1176_v2 = vadd.f32 %v1144_v3, %v980_v61  ;;  %v547_v61 = vld [vmem:[%s13604_s5 + $0xa8] sm:$0xff] }
 0x19b   : > { %v1105_v7 = vpop.permute.xlu1 %1104  ;;  %v1248_v27 = vmax.f32 %v1216_v11, 0.0  ;;  %v7822_v5 = vcombine.high %v543_v9, %v547_v61 }
 0x19c   : > { %v1214_v52 = vadd.f32 %v9254_v8, %v1176_v2  ;;  %v1145_v37 = vmul.f32 %v9229_v51, %v1105_v7  ;;  %v9523_v51 = vrot.slane %v1517_v15, %v9203_v42  ;;  %v539_v2 = vld [vmem:[%s13604_s5 + $0x68] sm:$0xff] }
 0x19d   : > { %v7813_v15 = vcombine.low %v535_v57, %v539_v2 }
 0x19e   : > { %v1246_v12 = vmax.f32 %v1214_v52, 0.0  ;;  %v1177_v50 = vadd.f32 %v1145_v37, %v981_v10  ;;  %v1523_v18 = vadd.bf16 %v9523_v51, %v1499_v29  ;;  %v1524_v39 = vadd.bf16 %v9523_v51, %v1500_v30  ;;  %v576_v52 = vld [vmem:[%s13604_s5 + $0x190] sm:$0xff] }
 0x19f   : > { %v7821_v10 = vcombine.low %v543_v9, %v547_v61  ;;  %v580_v37 = vld [vmem:[%s13604_s5 + $0x1b0] sm:$0xff] }
 0x1a0   : > { %v1263_v20 = vpack.c.bf16 %v1246_v12, %v1245_v48  ;;  %v1215_v13 = vadd.f32 %v9254_v8, %v1177_v50  ;;  %v1388_v8 = vpop.f32.mrf.mxu0  ;;  %v9545_v58 = vmax.bf16 %v13613_v1, %v1523_v18  ;;  %v9568_v24 = vmax.bf16 %v13613_v1, %v1524_v39  ;;  %v527_v12 = vld [vmem:[%s13604_s5 + $0x8] sm:$0xff]  ;;  %v585_v18 = vld [vmem:[%s13604_s5 + $0x1d8] sm:$0xff]  ;;  %v544_v61 = vld [vmem:[%s13604_s5 + $0x90] sm:$0xff] }
 0x1a1   : > { %v7814_v48 = vcombine.high %v535_v57, %v539_v2  ;;  %v531_v50 = vld [vmem:[%s13604_s5 + $0x28] sm:$0xff]  ;;  %v7856_v14 = vcombine.high %v576_v52, %v580_v37  ;;  %v7855_v59 = vcombine.low %v576_v52, %v580_v37  ;;  %v553_v2 = vld [vmem:[%s13604_s5 + $0xd8] sm:$0xff] }
 0x1a2   : > { %v1247_v16 = vmax.f32 %v1215_v13, 0.0  ;;  %8375 = vmatprep.mubr.msk.bf16.mxu0 %vm1289_vm0, %v1263_v20  ;;  %v8354_v23 = vpop.f32.mrf.mxu0  ;;  %v7863_v20 = vcombine.low %v9537_v21, %v9542_v22  ;;  %v7805_v21 = vcombine.low %v527_v12, %v531_v50 }
 0x1a3   : > { %v1502_v3 = vpack.c.bf16 %v8354_v23, %v9520_v38  ;;  %v7806_v38 = vcombine.high %v527_v12, %v531_v50  ;;  %v560_v23 = vld [vmem:[%s13604_s5 + $0x110] sm:$0xff] }
 0x1a4   : > { %v1264_v17 = vpack.c.bf16 %v1248_v27, %v1247_v16  ;;  %v1391_v28 = vpop.f32.mrf.mxu0  ;;  %v568_v27 = vld [vmem:[%s13604_s5 + $0x150] sm:$0xff]  ;;  %v7839_v39 = vcombine.low %v560_v23, %v564_v32 }
 0x1a5   : > { %v1501_v53 = vpack.c.bf16 %v1391_v28, %v1388_v8  ;;  %v1526_v47 = vadd.bf16 %v9523_v51, %v1502_v3  ;;  %v572_v16 = vld [vmem:[%s13604_s5 + $0x170] sm:$0xff]  ;;  %v589_v8 = vld [vmem:[%s13604_s5 + $0x1f8] sm:$0xff] }
 0x1a6   : > { %8376 = vmatmul.mubr.msk.bf16.gmra.mxu0 %vm1289_vm0, %v1264_v17  ;;  %v7848_v19 = vcombine.high %v568_v27, %v572_v16  ;;  %v7866_v30 = vcombine.high %v585_v18, %v589_v8  ;;  %v552_v28 = vld [vmem:[%s13604_s5 + $0xd0] sm:$0xff]  ;;  %v7865_v40 = vcombine.low %v585_v18, %v589_v8 }
 0x1a7   : > { %1907 = vmatprep.mubr.bf16.mxu0 %v13613_v1  ;;  %v1525_v25 = vadd.bf16 %v9523_v51, %v1501_v53  ;;  %v9623_v29 = vmax.bf16 %v13613_v1, %v1526_v47  ;;  %v7831_v53 = vcombine.low %v552_v28, %v556_v54 }
 0x1a9   : > { %v9587_v4 = vmax.bf16 %v13613_v1, %v1525_v25 }
 0x1ae   : > { %1908 = vmatmul.mubr.bf16.vlgmr.msra.gmra.mxu0 %v9545_v58 }
 0x1af   : > { %1917 = vmatprep.mubr.bf16.mxu0 %v13613_v1  ;;  %2069 = vmatpush1.bf16.msra.mxu0 %v7861_v33  ;;  %v551_v33 = vld [vmem:[%s13604_s5 + $0xc8] sm:$0xff] }
 0x1b0   : > { %2070 = vmatprep.subr.bf16.mxu0 %v7854_v31  ;;  %v7830_v55 = vcombine.high %v551_v33, %v555_v0  ;;  %v7829_v63 = vcombine.low %v551_v33, %v555_v0  ;;  %v7847_v31 = vcombine.low %v568_v27, %v572_v16  ;;  %v569_v33 = vld [vmem:[%s13604_s5 + $0x158] sm:$0xff] }
 0x1b1   : > { %v573_v0 = vld [vmem:[%s13604_s5 + $0x178] sm:$0xff] }
 0x1b2   : > { %v7850_v25 = vcombine.high %v569_v33, %v573_v0  ;;  %v537_v27 = vld [vmem:[%s13604_s5 + $0x58] sm:$0xff] }
 0x1b3   : > { %2071 = vmatpush1.bf16.msra.mxu0 %v7853_v35  ;;  %v581_v35 = vld [vmem:[%s13604_s5 + $0x1b8] sm:$0xff] }
 0x1b4   : > { %2072 = vmatprep.subr.bf16.mxu0 %v7846_v46  ;;  %v7840_v46 = vcombine.high %v560_v23, %v564_v32  ;;  %v541_v16 = vld [vmem:[%s13604_s5 + $0x78] sm:$0xff]  ;;  %v528_v32 = vld [vmem:[%s13604_s5 + $0x10] sm:$0xff] }
 0x1b5   : > { %v7818_v18 = vcombine.high %v537_v27, %v541_v16  ;;  %v7817_v8 = vcombine.low %v537_v27, %v541_v16  ;;  %v533_v23 = vld [vmem:[%s13604_s5 + $0x38] sm:$0xff] }
 0x1b6   : > { %1918 = vmatmul.mubr.bf16.gmra.mxu0 %v9568_v24 }
 0x1b7   : > { %1927 = vmatprep.mubr.bf16.mxu0 %v13613_v1  ;;  %2073 = vmatpush1.bf16.msra.mxu0 %v7845_v60  ;;  %v7858_v60 = vcombine.high %v577_v34, %v581_v35 }
 0x1b8   : > { %2074 = vmatprep.subr.bf16.mxu0 %v7838_v56  ;;  %v7832_v56 = vcombine.high %v552_v28, %v556_v54 }
 0x1b9   : > { %v8357_v44 = vpop.f32.mrf.mxu0 }
 0x1bb   : > { %v1404_v62 = vpop.f32.mrf.mxu0  ;;  %2075 = vmatpush1.bf16.msra.mxu0 %v7837_v26  ;;  %v7857_v26 = vcombine.low %v577_v34, %v581_v35 }
 0x1bc   : > { %2076 = vmatprep.subr.bf16.mxu0 %v7830_v55  ;;  %v561_v55 = vld [vmem:[%s13604_s5 + $0x118] sm:$0xff] }
 0x1bd   : > { %v8358_v6 = vpop.f32.mrf.mxu0 }
 0x1be   : > { %v1504_v7 = vpack.c.bf16 %v8358_v6, %v8357_v44  ;;  %1928 = vmatmul.mubr.bf16.gmra.mxu0 %v9587_v4  ;;  %v565_v44 = vld [vmem:[%s13604_s5 + $0x138] sm:$0xff] }
 0x1bf   : > { %1937 = vmatprep.mubr.bf16.mxu0 %v13613_v1  ;;  %2077 = vmatpush1.bf16.msra.mxu0 %v7829_v63  ;;  %v1407_v11 = vpop.f32.mrf.mxu0  ;;  %v7849_v63 = vcombine.low %v569_v33, %v573_v0  ;;  %v7842_v57 = vcombine.high %v561_v55, %v565_v44  ;;  %v7841_v52 = vcombine.low %v561_v55, %v565_v44  ;;  %v8479_v33 = vld [vmem:[%s13607_s8 + $0xe4] ss:$16 sps:$4 sm:$0xff]  }
 0x1c0   : > { %v1528_v49 = vadd.bf16 %v9523_v51, %v1504_v7  ;;  %2078 = vmatprep.subr.bf16.mxu0 %v7822_v5  ;;  %v1503_v17 = vpack.c.bf16 %v1407_v11, %v1404_v62  ;;  %v548_v62 = vld [vmem:[%s13604_s5 + $0xb0] sm:$0xff]  ;;  %v557_v7 = vld [vmem:[%s13604_s5 + $0xf8] sm:$0xff] }
 0x1c1   : > { %v7823_v3 = vcombine.low %v544_v61, %v548_v62  ;;  %v7824_v5 = vcombine.high %v544_v61, %v548_v62  ;;  %v7834_v47 = vcombine.high %v553_v2, %v557_v7  ;;  %v549_v11 = vld [vmem:[%s13604_s5 + $0xb8] sm:$0xff]  ;;  %v7833_v50 = vcombine.low %v553_v2, %v557_v7 }
 0x1c2   : > { %v9614_v13 = vmax.bf16 %v13613_v1, %v1528_v49  ;;  %v1527_v22 = vadd.bf16 %v9523_v51, %v1503_v17 }
 0x1c3   : > { %2079 = vmatpush1.bf16.msra.mxu0 %v7821_v10 }
 0x1c4   : > { %1958 = vmatmul.mubr.bf16.vlgmr.msra.gmra.mxu1 %v9614_v13  ;;  %2080 = vmatprep.subr.bf16.mxu0 %v7814_v48  ;;  %v9637_v43 = vmax.bf16 %v13613_v1, %v1527_v22  ;;  %v545_v48 = vld [vmem:[%s13604_s5 + $0x98] sm:$0xff] }
 0x1c5   : > { %1967 = vmatprep.mubr.bf16.mxu1 %v13613_v1  ;;  %2262 = vmatpush1.bf16.msra.mxu1 %v7863_v20  ;;  %v7825_v17 = vcombine.low %v545_v48, %v549_v11 }
 0x1c6   : > { %1938 = vmatmul.mubr.bf16.gmra.mxu0 %v9623_v29  ;;  %2263 = vmatprep.subr.bf16.mxu1 %v7856_v14 }
 0x1c7   : > { %1947 = vmatprep.mubr.bf16.mxu0 %v13613_v1  ;;  %2081 = vmatpush1.bf16.msra.mxu0 %v7813_v15  ;;  %v7826_v15 = vcombine.high %v545_v48, %v549_v11 }
 0x1c8   : > { %2082 = vmatprep.subr.bf16.mxu0 %v7806_v38 }
 0x1c9   : > { %2264 = vmatpush1.bf16.msra.mxu1 %v7855_v59 }
 0x1ca   : > { %2265 = vmatprep.subr.bf16.mxu1 %v7848_v19  ;;  %v536_v19 = vld [vmem:[%s13604_s5 + $0x50] sm:$0xff] }
 0x1cb   : > { %2083 = vmatpush1.bf16.msra.mxu0 %v7805_v21  ;;  %v540_v21 = vld [vmem:[%s13604_s5 + $0x70] sm:$0xff] }
 0x1cc   : > { %2454 = vmatprep.subr.bf16.mxu0 %v7866_v30  ;;  %v7815_v22 = vcombine.low %v536_v19, %v540_v21  ;;  %v7816_v30 = vcombine.high %v536_v19, %v540_v21 }
 0x1cd   : > { %2266 = vmatpush1.bf16.msra.mxu1 %v7847_v31  ;;  %v529_v31 = vld [vmem:[%s13604_s5 + $0x18] sm:$0xff] }
 0x1ce   : > { %1948 = vmatmul.mubr.bf16.gmra.mxu0 %v9637_v43  ;;  %2267 = vmatprep.subr.bf16.mxu1 %v7840_v46  ;;  %v7809_v34 = vcombine.low %v529_v31, %v533_v23  ;;  %v7810_v35 = vcombine.high %v529_v31, %v533_v23 }
 0x1cf   : > { %2100 = vmatprep.mubr.bf16.mxu0 %v13613_v1 }
 0x1d1   : > { %2268 = vmatpush1.bf16.msra.mxu1 %v7839_v39  ;;  %v532_v39 = vld [vmem:[%s13604_s5 + $0x30] sm:$0xff] }
 0x1d2   : > { %2269 = vmatprep.subr.bf16.mxu1 %v7832_v56  ;;  %v7807_v46 = vcombine.low %v528_v32, %v532_v39  ;;  %v7808_v28 = vcombine.high %v528_v32, %v532_v39 }
 0x1d5   : > { %2270 = vmatpush1.bf16.msra.mxu1 %v7831_v53 }
 0x1d6   : > { %2101 = vmatmul.mubr.bf16.vlgmr.msra.gmra.mxu0 %v9545_v58  ;;  %2271 = vmatprep.subr.bf16.mxu1 %v7824_v5 }
 0x1d7   : > { %2110 = vmatprep.mubr.bf16.mxu0 %v13613_v1  ;;  %2455 = vmatpush1.bf16.msra.mxu0 %v7865_v40 }
 0x1d8   : > { %2456 = vmatprep.subr.bf16.mxu0 %v7858_v60 }
 0x1d9   : > { %2272 = vmatpush1.bf16.msra.mxu1 %v7823_v3 }
 0x1da   : > { %v8361_v9 = vpop.f32.mrf.mxu0  ;;  %2273 = vmatprep.subr.bf16.mxu1 %v7816_v30 }
 0x1db   : > { %2457 = vmatpush1.bf16.msra.mxu0 %v7857_v26  ;;  %v8482_v26 = vld [vmem:[%s13607_s8 + $0x2e4] ss:$16 sps:$4 sm:$0xff]  }
 0x1dc   : > { %v1420_v6 = vpop.f32.mrf.mxu0  ;;  %2458 = vmatprep.subr.bf16.mxu0 %v7850_v25 }
 0x1dd   : > { %2274 = vmatpush1.bf16.msra.mxu1 %v7815_v22 }
 0x1de   : > { %v8362_v10 = vpop.f32.mrf.mxu0  ;;  %2111 = vmatmul.mubr.bf16.gmra.mxu0 %v9568_v24  ;;  %2275 = vmatprep.subr.bf16.mxu1 %v7808_v28 }
 0x1df   : > { %2120 = vmatprep.mubr.bf16.mxu0 %v13613_v1  ;;  %2459 = vmatpush1.bf16.msra.mxu0 %v7849_v63  ;;  %v1506_v20 = vpack.c.bf16 %v8362_v10, %v8361_v9 }
 0x1e0   : > { %v1423_v37 = vpop.f32.mrf.mxu0  ;;  %2460 = vmatprep.subr.bf16.mxu0 %v7842_v57 }
 0x1e1   : > { %v1505_v49 = vpack.c.bf16 %v1423_v37, %v1420_v6  ;;  %v1530_v38 = vadd.bf16 %v9523_v51, %v1506_v20  ;;  %2276 = vmatpush1.bf16.msra.mxu1 %v7807_v46 }
 0x1e2   : > { %4672 = vmatprep.subr.bf16.mxu1 %v8479_v33 }
 0x1e3   : > { %v1529_v12 = vadd.bf16 %v9523_v51, %v1505_v49  ;;  %2461 = vmatpush1.bf16.msra.mxu0 %v7841_v52  ;;  %v9709_v59 = vmax.bf16 %v13613_v1, %v1530_v38 }
 0x1e4   : > { %2462 = vmatprep.subr.bf16.mxu0 %v7834_v47 }
 0x1e5   : > { %v9695_v14 = vmax.bf16 %v13613_v1, %v1529_v12 }
 0x1e6   : > { %2121 = vmatmul.mubr.bf16.gmra.mxu0 %v9587_v4 }
 0x1e7   : > { %1968 = vmatmul.mubr.bf16.gmra.mxu1 %v9695_v14  ;;  %2130 = vmatprep.mubr.bf16.mxu0 %v13613_v1 }
 0x1e8   : > { %1977 = vmatprep.mubr.bf16.mxu1 %v13613_v1  ;;  %2463 = vmatpush1.bf16.msra.mxu0 %v7833_v50 }
 0x1e9   : > { %2464 = vmatprep.subr.bf16.mxu0 %v7826_v15 }
 0x1ec   : > { %2465 = vmatpush1.bf16.msra.mxu0 %v7825_v17 }
 0x1ed   : > { %2466 = vmatprep.subr.bf16.mxu0 %v7818_v18 }
 0x1ee   : > { %2131 = vmatmul.mubr.bf16.gmra.mxu0 %v9623_v29 }
 0x1ef   : > { %1978 = vmatmul.mubr.bf16.gmra.mxu1 %v9709_v59  ;;  %2140 = vmatprep.mubr.bf16.mxu0 %v13613_v1 }
 0x1f0   : > { %1987 = vmatprep.mubr.bf16.mxu1 %v13613_v1  ;;  %2467 = vmatpush1.bf16.msra.mxu0 %v7817_v8 }
 0x1f1   : > { %2468 = vmatprep.subr.bf16.mxu0 %v7810_v35 }
 0x1f4   : > { %2469 = vmatpush1.bf16.msra.mxu0 %v7809_v34 }
 0x1f5   : > { %4865 = vmatprep.subr.bf16.mxu0 %v8482_v26  ;;  %v8488_v26 = vld [vmem:[%s13607_s8 + $0x2c4] ss:$16 sps:$4 sm:$0xff]  }
 0x1f6   : > { %2141 = vmatmul.mubr.bf16.gmra.mxu0 %v9637_v43 }
 0x1f7   : > { %2150 = vmatprep.mubr.bf16.mxu0 %v13613_v1 }
 0x1fe   : > { %2151 = vmatmul.mubr.bf16.gmra.mxu0 %v9614_v13 }
 0x1ff   : > { %v8365_v40 = vpop.f32.mrf.mxu0  ;;  %2160 = vmatprep.mubr.bf16.mxu0 %v13613_v1 }
 0x201   : > { %v1436_v54 = vpop.f32.mrf.mxu0 }
 0x203   : > { %v8366_v60 = vpop.f32.mrf.mxu0 }
 0x204   : > { %v1508_v25 = vpack.c.bf16 %v8366_v60, %v8365_v40 }
 0x205   : > { %v1439_v53 = vpop.f32.mrf.mxu0 }
 0x206   : > { %v1507_v56 = vpack.c.bf16 %v1439_v53, %v1436_v54  ;;  %2161 = vmatmul.mubr.bf16.gmra.mxu0 %v9695_v14  ;;  %v1532_v44 = vadd.bf16 %v9523_v51, %v1508_v25  ;;  %v8477_v53 = vld [vmem:[%s13607_s8 + $0xe0] ss:$16 sps:$4 sm:$0xff]   ;;  %v8563_v25 = vld [vmem:[%s13607_s8 + $0x124] ss:$16 sps:$4 sm:$0xff]  }
 0x207   : > { %2170 = vmatprep.mubr.bf16.mxu0 %v13613_v1 }
 0x208   : > { %v1531_v0 = vadd.bf16 %v9523_v51, %v1507_v56  ;;  %v9755_v9 = vmax.bf16 %v13613_v1, %v1532_v44  ;;  %v8480_v56 = vld [vmem:[%s13607_s8 + $0x2e0] ss:$16 sps:$4 sm:$0xff]  }
 0x20a   : > { %v9747_v55 = vmax.bf16 %v13613_v1, %v1531_v0  ;;  %v8485_v0 = vld [vmem:[%s13607_s8 + $0xc4] ss:$16 sps:$4 sm:$0xff]  }
 0x20c   : > { %1988 = vmatmul.mubr.bf16.gmra.mxu1 %v9747_v55 }
 0x20d   : > { %1997 = vmatprep.mubr.bf16.mxu1 %v13613_v1 }
 0x20e   : > { %2171 = vmatmul.mubr.bf16.gmra.mxu0 %v9709_v59 }
 0x20f   : > { %2180 = vmatprep.mubr.bf16.mxu0 %v13613_v1 }
 0x214   : > { %1998 = vmatmul.mubr.bf16.gmra.mxu1 %v9755_v9 }
 0x215   : > { %2007 = vmatprep.mubr.bf16.mxu1 %v13613_v1 }
 0x216   : > { %2181 = vmatmul.mubr.bf16.gmra.mxu0 %v9747_v55 }
 0x217   : > { %2190 = vmatprep.mubr.bf16.mxu0 %v13613_v1 }
 0x21e   : > { %2191 = vmatmul.mubr.bf16.gmra.mxu0 %v9755_v9 }
 0x21f   : > { %2200 = vmatprep.mubr.bf16.mxu0 %v13613_v1 }
 0x220   : > { %v8369_v61 = vpop.f32.mrf.mxu0 }
 0x222   : > { %v1452_v62 = vpop.f32.mrf.mxu0 }
 0x224   : > { %v8370_v63 = vpop.f32.mrf.mxu0 }
 0x225   : > { %v1510_v57 = vpack.c.bf16 %v8370_v63, %v8369_v61  ;;  %v8483_v61 = vld [vmem:[%s13607_s8 + $0xc0] ss:$16 sps:$4 sm:$0xff]   ;;  %v8494_v63 = vld [vmem:[%s13607_s8 + $0x2a4] ss:$16 sps:$4 sm:$0xff]  }
 0x226   : > { %v1455_v3 = vpop.f32.mrf.mxu0 }
 0x227   : > { %v1509_v5 = vpack.c.bf16 %v1455_v3, %v1452_v62  ;;  %v1534_v7 = vadd.bf16 %v9523_v51, %v1510_v57  ;;  %v8486_v62 = vld [vmem:[%s13607_s8 + $0x2c0] ss:$16 sps:$4 sm:$0xff]  }
 0x229   : > { %v1533_v6 = vadd.bf16 %v9523_v51, %v1509_v5  ;;  %v9773_v10 = vmax.bf16 %v13613_v1, %v1534_v7  ;;  %v8492_v7 = vld [vmem:[%s13607_s8 + $0x2a0] ss:$16 sps:$4 sm:$0xff]  }
 0x22b   : > { %v9765_v2 = vmax.bf16 %v13613_v1, %v1533_v6  ;;  %v8489_v6 = vld [vmem:[%s13607_s8 + $0xa0] ss:$16 sps:$4 sm:$0xff]  }
 0x22d   : > { %2008 = vmatmul.mubr.bf16.gmra.mxu1 %v9765_v2  ;;  %2201 = vmatmul.mubr.bf16.gmra.mxu0 %v9765_v2 }
 0x22e   : > { %2017 = vmatprep.mubr.bf16.mxu1 %v13613_v1  ;;  %2210 = vmatprep.mubr.bf16.mxu0 %v13613_v1 }
 0x235   : > { %2018 = vmatmul.mubr.bf16.gmra.mxu1 %v9773_v10  ;;  %2211 = vmatmul.mubr.bf16.gmra.mxu0 %v9773_v10 }
 0x236   : > { %2027 = vmatprep.mubr.bf16.mxu1 %v13613_v1  ;;  %2220 = vmatprep.mubr.bf16.mxu0 %v13613_v1 }
 0x245   : > { %v8373_v52 = vpop.f32.mrf.mxu0 }
 0x247   : > { %v1468_v37 = vpop.f32.mrf.mxu0 }
 0x249   : > { %v8374_v47 = vpop.f32.mrf.mxu0 }
 0x24a   : > { %v1512_v12 = vpack.c.bf16 %v8374_v47, %v8373_v52  ;;  %v8497_v52 = vld [vmem:[%s13607_s8 + $0x84] ss:$16 sps:$4 sm:$0xff]  }
 0x24b   : > { %v1471_v49 = vpop.f32.mrf.mxu0  ;;  %v8500_v47 = vld [vmem:[%s13607_s8 + $0x284] ss:$16 sps:$4 sm:$0xff]  }
 0x24c   : > { %v1511_v48 = vpack.c.bf16 %v1471_v49, %v1468_v37  ;;  %v1536_v20 = vadd.bf16 %v9523_v51, %v1512_v12  ;;  %v8503_v12 = vld [vmem:[%s13607_s8 + $0x64] ss:$16 sps:$4 sm:$0xff]  }
 0x24e   : > { %v1535_v11 = vadd.bf16 %v9523_v51, %v1511_v48  ;;  %v9789_v15 = vmax.bf16 %v13613_v1, %v1536_v20  ;;  %v8495_v48 = vld [vmem:[%s13607_s8 + $0x80] ss:$16 sps:$4 sm:$0xff]  }
 0x250   : > { %v9781_v50 = vmax.bf16 %v13613_v1, %v1535_v11 }
 0x252   : > { %2028 = vmatmul.mubr.bf16.gmra.mxu1 %v9781_v50  ;;  %2221 = vmatmul.mubr.bf16.gmra.mxu0 %v9781_v50 }
 0x253   : > { %2037 = vmatprep.mubr.bf16.mxu1 %v13613_v1  ;;  %2230 = vmatprep.mubr.bf16.mxu0 %v13613_v1 }
 0x25a   : > { %2038 = vmatmul.mubr.bf16.gmra.mxu1 %v9789_v15  ;;  %2231 = vmatmul.mubr.bf16.gmra.mxu0 %v9789_v15 }
 0x25b   : > { %2047 = vmatprep.mubr.bf16.mxu1 %v13613_v1  ;;  %2240 = vmatprep.mubr.bf16.mxu0 %v13613_v1 }
 0x266   : > { %v8377_v27 = vpop.f32.mrf.mxu0 }
 0x268   : > { %v1484_v16 = vpop.f32.mrf.mxu0 }
 0x26a   : > { %v8378_v17 = vpop.f32.mrf.mxu0 }
 0x26b   : > { %v1514_v22 = vpack.c.bf16 %v8378_v17, %v8377_v27  ;;  %v8501_v27 = vld [vmem:[%s13607_s8 + $0x60] ss:$16 sps:$4 sm:$0xff]  }
 0x26c   : > { %v1487_v38 = vpop.f32.mrf.mxu0 }
 0x26d   : > { %v1513_v18 = vpack.c.bf16 %v1487_v38, %v1484_v16  ;;  %v1538_v34 = vadd.bf16 %v9523_v51, %v1514_v22  ;;  %v8506_v16 = vld [vmem:[%s13607_s8 + $0x264] ss:$16 sps:$4 sm:$0xff]   ;;  %v8504_v38 = vld [vmem:[%s13607_s8 + $0x260] ss:$16 sps:$4 sm:$0xff]  }
 0x26e   : > { %v9795_v8 = vpop.f32.mrf.mxu0  ;;  %v8512_v22 = vld [vmem:[%s13607_s8 + $0x244] ss:$16 sps:$4 sm:$0xff]  }
 0x26f   : > { %v1537_v19 = vadd.bf16 %v9523_v51, %v1513_v18  ;;  %v9819_v46 = vmax.bf16 %v13613_v1, %v1538_v34  ;;  %v8509_v18 = vld [vmem:[%s13607_s8 + $0x44] ss:$16 sps:$4 sm:$0xff]  }
 0x270   : > { %v9798_v21 = vpop.f32.mrf.mxu0 }
 0x271   : > { %v9801_v30 = vmax.bf16 %v13613_v1, %v1537_v19 }
 0x272   : > { %v9803_v31 = vpop.f32.mrf.mxu0 }
 0x273   : > { %2048 = vmatmul.mubr.bf16.gmra.mxu1 %v9801_v30  ;;  %2241 = vmatmul.mubr.bf16.gmra.mxu0 %v9801_v30 }
 0x274   : > { %v9809_v32 = vpop.f32.mrf.mxu0  ;;  %2057 = vmatprep.mubr.bf16.mxu1 %v13613_v1  ;;  %2250 = vmatprep.mubr.bf16.mxu0 %v13613_v1 }
 0x276   : > { %v9814_v35 = vpop.f32.mrf.mxu0 }
 0x278   : > { %v9816_v39 = vpop.f32.mrf.mxu0 }
 0x27a   : > { %v9821_v28 = vpop.f32.mrf.mxu0 }
 0x27b   : > { %2058 = vmatmul.mubr.bf16.gmra.mxu1 %v9819_v46  ;;  %2251 = vmatmul.mubr.bf16.gmra.mxu0 %v9819_v46 }
 0x27c   : > { %v9827_v54 = vpop.f32.mrf.mxu0  ;;  %2293 = vmatprep.mubr.bf16.mxu1 %v13613_v1  ;;  %2486 = vmatprep.mubr.bf16.mxu0 %v13613_v1 }
 0x27e   : > { %v9831_v51 = vpop.f32.mrf.mxu0 }
 0x280   : > { %v9833_v60 = vpop.f32.mrf.mxu0 }
 0x282   : > { %v9841_v33 = vpop.f32.mrf.mxu0 }
 0x283   : > { %2294 = vmatmul.mubr.bf16.vlgmr.msra.gmra.mxu1 %v9545_v58  ;;  %2487 = vmatmul.mubr.bf16.vlgmr.msra.gmra.mxu0 %v9545_v58  ;;  %v8491_v58 = vld [vmem:[%s13607_s8 + $0xa4] ss:$16 sps:$4 sm:$0xff]  }
 0x284   : > { %4673 = vmatpush1.bf16.msra.mxu1 %v8477_v53  ;;  %v9853_v44 = vpop.f32.mrf.mxu0  ;;  %4866 = vmatpush1.bf16.msra.mxu0 %v8480_v56  ;;  %v8507_v53 = vld [vmem:[%s13607_s8 + $0x40] ss:$16 sps:$4 sm:$0xff]  }
 0x285   : > { %2303 = vmatprep.mubr.bf16.mxu1 %v13613_v1  ;;  %2496 = vmatprep.mubr.bf16.mxu0 %v13613_v1 }
 0x286   : > { %v9869_v3 = vpop.f32.mrf.mxu0  ;;  %4674 = vmatprep.subr.bf16.mxu1 %v8485_v0  ;;  %4867 = vmatprep.subr.bf16.mxu0 %v8488_v26  ;;  %v8515_v0 = vld [vmem:[%s13607_s8 + $0x24] ss:$16 sps:$4 sm:$0xff]  }
 0x288   : > { %v9871_v5 = vpop.f32.mrf.mxu0  ;;  %4675 = vmatpush1.bf16.msra.mxu1 %v8483_v61  ;;  %4868 = vmatpush1.bf16.msra.mxu0 %v8486_v62  ;;  %v8513_v61 = vld [vmem:[%s13607_s8 + $0x20] ss:$16 sps:$4 sm:$0xff]   ;;  %v8518_v62 = vld [vmem:[%s13607_s8 + $0x224] ss:$16 sps:$4 sm:$0xff]  }
 0x289   : > { %4676 = vmatprep.subr.bf16.mxu1 %v8491_v58  ;;  %4869 = vmatprep.subr.bf16.mxu0 %v8494_v63  ;;  %v8516_v63 = vld [vmem:[%s13607_s8 + $0x220] ss:$16 sps:$4 sm:$0xff]  }
 0x28a   : > { %v9876_v57 = vpop.f32.mrf.mxu0 }
 0x28b   : > { %2304 = vmatmul.mubr.bf16.gmra.mxu1 %v9568_v24  ;;  %2497 = vmatmul.mubr.bf16.gmra.mxu0 %v9568_v24  ;;  %v8498_v24 = vld [vmem:[%s13607_s8 + $0x280] ss:$16 sps:$4 sm:$0xff]  }
 0x28c   : > { %v9891_v49 = vpop.f32.mrf.mxu0  ;;  %2313 = vmatprep.mubr.bf16.mxu1 %v13613_v1  ;;  %2506 = vmatprep.mubr.bf16.mxu0 %v13613_v1 }
 0x28d   : > { %4677 = vmatpush1.bf16.msra.mxu1 %v8489_v6  ;;  %4870 = vmatpush1.bf16.msra.mxu0 %v8492_v7  ;;  %v8521_v6 = vld [vmem:[%s13607_s8 + $0x4] ss:$16 sps:$4 sm:$0xff]  }
 0x28e   : > { %v9898_v11 = vpop.f32.mrf.mxu0  ;;  %4678 = vmatprep.subr.bf16.mxu1 %v8497_v52  ;;  %4871 = vmatprep.subr.bf16.mxu0 %v8500_v47  ;;  %v8524_v7 = vld [vmem:[%s13607_s8 + $0x204] ss:$16 sps:$4 sm:$0xff]   ;;  %v8519_v47 = vld [vmem:[%s13607_s8] ss:$16 sps:$4 sm:$0xff]  }
 0x28f   : > { %13784 = vst [vmem:[#allocation6_spill] sm:$0xff] %v9898_v11 }
 0x290   : > { %v9906_v20 = vpop.f32.mrf.mxu0 }
 0x291   : > { %4679 = vmatpush1.bf16.msra.mxu1 %v8495_v48  ;;  %4872 = vmatpush1.bf16.msra.mxu0 %v8498_v24  ;;  %v8527_v24 = vld [vmem:[%s13607_s8 + $0x1e4] ss:$16 sps:$4 sm:$0xff]  }
 0x292   : > { %v9914_v17 = vpop.f32.mrf.mxu0  ;;  %4680 = vmatprep.subr.bf16.mxu1 %v8503_v12  ;;  %4873 = vmatprep.subr.bf16.mxu0 %v8506_v16  ;;  %v8530_v16 = vld [vmem:[%s13607_s8 + $0x3e4] ss:$16 sps:$4 sm:$0xff]  }
 0x293   : > { %2314 = vmatmul.mubr.bf16.gmra.mxu1 %v9587_v4  ;;  %2507 = vmatmul.mubr.bf16.gmra.mxu0 %v9587_v4  ;;  %v8510_v4 = vld [vmem:[%s13607_s8 + $0x240] ss:$16 sps:$4 sm:$0xff]  }
 0x294   : > { %v9929_v34 = vpop.f32.mrf.mxu0  ;;  %2323 = vmatprep.mubr.bf16.mxu1 %v13613_v1  ;;  %2516 = vmatprep.mubr.bf16.mxu0 %v13613_v1 }
 0x295   : > { %4681 = vmatpush1.bf16.msra.mxu1 %v8501_v27  ;;  %4874 = vmatpush1.bf16.msra.mxu0 %v8504_v38  ;;  %v8525_v27 = vld [vmem:[%s13607_s8 + $0x1e0] ss:$16 sps:$4 sm:$0xff]  }
 0x296   : > { %v9936_v56 = vpop.f32.mrf.mxu0  ;;  %4682 = vmatprep.subr.bf16.mxu1 %v8509_v18  ;;  %4875 = vmatprep.subr.bf16.mxu0 %v8512_v22  ;;  %v8528_v18 = vld [vmem:[%s13607_s8 + $0x3e0] ss:$16 sps:$4 sm:$0xff]   ;;  %v8533_v22 = vld [vmem:[%s13607_s8 + $0x1c4] ss:$16 sps:$4 sm:$0xff]  }
 0x298   : > { %v9944_v26 = vpop.f32.mrf.mxu0 }
 0x299   : > { %4683 = vmatpush1.bf16.msra.mxu1 %v8507_v53  ;;  %4876 = vmatpush1.bf16.msra.mxu0 %v8510_v4  ;;  %v8536_v53 = vld [vmem:[%s13607_s8 + $0x3c4] ss:$16 sps:$4 sm:$0xff]  }
 0x29a   : > { %v9952_v58 = vpop.f32.mrf.mxu0  ;;  %4684 = vmatprep.subr.bf16.mxu1 %v8515_v0  ;;  %4877 = vmatprep.subr.bf16.mxu0 %v8518_v62  ;;  %v8531_v0 = vld [vmem:[%s13607_s8 + $0x1c0] ss:$16 sps:$4 sm:$0xff]   ;;  %v8539_v62 = vld [vmem:[%s13607_s8 + $0x1a4] ss:$16 sps:$4 sm:$0xff]  }
 0x29b   : > { %2324 = vmatmul.mubr.bf16.gmra.mxu1 %v9623_v29  ;;  %2517 = vmatmul.mubr.bf16.gmra.mxu0 %v9623_v29  ;;  %v8522_v29 = vld [vmem:[%s13607_s8 + $0x200] ss:$16 sps:$4 sm:$0xff]  }
 0x29c   : > { %v9965_v52 = vpop.f32.mrf.mxu0  ;;  %2333 = vmatprep.mubr.bf16.mxu1 %v13613_v1  ;;  %2526 = vmatprep.mubr.bf16.mxu0 %v13613_v1 }
 0x29d   : > { %4685 = vmatpush1.bf16.msra.mxu1 %v8513_v61  ;;  %4878 = vmatpush1.bf16.msra.mxu0 %v8516_v63 }
 0x29e   : > { %v9972_v48 = vpop.f32.mrf.mxu0  ;;  %4686 = vmatprep.subr.bf16.mxu1 %v8521_v6  ;;  %4879 = vmatprep.subr.bf16.mxu0 %v8524_v7  ;;  %v8537_v6 = vld [vmem:[%s13607_s8 + $0x1a0] ss:$16 sps:$4 sm:$0xff]   ;;  %v8542_v7 = vld [vmem:[%s13607_s8 + $0x3a4] ss:$16 sps:$4 sm:$0xff]  }
 0x2a0   : > { %v9980_v12 = vpop.f32.mrf.mxu0 }
 0x2a1   : > { %4687 = vmatpush1.bf16.msra.mxu1 %v8519_v47  ;;  %4880 = vmatpush1.bf16.msra.mxu0 %v8522_v29  ;;  %v8540_v29 = vld [vmem:[%s13607_s8 + $0x3a0] ss:$16 sps:$4 sm:$0xff]  }
 0x2a2   : > { %v9988_v38 = vpop.f32.mrf.mxu0  ;;  %4688 = vmatprep.subr.bf16.mxu1 %v8527_v24  ;;  %4881 = vmatprep.subr.bf16.mxu0 %v8530_v16  ;;  %v8545_v24 = vld [vmem:[%s13607_s8 + $0x184] ss:$16 sps:$4 sm:$0xff]  }
 0x2a3   : > { %2334 = vmatmul.mubr.bf16.gmra.mxu1 %v9637_v43  ;;  %2527 = vmatmul.mubr.bf16.gmra.mxu0 %v9637_v43  ;;  %v8534_v43 = vld [vmem:[%s13607_s8 + $0x3c0] ss:$16 sps:$4 sm:$0xff]  }
 0x2a4   : > { %v10001_v4 = vpop.f32.mrf.mxu0  ;;  %2343 = vmatprep.mubr.bf16.mxu1 %v13613_v1  ;;  %2536 = vmatprep.mubr.bf16.mxu0 %v13613_v1 }
 0x2a5   : > { %4689 = vmatpush2.bf16.msra.mxu1 %v8525_v27  ;;  %4882 = vmatpush2.bf16.msra.mxu0 %v8528_v18  ;;  %v8548_v27 = vld [vmem:[%s13607_s8 + $0x384] ss:$16 sps:$4 sm:$0xff]   ;;  %v10041_v18 = vpop.f32.mrf.mxu1 }
 0x2a6   : > { %v10008_v61 = vpop.f32.mrf.mxu0  ;;  %4690 = vmatprep.subr.bf16.mxu1 %v8533_v22  ;;  %4883 = vmatprep.subr.bf16.mxu0 %v8536_v53  ;;  %13785 = vst [vmem:[#allocation7_spill] sm:$0xff] %v10041_v18  ;;  %v8543_v22 = vld [vmem:[%s13607_s8 + $0x180] ss:$16 sps:$4 sm:$0xff]   ;;  %v8575_v18 = vld [vmem:[%s13607_s8 + $0x4e4] ss:$16 sps:$4 sm:$0xff]  }
 0x2a8   : > { %v10016_v63 = vpop.f32.mrf.mxu0 }
 0x2a9   : > { %4691 = vmatpush2.bf16.msra.mxu1 %v8531_v0  ;;  %4884 = vmatpush2.bf16.msra.mxu0 %v8534_v43  ;;  %v8551_v0 = vld [vmem:[%s13607_s8 + $0x164] ss:$16 sps:$4 sm:$0xff]  }
 0x2aa   : > { %v10024_v47 = vpop.f32.mrf.mxu0  ;;  %4692 = vmatprep.subr.bf16.mxu1 %v8539_v62  ;;  %4885 = vmatprep.subr.bf16.mxu0 %v8542_v7  ;;  %v10056_v62 = vpop.f32.mrf.mxu1  ;;  %v8554_v7 = vld [vmem:[%s13607_s8 + $0x364] ss:$16 sps:$4 sm:$0xff]  }
 0x2ab   : > { %2344 = vmatmul.mubr.bf16.gmra.mxu1 %v9614_v13  ;;  %2537 = vmatmul.mubr.bf16.gmra.mxu0 %v9614_v13  ;;  %v8546_v13 = vld [vmem:[%s13607_s8 + $0x380] ss:$16 sps:$4 sm:$0xff]  }
 0x2ac   : > { %v10037_v16 = vpop.f32.mrf.mxu0  ;;  %2353 = vmatprep.mubr.bf16.mxu1 %v13613_v1  ;;  %2546 = vmatprep.mubr.bf16.mxu0 %v13613_v1 }
 0x2ad   : > { %4693 = vmatpush2.bf16.msra.mxu1 %v8537_v6  ;;  %4886 = vmatpush2.bf16.msra.mxu0 %v8540_v29  ;;  %v8549_v6 = vld [vmem:[%s13607_s8 + $0x160] ss:$16 sps:$4 sm:$0xff]  }
 0x2ae   : > { %v10046_v53 = vpop.f32.mrf.mxu0  ;;  %4694 = vmatprep.subr.bf16.mxu1 %v8545_v24  ;;  %4887 = vmatprep.subr.bf16.mxu0 %v8548_v27  ;;  %v8552_v24 = vld [vmem:[%s13607_s8 + $0x360] ss:$16 sps:$4 sm:$0xff]   ;;  %v8557_v27 = vld [vmem:[%s13607_s8 + $0x144] ss:$16 sps:$4 sm:$0xff]  }
 0x2b0   : > { %v10054_v43 = vpop.f32.mrf.mxu0 }
 0x2b1   : > { %4695 = vmatpush2.bf16.msra.mxu1 %v8543_v22  ;;  %4888 = vmatpush2.bf16.msra.mxu0 %v8546_v13  ;;  %v8560_v22 = vld [vmem:[%s13607_s8 + $0x344] ss:$16 sps:$4 sm:$0xff]   ;;  %v10081_v13 = vpop.f32.mrf.mxu1 }
 0x2b2   : > { %v10064_v29 = vpop.f32.mrf.mxu0  ;;  %4696 = vmatprep.subr.bf16.mxu1 %v8551_v0  ;;  %13786 = vst [vmem:[#allocation8_spill] sm:$0xff] %v10081_v13  ;;  %4889 = vmatprep.subr.bf16.mxu0 %v8554_v7  ;;  %v8555_v0 = vld [vmem:[%s13607_s8 + $0x140] ss:$16 sps:$4 sm:$0xff]  }
 0x2b3   : > { %2354 = vmatmul.mubr.bf16.gmra.mxu1 %v9695_v14  ;;  %2547 = vmatmul.mubr.bf16.gmra.mxu0 %v9695_v14  ;;  %v8558_v14 = vld [vmem:[%s13607_s8 + $0x340] ss:$16 sps:$4 sm:$0xff]  }
 0x2b4   : > { %v10077_v19 = vpop.f32.mrf.mxu0  ;;  %2363 = vmatprep.mubr.bf16.mxu1 %v13613_v1  ;;  %2556 = vmatprep.mubr.bf16.mxu0 %v13613_v1  ;;  %v8561_v7 = vld [vmem:[%s13607_s8 + $0x120] ss:$16 sps:$4 sm:$0xff]   ;;  %v8572_v1 = vld [vmem:[%s13607_s8 + $0x304] ss:$16 sps:$4 sm:$0xff]  }
 0x2b5   : > { %4697 = vmatpush2.bf16.msra.mxu1 %v8549_v6  ;;  %4890 = vmatpush2.bf16.msra.mxu0 %v8552_v24  ;;  %v10096_v6 = vpop.f32.mrf.mxu1  ;;  %v8566_v24 = vld [vmem:[%s13607_s8 + $0x324] ss:$16 sps:$4 sm:$0xff]  }
 0x2b6   : > { %v10086_v37 = vpop.f32.mrf.mxu0  ;;  %4698 = vmatprep.subr.bf16.mxu1 %v8557_v27  ;;  %4891 = vmatprep.subr.bf16.mxu0 %v8560_v22  ;;  %v8564_v22 = vld [vmem:[%s13607_s8 + $0x320] ss:$16 sps:$4 sm:$0xff]  }
 0x2b7   : > { %v10112_v23 = vpop.f32.mrf.mxu1 }
 0x2b8   : > { %v10094_v40 = vpop.f32.mrf.mxu0  ;;  %13787 = vst [vmem:[#allocation9_spill] sm:$0xff] %v10112_v23  ;;  %v8567_v23 = vld [vmem:[%s13607_s8 + $0x100] ss:$16 sps:$4 sm:$0xff]  }
 0x2b9   : > { %4699 = vmatpush2.bf16.msra.mxu1 %v8555_v0  ;;  %4892 = vmatpush2.bf16.msra.mxu0 %v8558_v14  ;;  %v8569_v0 = vld [vmem:[%s13607_s8 + $0x104] ss:$16 sps:$4 sm:$0xff]   ;;  %v10134_v11 = vpop.f32.mrf.mxu1 }
 0x2ba   : > { %v10104_v27 = vpop.f32.mrf.mxu0  ;;  %4700 = vmatprep.subr.bf16.mxu1 %v8563_v25  ;;  %v13788_v25 = vmov 0   ;;  %4893 = vmatprep.subr.bf16.mxu0 %v8566_v24  ;;  %v8578_v24 = vld [vmem:[%s13607_s8 + $0x6e4] ss:$16 sps:$4 sm:$0xff]  }
 0x2bb   : > { %2364 = vmatmul.mubr.bf16.gmra.mxu1 %v9709_v59  ;;  %2557 = vmatmul.mubr.bf16.gmra.mxu0 %v9709_v59  ;;  %v8570_v59 = vld [vmem:[%s13607_s8 + $0x300] ss:$16 sps:$4 sm:$0xff]  }
 0x2bc   : > { %v10119_v14 = vpop.f32.mrf.mxu0  ;;  %2373 = vmatprep.mubr.bf16.mxu1 %v13788_v25  ;;  %2566 = vmatprep.mubr.bf16.mxu0 %v13788_v25 }
 0x2bd   : > { %4701 = vmatpush2.bf16.msra.mxu1 %v8561_v7  ;;  %4894 = vmatpush2.bf16.msra.mxu0 %v8564_v22 }
 0x2be   : > { %v10126_v13 = vpop.f32.mrf.mxu0  ;;  %4702 = vmatprep.subr.bf16.mxu1 %v8569_v0  ;;  %4895 = vmatprep.subr.bf16.mxu0 %v8572_v1  ;;  %v10143_v0 = vpop.f32.mrf.mxu1 }
 0x2bf   : > { %13789 = vst [vmem:[#allocation10_spill] sm:$0xff] %v10126_v13  ;;  %13791 = vst [vmem:[#allocation12_spill] sm:$0xff] %v10143_v0 }
 0x2c0   : > { %v10136_v7 = vpop.f32.mrf.mxu0 }
 0x2c1   : > { %4703 = vmatpush2.bf16.msra.mxu1 %v8567_v23  ;;  %4896 = vmatpush2.bf16.msra.mxu0 %v8570_v59  ;;  %v10153_v23 = vpop.f32.mrf.mxu1 }
 0x2c2   : > { %v10141_v22 = vpop.f32.mrf.mxu0  ;;  %5058 = vmatprep.subr.bf16.mxu1 %v8575_v18  ;;  %5251 = vmatprep.subr.bf16.mxu0 %v8578_v24  ;;  %13793 = vst [vmem:[#allocation14_spill] sm:$0xff] %v10153_v23 }
 0x2c3   : > { %13790 = vst [vmem:[#allocation11_spill] sm:$0xff] %v10141_v22  ;;  %2374 = vmatmul.mubr.bf16.gmra.mxu1 %v9747_v55  ;;  %2567 = vmatmul.mubr.bf16.gmra.mxu0 %v9747_v55  ;;  %v10159_v59 = vpop.f32.mrf.mxu1 }
 0x2c4   : > { %v10147_v13 = vpop.f32.mrf.mxu0  ;;  %2383 = vmatprep.mubr.bf16.mxu1 %v13788_v25  ;;  %2576 = vmatprep.mubr.bf16.mxu0 %v13788_v25  ;;  %13796 = vst [vmem:[#allocation17_spill] sm:$0xff] %v10159_v59 }
 0x2c6   : > { %v10151_v1 = vpop.f32.mrf.mxu0 }
 0x2c7   : > { %13792 = vst [vmem:[#allocation13_spill] sm:$0xff] %v10151_v1  ;;  %v10169_v1 = vpop.f32.mrf.mxu1 }
 0x2c8   : > { %v10155_v22 = vpop.f32.mrf.mxu0  ;;  %13799 = vst [vmem:[#allocation20_spill] sm:$0xff] %v10169_v1 }
 0x2c9   : > { %13794 = vst [vmem:[#allocation15_spill] sm:$0xff] %v10155_v22 }
 0x2ca   : > { %v10157_v18 = vpop.f32.mrf.mxu0 }
 0x2cb   : > { %13795 = vst [vmem:[#allocation16_spill] sm:$0xff] %v10157_v18  ;;  %2384 = vmatmul.mubr.bf16.gmra.mxu1 %v9755_v9  ;;  %2577 = vmatmul.mubr.bf16.gmra.mxu0 %v9755_v9  ;;  %v10175_v18 = vpop.f32.mrf.mxu1 }
 0x2cc   : > { %v10163_v55 = vpop.f32.mrf.mxu0  ;;  %2393 = vmatprep.mubr.bf16.mxu1 %v13788_v25  ;;  %2586 = vmatprep.mubr.bf16.mxu0 %v13788_v25  ;;  %13802 = vst [vmem:[#allocation23_spill] sm:$0xff] %v10175_v18 }
 0x2cd   : > { %13797 = vst [vmem:[#allocation18_spill] sm:$0xff] %v10163_v55  ;;  %v10183_v59 = vpop.f32.mrf.mxu1  ;;  %v2648_v55 = vpack.c.bf16 %v9809_v32, %v9798_v21 }
 0x2ce   : > { %v10167_v24 = vpop.f32.mrf.mxu0  ;;  %13804 = vst [vmem:[#allocation25_spill] sm:$0xff] %v10183_v59 }
 0x2cf   : > { %13798 = vst [vmem:[#allocation19_spill] sm:$0xff] %v10167_v24  ;;  %v10185_v24 = vpop.f32.mrf.mxu1 }
 0x2d0   : > { %v10171_v0 = vpop.f32.mrf.mxu0  ;;  %13805 = vst [vmem:[#allocation26_spill] sm:$0xff] %v10185_v24 }
 0x2d1   : > { %13800 = vst [vmem:[#allocation21_spill] sm:$0xff] %v10171_v0 }
 0x2d2   : > { %v10173_v22 = vpop.f32.mrf.mxu0 }
 0x2d3   : > { %13801 = vst [vmem:[#allocation22_spill] sm:$0xff] %v10173_v22  ;;  %2394 = vmatmul.mubr.bf16.gmra.mxu1 %v9765_v2  ;;  %2587 = vmatmul.mubr.bf16.gmra.mxu0 %v9765_v2  ;;  %v10193_v2 = vpop.f32.mrf.mxu1 }
 0x2d4   : > { %2403 = vmatprep.mubr.bf16.mxu1 %v13788_v25  ;;  %2596 = vmatprep.mubr.bf16.mxu0 %v13788_v25  ;;  %v10181_v9 = vpop.f32.mrf.mxu0  ;;  %13807 = vst [vmem:[#allocation28_spill] sm:$0xff] %v10193_v2 }
 0x2d5   : > { %13803 = vst [vmem:[#allocation24_spill] sm:$0xff] %v10181_v9  ;;  %v10197_v18 = vpop.f32.mrf.mxu1 }
 0x2d6   : > { %v10187_v1 = vpop.f32.mrf.mxu0  ;;  %13809 = vst [vmem:[#allocation30_spill] sm:$0xff] %v10197_v18 }
 0x2d7   : > { %13806 = vst [vmem:[#allocation27_spill] sm:$0xff] %v10187_v1  ;;  %v10211_v1 = vpop.f32.mrf.mxu1 }
 0x2d8   : > { %v10195_v22 = vpop.f32.mrf.mxu0  ;;  %13812 = vst [vmem:[#allocation33_spill] sm:$0xff] %v10211_v1 }
 0x2d9   : > { %13808 = vst [vmem:[#allocation29_spill] sm:$0xff] %v10195_v22  ;;  %v10220_v22 = vpop.f32.mrf.mxu1 }
 0x2da   : > { %v10199_v9 = vpop.f32.mrf.mxu0  ;;  %13815 = vst [vmem:[#allocation35_spill] sm:$0xff] %v10220_v22 }
 0x2db   : > { %2404 = vmatmul.mubr.bf16.gmra.mxu1 %v9773_v10  ;;  %2597 = vmatmul.mubr.bf16.gmra.mxu0 %v9773_v10  ;;  %13810 = vst [vmem:[#allocation31_spill] sm:$0xff] %v10199_v9  ;;  %v10209_v10 = vld [vmem:[%s13605_s6] sm:$0xff]  ;;  %v13814_v9 = vsub.s32 3, %v9190_v36  ;;  %v10232_v36 = vpop.f32.mrf.mxu1 }
 0x2dc   : > { %2413 = vmatprep.mubr.bf16.mxu1 %v13788_v25  ;;  %2606 = vmatprep.mubr.bf16.mxu0 %v13788_v25  ;;  %13811 = vst [vmem:[#allocation32_spill] sm:$0xff] %v10209_v10  ;;  %v10213_v18 = vpop.f32.mrf.mxu0  ;;  %v2783_v24 = vrot.slane %v10209_v10, %v9200_v41  ;;  %v2779_v41 = vrot.slane %v10209_v10, %v9203_v42 }
 0x2dd   : > { %13813 = vst [vmem:[#allocation34_spill] sm:$0xff] %v10213_v18  ;;  %v10236_v1 = vpop.f32.mrf.mxu1 }
 0x2de   : > { %v10222_v2 = vpop.f32.mrf.mxu0  ;;  %v2817_v0 = vpack.c.bf16 %v2783_v24, %v2783_v24 }
 0x2df   : > { %13816 = vst [vmem:[#allocation36_spill] sm:$0xff] %v10222_v2  ;;  %v2816_v2 = vpack.c.bf16 %v2779_v41, %v2779_v41 }
 0x2e0   : > { %v10234_v22 = vpop.f32.mrf.mxu0  ;;  %v2832_v24 = vpack.i.b16 %v2817_v0, %v2817_v0 }
 0x2e1   : > { %v2825_v41 = vpack.i.b16 %v2816_v2, %v2816_v2 }
 0x2e2   : > { %v10243_v23 = vrot.slane %v2832_v24, %v9203_v42  ;;  %v2656_v24 = vpack.c.bf16 %v9827_v54, %v9816_v39  ;;  %v13820_v39 = vpack.c.bf16 %v9803_v31, %v9795_v8 }
 0x2e3   : > { %2414 = vmatmul.mubr.bf16.gmra.mxu1 %v9781_v50  ;;  %2607 = vmatmul.mubr.bf16.gmra.mxu0 %v9781_v50  ;;  %v2791_v50 = vrot.slane %v10209_v10, %v13814_v9  ;;  %v2787_v9 = vrot.slane %v10209_v10, %v9211_v45  ;;  %v2650_v45 = vpack.c.bf16 %v9965_v52, %v9944_v26 }
 0x2e4   : > { %2423 = vmatprep.mubr.bf16.mxu1 %v13788_v25  ;;  %2616 = vmatprep.mubr.bf16.mxu0 %v13788_v25  ;;  %v2881_v32 = vadd.bf16 %v10243_v23, %v2648_v55 }
 0x2e5   : > { %v2819_v59 = vpack.c.bf16 %v2791_v50, %v2791_v50  ;;  %v2818_v18 = vpack.c.bf16 %v2787_v9, %v2787_v9 }
 0x2e6   : > { %v10275_v55 = vmax.bf16 %v13788_v25, %v2881_v32  ;;  %v2657_v32 = vpack.c.bf16 %v9988_v38, %v9972_v48  ;;  %v8584_v48 = vld [vmem:[%s13607_s8 + $0x6c4] ss:$16 sps:$4 sm:$0xff]  }
 0x2e7   : > { %v2846_v50 = vpack.i.b16 %v2819_v59, %v2819_v59  ;;  %v2839_v0 = vpack.i.b16 %v2818_v18, %v2818_v18  ;;  %v10253_v59 = vpop.f32.mrf.mxu1  ;;  %v2649_v18 = vpack.c.bf16 %v9952_v58, %v9936_v56 }
 0x2e8   : > { %13818 = vst [vmem:[#allocation38_spill] sm:$0xff] %v10275_v55 }
 0x2e9   : > { %v10248_v10 = vrot.slane %v2846_v50, %v9203_v42  ;;  %v10270_v2 = vrot.slane %v2839_v0, %v9203_v42  ;;  %v8573_v0 = vld [vmem:[%s13607_s8 + $0x4e0] ss:$16 sps:$4 sm:$0xff]  }
 0x2eb   : > { %2424 = vmatmul.mubr.bf16.gmra.mxu1 %v9789_v15  ;;  %2617 = vmatmul.mubr.bf16.gmra.mxu0 %v9789_v15  ;;  %v10238_v15 = vpop.f32.mrf.mxu0  ;;  %v2883_v26 = vadd.bf16 %v10248_v10, %v2650_v45  ;;  %v2658_v45 = vpack.c.bf16 %v10001_v4, %v9980_v12  ;;  %v2882_v58 = vadd.bf16 %v10270_v2, %v2649_v18 }
 0x2ec   : > { %2433 = vmatprep.mubr.bf16.mxu1 %v13788_v25  ;;  %2626 = vmatprep.mubr.bf16.mxu0 %v13788_v25  ;;  %v2889_v12 = vadd.bf16 %v10243_v23, %v2656_v24  ;;  %v2664_v18 = vpack.c.bf16 %v9853_v44, %v9833_v60  ;;  %v2666_v24 = vpack.c.bf16 %v10037_v16, %v10016_v63  ;;  %v8579_v16 = vld [vmem:[%s13607_s8 + $0x4c0] ss:$16 sps:$4 sm:$0xff]  }
 0x2ed   : > { %v10255_v21 = vpop.f32.mrf.mxu0  ;;  %v10260_v52 = vpop.f32.mrf.mxu1  ;;  %v10286_v56 = vmax.bf16 %v13788_v25, %v2883_v26  ;;  %v2891_v4 = vadd.bf16 %v10248_v10, %v2658_v45  ;;  %v10308_v31 = vmax.bf16 %v13788_v25, %v2882_v58  ;;  %v8576_v26 = vld [vmem:[%s13607_s8 + $0x6e0] ss:$16 sps:$4 sm:$0xff]   ;;  %v13825_v44 = vpack.c.bf16 %v9821_v28, %v9814_v35  ;;  %v8587_v35 = vld [vmem:[%s13607_s8 + $0x4a4] ss:$16 sps:$4 sm:$0xff]  }
 0x2ee   : > { %v10320_v45 = vmax.bf16 %v13788_v25, %v2889_v12  ;;  %v2890_v58 = vadd.bf16 %v10270_v2, %v2657_v32  ;;  %v8582_v12 = vld [vmem:[%s13607_s8 + $0x6c0] ss:$16 sps:$4 sm:$0xff]   ;;  %v2897_v28 = vadd.bf16 %v10243_v23, %v2664_v18 }
 0x2ef   : > { %v10262_v9 = vpop.f32.mrf.mxu0  ;;  %v10279_v50 = vpop.f32.mrf.mxu1  ;;  %13819 = vst [vmem:[#allocation39_spill] sm:$0xff] %v10286_v56  ;;  %13822 = vst [vmem:[#allocation41_spill] sm:$0xff] %v10308_v31  ;;  %v10335_v60 = vmax.bf16 %v13788_v25, %v2891_v4  ;;  %v2899_v4 = vadd.bf16 %v10248_v10, %v2666_v24  ;;  %v2665_v24 = vpack.c.bf16 %v10024_v47, %v10008_v61  ;;  %v8593_v61 = vld [vmem:[%s13607_s8 + $0x484] ss:$16 sps:$4 sm:$0xff]  }
 0x2f0   : > { %13817 = vst [vmem:[#allocation37_spill] sm:$0xff] %v10262_v9  ;;  %13823 = vst [vmem:[#allocation42_spill] sm:$0xff] %v10320_v45  ;;  %v10368_v18 = vmax.bf16 %v13788_v25, %v2890_v58  ;;  %v8596_v47 = vld [vmem:[%s13607_s8 + $0x684] ss:$16 sps:$4 sm:$0xff]  }
 0x2f1   : > { %v10281_v9 = vpop.f32.mrf.mxu0  ;;  %13824 = vst [vmem:[#allocation43_spill] sm:$0xff] %v10335_v60 }
 0x2f2   : > { %13827 = vst [vmem:[#allocation45_spill] sm:$0xff] %v10368_v18 }
 0x2f3   : > { %2434 = vmatmul.mubr.bf16.gmra.mxu1 %v9801_v30  ;;  %2627 = vmatmul.mubr.bf16.gmra.mxu0 %v9801_v30  ;;  %v10265_v30 = vrot.slane %v2825_v41, %v9203_v42  ;;  %v10297_v41 = vpop.f32.mrf.mxu1  ;;  %v13883_v42 = vld [vmem:[#allocation27_spill] sm:$0xff] }
 0x2f4   : > { %2443 = vmatprep.mubr.bf16.mxu1 %v13788_v25  ;;  %2636 = vmatprep.mubr.bf16.mxu0 %v13788_v25 }
 0x2f5   : > { %v2880_v54 = vadd.bf16 %v10265_v30, %v13820_v39  ;;  %v8581_v39 = vld [vmem:[%s13607_s8 + $0x4c4] ss:$16 sps:$4 sm:$0xff]   ;;  %v10328_v38 = vpop.f32.mrf.mxu1  ;;  %v2888_v63 = vadd.bf16 %v10265_v30, %v13825_v44 }
 0x2f7   : > { %v10305_v8 = vmax.bf16 %v13788_v25, %v2880_v54  ;;  %v10358_v32 = vpop.f32.mrf.mxu1  ;;  %v10363_v44 = vmax.bf16 %v13788_v25, %v2888_v63  ;;  %v2674_v63 = vpack.c.bf16 %v10077_v19, %v10054_v43  ;;  %v13830_v19 = vpack.c.bf16 %v9841_v33, %v9831_v51  ;;  %v8599_v51 = vld [vmem:[%s13607_s8 + $0x464] ss:$16 sps:$4 sm:$0xff]  }
 0x2f8   : > { %v8602_v33 = vld [vmem:[%s13607_s8 + $0x664] ss:$16 sps:$4 sm:$0xff]  }
 0x2f9   : > { %13821 = vst [vmem:[#allocation40_spill] sm:$0xff] %v10305_v8  ;;  %13826 = vst [vmem:[#allocation44_spill] sm:$0xff] %v10363_v44  ;;  %v2896_v43 = vadd.bf16 %v10265_v30, %v13830_v19  ;;  %v2680_v19 = vpack.c.bf16 %v9929_v34, %v9906_v20 }
 0x2fb   : > { %2444 = vmatmul.mubr.bf16.gmra.mxu1 %v9819_v46  ;;  %2637 = vmatmul.mubr.bf16.gmra.mxu0 %v9819_v46  ;;  %v10299_v46 = vpop.f32.mrf.mxu0 }
 0x2fc   : > { %4704 = vmatprep.mubr.bf16.mxu1 %v10275_v55  ;;  %4897 = vmatprep.mubr.bf16.mxu0 %v10286_v56  ;;  %v13875_v56 = vld [vmem:[#allocation34_spill] sm:$0xff] }
 0x2fd   : > { %v10330_v54 = vpop.f32.mrf.mxu0 }
 0x303   : > { %4705 = vmatmul.mubr.bf16.vlgmr.msra.gmra.mxu1 %v10305_v8  ;;  %4898 = vmatmul.mubr.bf16.vlgmr.msra.gmra.mxu0 %v10308_v31  ;;  %v13873_v31 = vld [vmem:[#allocation33_spill] sm:$0xff] }
 0x304   : > { %5059 = vmatpush1.bf16.msra.mxu1 %v8573_v0  ;;  %4714 = vmatprep.mubr.bf16.mxu1 %v10320_v45  ;;  %v8590_v0 = vld [vmem:[%s13607_s8 + $0x6a4] ss:$16 sps:$4 sm:$0xff]   ;;  %v13874_v8 = vld [vmem:[#allocation29_spill] sm:$0xff] }
 0x305   : > { %4907 = vmatprep.mubr.bf16.mxu0 %v10335_v60  ;;  %5252 = vmatpush1.bf16.msra.mxu0 %v8576_v26  ;;  %v10360_v26 = vpop.f32.mrf.mxu0  ;;  %v2672_v60 = vpack.c.bf16 %v9891_v49, %v9871_v5  ;;  %v10381_v5 = vmax.bf16 %v13788_v25, %v2897_v28  ;;  %v10384_v49 = vmax.bf16 %v13788_v25, %v2899_v4  ;;  %v8591_v28 = vld [vmem:[%s13607_s8 + $0x480] ss:$16 sps:$4 sm:$0xff]  }
 0x306   : > { %5060 = vmatprep.subr.bf16.mxu1 %v8581_v39  ;;  %5253 = vmatprep.subr.bf16.mxu0 %v8584_v48  ;;  %v8585_v39 = vld [vmem:[%s13607_s8 + $0x4a0] ss:$16 sps:$4 sm:$0xff]   ;;  %v2714_v55 = vpack.c.bf16 %v13875_v56, %v13874_v8 }
 0x307   : > { %v8588_v48 = vld [vmem:[%s13607_s8 + $0x6a0] ss:$16 sps:$4 sm:$0xff]   ;;  %13828 = vst [vmem:[#allocation46_spill] sm:$0xff] %v10381_v5  ;;  %13829 = vst [vmem:[#allocation47_spill] sm:$0xff] %v10384_v49  ;;  %v10394_v58 = vpop.f32.mrf.mxu0 }
 0x308   : > { %5061 = vmatpush1.bf16.msra.mxu1 %v8579_v16  ;;  %v10392_v16 = vpop.f32.mrf.mxu1  ;;  %v8594_v4 = vld [vmem:[%s13607_s8 + $0x680] ss:$16 sps:$4 sm:$0xff]  }
 0x309   : > { %5254 = vmatpush1.bf16.msra.mxu0 %v8582_v12  ;;  %5062 = vmatprep.subr.bf16.mxu1 %v8587_v35  ;;  %v2905_v12 = vadd.bf16 %v10243_v23, %v2672_v60  ;;  %v2898_v35 = vadd.bf16 %v10270_v2, %v2665_v24  ;;  %v10421_v24 = vpop.f32.mrf.mxu0 }
 0x30a   : > { %5255 = vmatprep.subr.bf16.mxu0 %v8590_v0  ;;  %v2907_v0 = vadd.bf16 %v10248_v10, %v2674_v63  ;;  %v10419_v60 = vpop.f32.mrf.mxu1 }
 0x30b   : > { %4715 = vmatmul.mubr.bf16.gmra.mxu1 %v10363_v44  ;;  %4908 = vmatmul.mubr.bf16.gmra.mxu0 %v10368_v18  ;;  %v10430_v63 = vmax.bf16 %v13788_v25, %v2905_v12  ;;  %v8605_v12 = vld [vmem:[%s13607_s8 + $0x444] ss:$16 sps:$4 sm:$0xff]   ;;  %v10455_v34 = vpop.f32.mrf.mxu0  ;;  %v13862_v18 = vld [vmem:[#allocation21_spill] sm:$0xff] }
 0x30c   : > { %4724 = vmatprep.mubr.bf16.mxu1 %v10381_v5  ;;  %4917 = vmatprep.mubr.bf16.mxu0 %v10384_v49  ;;  %v10453_v20 = vpop.f32.mrf.mxu1  ;;  %v13860_v5 = vld [vmem:[#allocation13_spill] sm:$0xff]  ;;  %v13863_v44 = vld [vmem:[#allocation24_spill] sm:$0xff] }
 0x30d   : > { %5063 = vmatpush1.bf16.msra.mxu1 %v8585_v39  ;;  %5256 = vmatpush1.bf16.msra.mxu0 %v8588_v48  ;;  %v10424_v39 = vmax.bf16 %v13788_v25, %v2896_v43  ;;  %v10427_v48 = vmax.bf16 %v13788_v25, %v2898_v35  ;;  %13833 = vst [vmem:[#allocation50_spill] sm:$0xff] %v10430_v63 }
 0x30e   : > { %5064 = vmatprep.subr.bf16.mxu1 %v8593_v61  ;;  %5257 = vmatprep.subr.bf16.mxu0 %v8596_v47  ;;  %v8597_v61 = vld [vmem:[%s13607_s8 + $0x460] ss:$16 sps:$4 sm:$0xff]   ;;  %v2673_v43 = vpack.c.bf16 %v10064_v29, %v10046_v53  ;;  %v10443_v35 = vmax.bf16 %v13788_v25, %v2907_v0  ;;  %v13835_v53 = vpack.c.bf16 %v9876_v57, %v9869_v3  ;;  %v8611_v57 = vld [vmem:[%s13607_s8 + $0x424] ss:$16 sps:$4 sm:$0xff]  }
 0x30f   : > { %13831 = vst [vmem:[#allocation48_spill] sm:$0xff] %v10424_v39  ;;  %13832 = vst [vmem:[#allocation49_spill] sm:$0xff] %v10427_v48  ;;  %v8600_v47 = vld [vmem:[%s13607_s8 + $0x660] ss:$16 sps:$4 sm:$0xff]   ;;  %v2706_v45 = vpack.c.bf16 %v13863_v44, %v13862_v18 }
 0x310   : > { %13834 = vst [vmem:[#allocation51_spill] sm:$0xff] %v10443_v35  ;;  %v2904_v29 = vadd.bf16 %v10265_v30, %v13835_v53  ;;  %v8606_v3 = vld [vmem:[%s13607_s8 + $0x640] ss:$16 sps:$4 sm:$0xff]  }
 0x311   : > { %5065 = vmatpush1.bf16.msra.mxu1 %v8591_v28  ;;  %5258 = vmatpush1.bf16.msra.mxu0 %v8594_v4  ;;  %v8608_v28 = vld [vmem:[%s13607_s8 + $0x644] ss:$16 sps:$4 sm:$0xff]   ;;  %v2682_v4 = vpack.c.bf16 %v10119_v14, %v10094_v40  ;;  %v8603_v14 = vld [vmem:[%s13607_s8 + $0x440] ss:$16 sps:$4 sm:$0xff]  }
 0x312   : > { %5066 = vmatprep.subr.bf16.mxu1 %v8599_v51  ;;  %5259 = vmatprep.subr.bf16.mxu0 %v8602_v33  ;;  %v10465_v0 = vpop.f32.mrf.mxu1  ;;  %v10467_v40 = vpop.f32.mrf.mxu0  ;;  %v2913_v51 = vadd.bf16 %v10243_v23, %v2680_v19  ;;  %v2906_v33 = vadd.bf16 %v10270_v2, %v2673_v43  ;;  %v2688_v19 = vpack.c.bf16 %v10096_v6, %v10056_v62  ;;  %v8614_v62 = vld [vmem:[%s13607_s8 + $0x624] ss:$16 sps:$4 sm:$0xff]   ;;  %v8636_v44 = vld [vmem:[%s13607_s8 + $0x7a0] ss:$16 sps:$4 sm:$0xff]  }
 0x313   : > { %4725 = vmatmul.mubr.bf16.gmra.mxu1 %v10424_v39  ;;  %4918 = vmatmul.mubr.bf16.gmra.mxu0 %v10427_v48  ;;  %v8617_v6 = vld [vmem:[%s13607_s8 + $0x404] ss:$16 sps:$4 sm:$0xff]   ;;  %v13858_v39 = vld [vmem:[#allocation25_spill] sm:$0xff] }
 0x314   : > { %4734 = vmatprep.mubr.bf16.mxu1 %v10430_v63  ;;  %4927 = vmatprep.mubr.bf16.mxu0 %v10443_v35  ;;  %v10486_v53 = vpop.f32.mrf.mxu1  ;;  %v10488_v43 = vpop.f32.mrf.mxu0 }
 0x315   : > { %5067 = vmatpush1.bf16.msra.mxu1 %v8597_v61  ;;  %5260 = vmatpush1.bf16.msra.mxu0 %v8600_v47  ;;  %v2915_v61 = vadd.bf16 %v10248_v10, %v2682_v4  ;;  %v10482_v47 = vmax.bf16 %v13788_v25, %v2904_v29  ;;  %v2681_v4 = vpack.c.bf16 %v10104_v27, %v10086_v37  ;;  %v8612_v27 = vld [vmem:[%s13607_s8 + $0x620] ss:$16 sps:$4 sm:$0xff]  }
 0x316   : > { %5068 = vmatprep.subr.bf16.mxu1 %v8605_v12  ;;  %5261 = vmatprep.subr.bf16.mxu0 %v8608_v28  ;;  %v8609_v12 = vld [vmem:[%s13607_s8 + $0x420] ss:$16 sps:$4 sm:$0xff]   ;;  %v10494_v28 = vmax.bf16 %v13788_v25, %v2906_v33  ;;  %v10499_v29 = vmax.bf16 %v13788_v25, %v2913_v51  ;;  %v8620_v51 = vld [vmem:[%s13607_s8 + $0x604] ss:$16 sps:$4 sm:$0xff]  }
 0x317   : > { %13836 = vst [vmem:[#allocation52_spill] sm:$0xff] %v10482_v47  ;;  %v10511_v37 = vmax.bf16 %v13788_v25, %v2915_v61  ;;  %v13840_v33 = vld [vmem:[#allocation6_spill] sm:$0xff] }
 0x318   : > { %13837 = vst [vmem:[#allocation53_spill] sm:$0xff] %v10494_v28  ;;  %13838 = vst [vmem:[#allocation54_spill] sm:$0xff] %v10499_v29  ;;  %v8615_v61 = vld [vmem:[%s13607_s8 + $0x400] ss:$16 sps:$4 sm:$0xff]  }
 0x319   : > { %5069 = vmatpush1.bf16.msra.mxu1 %v8603_v14  ;;  %5262 = vmatpush1.bf16.msra.mxu0 %v8606_v3  ;;  %v2690_v14 = vpack.c.bf16 %v10147_v13, %v10136_v7  ;;  %13839 = vst [vmem:[#allocation55_spill] sm:$0xff] %v10511_v37  ;;  %v13841_v13 = vpack.c.bf16 %v9914_v17, %v13840_v33  ;;  %v10525_v3 = vpop.f32.mrf.mxu1  ;;  %v8623_v17 = vld [vmem:[%s13607_s8 + $0x5e4] ss:$16 sps:$4 sm:$0xff]  }
 0x31a   : > { %5070 = vmatprep.subr.bf16.mxu1 %v8611_v57  ;;  %v10527_v57 = vpop.f32.mrf.mxu0  ;;  %5263 = vmatprep.subr.bf16.mxu0 %v8614_v62 }
 0x31b   : > { %4735 = vmatmul.mubr.bf16.gmra.mxu1 %v10482_v47  ;;  %4928 = vmatmul.mubr.bf16.gmra.mxu0 %v10494_v28  ;;  %v2912_v7 = vadd.bf16 %v10265_v30, %v13841_v13  ;;  %v2914_v28 = vadd.bf16 %v10270_v2, %v2681_v4  ;;  %v2923_v33 = vadd.bf16 %v10248_v10, %v2690_v14  ;;  %v13842_v13 = vld [vmem:[#allocation7_spill] sm:$0xff]  ;;  %v10546_v4 = vpop.f32.mrf.mxu1 }
 0x31c   : > { %4744 = vmatprep.mubr.bf16.mxu1 %v10499_v29  ;;  %4937 = vmatprep.mubr.bf16.mxu0 %v10511_v37  ;;  %v2921_v29 = vadd.bf16 %v10243_v23, %v2688_v19  ;;  %v13845_v19 = vld [vmem:[#allocation14_spill] sm:$0xff]  ;;  %v10548_v62 = vpop.f32.mrf.mxu0 }
 0x31d   : > { %5071 = vmatpush1.bf16.msra.mxu1 %v8609_v12  ;;  %5264 = vmatpush1.bf16.msra.mxu0 %v8612_v27  ;;  %v13843_v12 = vld [vmem:[#allocation8_spill] sm:$0xff]  ;;  %v10542_v47 = vmax.bf16 %v13788_v25, %v2912_v7  ;;  %v2696_v35 = vpack.c.bf16 %v13845_v19, %v10134_v11  ;;  %v10554_v14 = vmax.bf16 %v13788_v25, %v2914_v28  ;;  %v13847_v27 = vld [vmem:[#allocation10_spill] sm:$0xff] }
 0x31e   : > { %5072 = vmatprep.subr.bf16.mxu1 %v8617_v6  ;;  %5265 = vmatprep.subr.bf16.mxu0 %v8620_v51  ;;  %v2687_v37 = vpack.c.bf16 %v13843_v12, %v13842_v13  ;;  %v8618_v6 = vld [vmem:[%s13607_s8 + $0x600] ss:$16 sps:$4 sm:$0xff]   ;;  %v13848_v51 = vld [vmem:[#allocation11_spill] sm:$0xff]  ;;  %v10559_v7 = vmax.bf16 %v13788_v25, %v2921_v29  ;;  %v10571_v28 = vmax.bf16 %v13788_v25, %v2923_v33  ;;  %v8629_v29 = vld [vmem:[%s13607_s8 + $0x5c4] ss:$16 sps:$4 sm:$0xff]  }
 0x31f   : > { %13844 = vst [vmem:[#allocation6_spill] sm:$0xff] %v10542_v47  ;;  %13846 = vst [vmem:[#allocation7_spill] sm:$0xff] %v10554_v14  ;;  %v2689_v13 = vpack.c.bf16 %v13848_v51, %v13847_v27  ;;  %v8621_v11 = vld [vmem:[%s13607_s8 + $0x5e0] ss:$16 sps:$4 sm:$0xff]   ;;  %v13850_v12 = vld [vmem:[#allocation15_spill] sm:$0xff]  ;;  %v2929_v27 = vadd.bf16 %v10243_v23, %v2696_v35  ;;  %v10580_v51 = vpop.f32.mrf.mxu1 }
 0x320   : > { %13849 = vst [vmem:[#allocation8_spill] sm:$0xff] %v10559_v7  ;;  %v13851_v19 = vld [vmem:[#allocation18_spill] sm:$0xff]  ;;  %13852 = vst [vmem:[#allocation14_spill] sm:$0xff] %v10571_v28 }
 0x321   : > { %5073 = vmatpush1.bf16.msra.mxu1 %v8615_v61  ;;  %v8626_v61 = vld [vmem:[%s13607_s8 + $0x7e4] ss:$16 sps:$4 sm:$0xff]   ;;  %v2698_v63 = vpack.c.bf16 %v13851_v19, %v13850_v12  ;;  %v10582_v12 = vpop.f32.mrf.mxu0  ;;  %5266 = vmatpush1.bf16.msra.mxu0 %v8618_v6  ;;  %v8624_v33 = vld [vmem:[%s13607_s8 + $0x7e0] ss:$16 sps:$4 sm:$0xff]   ;;  %v2922_v19 = vadd.bf16 %v10270_v2, %v2689_v13  ;;  %v13854_v13 = vld [vmem:[#allocation9_spill] sm:$0xff]  ;;  %v10609_v48 = vmax.bf16 %v13788_v25, %v2929_v27 }
 0x322   : > { %5074 = vmatprep.subr.bf16.mxu1 %v8623_v17  ;;  %v2920_v17 = vadd.bf16 %v10265_v30, %v2687_v37  ;;  %5267 = vmatprep.subr.bf16.mxu0 %v8626_v61  ;;  %v8627_v37 = vld [vmem:[%s13607_s8 + $0x5c0] ss:$16 sps:$4 sm:$0xff]   ;;  %v8632_v35 = vld [vmem:[%s13607_s8 + $0x7c4] ss:$16 sps:$4 sm:$0xff]  }
 0x323   : > { %4745 = vmatmul.mubr.bf16.gmra.mxu1 %v10542_v47  ;;  %4938 = vmatmul.mubr.bf16.gmra.mxu0 %v10554_v14  ;;  %v8635_v6 = vld [vmem:[%s13607_s8 + $0x5a4] ss:$16 sps:$4 sm:$0xff]   ;;  %v10604_v14 = vpop.f32.mrf.mxu1  ;;  %v10606_v47 = vpop.f32.mrf.mxu0  ;;  %13856 = vst [vmem:[#allocation11_spill] sm:$0xff] %v10609_v48  ;;  %v8633_v27 = vld [vmem:[%s13607_s8 + $0x5a0] ss:$16 sps:$4 sm:$0xff]  }
 0x324   : > { %4754 = vmatprep.mubr.bf16.mxu1 %v10559_v7  ;;  %4947 = vmatprep.mubr.bf16.mxu0 %v10571_v28  ;;  %v2931_v7 = vadd.bf16 %v10248_v10, %v2698_v63  ;;  %v10600_v28 = vmax.bf16 %v13788_v25, %v2920_v17  ;;  %v8630_v63 = vld [vmem:[%s13607_s8 + $0x7c0] ss:$16 sps:$4 sm:$0xff]   ;;  %v10617_v17 = vmax.bf16 %v13788_v25, %v2922_v19 }
 0x325   : > { %5075 = vmatpush2.bf16.msra.mxu1 %v8621_v11  ;;  %v13855_v11 = vld [vmem:[#allocation12_spill] sm:$0xff]  ;;  %5268 = vmatpush2.bf16.msra.mxu0 %v8624_v33 }
 0x326   : > { %5076 = vmatprep.subr.bf16.mxu1 %v8629_v29  ;;  %13853 = vst [vmem:[#allocation10_spill] sm:$0xff] %v10600_v28  ;;  %v2695_v61 = vpack.c.bf16 %v13855_v11, %v13854_v13  ;;  %v13857_v29 = vld [vmem:[#allocation20_spill] sm:$0xff]  ;;  %13859 = vst [vmem:[#allocation15_spill] sm:$0xff] %v10617_v17  ;;  %5269 = vmatprep.subr.bf16.mxu0 %v8632_v35  ;;  %v10641_v35 = vpop.f32.mrf.mxu0 }
 0x327   : > { %v2704_v49 = vpack.c.bf16 %v13858_v39, %v13857_v29  ;;  %v13861_v13 = vld [vmem:[#allocation16_spill] sm:$0xff]  ;;  %v10631_v39 = vmax.bf16 %v13788_v25, %v2931_v7 }
 0x328   : > { %v2697_v11 = vpack.c.bf16 %v13861_v13, %v13860_v5  ;;  %v8638_v33 = vld [vmem:[%s13607_s8 + $0x7a4] ss:$16 sps:$4 sm:$0xff]   ;;  %v2928_v19 = vadd.bf16 %v10265_v30, %v2695_v61  ;;  %v13866_v13 = vld [vmem:[#allocation17_spill] sm:$0xff] }
 0x329   : > { %5077 = vmatpush2.bf16.msra.mxu1 %v8627_v37  ;;  %13864 = vst [vmem:[#allocation18_spill] sm:$0xff] %v10631_v39  ;;  %v8641_v5 = vld [vmem:[%s13607_s8 + $0x584] ss:$16 sps:$4 sm:$0xff]   ;;  %v10639_v37 = vpop.f32.mrf.mxu1  ;;  %5270 = vmatpush2.bf16.msra.mxu0 %v8630_v63  ;;  %v2937_v18 = vadd.bf16 %v10243_v23, %v2704_v49  ;;  %v2939_v63 = vadd.bf16 %v10248_v10, %v2706_v45  ;;  %v8642_v45 = vld [vmem:[%s13607_s8 + $0x780] ss:$16 sps:$4 sm:$0xff]  }
 0x32a   : > { %5078 = vmatprep.subr.bf16.mxu1 %v8635_v6  ;;  %v2930_v7 = vadd.bf16 %v10270_v2, %v2697_v11  ;;  %5271 = vmatprep.subr.bf16.mxu0 %v8638_v33  ;;  %v8639_v6 = vld [vmem:[%s13607_s8 + $0x580] ss:$16 sps:$4 sm:$0xff]   ;;  %v8644_v61 = vld [vmem:[%s13607_s8 + $0x784] ss:$16 sps:$4 sm:$0xff]   ;;  %v10660_v49 = vmax.bf16 %v13788_v25, %v2928_v19  ;;  %v13867_v11 = vld [vmem:[#allocation23_spill] sm:$0xff] }
 0x32b   : > { %4755 = vmatmul.mubr.bf16.gmra.mxu1 %v10600_v28  ;;  %4948 = vmatmul.mubr.bf16.gmra.mxu0 %v10617_v17  ;;  %v8647_v29 = vld [vmem:[%s13607_s8 + $0x564] ss:$16 sps:$4 sm:$0xff]   ;;  %v10664_v33 = vpop.f32.mrf.mxu1  ;;  %v10677_v19 = vmax.bf16 %v13788_v25, %v2937_v18  ;;  %v10695_v18 = vmax.bf16 %v13788_v25, %v2939_v63 }
 0x32c   : > { %4764 = vmatprep.mubr.bf16.mxu1 %v10609_v48  ;;  %4957 = vmatprep.mubr.bf16.mxu0 %v10631_v39  ;;  %13865 = vst [vmem:[#allocation9_spill] sm:$0xff] %v10660_v49  ;;  %v10666_v39 = vpop.f32.mrf.mxu0  ;;  %v13869_v48 = vld [vmem:[#allocation19_spill] sm:$0xff]  ;;  %v13870_v17 = vld [vmem:[#allocation22_spill] sm:$0xff] }
 0x32d   : > { %5079 = vmatpush2.bf16.msra.mxu1 %v8633_v27  ;;  %v2703_v27 = vpack.c.bf16 %v13867_v11, %v13866_v13  ;;  %5272 = vmatpush2.bf16.msra.mxu0 %v8636_v44  ;;  %v2705_v28 = vpack.c.bf16 %v13870_v17, %v13869_v48  ;;  %13871 = vst [vmem:[#allocation20_spill] sm:$0xff] %v10677_v19  ;;  %v8645_v13 = vld [vmem:[%s13607_s8 + $0x560] ss:$16 sps:$4 sm:$0xff]   ;;  %v8650_v44 = vld [vmem:[%s13607_s8 + $0x764] ss:$16 sps:$4 sm:$0xff]   ;;  %13877 = vst [vmem:[#allocation13_spill] sm:$0xff] %v10695_v18 }
 0x32e   : > { %5080 = vmatprep.subr.bf16.mxu1 %v8641_v5  ;;  %v10672_v5 = vmax.bf16 %v13788_v25, %v2930_v7  ;;  %5273 = vmatprep.subr.bf16.mxu0 %v8644_v61  ;;  %v13872_v11 = vld [vmem:[#allocation28_spill] sm:$0xff] }
 0x32f   : > { %v2712_v7 = vpack.c.bf16 %v13873_v31, %v13872_v11  ;;  %v2936_v56 = vadd.bf16 %v10265_v30, %v2703_v27  ;;  %v8648_v61 = vld [vmem:[%s13607_s8 + $0x760] ss:$16 sps:$4 sm:$0xff]   ;;  %v2938_v63 = vadd.bf16 %v10270_v2, %v2705_v28  ;;  %v2947_v11 = vadd.bf16 %v10248_v10, %v2714_v55 }
 0x330   : > { %13868 = vst [vmem:[#allocation12_spill] sm:$0xff] %v10672_v5 }
 0x331   : > { %5081 = vmatpush2.bf16.msra.mxu1 %v8639_v6  ;;  %v8653_v6 = vld [vmem:[%s13607_s8 + $0x544] ss:$16 sps:$4 sm:$0xff]   ;;  %5274 = vmatpush2.bf16.msra.mxu0 %v8642_v45  ;;  %v2945_v27 = vadd.bf16 %v10243_v23, %v2712_v7  ;;  %v10725_v28 = vmax.bf16 %v13788_v25, %v2936_v56  ;;  %v10734_v55 = vmax.bf16 %v13788_v25, %v2938_v63  ;;  %v8654_v56 = vld [vmem:[%s13607_s8 + $0x740] ss:$16 sps:$4 sm:$0xff]  }
 0x332   : > { %5082 = vmatprep.subr.bf16.mxu1 %v8647_v29  ;;  %5275 = vmatprep.subr.bf16.mxu0 %v8650_v44  ;;  %v8651_v29 = vld [vmem:[%s13607_s8 + $0x540] ss:$16 sps:$4 sm:$0xff]   ;;  %v8656_v45 = vld [vmem:[%s13607_s8 + $0x744] ss:$16 sps:$4 sm:$0xff]  }
 0x333   : > { %v10689_v48 = vpop.f32.mrf.mxu1  ;;  %v10691_v17 = vpop.f32.mrf.mxu0  ;;  %4765 = vmatmul.mubr.bf16.gmra.mxu1 %v10660_v49  ;;  %4958 = vmatmul.mubr.bf16.gmra.mxu0 %v10672_v5  ;;  %13879 = vst [vmem:[#allocation21_spill] sm:$0xff] %v10725_v28  ;;  %v13881_v44 = vld [vmem:[#allocation30_spill] sm:$0xff]  ;;  %13882 = vst [vmem:[#allocation24_spill] sm:$0xff] %v10734_v55 }
 0x334   : > { %13876 = vst [vmem:[#allocation25_spill] sm:$0xff] %v10691_v17  ;;  %4774 = vmatprep.mubr.bf16.mxu1 %v10677_v19  ;;  %4967 = vmatprep.mubr.bf16.mxu0 %v10695_v18 }
 0x335   : > { %v10704_v8 = vpop.f32.mrf.mxu1  ;;  %v10706_v31 = vpop.f32.mrf.mxu0  ;;  %5083 = vmatpush2.bf16.msra.mxu1 %v8645_v13  ;;  %v13880_v13 = vld [vmem:[#allocation26_spill] sm:$0xff]  ;;  %5276 = vmatpush2.bf16.msra.mxu0 %v8648_v61  ;;  %v2722_v61 = vpack.c.bf16 %v10255_v21, %v10234_v22 }
 0x336   : > { %5084 = vmatprep.subr.bf16.mxu1 %v8653_v6  ;;  %v2711_v5 = vpack.c.bf16 %v13881_v44, %v13880_v13  ;;  %v2720_v6 = vpack.c.bf16 %v10253_v59, %v10232_v36  ;;  %v8659_v13 = vld [vmem:[%s13607_s8 + $0x524] ss:$16 sps:$4 sm:$0xff]   ;;  %v10754_v36 = vmax.bf16 %v13788_v25, %v2945_v27  ;;  %5277 = vmatprep.subr.bf16.mxu0 %v8656_v45  ;;  %v8657_v59 = vld [vmem:[%s13607_s8 + $0x520] ss:$16 sps:$4 sm:$0xff]  }
 0x337   : > { %v10717_v18 = vpop.f32.mrf.mxu1  ;;  %v10719_v19 = vpop.f32.mrf.mxu0  ;;  %v8662_v22 = vld [vmem:[%s13607_s8 + $0x724] ss:$16 sps:$4 sm:$0xff]  }
 0x338   : > { %13878 = vst [vmem:[#allocation16_spill] sm:$0xff] %v10719_v19  ;;  %v13884_v19 = vld [vmem:[#allocation31_spill] sm:$0xff]  ;;  %13886 = vst [vmem:[#allocation23_spill] sm:$0xff] %v10754_v36  ;;  %v8665_v21 = vld [vmem:[%s13607_s8 + $0x504] ss:$16 sps:$4 sm:$0xff]  }
 0x339   : > { %v10729_v49 = vpop.f32.mrf.mxu1  ;;  %v10731_v7 = vpop.f32.mrf.mxu0  ;;  %v2713_v17 = vpack.c.bf16 %v13884_v19, %v13883_v42  ;;  %5085 = vmatpush2.bf16.msra.mxu1 %v8651_v29  ;;  %v10757_v42 = vmax.bf16 %v13788_v25, %v2947_v11  ;;  %v2944_v19 = vadd.bf16 %v10265_v30, %v2711_v5  ;;  %v2953_v11 = vadd.bf16 %v10243_v23, %v2720_v6  ;;  %v8668_v6 = vld [vmem:[%s13607_s8 + $0x704] ss:$16 sps:$4 sm:$0xff]  }
 0x33a   : > { %5278 = vmatpush2.bf16.msra.mxu0 %v8654_v56  ;;  %5086 = vmatprep.subr.bf16.mxu1 %v8659_v13  ;;  %v2955_v5 = vadd.bf16 %v10248_v10, %v2722_v61  ;;  %v13890_v56 = vld [vmem:[#allocation35_spill] sm:$0xff] }
 0x33b   : > { %v10748_v63 = vpop.f32.mrf.mxu1  ;;  %v10750_v44 = vpop.f32.mrf.mxu0  ;;  %4775 = vmatmul.mubr.bf16.gmra.mxu1 %v10725_v28  ;;  %13887 = vst [vmem:[#allocation19_spill] sm:$0xff] %v10757_v42  ;;  %4968 = vmatmul.mubr.bf16.gmra.mxu0 %v10734_v55  ;;  %v2946_v45 = vadd.bf16 %v10270_v2, %v2713_v17  ;;  %v8660_v55 = vld [vmem:[%s13607_s8 + $0x720] ss:$16 sps:$4 sm:$0xff]   ;;  %v10790_v17 = vmax.bf16 %v13788_v25, %v2944_v19 }
 0x33c   : > { %13885 = vst [vmem:[#allocation17_spill] sm:$0xff] %v10750_v44  ;;  %4784 = vmatprep.mubr.bf16.mxu1 %v10754_v36  ;;  %4977 = vmatprep.mubr.bf16.mxu0 %v10757_v42  ;;  %v2719_v13 = vpack.c.bf16 %v10236_v1, %v13890_v56  ;;  %v8666_v1 = vld [vmem:[%s13607_s8 + $0x700] ss:$16 sps:$4 sm:$0xff]   ;;  %v2728_v19 = vpack.c.bf16 %v10328_v38, %v10279_v50  ;;  %v8674_v50 = vld [vmem:[%s13607_s8 + $0x2ec] ss:$16 sps:$4 sm:$0xff]  }
 0x33d   : > { %v10772_v29 = vpop.f32.mrf.mxu1  ;;  %v10774_v27 = vpop.f32.mrf.mxu0  ;;  %5087 = vmatpush2.bf16.msra.mxu1 %v8657_v59  ;;  %5279 = vmatprep.subr.bf16.mxu0 %v8662_v22  ;;  %13889 = vst [vmem:[#allocation28_spill] sm:$0xff] %v10790_v17  ;;  %v10799_v44 = vmax.bf16 %v13788_v25, %v2946_v45  ;;  %v13892_v59 = vld [vmem:[#allocation36_spill] sm:$0xff]  ;;  %v2730_v45 = vpack.c.bf16 %v10330_v54, %v10281_v9 }
 0x33e   : > { %5088 = vmatprep.subr.bf16.mxu1 %v8665_v21  ;;  %v2721_v22 = vpack.c.bf16 %v10238_v15, %v13892_v59  ;;  %5280 = vmatpush2.bf16.msra.mxu0 %v8660_v55  ;;  %v8663_v21 = vld [vmem:[%s13607_s8 + $0x500] ss:$16 sps:$4 sm:$0xff]   ;;  %v10822_v55 = vmax.bf16 %v13788_v25, %v2955_v5  ;;  %v2952_v9 = vadd.bf16 %v10265_v30, %v2719_v13 }
 0x33f   : > { %v10782_v28 = vpop.f32.mrf.mxu1  ;;  %v10784_v36 = vpop.f32.mrf.mxu0  ;;  %13891 = vst [vmem:[#allocation33_spill] sm:$0xff] %v10799_v44  ;;  %5281 = vmatprep.subr.bf16.mxu0 %v8668_v6  ;;  %v2961_v6 = vadd.bf16 %v10243_v23, %v2728_v19  ;;  %v2963_v59 = vadd.bf16 %v10248_v10, %v2730_v45  ;;  %v2736_v45 = vpack.c.bf16 %v10453_v20, %v10392_v16 }
 0x340   : > { %13888 = vst [vmem:[#allocation22_spill] sm:$0xff] %v10784_v36  ;;  %v10804_v36 = vmax.bf16 %v13788_v25, %v2953_v11  ;;  %13894 = vst [vmem:[#allocation34_spill] sm:$0xff] %v10822_v55  ;;  %v8671_v11 = vld [vmem:[%s13607_s8 + $0xec] ss:$16 sps:$4 sm:$0xff]   ;;  %v2954_v5 = vadd.bf16 %v10270_v2, %v2721_v22  ;;  %v10846_v13 = vmax.bf16 %v13788_v25, %v2952_v9 }
 0x341   : > { %v10794_v42 = vpop.f32.mrf.mxu1  ;;  %v10796_v61 = vpop.f32.mrf.mxu0  ;;  %5089 = vmatpush2.bf16.msra.mxu1 %v8663_v21 }
 0x342   : > { %13893 = vst [vmem:[#allocation29_spill] sm:$0xff] %v10804_v36  ;;  %5282 = vmatpush2.bf16.msra.mxu0 %v8666_v1  ;;  %5444 = vmatprep.subr.bf16.mxu1 %v8671_v11  ;;  %13895 = vst [vmem:[#allocation26_spill] sm:$0xff] %v10846_v13  ;;  %v10855_v21 = vmax.bf16 %v13788_v25, %v2954_v5  ;;  %v13897_v1 = vld [vmem:[#allocation37_spill] sm:$0xff]  ;;  %v2738_v11 = vpack.c.bf16 %v10455_v34, %v10394_v58 }
 0x343   : > { %v10816_v56 = vpop.f32.mrf.mxu1  ;;  %v10818_v15 = vpop.f32.mrf.mxu0  ;;  %4785 = vmatmul.mubr.bf16.gmra.mxu1 %v10790_v17  ;;  %4978 = vmatmul.mubr.bf16.gmra.mxu0 %v10799_v44  ;;  %v2729_v19 = vpack.c.bf16 %v10299_v46, %v13897_v1  ;;  %v2969_v34 = vadd.bf16 %v10243_v23, %v2736_v45  ;;  %v2735_v1 = vpack.c.bf16 %v10419_v60, %v10358_v32 }
 0x344   : > { %4794 = vmatprep.mubr.bf16.mxu1 %v10804_v36  ;;  %4987 = vmatprep.mubr.bf16.mxu0 %v10822_v55  ;;  %v2727_v55 = vpack.c.bf16 %v10297_v41, %v10260_v52  ;;  %13896 = vst [vmem:[#allocation30_spill] sm:$0xff] %v10855_v21  ;;  %v10869_v52 = vmax.bf16 %v13788_v25, %v2961_v6 }
 0x345   : > { %v10834_v38 = vpop.f32.mrf.mxu1  ;;  %v10836_v54 = vpop.f32.mrf.mxu0  ;;  %5637 = vmatprep.subr.bf16.mxu0 %v8674_v50  ;;  %v10872_v41 = vmax.bf16 %v13788_v25, %v2963_v59  ;;  %v2962_v20 = vadd.bf16 %v10270_v2, %v2729_v19  ;;  %v2971_v5 = vadd.bf16 %v10248_v10, %v2738_v11  ;;  %v2737_v45 = vpack.c.bf16 %v10421_v24, %v10360_v26 }
 0x346   : > { %13898 = vst [vmem:[#allocation27_spill] sm:$0xff] %v10869_v52  ;;  %v2960_v46 = vadd.bf16 %v10265_v30, %v2727_v55  ;;  %v2744_v11 = vpack.c.bf16 %v10546_v4, %v10486_v53  ;;  %v10913_v32 = vmax.bf16 %v13788_v25, %v2969_v34  ;;  %v2968_v26 = vadd.bf16 %v10265_v30, %v2735_v1 }
 0x347   : > { %v10841_v17 = vpop.f32.mrf.mxu1  ;;  %v10843_v44 = vpop.f32.mrf.mxu0  ;;  %13899 = vst [vmem:[#allocation31_spill] sm:$0xff] %v10872_v41  ;;  %v10899_v19 = vmax.bf16 %v13788_v25, %v2962_v20  ;;  %v10916_v60 = vmax.bf16 %v13788_v25, %v2971_v5  ;;  %v2743_v1 = vpack.c.bf16 %v10525_v3, %v10465_v0 }
 0x348   : > { %v10890_v55 = vmax.bf16 %v13788_v25, %v2960_v46  ;;  %v2746_v46 = vpack.c.bf16 %v10548_v62, %v10488_v43  ;;  %13902 = vst [vmem:[#allocation37_spill] sm:$0xff] %v10913_v32  ;;  %v2970_v43 = vadd.bf16 %v10270_v2, %v2737_v45  ;;  %v2977_v4 = vadd.bf16 %v10243_v23, %v2744_v11 }
 0x349   : > { %v10850_v36 = vpop.f32.mrf.mxu1  ;;  %v10852_v22 = vpop.f32.mrf.mxu0  ;;  %13901 = vst [vmem:[#allocation36_spill] sm:$0xff] %v10899_v19  ;;  %13903 = vst [vmem:[#allocation56_spill] sm:$0xff] %v10916_v60  ;;  %v10934_v5 = vmax.bf16 %v13788_v25, %v2968_v26  ;;  %v2745_v11 = vpack.c.bf16 %v10527_v57, %v10467_v40  ;;  %v2754_v26 = vpack.c.bf16 %v10666_v39, %v10606_v47 }
 0x34a   : > { %13900 = vst [vmem:[#allocation35_spill] sm:$0xff] %v10890_v55  ;;  %v2979_v62 = vadd.bf16 %v10248_v10, %v2746_v46  ;;  %v10943_v45 = vmax.bf16 %v13788_v25, %v2970_v43  ;;  %v2752_v46 = vpack.c.bf16 %v10664_v33, %v10604_v14  ;;  %v10957_v0 = vmax.bf16 %v13788_v25, %v2977_v4 }
 0x34b   : > { %v10863_v50 = vpop.f32.mrf.mxu1  ;;  %v10865_v9 = vpop.f32.mrf.mxu0  ;;  %4795 = vmatmul.mubr.bf16.gmra.mxu1 %v10846_v13  ;;  %4988 = vmatmul.mubr.bf16.gmra.mxu0 %v10855_v21  ;;  %13904 = vst [vmem:[#allocation57_spill] sm:$0xff] %v10934_v5  ;;  %v2976_v40 = vadd.bf16 %v10265_v30, %v2743_v1  ;;  %v2978_v14 = vadd.bf16 %v10270_v2, %v2745_v11 }
 0x34c   : > { %4804 = vmatprep.mubr.bf16.mxu1 %v10869_v52  ;;  %4997 = vmatprep.mubr.bf16.mxu0 %v10872_v41  ;;  %13905 = vst [vmem:[#allocation58_spill] sm:$0xff] %v10943_v45  ;;  %13906 = vst [vmem:[#allocation59_spill] sm:$0xff] %v10957_v0  ;;  %v10960_v3 = vmax.bf16 %v13788_v25, %v2979_v62  ;;  %v2985_v39 = vadd.bf16 %v10243_v23, %v2752_v46 }
 0x34d   : > { %v10878_v16 = vpop.f32.mrf.mxu1  ;;  %v10880_v58 = vpop.f32.mrf.mxu0  ;;  %v2987_v33 = vadd.bf16 %v10248_v10, %v2754_v26  ;;  %v10978_v62 = vmax.bf16 %v13788_v25, %v2976_v40  ;;  %v2751_v1 = vpack.c.bf16 %v10639_v37, %v10580_v51  ;;  %v10987_v11 = vmax.bf16 %v13788_v25, %v2978_v14  ;;  %v13911_v26 = vld [vmem:[#allocation2_spill] sm:$0xff] }
 0x34e   : > { %13907 = vst [vmem:[#allocation60_spill] sm:$0xff] %v10960_v3  ;;  %v2753_v46 = vpack.c.bf16 %v10641_v35, %v10582_v12  ;;  %v2760_v40 = vpack.c.bf16 %v10729_v49, %v10704_v8  ;;  %v2762_v51 = vpack.c.bf16 %v10731_v7, %v10706_v31  ;;  %v11003_v14 = vmax.bf16 %v13788_v25, %v2985_v39  ;;  %v13918_v7 = vld [vmem:[#allocation32_spill] sm:$0xff] }
 0x34f   : > { %v10885_v6 = vpop.f32.mrf.mxu1  ;;  %v10887_v59 = vpop.f32.mrf.mxu0  ;;  %13909 = vst [vmem:[#allocation62_spill] sm:$0xff] %v10978_v62  ;;  %13910 = vst [vmem:[#allocation63_spill] sm:$0xff] %v10987_v11  ;;  %v11006_v12 = vmax.bf16 %v13788_v25, %v2987_v33  ;;  %v2984_v35 = vadd.bf16 %v10265_v30, %v2751_v1 }
 0x350   : > { %13914 = vst [vmem:[#allocation66_spill] sm:$0xff] %v11003_v14  ;;  %v2986_v31 = vadd.bf16 %v10270_v2, %v2753_v46  ;;  %v2993_v33 = vadd.bf16 %v10243_v23, %v2760_v40  ;;  %v2794_v46 = vsub.s32 4, %v13911_v26 }
 0x351   : > { %v10894_v41 = vpop.f32.mrf.mxu1  ;;  %v10896_v52 = vpop.f32.mrf.mxu0  ;;  %13915 = vst [vmem:[#allocation67_spill] sm:$0xff] %v11006_v12 }
 0x352   : > { %v11037_v40 = vmax.bf16 %v13788_v25, %v2986_v31  ;;  %v11051_v31 = vmax.bf16 %v13788_v25, %v2993_v33 }
 0x353   : > { %v10907_v21 = vpop.f32.mrf.mxu1  ;;  %v10909_v13 = vpop.f32.mrf.mxu0  ;;  %4805 = vmatmul.mubr.bf16.gmra.mxu1 %v10890_v55  ;;  %4998 = vmatmul.mubr.bf16.gmra.mxu0 %v10899_v19 }
 0x354   : > { %4814 = vmatprep.mubr.bf16.mxu1 %v10913_v32  ;;  %5007 = vmatprep.mubr.bf16.mxu0 %v10916_v60  ;;  %13923 = vst [vmem:[#allocation73_spill] sm:$0xff] %v11037_v40 }
 0x355   : > { %v10922_v24 = vpop.f32.mrf.mxu1  ;;  %v10924_v53 = vpop.f32.mrf.mxu0 }
 0x357   : > { %v10929_v20 = vpop.f32.mrf.mxu1  ;;  %v10931_v34 = vpop.f32.mrf.mxu0 }
 0x359   : > { %v10938_v60 = vpop.f32.mrf.mxu1  ;;  %v10940_v32 = vpop.f32.mrf.mxu0 }
 0x35b   : > { %v10951_v19 = vpop.f32.mrf.mxu1  ;;  %v10953_v55 = vpop.f32.mrf.mxu0  ;;  %4815 = vmatmul.mubr.bf16.gmra.mxu1 %v10934_v5  ;;  %5008 = vmatmul.mubr.bf16.gmra.mxu0 %v10943_v45  ;;  %v2798_v45 = vsub.s32 5, %v13911_v26  ;;  %v2806_v5 = vsub.s32 7, %v13911_v26 }
 0x35c   : > { %4824 = vmatprep.mubr.bf16.mxu1 %v10957_v0  ;;  %5017 = vmatprep.mubr.bf16.mxu0 %v10960_v3 }
 0x35d   : > { %v10966_v47 = vpop.f32.mrf.mxu1  ;;  %v10968_v57 = vpop.f32.mrf.mxu0  ;;  %v2799_v39 = vrot.slane %v13918_v7, %v2798_v45  ;;  %v2802_v45 = vsub.s32 6, %v13911_v26 }
 0x35f   : > { %v10973_v43 = vpop.f32.mrf.mxu1  ;;  %v10975_v4 = vpop.f32.mrf.mxu0 }
 0x360   : > { %13908 = vst [vmem:[#allocation61_spill] sm:$0xff] %v10975_v4 }
 0x361   : > { %v10982_v3 = vpop.f32.mrf.mxu1  ;;  %v10984_v0 = vpop.f32.mrf.mxu0 }
 0x363   : > { %v10997_v37 = vpop.f32.mrf.mxu1  ;;  %v10999_v4 = vpop.f32.mrf.mxu0  ;;  %4825 = vmatmul.mubr.bf16.gmra.mxu1 %v10978_v62  ;;  %5018 = vmatmul.mubr.bf16.gmra.mxu0 %v10987_v11  ;;  %v2807_v62 = vrot.slane %v13918_v7, %v2806_v5  ;;  %v2995_v11 = vadd.bf16 %v10248_v10, %v2762_v51  ;;  %v13924_v51 = vld [vmem:[#allocation25_spill] sm:$0xff] }
 0x364   : > { %13912 = vst [vmem:[#allocation64_spill] sm:$0xff] %v10997_v37  ;;  %13913 = vst [vmem:[#allocation65_spill] sm:$0xff] %v10999_v4  ;;  %4834 = vmatprep.mubr.bf16.mxu1 %v11003_v14  ;;  %5027 = vmatprep.mubr.bf16.mxu0 %v11006_v12  ;;  %v11026_v12 = vmax.bf16 %v13788_v25, %v2984_v35  ;;  %v2759_v14 = vpack.c.bf16 %v10717_v18, %v10689_v48 }
 0x365   : > { %v11012_v49 = vpop.f32.mrf.mxu1  ;;  %v11014_v8 = vpop.f32.mrf.mxu0  ;;  %v2823_v35 = vpack.c.bf16 %v2807_v62, %v2807_v62  ;;  %v2770_v48 = vpack.c.bf16 %v10796_v61, %v10774_v27  ;;  %13926 = vst [vmem:[#allocation25_spill] sm:$0xff] %v11051_v31 }
 0x366   : > { %13916 = vst [vmem:[#allocation68_spill] sm:$0xff] %v11012_v49  ;;  %13917 = vst [vmem:[#allocation69_spill] sm:$0xff] %v11014_v8  ;;  %v2821_v8 = vpack.c.bf16 %v2799_v39, %v2799_v39  ;;  %v2768_v49 = vpack.c.bf16 %v10794_v42, %v10772_v29  ;;  %v2795_v42 = vrot.slane %v13918_v7, %v2794_v46 }
 0x367   : > { %v11021_v4 = vpop.f32.mrf.mxu1  ;;  %v11023_v1 = vpop.f32.mrf.mxu0  ;;  %13921 = vst [vmem:[#allocation71_spill] sm:$0xff] %v11026_v12  ;;  %v2803_v29 = vrot.slane %v13918_v7, %v2802_v45  ;;  %v2874_v39 = vpack.i.b16 %v2823_v35, %v2823_v35  ;;  %v2767_v45 = vpack.c.bf16 %v10782_v28, %v10748_v63  ;;  %v13932_v35 = vld [vmem:[#allocation4_spill] sm:$0xff]  ;;  %v2652_v28 = vpack.c.bf16 %v10850_v36, %v10834_v38 }
 0x368   : > { %13919 = vst [vmem:[#allocation32_spill] sm:$0xff] %v11021_v4  ;;  %13920 = vst [vmem:[#allocation70_spill] sm:$0xff] %v11023_v1  ;;  %v13925_v4 = vld [vmem:[#allocation16_spill] sm:$0xff]  ;;  %v3001_v33 = vadd.bf16 %v10243_v23, %v2768_v49  ;;  %v13931_v49 = vld [vmem:[#allocation22_spill] sm:$0xff]  ;;  %v2654_v63 = vpack.c.bf16 %v10852_v22, %v10836_v54 }
 0x369   : > { %v11032_v37 = vpop.f32.mrf.mxu1  ;;  %v11034_v5 = vpop.f32.mrf.mxu0  ;;  %v2761_v1 = vpack.c.bf16 %v13925_v4, %v13924_v51  ;;  %v2992_v4 = vadd.bf16 %v10265_v30, %v2759_v14  ;;  %v3003_v14 = vadd.bf16 %v10248_v10, %v2770_v48  ;;  %v13930_v10 = vld [vmem:[#allocation17_spill] sm:$0xff] }
 0x36a   : > { %13922 = vst [vmem:[#allocation72_spill] sm:$0xff] %v11034_v5  ;;  %v11054_v5 = vmax.bf16 %v13788_v25, %v2995_v11  ;;  %v2860_v11 = vpack.i.b16 %v2821_v8, %v2821_v8 }
 0x36b   : > { %v11045_v18 = vpop.f32.mrf.mxu1  ;;  %v11047_v26 = vpop.f32.mrf.mxu0  ;;  %4835 = vmatmul.mubr.bf16.gmra.mxu1 %v11026_v12  ;;  %5028 = vmatmul.mubr.bf16.gmra.mxu0 %v11037_v40  ;;  %v2994_v62 = vadd.bf16 %v10270_v2, %v2761_v1  ;;  %v11074_v7 = vmax.bf16 %v13788_v25, %v2992_v4  ;;  %v2769_v1 = vpack.c.bf16 %v13931_v49, %v13930_v10 }
 0x36c   : > { %13927 = vst [vmem:[#allocation16_spill] sm:$0xff] %v11054_v5  ;;  %4844 = vmatprep.mubr.bf16.mxu1 %v11051_v31  ;;  %5037 = vmatprep.mubr.bf16.mxu0 %v11054_v5  ;;  %v2820_v5 = vpack.c.bf16 %v2795_v42, %v2795_v42  ;;  %v2822_v31 = vpack.c.bf16 %v2803_v29, %v2803_v29 }
 0x36d   : > { %v11062_v27 = vpop.f32.mrf.mxu1  ;;  %v11064_v61 = vpop.f32.mrf.mxu0  ;;  %13928 = vst [vmem:[#allocation74_spill] sm:$0xff] %v11074_v7  ;;  %v11083_v23 = vmax.bf16 %v13788_v25, %v2994_v62  ;;  %v11088_v48 = vrot.slane %v2860_v11, %v13932_v35  ;;  %v11091_v4 = vrot.slane %v2874_v39, %v13932_v35  ;;  %v11103_v62 = vmax.bf16 %v13788_v25, %v3001_v33 }
 0x36e   : > { %v11106_v11 = vmax.bf16 %v13788_v25, %v3003_v14  ;;  %v3000_v39 = vadd.bf16 %v10265_v30, %v2767_v45  ;;  %v2853_v36 = vpack.i.b16 %v2820_v5, %v2820_v5  ;;  %v3002_v22 = vadd.bf16 %v10270_v2, %v2769_v1 }
 0x36f   : > { %v11069_v51 = vpop.f32.mrf.mxu1  ;;  %v11071_v46 = vpop.f32.mrf.mxu0  ;;  %13929 = vst [vmem:[#allocation75_spill] sm:$0xff] %v11083_v23  ;;  %13933 = vst [vmem:[#allocation17_spill] sm:$0xff] %v11103_v62  ;;  %v2867_v33 = vpack.i.b16 %v2822_v31, %v2822_v31  ;;  %v2885_v10 = vadd.bf16 %v11088_v48, %v2652_v28  ;;  %v2887_v14 = vadd.bf16 %v11091_v4, %v2654_v63 }
 0x370   : > { %13934 = vst [vmem:[#allocation22_spill] sm:$0xff] %v11106_v11  ;;  %v11124_v30 = vmax.bf16 %v13788_v25, %v3000_v39  ;;  %v2651_v5 = vpack.c.bf16 %v10841_v17, %v10816_v56  ;;  %v11129_v45 = vrot.slane %v2853_v36, %v13932_v35  ;;  %v11136_v31 = vmax.bf16 %v13788_v25, %v3002_v22 }
 0x371   : > { %v11078_v40 = vpop.f32.mrf.mxu1  ;;  %v11080_v8 = vpop.f32.mrf.mxu0  ;;  %v2653_v1 = vpack.c.bf16 %v10843_v44, %v10818_v15  ;;  %v11141_v28 = vrot.slane %v2867_v33, %v13932_v35  ;;  %v2660_v63 = vpack.c.bf16 %v10894_v41, %v10878_v16  ;;  %v11151_v39 = vmax.bf16 %v13788_v25, %v2885_v10 }
 0x372   : > { %13935 = vst [vmem:[#allocation76_spill] sm:$0xff] %v11124_v30  ;;  %13936 = vst [vmem:[#allocation77_spill] sm:$0xff] %v11136_v31  ;;  %v11154_v36 = vmax.bf16 %v13788_v25, %v2887_v14  ;;  %v2662_v44 = vpack.c.bf16 %v10896_v52, %v10880_v58  ;;  %v2884_v15 = vadd.bf16 %v11129_v45, %v2651_v5 }
 0x373   : > { %v11097_v42 = vpop.f32.mrf.mxu1  ;;  %v11099_v29 = vpop.f32.mrf.mxu0  ;;  %4845 = vmatmul.mubr.bf16.gmra.mxu1 %v11074_v7  ;;  %5038 = vmatmul.mubr.bf16.gmra.mxu0 %v11083_v23  ;;  %13937 = vst [vmem:[#allocation78_spill] sm:$0xff] %v11151_v39  ;;  %v2886_v22 = vadd.bf16 %v11141_v28, %v2653_v1  ;;  %v2893_v33 = vadd.bf16 %v11088_v48, %v2660_v63  ;;  %v8669_v1 = vld [vmem:[%s13607_s8 + $0xe8] ss:$16 sps:$4 sm:$0xff]  }
 0x374   : > { %4854 = vmatprep.mubr.bf16.mxu1 %v11103_v62  ;;  %5047 = vmatprep.mubr.bf16.mxu0 %v11106_v11  ;;  %13938 = vst [vmem:[#allocation79_spill] sm:$0xff] %v11154_v36  ;;  %v2895_v52 = vadd.bf16 %v11091_v4, %v2662_v44  ;;  %v11174_v58 = vmax.bf16 %v13788_v25, %v2884_v15  ;;  %v13951_v62 = vld [vmem:[#allocation68_spill] sm:$0xff] }
 0x375   : > { %v11112_v38 = vpop.f32.mrf.mxu1  ;;  %v11114_v54 = vpop.f32.mrf.mxu0  ;;  %v2659_v5 = vpack.c.bf16 %v10885_v6, %v10863_v50  ;;  %v11186_v63 = vmax.bf16 %v13788_v25, %v2886_v22  ;;  %v2661_v44 = vpack.c.bf16 %v10887_v59, %v10865_v9  ;;  %v2668_v15 = vpack.c.bf16 %v10938_v60, %v10922_v24  ;;  %v8672_v50 = vld [vmem:[%s13607_s8 + $0x2e8] ss:$16 sps:$4 sm:$0xff]   ;;  %v8677_v9 = vld [vmem:[%s13607_s8 + $0xcc] ss:$16 sps:$4 sm:$0xff]  }
 0x376   : > { %13939 = vst [vmem:[#allocation80_spill] sm:$0xff] %v11174_v58  ;;  %v2670_v6 = vpack.c.bf16 %v10940_v32, %v10924_v53  ;;  %v11203_v22 = vmax.bf16 %v13788_v25, %v2893_v33  ;;  %v8680_v59 = vld [vmem:[%s13607_s8 + $0x2cc] ss:$16 sps:$4 sm:$0xff]   ;;  %v11213_v32 = vmax.bf16 %v13788_v25, %v2895_v52  ;;  %v8675_v33 = vld [vmem:[%s13607_s8 + $0xc8] ss:$16 sps:$4 sm:$0xff]   ;;  %v2684_v7 = vpack.c.bf16 %v11032_v37, %v13951_v62 }
 0x377   : > { %v11119_v49 = vpop.f32.mrf.mxu1  ;;  %v11121_v23 = vpop.f32.mrf.mxu0  ;;  %13940 = vst [vmem:[#allocation81_spill] sm:$0xff] %v11186_v63  ;;  %v2892_v60 = vadd.bf16 %v11129_v45, %v2659_v5  ;;  %v8678_v52 = vld [vmem:[%s13607_s8 + $0x2c8] ss:$16 sps:$4 sm:$0xff]  }
 0x378   : > { %13941 = vst [vmem:[#allocation82_spill] sm:$0xff] %v11203_v22  ;;  %13942 = vst [vmem:[#allocation83_spill] sm:$0xff] %v11213_v32  ;;  %v2903_v5 = vadd.bf16 %v11091_v4, %v2670_v6  ;;  %v8693_v62 = vld [vmem:[%s13607_s8 + $0x68] ss:$16 sps:$4 sm:$0xff]  }
 0x379   : > { %v11131_v11 = vpop.f32.mrf.mxu1  ;;  %v11133_v2 = vpop.f32.mrf.mxu0 }
 0x37b   : > { %v11145_v17 = vpop.f32.mrf.mxu1  ;;  %v11147_v56 = vpop.f32.mrf.mxu0  ;;  %4855 = vmatmul.mubr.bf16.gmra.mxu1 %v11124_v30  ;;  %5048 = vmatmul.mubr.bf16.gmra.mxu0 %v11136_v31 }
 0x37c   : > { %5090 = vmatprep.mubr.bf16.mxu1 %v11151_v39  ;;  %5283 = vmatprep.mubr.bf16.mxu0 %v11154_v36 }
 0x37d   : > { %v11162_v41 = vpop.f32.mrf.mxu1  ;;  %v11164_v16 = vpop.f32.mrf.mxu0 }
 0x37f   : > { %v11168_v10 = vpop.f32.mrf.mxu1  ;;  %v11170_v14 = vpop.f32.mrf.mxu0 }
 0x381   : > { %v11178_v35 = vpop.f32.mrf.mxu1  ;;  %v11180_v36 = vpop.f32.mrf.mxu0 }
 0x383   : > { %v11197_v39 = vpop.f32.mrf.mxu1  ;;  %v11199_v31 = vpop.f32.mrf.mxu0  ;;  %5091 = vmatmul.mubr.bf16.vlgmr.msra.gmra.mxu1 %v11174_v58  ;;  %5284 = vmatmul.mubr.bf16.vlgmr.msra.gmra.mxu0 %v11186_v63  ;;  %v2894_v58 = vadd.bf16 %v11141_v28, %v2661_v44  ;;  %v2901_v63 = vadd.bf16 %v11088_v48, %v2668_v15  ;;  %v8683_v44 = vld [vmem:[%s13607_s8 + $0xac] ss:$16 sps:$4 sm:$0xff]   ;;  %v11239_v15 = vmax.bf16 %v13788_v25, %v2892_v60  ;;  %v8681_v60 = vld [vmem:[%s13607_s8 + $0xa8] ss:$16 sps:$4 sm:$0xff]  }
 0x384   : > { %5445 = vmatpush1.bf16.msra.mxu1 %v8669_v1  ;;  %5100 = vmatprep.mubr.bf16.mxu1 %v11203_v22 }
 0x385   : > { %v11217_v24 = vpop.f32.mrf.mxu1  ;;  %v11219_v53 = vpop.f32.mrf.mxu0  ;;  %5293 = vmatprep.mubr.bf16.mxu0 %v11213_v32  ;;  %5638 = vmatpush1.bf16.msra.mxu0 %v8672_v50  ;;  %13943 = vst [vmem:[#allocation84_spill] sm:$0xff] %v11239_v15  ;;  %v2667_v50 = vpack.c.bf16 %v10929_v20, %v10907_v21  ;;  %v11248_v6 = vmax.bf16 %v13788_v25, %v2894_v58  ;;  %v8686_v21 = vld [vmem:[%s13607_s8 + $0x2ac] ss:$16 sps:$4 sm:$0xff]  }
 0x386   : > { %5446 = vmatprep.subr.bf16.mxu1 %v8677_v9  ;;  %5639 = vmatprep.subr.bf16.mxu0 %v8680_v59  ;;  %v2669_v9 = vpack.c.bf16 %v10931_v34, %v10909_v13  ;;  %v11253_v59 = vmax.bf16 %v13788_v25, %v2901_v63  ;;  %v2676_v20 = vpack.c.bf16 %v10982_v3, %v10966_v47  ;;  %v8684_v63 = vld [vmem:[%s13607_s8 + $0x2a8] ss:$16 sps:$4 sm:$0xff]   ;;  %v8689_v3 = vld [vmem:[%s13607_s8 + $0x8c] ss:$16 sps:$4 sm:$0xff]  }
 0x387   : > { %v11231_v1 = vpop.f32.mrf.mxu1  ;;  %v11233_v22 = vpop.f32.mrf.mxu0  ;;  %13944 = vst [vmem:[#allocation85_spill] sm:$0xff] %v11248_v6  ;;  %v2678_v58 = vpack.c.bf16 %v10984_v0, %v10968_v57  ;;  %v11271_v34 = vmax.bf16 %v13788_v25, %v2903_v5  ;;  %v8692_v0 = vld [vmem:[%s13607_s8 + $0x28c] ss:$16 sps:$4 sm:$0xff]   ;;  %v2900_v47 = vadd.bf16 %v11129_v45, %v2667_v50 }
 0x388   : > { %5447 = vmatpush1.bf16.msra.mxu1 %v8675_v33  ;;  %13945 = vst [vmem:[#allocation86_spill] sm:$0xff] %v11253_v59  ;;  %v2902_v5 = vadd.bf16 %v11141_v28, %v2669_v9  ;;  %v8690_v9 = vld [vmem:[%s13607_s8 + $0x288] ss:$16 sps:$4 sm:$0xff]  }
 0x389   : > { %v11243_v32 = vpop.f32.mrf.mxu1  ;;  %v11245_v30 = vpop.f32.mrf.mxu0  ;;  %5640 = vmatpush1.bf16.msra.mxu0 %v8678_v52  ;;  %13946 = vst [vmem:[#allocation87_spill] sm:$0xff] %v11271_v34  ;;  %5448 = vmatprep.subr.bf16.mxu1 %v8683_v44  ;;  %v8687_v44 = vld [vmem:[%s13607_s8 + $0x88] ss:$16 sps:$4 sm:$0xff]   ;;  %v2911_v50 = vadd.bf16 %v11091_v4, %v2678_v58 }
 0x38a   : > { %5641 = vmatprep.subr.bf16.mxu0 %v8686_v21  ;;  %v2675_v21 = vpack.c.bf16 %v10973_v43, %v10951_v19  ;;  %v8698_v19 = vld [vmem:[%s13607_s8 + $0x26c] ss:$16 sps:$4 sm:$0xff]  }
 0x38b   : > { %v11265_v33 = vpop.f32.mrf.mxu1  ;;  %v11267_v13 = vpop.f32.mrf.mxu0  ;;  %5101 = vmatmul.mubr.bf16.gmra.mxu1 %v11239_v15  ;;  %5294 = vmatmul.mubr.bf16.gmra.mxu0 %v11248_v6  ;;  %v2909_v6 = vadd.bf16 %v11088_v48, %v2676_v20  ;;  %v13952_v43 = vld [vmem:[#allocation69_spill] sm:$0xff]  ;;  %v11336_v37 = vmax.bf16 %v13788_v25, %v2911_v50 }
 0x38c   : > { %5110 = vmatprep.mubr.bf16.mxu1 %v11253_v59  ;;  %5303 = vmatprep.mubr.bf16.mxu0 %v11271_v34  ;;  %v11313_v34 = vmax.bf16 %v13788_v25, %v2902_v5  ;;  %v2908_v50 = vadd.bf16 %v11129_v45, %v2675_v21  ;;  %v8702_v21 = vld [vmem:[%s13607_s8 + $0x248] ss:$16 sps:$4 sm:$0xff]  }
 0x38d   : > { %v11286_v57 = vpop.f32.mrf.mxu1  ;;  %v11288_v52 = vpop.f32.mrf.mxu0  ;;  %5449 = vmatpush1.bf16.msra.mxu1 %v8681_v60  ;;  %5642 = vmatpush1.bf16.msra.mxu0 %v8684_v63  ;;  %v11304_v60 = vmax.bf16 %v13788_v25, %v2900_v47  ;;  %v13950_v63 = vld [vmem:[#allocation61_spill] sm:$0xff]  ;;  %v13953_v47 = vld [vmem:[#allocation72_spill] sm:$0xff] }
 0x38e   : > { %5450 = vmatprep.subr.bf16.mxu1 %v8689_v3  ;;  %5643 = vmatprep.subr.bf16.mxu0 %v8692_v0  ;;  %13949 = vst [vmem:[#allocation90_spill] sm:$0xff] %v11313_v34  ;;  %v2677_v3 = vpack.c.bf16 %v13950_v63, %v10953_v55  ;;  %v8695_v0 = vld [vmem:[%s13607_s8 + $0x6c] ss:$16 sps:$4 sm:$0xff]   ;;  %v2686_v12 = vpack.c.bf16 %v13953_v47, %v13952_v43  ;;  %13957 = vst [vmem:[#allocation72_spill] sm:$0xff] %v11336_v37 }
 0x38f   : > { %v11296_v15 = vpop.f32.mrf.mxu1  ;;  %v11298_v59 = vpop.f32.mrf.mxu0  ;;  %13948 = vst [vmem:[#allocation89_spill] sm:$0xff] %v11304_v60  ;;  %v11333_v55 = vmax.bf16 %v13788_v25, %v2909_v6  ;;  %v8701_v63 = vld [vmem:[%s13607_s8 + $0x4c] ss:$16 sps:$4 sm:$0xff]  }
 0x390   : > { %13947 = vst [vmem:[#allocation88_spill] sm:$0xff] %v11298_v59  ;;  %v8704_v6 = vld [vmem:[%s13607_s8 + $0x24c] ss:$16 sps:$4 sm:$0xff]   ;;  %v2910_v47 = vadd.bf16 %v11141_v28, %v2677_v3  ;;  %v11369_v3 = vmax.bf16 %v13788_v25, %v2908_v50  ;;  %v2692_v50 = vpack.c.bf16 %v11078_v40, %v11062_v27  ;;  %v8708_v40 = vld [vmem:[%s13607_s8 + $0x228] ss:$16 sps:$4 sm:$0xff]  }
 0x391   : > { %v11308_v20 = vpop.f32.mrf.mxu1  ;;  %v11310_v58 = vpop.f32.mrf.mxu0  ;;  %5451 = vmatpush1.bf16.msra.mxu1 %v8687_v44  ;;  %13956 = vst [vmem:[#allocation69_spill] sm:$0xff] %v11333_v55  ;;  %5644 = vmatpush1.bf16.msra.mxu0 %v8690_v9  ;;  %v8696_v44 = vld [vmem:[%s13607_s8 + $0x268] ss:$16 sps:$4 sm:$0xff]   ;;  %v8716_v27 = vld [vmem:[%s13607_s8 + $0x20c] ss:$16 sps:$4 sm:$0xff]  }
 0x392   : > { %5452 = vmatprep.subr.bf16.mxu1 %v8695_v0  ;;  %5645 = vmatprep.subr.bf16.mxu0 %v8698_v19  ;;  %13960 = vst [vmem:[#allocation93_spill] sm:$0xff] %v11369_v3  ;;  %v13962_v0 = vld [vmem:[#allocation32_spill] sm:$0xff] }
 0x393   : > { %v11327_v5 = vpop.f32.mrf.mxu1  ;;  %v11329_v59 = vpop.f32.mrf.mxu0  ;;  %5111 = vmatmul.mubr.bf16.gmra.mxu1 %v11304_v60  ;;  %5304 = vmatmul.mubr.bf16.gmra.mxu0 %v11313_v34  ;;  %v2917_v34 = vadd.bf16 %v11088_v48, %v2684_v7  ;;  %v2919_v60 = vadd.bf16 %v11091_v4, %v2686_v12  ;;  %v13961_v7 = vld [vmem:[#allocation64_spill] sm:$0xff] }
 0x394   : > { %13954 = vst [vmem:[#allocation61_spill] sm:$0xff] %v11327_v5  ;;  %13955 = vst [vmem:[#allocation68_spill] sm:$0xff] %v11329_v59  ;;  %5120 = vmatprep.mubr.bf16.mxu1 %v11333_v55  ;;  %5313 = vmatprep.mubr.bf16.mxu0 %v11336_v37  ;;  %v2683_v19 = vpack.c.bf16 %v13962_v0, %v13961_v7  ;;  %v11378_v55 = vmax.bf16 %v13788_v25, %v2910_v47 }
 0x395   : > { %v11354_v9 = vpop.f32.mrf.mxu1  ;;  %v11356_v43 = vpop.f32.mrf.mxu0  ;;  %5453 = vmatpush1.bf16.msra.mxu1 %v8693_v62  ;;  %5646 = vmatpush1.bf16.msra.mxu0 %v8696_v44  ;;  %v13964_v62 = vld [vmem:[#allocation65_spill] sm:$0xff]  ;;  %v13965_v44 = vld [vmem:[#allocation70_spill] sm:$0xff]  ;;  %v2694_v47 = vpack.c.bf16 %v11080_v8, %v11064_v61 }
 0x396   : > { %5454 = vmatprep.subr.bf16.mxu1 %v8701_v63  ;;  %5647 = vmatprep.subr.bf16.mxu0 %v8704_v6  ;;  %13963 = vst [vmem:[#allocation64_spill] sm:$0xff] %v11378_v55  ;;  %v8699_v63 = vld [vmem:[%s13607_s8 + $0x48] ss:$16 sps:$4 sm:$0xff]   ;;  %v8710_v6 = vld [vmem:[%s13607_s8 + $0x22c] ss:$16 sps:$4 sm:$0xff]   ;;  %v2916_v61 = vadd.bf16 %v11129_v45, %v2683_v19 }
 0x397   : > { %v11361_v59 = vpop.f32.mrf.mxu1  ;;  %v11363_v5 = vpop.f32.mrf.mxu0  ;;  %v2927_v19 = vadd.bf16 %v11091_v4, %v2694_v47 }
 0x398   : > { %13958 = vst [vmem:[#allocation91_spill] sm:$0xff] %v11361_v59  ;;  %13959 = vst [vmem:[#allocation92_spill] sm:$0xff] %v11363_v5  ;;  %v2685_v5 = vpack.c.bf16 %v13965_v44, %v13964_v62  ;;  %v11383_v59 = vmax.bf16 %v13788_v25, %v2917_v34  ;;  %v11401_v34 = vmax.bf16 %v13788_v25, %v2919_v60  ;;  %v8707_v62 = vld [vmem:[%s13607_s8 + $0x2c] ss:$16 sps:$4 sm:$0xff]   ;;  %v8705_v44 = vld [vmem:[%s13607_s8 + $0x28] ss:$16 sps:$4 sm:$0xff]  }
 0x399   : > { %v11373_v37 = vpop.f32.mrf.mxu1  ;;  %v11375_v12 = vpop.f32.mrf.mxu0  ;;  %5648 = vmatpush1.bf16.msra.mxu0 %v8702_v21  ;;  %5455 = vmatpush1.bf16.msra.mxu1 %v8699_v63  ;;  %v11434_v63 = vmax.bf16 %v13788_v25, %v2916_v61 }
 0x39a   : > { %13966 = vst [vmem:[#allocation32_spill] sm:$0xff] %v11383_v59  ;;  %13967 = vst [vmem:[#allocation65_spill] sm:$0xff] %v11401_v34  ;;  %v2918_v21 = vadd.bf16 %v11141_v28, %v2685_v5  ;;  %5649 = vmatprep.subr.bf16.mxu0 %v8710_v6  ;;  %5456 = vmatprep.subr.bf16.mxu1 %v8707_v62  ;;  %v8713_v5 = vld [vmem:[%s13607_s8 + $0xc] ss:$16 sps:$4 sm:$0xff]   ;;  %v2691_v6 = vpack.c.bf16 %v11069_v51, %v11045_v18  ;;  %v8714_v18 = vld [vmem:[%s13607_s8 + $0x208] ss:$16 sps:$4 sm:$0xff]  }
 0x39b   : > { %v11395_v7 = vpop.f32.mrf.mxu1  ;;  %v11397_v0 = vpop.f32.mrf.mxu0  ;;  %5121 = vmatmul.mubr.bf16.gmra.mxu1 %v11369_v3  ;;  %5314 = vmatmul.mubr.bf16.gmra.mxu0 %v11378_v55  ;;  %v2925_v55 = vadd.bf16 %v11088_v48, %v2692_v50  ;;  %13968 = vst [vmem:[#allocation70_spill] sm:$0xff] %v11434_v63  ;;  %v2693_v62 = vpack.c.bf16 %v11071_v46, %v11047_v26 }
 0x39c   : > { %5130 = vmatprep.mubr.bf16.mxu1 %v11383_v59  ;;  %5323 = vmatprep.mubr.bf16.mxu0 %v11401_v34  ;;  %v11443_v34 = vmax.bf16 %v13788_v25, %v2918_v21  ;;  %v2702_v51 = vpack.c.bf16 %v11133_v2, %v11114_v54  ;;  %v11466_v46 = vmax.bf16 %v13788_v25, %v2927_v19 }
 0x39d   : > { %v11416_v8 = vpop.f32.mrf.mxu1  ;;  %v11418_v60 = vpop.f32.mrf.mxu0  ;;  %5650 = vmatpush1.bf16.msra.mxu0 %v8708_v40  ;;  %v2700_v40 = vpack.c.bf16 %v11131_v11, %v11112_v38  ;;  %5457 = vmatpush1.bf16.msra.mxu1 %v8705_v44  ;;  %v11463_v26 = vmax.bf16 %v13788_v25, %v2925_v55  ;;  %v8719_v11 = vld [vmem:[%s13607_s8 + $0x1ec] ss:$16 sps:$4 sm:$0xff]   ;;  %v2924_v54 = vadd.bf16 %v11129_v45, %v2691_v6 }
 0x39e   : > { %5651 = vmatprep.subr.bf16.mxu0 %v8716_v27  ;;  %13969 = vst [vmem:[#allocation94_spill] sm:$0xff] %v11443_v34  ;;  %v8711_v27 = vld [vmem:[%s13607_s8 + $0x8] ss:$16 sps:$4 sm:$0xff]   ;;  %13971 = vst [vmem:[#allocation96_spill] sm:$0xff] %v11466_v46  ;;  %5458 = vmatprep.subr.bf16.mxu1 %v8713_v5  ;;  %v8722_v38 = vld [vmem:[%s13607_s8 + $0x3ec] ss:$16 sps:$4 sm:$0xff]   ;;  %v2926_v44 = vadd.bf16 %v11141_v28, %v2693_v62  ;;  %v2935_v6 = vadd.bf16 %v11091_v4, %v2702_v51 }
 0x39f   : > { %v11426_v3 = vpop.f32.mrf.mxu1  ;;  %v11428_v59 = vpop.f32.mrf.mxu0  ;;  %13970 = vst [vmem:[#allocation95_spill] sm:$0xff] %v11463_v26  ;;  %v2933_v19 = vadd.bf16 %v11088_v48, %v2700_v40  ;;  %v8717_v5 = vld [vmem:[%s13607_s8 + $0x1e8] ss:$16 sps:$4 sm:$0xff]   ;;  %v11496_v62 = vmax.bf16 %v13788_v25, %v2924_v54  ;;  %v2699_v40 = vpack.c.bf16 %v11119_v49, %v11097_v42  ;;  %v8728_v42 = vld [vmem:[%s13607_s8 + $0x3cc] ss:$16 sps:$4 sm:$0xff]   ;;  %v2708_v49 = vpack.c.bf16 %v11178_v35, %v11162_v41 }
 0x3a0   : > { %v11505_v51 = vmax.bf16 %v13788_v25, %v2926_v44  ;;  %v2710_v54 = vpack.c.bf16 %v11180_v36, %v11164_v16  ;;  %v8726_v35 = vld [vmem:[%s13607_s8 + $0x3c8] ss:$16 sps:$4 sm:$0xff]   ;;  %v8731_v36 = vld [vmem:[%s13607_s8 + $0x1ac] ss:$16 sps:$4 sm:$0xff]  }
 0x3a1   : > { %v11438_v50 = vpop.f32.mrf.mxu1  ;;  %v11440_v47 = vpop.f32.mrf.mxu0  ;;  %5459 = vmatpush1.bf16.msra.mxu1 %v8711_v27  ;;  %5652 = vmatpush1.bf16.msra.mxu0 %v8714_v18  ;;  %13972 = vst [vmem:[#allocation97_spill] sm:$0xff] %v11496_v62  ;;  %v8734_v41 = vld [vmem:[%s13607_s8 + $0x3ac] ss:$16 sps:$4 sm:$0xff]   ;;  %v2932_v16 = vadd.bf16 %v11129_v45, %v2699_v40  ;;  %v8732_v40 = vld [vmem:[%s13607_s8 + $0x3a8] ss:$16 sps:$4 sm:$0xff]  }
 0x3a2   : > { %5460 = vmatprep.subr.bf16.mxu1 %v8719_v11  ;;  %5653 = vmatprep.subr.bf16.mxu0 %v8722_v38  ;;  %13973 = vst [vmem:[#allocation98_spill] sm:$0xff] %v11505_v51  ;;  %v2701_v11 = vpack.c.bf16 %v11121_v23, %v11099_v29  ;;  %v8725_v38 = vld [vmem:[%s13607_s8 + $0x1cc] ss:$16 sps:$4 sm:$0xff]   ;;  %v11528_v29 = vmax.bf16 %v13788_v25, %v2935_v6 }
 0x3a3   : > { %v11457_v61 = vpop.f32.mrf.mxu1  ;;  %v11459_v21 = vpop.f32.mrf.mxu0  ;;  %5131 = vmatmul.mubr.bf16.gmra.mxu1 %v11434_v63  ;;  %5324 = vmatmul.mubr.bf16.gmra.mxu0 %v11443_v34  ;;  %v11510_v63 = vmax.bf16 %v13788_v25, %v2933_v19  ;;  %v8723_v19 = vld [vmem:[%s13607_s8 + $0x1c8] ss:$16 sps:$4 sm:$0xff]  }
 0x3a4   : > { %5140 = vmatprep.mubr.bf16.mxu1 %v11463_v26  ;;  %5333 = vmatprep.mubr.bf16.mxu0 %v11466_v46  ;;  %v8720_v46 = vld [vmem:[%s13607_s8 + $0x3e8] ss:$16 sps:$4 sm:$0xff]   ;;  %13977 = vst [vmem:[#allocation102_spill] sm:$0xff] %v11528_v29  ;;  %v2934_v6 = vadd.bf16 %v11141_v28, %v2701_v11  ;;  %v11561_v11 = vmax.bf16 %v13788_v25, %v2932_v16 }
 0x3a5   : > { %v11478_v2 = vpop.f32.mrf.mxu1  ;;  %v11480_v55 = vpop.f32.mrf.mxu0  ;;  %13974 = vst [vmem:[#allocation99_spill] sm:$0xff] %v11510_v63  ;;  %5461 = vmatpush2.bf16.msra.mxu1 %v8717_v5  ;;  %5654 = vmatpush2.bf16.msra.mxu0 %v8720_v46 }
 0x3a6   : > { %5462 = vmatprep.subr.bf16.mxu1 %v8725_v38  ;;  %5655 = vmatprep.subr.bf16.mxu0 %v8728_v42  ;;  %13978 = vst [vmem:[#allocation103_spill] sm:$0xff] %v11561_v11  ;;  %v2707_v38 = vpack.c.bf16 %v11168_v10, %v11145_v17  ;;  %v8740_v17 = vld [vmem:[%s13607_s8 + $0x38c] ss:$16 sps:$4 sm:$0xff]   ;;  %v2718_v10 = vpack.c.bf16 %v11245_v30, %v11219_v53  ;;  %v8738_v30 = vld [vmem:[%s13607_s8 + $0x388] ss:$16 sps:$4 sm:$0xff]  }
 0x3a7   : > { %v11488_v34 = vpop.f32.mrf.mxu1  ;;  %v11490_v26 = vpop.f32.mrf.mxu0 }
 0x3a8   : > { %v2940_v53 = vadd.bf16 %v11129_v45, %v2707_v38  ;;  %v2951_v38 = vadd.bf16 %v11091_v4, %v2718_v10 }
 0x3a9   : > { %v11500_v27 = vpop.f32.mrf.mxu1  ;;  %v11502_v18 = vpop.f32.mrf.mxu0  ;;  %5463 = vmatpush2.bf16.msra.mxu1 %v8723_v19  ;;  %5656 = vmatpush2.bf16.msra.mxu0 %v8726_v35  ;;  %v2709_v19 = vpack.c.bf16 %v11170_v14, %v11147_v56  ;;  %v2716_v35 = vpack.c.bf16 %v11243_v32, %v11217_v24  ;;  %v8737_v32 = vld [vmem:[%s13607_s8 + $0x18c] ss:$16 sps:$4 sm:$0xff]  }
 0x3aa   : > { %5464 = vmatprep.subr.bf16.mxu1 %v8731_v36  ;;  %5657 = vmatprep.subr.bf16.mxu0 %v8734_v41  ;;  %v8729_v36 = vld [vmem:[%s13607_s8 + $0x1a8] ss:$16 sps:$4 sm:$0xff]   ;;  %v8746_v24 = vld [vmem:[%s13607_s8 + $0x36c] ss:$16 sps:$4 sm:$0xff]  }
 0x3ab   : > { %v11522_v44 = vpop.f32.mrf.mxu1  ;;  %v11524_v23 = vpop.f32.mrf.mxu0  ;;  %5141 = vmatmul.mubr.bf16.gmra.mxu1 %v11496_v62  ;;  %5334 = vmatmul.mubr.bf16.gmra.mxu0 %v11505_v51  ;;  %v2941_v51 = vadd.bf16 %v11088_v48, %v2708_v49  ;;  %v2943_v62 = vadd.bf16 %v11091_v4, %v2710_v54  ;;  %v11570_v54 = vmax.bf16 %v13788_v25, %v2934_v6 }
 0x3ac   : > { %13975 = vst [vmem:[#allocation100_spill] sm:$0xff] %v11522_v44  ;;  %13976 = vst [vmem:[#allocation101_spill] sm:$0xff] %v11524_v23  ;;  %5150 = vmatprep.mubr.bf16.mxu1 %v11510_v63  ;;  %5343 = vmatprep.mubr.bf16.mxu0 %v11528_v29  ;;  %v2942_v6 = vadd.bf16 %v11141_v28, %v2709_v19  ;;  %v8743_v19 = vld [vmem:[%s13607_s8 + $0x16c] ss:$16 sps:$4 sm:$0xff]   ;;  %v2732_v29 = vpack.c.bf16 %v11373_v37, %v11354_v9  ;;  %v8753_v9 = vld [vmem:[%s13607_s8 + $0x128] ss:$16 sps:$4 sm:$0xff]  }
 0x3ad   : > { %v11546_v46 = vpop.f32.mrf.mxu1  ;;  %v11548_v5 = vpop.f32.mrf.mxu0  ;;  %13979 = vst [vmem:[#allocation104_spill] sm:$0xff] %v11570_v54  ;;  %v11590_v56 = vmax.bf16 %v13788_v25, %v2941_v51  ;;  %v11593_v14 = vmax.bf16 %v13788_v25, %v2943_v62  ;;  %5658 = vmatpush2.bf16.msra.mxu0 %v8732_v40  ;;  %v2949_v40 = vadd.bf16 %v11088_v48, %v2716_v35 }
 0x3ae   : > { %5465 = vmatpush2.bf16.msra.mxu1 %v8729_v36  ;;  %5659 = vmatprep.subr.bf16.mxu0 %v8740_v17  ;;  %v11626_v35 = vmax.bf16 %v13788_v25, %v2940_v53  ;;  %v2715_v36 = vpack.c.bf16 %v11231_v1, %v11197_v39  ;;  %v8744_v39 = vld [vmem:[%s13607_s8 + $0x368] ss:$16 sps:$4 sm:$0xff]   ;;  %v2724_v1 = vpack.c.bf16 %v11308_v20, %v11286_v57  ;;  %v8752_v57 = vld [vmem:[%s13607_s8 + $0x34c] ss:$16 sps:$4 sm:$0xff]  }
 0x3af   : > { %v11553_v23 = vpop.f32.mrf.mxu1  ;;  %v11555_v44 = vpop.f32.mrf.mxu0  ;;  %13980 = vst [vmem:[#allocation105_spill] sm:$0xff] %v11590_v56  ;;  %13981 = vst [vmem:[#allocation106_spill] sm:$0xff] %v11593_v14  ;;  %5466 = vmatprep.subr.bf16.mxu1 %v8737_v32  ;;  %v2717_v32 = vpack.c.bf16 %v11233_v22, %v11199_v31  ;;  %v2726_v53 = vpack.c.bf16 %v11310_v58, %v11288_v52  ;;  %v11658_v22 = vmax.bf16 %v13788_v25, %v2951_v38  ;;  %v8747_v38 = vld [vmem:[%s13607_s8 + $0x148] ss:$16 sps:$4 sm:$0xff]  }
 0x3b0   : > { %13982 = vst [vmem:[#allocation107_spill] sm:$0xff] %v11626_v35  ;;  %v2948_v52 = vadd.bf16 %v11129_v45, %v2715_v36 }
 0x3b1   : > { %v11565_v42 = vpop.f32.mrf.mxu1  ;;  %v11567_v49 = vpop.f32.mrf.mxu0  ;;  %5660 = vmatpush2.bf16.msra.mxu0 %v8738_v30  ;;  %v11640_v30 = vmax.bf16 %v13788_v25, %v2949_v40  ;;  %13986 = vst [vmem:[#allocation111_spill] sm:$0xff] %v11658_v22  ;;  %v2950_v40 = vadd.bf16 %v11141_v28, %v2717_v32  ;;  %v2959_v36 = vadd.bf16 %v11091_v4, %v2726_v53 }
 0x3b2   : > { %5661 = vmatprep.subr.bf16.mxu0 %v8746_v24  ;;  %v8741_v24 = vld [vmem:[%s13607_s8 + $0x168] ss:$16 sps:$4 sm:$0xff]   ;;  %v11688_v32 = vmax.bf16 %v13788_v25, %v2948_v52 }
 0x3b3   : > { %v11584_v41 = vpop.f32.mrf.mxu1  ;;  %v11586_v16 = vpop.f32.mrf.mxu0  ;;  %5151 = vmatmul.mubr.bf16.gmra.mxu1 %v11561_v11  ;;  %5344 = vmatmul.mubr.bf16.gmra.mxu0 %v11570_v54  ;;  %v8735_v54 = vld [vmem:[%s13607_s8 + $0x188] ss:$16 sps:$4 sm:$0xff]   ;;  %13984 = vst [vmem:[#allocation109_spill] sm:$0xff] %v11640_v30  ;;  %v11716_v37 = vmax.bf16 %v13788_v25, %v2959_v36 }
 0x3b4   : > { %5160 = vmatprep.mubr.bf16.mxu1 %v11590_v56  ;;  %5353 = vmatprep.mubr.bf16.mxu0 %v11593_v14  ;;  %v11635_v14 = vmax.bf16 %v13788_v25, %v2942_v6  ;;  %13988 = vst [vmem:[#allocation113_spill] sm:$0xff] %v11688_v32 }
 0x3b5   : > { %v11608_v62 = vpop.f32.mrf.mxu1  ;;  %v11610_v51 = vpop.f32.mrf.mxu0  ;;  %5467 = vmatpush2.bf16.msra.mxu1 %v8735_v54  ;;  %v8749_v54 = vld [vmem:[%s13607_s8 + $0x14c] ss:$16 sps:$4 sm:$0xff]   ;;  %5662 = vmatpush2.bf16.msra.mxu0 %v8744_v39  ;;  %v13989_v39 = vld [vmem:[#allocation88_spill] sm:$0xff]  ;;  %13992 = vst [vmem:[#allocation115_spill] sm:$0xff] %v11716_v37 }
 0x3b6   : > { %13983 = vst [vmem:[#allocation108_spill] sm:$0xff] %v11635_v14  ;;  %5468 = vmatprep.subr.bf16.mxu1 %v8743_v19  ;;  %v2957_v19 = vadd.bf16 %v11088_v48, %v2724_v1  ;;  %5663 = vmatprep.subr.bf16.mxu0 %v8752_v57  ;;  %v2725_v1 = vpack.c.bf16 %v13989_v39, %v11267_v13  ;;  %v8755_v57 = vld [vmem:[%s13607_s8 + $0x12c] ss:$16 sps:$4 sm:$0xff]  }
 0x3b7   : > { %v11618_v11 = vpop.f32.mrf.mxu1  ;;  %v11620_v56 = vpop.f32.mrf.mxu0 }
 0x3b9   : > { %v11630_v17 = vpop.f32.mrf.mxu1  ;;  %v11632_v10 = vpop.f32.mrf.mxu0  ;;  %5469 = vmatpush2.bf16.msra.mxu1 %v8741_v24  ;;  %v2723_v24 = vpack.c.bf16 %v11296_v15, %v11265_v33  ;;  %v8758_v15 = vld [vmem:[%s13607_s8 + $0x32c] ss:$16 sps:$4 sm:$0xff]   ;;  %v2734_v33 = vpack.c.bf16 %v11375_v12, %v11356_v43 }
 0x3ba   : > { %5470 = vmatprep.subr.bf16.mxu1 %v8749_v54  ;;  %v11699_v54 = vmax.bf16 %v13788_v25, %v2950_v40  ;;  %v11713_v40 = vmax.bf16 %v13788_v25, %v2957_v19  ;;  %v8761_v43 = vld [vmem:[%s13607_s8 + $0x10c] ss:$16 sps:$4 sm:$0xff]   ;;  %v2958_v19 = vadd.bf16 %v11141_v28, %v2725_v1  ;;  %v8762_v1 = vld [vmem:[%s13607_s8 + $0x308] ss:$16 sps:$4 sm:$0xff]  }
 0x3bb   : > { %v11652_v6 = vpop.f32.mrf.mxu1  ;;  %v11654_v31 = vpop.f32.mrf.mxu0  ;;  %5161 = vmatmul.mubr.bf16.gmra.mxu1 %v11626_v35  ;;  %5354 = vmatmul.mubr.bf16.gmra.mxu0 %v11635_v14  ;;  %v8764_v12 = vld [vmem:[%s13607_s8 + $0x30c] ss:$16 sps:$4 sm:$0xff]  }
 0x3bc   : > { %13985 = vst [vmem:[#allocation110_spill] sm:$0xff] %v11654_v31  ;;  %5170 = vmatprep.mubr.bf16.mxu1 %v11640_v30  ;;  %5363 = vmatprep.mubr.bf16.mxu0 %v11658_v22  ;;  %v8750_v22 = vld [vmem:[%s13607_s8 + $0x348] ss:$16 sps:$4 sm:$0xff]   ;;  %13990 = vst [vmem:[#allocation88_spill] sm:$0xff] %v11699_v54 }
 0x3bd   : > { %v11670_v20 = vpop.f32.mrf.mxu1  ;;  %v11672_v58 = vpop.f32.mrf.mxu0  ;;  %5471 = vmatpush2.bf16.msra.mxu1 %v8747_v38  ;;  %13991 = vst [vmem:[#allocation114_spill] sm:$0xff] %v11713_v40  ;;  %5664 = vmatpush2.bf16.msra.mxu0 %v8750_v22  ;;  %v8756_v38 = vld [vmem:[%s13607_s8 + $0x328] ss:$16 sps:$4 sm:$0xff]   ;;  %v2956_v22 = vadd.bf16 %v11129_v45, %v2723_v24 }
 0x3be   : > { %5472 = vmatprep.subr.bf16.mxu1 %v8755_v57  ;;  %5665 = vmatprep.subr.bf16.mxu0 %v8758_v15  ;;  %v13995_v57 = vld [vmem:[#allocation61_spill] sm:$0xff]  ;;  %v13996_v15 = vld [vmem:[#allocation91_spill] sm:$0xff] }
 0x3bf   : > { %v11680_v14 = vpop.f32.mrf.mxu1  ;;  %v11682_v30 = vpop.f32.mrf.mxu0 }
 0x3c0   : > { %13987 = vst [vmem:[#allocation112_spill] sm:$0xff] %v11682_v30  ;;  %v2967_v30 = vadd.bf16 %v11091_v4, %v2734_v33  ;;  %v2731_v33 = vpack.c.bf16 %v13996_v15, %v13995_v57  ;;  %v8770_v57 = vld [vmem:[%s13607_s8 + $0x6ec] ss:$16 sps:$4 sm:$0xff]   ;;  %v2742_v15 = vpack.c.bf16 %v11440_v47, %v11418_v60 }
 0x3c1   : > { %v11694_v53 = vpop.f32.mrf.mxu1  ;;  %v11696_v35 = vpop.f32.mrf.mxu0  ;;  %5473 = vmatpush2.bf16.msra.mxu1 %v8753_v9  ;;  %5666 = vmatpush2.bf16.msra.mxu0 %v8756_v38  ;;  %v8759_v38 = vld [vmem:[%s13607_s8 + $0x108] ss:$16 sps:$4 sm:$0xff]  }
 0x3c2   : > { %5474 = vmatprep.subr.bf16.mxu1 %v8761_v43  ;;  %5667 = vmatprep.subr.bf16.mxu0 %v8764_v12  ;;  %v2740_v43 = vpack.c.bf16 %v11438_v50, %v11416_v8  ;;  %v11776_v8 = vmax.bf16 %v13788_v25, %v2967_v30 }
 0x3c3   : > { %v4706_v13 = vpop.f32.mrf.mxu1  ;;  %v4899_v52 = vpop.f32.mrf.mxu0  ;;  %5171 = vmatmul.mubr.bf16.gmra.mxu1 %v11688_v32  ;;  %5364 = vmatmul.mubr.bf16.gmra.mxu0 %v11699_v54  ;;  %v2965_v32 = vadd.bf16 %v11088_v48, %v2732_v29  ;;  %v11747_v29 = vmax.bf16 %v13788_v25, %v2956_v22 }
 0x3c4   : > { %v11733_v36 = vadd.f32 %v4899_v52, %v4706_v13  ;;  %5180 = vmatprep.mubr.bf16.mxu1 %v11713_v40  ;;  %5373 = vmatprep.mubr.bf16.mxu0 %v11716_v37  ;;  %14000 = vst [vmem:[#allocation91_spill] sm:$0xff] %v11776_v8  ;;  %v14055_v40 = vld [vmem:[#allocation11_spill] sm:$0xff] }
 0x3c5   : > { %v4708_v39 = vpop.f32.mrf.mxu1  ;;  %v4901_v54 = vpop.f32.mrf.mxu0  ;;  %13993 = vst [vmem:[#allocation116_spill] sm:$0xff] %v11747_v29  ;;  %v11764_v22 = vmax.bf16 %v13788_v25, %v2965_v32  ;;  %5668 = vmatpush2.bf16.msra.mxu0 %v8762_v1  ;;  %v2964_v32 = vadd.bf16 %v11129_v45, %v2731_v33  ;;  %5475 = vmatpush2.bf16.msra.mxu1 %v8759_v38 }
 0x3c6   : > { %v11738_v63 = vadd.f32 %v4901_v54, %v4708_v39  ;;  %v11750_v54 = vmax.bf16 %v13788_v25, %v2958_v19  ;;  %v13997_v39 = vld [vmem:[#allocation68_spill] sm:$0xff]  ;;  %v8767_v19 = vld [vmem:[%s13607_s8 + $0x4ec] ss:$16 sps:$4 sm:$0xff]   ;;  %6023 = vmatprep.subr.bf16.mxu0 %v8770_v57  ;;  %v2975_v1 = vadd.bf16 %v11091_v4, %v2742_v15  ;;  %v2739_v38 = vpack.c.bf16 %v11426_v3, %v11395_v7 }
 0x3c7   : > { %v4710_v31 = vpop.f32.mrf.mxu1  ;;  %v4903_v24 = vpop.f32.mrf.mxu0  ;;  %13999 = vst [vmem:[#allocation61_spill] sm:$0xff] %v11764_v22  ;;  %5830 = vmatprep.subr.bf16.mxu1 %v8767_v19  ;;  %v11792_v33 = vmax.bf16 %v13788_v25, %v2964_v32  ;;  %v2748_v57 = vpack.c.bf16 %v11500_v27, %v11478_v2  ;;  %v2750_v32 = vpack.c.bf16 %v11502_v18, %v11480_v55 }
 0x3c8   : > { %v11744_v13 = vadd.f32 %v4903_v24, %v4710_v31  ;;  %13994 = vst [vmem:[#allocation117_spill] sm:$0xff] %v11750_v54  ;;  %v13998_v31 = vld [vmem:[#allocation92_spill] sm:$0xff]  ;;  %v2972_v2 = vadd.bf16 %v11129_v45, %v2739_v38 }
 0x3c9   : > { %v4712_v52 = vpop.f32.mrf.mxu1  ;;  %v4905_v9 = vpop.f32.mrf.mxu0  ;;  %v2733_v24 = vpack.c.bf16 %v13998_v31, %v13997_v39  ;;  %14001 = vst [vmem:[#allocation68_spill] sm:$0xff] %v11792_v33 }
 0x3ca   : > { %v11761_v12 = vadd.f32 %v4905_v9, %v4712_v52  ;;  %v2973_v9 = vadd.bf16 %v11088_v48, %v2740_v43 }
 0x3cb   : > { %v4716_v39 = vpop.f32.mrf.mxu1  ;;  %v4909_v31 = vpop.f32.mrf.mxu0  ;;  %5181 = vmatmul.mubr.bf16.gmra.mxu1 %v11747_v29  ;;  %5374 = vmatmul.mubr.bf16.gmra.mxu0 %v11750_v54  ;;  %v2966_v47 = vadd.bf16 %v11141_v28, %v2733_v24  ;;  %v2741_v24 = vpack.c.bf16 %v11428_v59, %v11397_v0  ;;  %v11812_v59 = vmax.bf16 %v13788_v25, %v2975_v1  ;;  %v14049_v29 = vld [vmem:[#allocation14_spill] sm:$0xff] }
 0x3cc   : > { %v11778_v50 = vadd.f32 %v4909_v31, %v4716_v39  ;;  %5190 = vmatprep.mubr.bf16.mxu1 %v11764_v22  ;;  %5383 = vmatprep.mubr.bf16.mxu0 %v11776_v8  ;;  %v2983_v1 = vadd.bf16 %v11091_v4, %v2750_v32  ;;  %v2756_v32 = vpack.c.bf16 %v11565_v42, %v11546_v46  ;;  %v14047_v8 = vld [vmem:[#allocation8_spill] sm:$0xff] }
 0x3cd   : > { %v4718_v52 = vpop.f32.mrf.mxu1  ;;  %v4911_v60 = vpop.f32.mrf.mxu0  ;;  %v11799_v19 = vmax.bf16 %v13788_v25, %v2966_v47  ;;  %14004 = vst [vmem:[#allocation119_spill] sm:$0xff] %v11812_v59  ;;  %v2974_v27 = vadd.bf16 %v11141_v28, %v2741_v24  ;;  %v2981_v47 = vadd.bf16 %v11088_v48, %v2748_v57  ;;  %v2747_v24 = vpack.c.bf16 %v11488_v34, %v11457_v61 }
 0x3ce   : > { %v11786_v30 = vadd.f32 %v4911_v60, %v4718_v52  ;;  %v11806_v60 = vmax.bf16 %v13788_v25, %v2973_v9  ;;  %v2749_v57 = vpack.c.bf16 %v11490_v26, %v11459_v21  ;;  %v11848_v34 = vmax.bf16 %v13788_v25, %v2983_v1 }
 0x3cf   : > { %v4720_v39 = vpop.f32.mrf.mxu1  ;;  %v4913_v31 = vpop.f32.mrf.mxu0  ;;  %14002 = vst [vmem:[#allocation92_spill] sm:$0xff] %v11799_v19  ;;  %v11831_v38 = vmax.bf16 %v13788_v25, %v2974_v27  ;;  %v2980_v21 = vadd.bf16 %v11129_v45, %v2747_v24  ;;  %v2989_v42 = vadd.bf16 %v11088_v48, %v2756_v32  ;;  %v14010_v24 = vld [vmem:[#allocation100_spill] sm:$0xff]  ;;  %v14012_v32 = vld [vmem:[#allocation101_spill] sm:$0xff] }
 0x3d0   : > { %v11789_v22 = vadd.f32 %v4913_v31, %v4720_v39  ;;  %14003 = vst [vmem:[#allocation118_spill] sm:$0xff] %v11806_v60  ;;  %14008 = vst [vmem:[#allocation123_spill] sm:$0xff] %v11848_v34 }
 0x3d1   : > { %v4722_v43 = vpop.f32.mrf.mxu1  ;;  %v4915_v52 = vpop.f32.mrf.mxu0  ;;  %14006 = vst [vmem:[#allocation121_spill] sm:$0xff] %v11831_v38 }
 0x3d2   : > { %v11803_v15 = vadd.f32 %v4915_v52, %v4722_v43  ;;  %v11828_v52 = vmax.bf16 %v13788_v25, %v2972_v2  ;;  %v2758_v2 = vpack.c.bf16 %v11567_v49, %v11548_v5  ;;  %v2982_v5 = vadd.bf16 %v11141_v28, %v2749_v57 }
 0x3d3   : > { %v4726_v3 = vpop.f32.mrf.mxu1  ;;  %v4919_v7 = vpop.f32.mrf.mxu0  ;;  %5191 = vmatmul.mubr.bf16.gmra.mxu1 %v11792_v33  ;;  %5384 = vmatmul.mubr.bf16.gmra.mxu0 %v11799_v19  ;;  %v14044_v19 = vld [vmem:[#allocation55_spill] sm:$0xff] }
 0x3d4   : > { %v11814_v0 = vadd.f32 %v4919_v7, %v4726_v3  ;;  %5200 = vmatprep.mubr.bf16.mxu1 %v11806_v60  ;;  %5393 = vmatprep.mubr.bf16.mxu0 %v11812_v59  ;;  %14005 = vst [vmem:[#allocation120_spill] sm:$0xff] %v11828_v52  ;;  %v11869_v57 = vmax.bf16 %v13788_v25, %v2982_v5  ;;  %v14043_v59 = vld [vmem:[#allocation54_spill] sm:$0xff] }
 0x3d5   : > { %v4728_v55 = vpop.f32.mrf.mxu1  ;;  %v4921_v18 = vpop.f32.mrf.mxu0 }
 0x3d6   : > { %v11822_v9 = vadd.f32 %v4921_v18, %v4728_v55  ;;  %v11842_v18 = vmax.bf16 %v13788_v25, %v2981_v47  ;;  %v2991_v47 = vadd.bf16 %v11091_v4, %v2758_v2  ;;  %14011 = vst [vmem:[#allocation100_spill] sm:$0xff] %v11869_v57  ;;  %v2764_v2 = vpack.c.bf16 %v11630_v17, %v11608_v62 }
 0x3d7   : > { %v4730_v39 = vpop.f32.mrf.mxu1  ;;  %v4923_v31 = vpop.f32.mrf.mxu0 }
 0x3d8   : > { %v11825_v43 = vadd.f32 %v4923_v31, %v4730_v39  ;;  %14007 = vst [vmem:[#allocation122_spill] sm:$0xff] %v11842_v18  ;;  %v11884_v5 = vmax.bf16 %v13788_v25, %v2991_v47 }
 0x3d9   : > { %v4732_v3 = vpop.f32.mrf.mxu1  ;;  %v4925_v7 = vpop.f32.mrf.mxu0 }
 0x3da   : > { %v11839_v55 = vadd.f32 %v4925_v7, %v4732_v3  ;;  %v11862_v3 = vmax.bf16 %v13788_v25, %v2980_v21  ;;  %v2755_v7 = vpack.c.bf16 %v11553_v23, %v14010_v24  ;;  %v2766_v21 = vpack.c.bf16 %v11632_v10, %v11610_v51  ;;  %14014 = vst [vmem:[#allocation125_spill] sm:$0xff] %v11884_v5 }
 0x3db   : > { %v4736_v27 = vpop.f32.mrf.mxu1  ;;  %5201 = vmatmul.mubr.bf16.gmra.mxu1 %v11828_v52  ;;  %v4929_v61 = vpop.f32.mrf.mxu0  ;;  %5394 = vmatmul.mubr.bf16.gmra.mxu0 %v11831_v38  ;;  %v2997_v10 = vadd.bf16 %v11088_v48, %v2764_v2  ;;  %v2765_v2 = vpack.c.bf16 %v11620_v56, %v11586_v16  ;;  %v14040_v38 = vld [vmem:[#allocation51_spill] sm:$0xff] }
 0x3dc   : > { %5210 = vmatprep.mubr.bf16.mxu1 %v11842_v18  ;;  %v11853_v26 = vadd.f32 %v4929_v61, %v4736_v27  ;;  %5403 = vmatprep.mubr.bf16.mxu0 %v11848_v34  ;;  %14009 = vst [vmem:[#allocation124_spill] sm:$0xff] %v11862_v3  ;;  %v2757_v34 = vpack.c.bf16 %v11555_v44, %v14012_v32 }
 0x3dd   : > { %v4738_v46 = vpop.f32.mrf.mxu1  ;;  %v4931_v49 = vpop.f32.mrf.mxu0  ;;  %v2988_v44 = vadd.bf16 %v11129_v45, %v2755_v7  ;;  %v2999_v47 = vadd.bf16 %v11091_v4, %v2766_v21  ;;  %v2763_v7 = vpack.c.bf16 %v11618_v11, %v11584_v41  ;;  %v2772_v21 = vpack.c.bf16 %v11694_v53, %v11670_v20 }
 0x3de   : > { %v11859_v1 = vadd.f32 %v4931_v49, %v4738_v46  ;;  %v11876_v49 = vmax.bf16 %v13788_v25, %v2989_v42  ;;  %v2990_v17 = vadd.bf16 %v11141_v28, %v2757_v34  ;;  %v2998_v20 = vadd.bf16 %v11141_v28, %v2765_v2 }
 0x3df   : > { %v4740_v39 = vpop.f32.mrf.mxu1  ;;  %v4933_v31 = vpop.f32.mrf.mxu0  ;;  %v2996_v16 = vadd.bf16 %v11129_v45, %v2763_v7  ;;  %v2771_v7 = vpack.c.bf16 %v11680_v14, %v11652_v6 }
 0x3e0   : > { %v11866_v27 = vadd.f32 %v4933_v31, %v4740_v39  ;;  %14013 = vst [vmem:[#allocation101_spill] sm:$0xff] %v11876_v49  ;;  %v11905_v34 = vmax.bf16 %v13788_v25, %v2990_v17  ;;  %v11920_v17 = vmax.bf16 %v13788_v25, %v2999_v47  ;;  %v11941_v2 = vmax.bf16 %v13788_v25, %v2998_v20 }
 0x3e1   : > { %v4742_v61 = vpop.f32.mrf.mxu1  ;;  %v4935_v46 = vpop.f32.mrf.mxu0  ;;  %v3004_v20 = vadd.bf16 %v11129_v45, %v2771_v7 }
 0x3e2   : > { %v11880_v23 = vadd.f32 %v4935_v46, %v4742_v61  ;;  %v11898_v46 = vmax.bf16 %v13788_v25, %v2988_v44  ;;  %14016 = vst [vmem:[#allocation127_spill] sm:$0xff] %v11905_v34  ;;  %v2774_v44 = vpack.c.bf16 %v11696_v35, %v11672_v58  ;;  %14018 = vst [vmem:[#allocation129_spill] sm:$0xff] %v11920_v17 }
 0x3e3   : > { %v4746_v39 = vpop.f32.mrf.mxu1  ;;  %5211 = vmatmul.mubr.bf16.gmra.mxu1 %v11862_v3  ;;  %v4939_v31 = vpop.f32.mrf.mxu0  ;;  %5404 = vmatmul.mubr.bf16.gmra.mxu0 %v11869_v57  ;;  %v3005_v58 = vadd.bf16 %v11088_v48, %v2772_v21  ;;  %14020 = vst [vmem:[#allocation131_spill] sm:$0xff] %v11941_v2  ;;  %v14021_v48 = vld [vmem:[#allocation110_spill] sm:$0xff]  ;;  %v14022_v21 = vld [vmem:[#allocation112_spill] sm:$0xff] }
 0x3e4   : > { %5220 = vmatprep.mubr.bf16.mxu1 %v11876_v49  ;;  %v11889_v62 = vadd.f32 %v4939_v31, %v4746_v39  ;;  %5413 = vmatprep.mubr.bf16.mxu0 %v11884_v5  ;;  %14015 = vst [vmem:[#allocation126_spill] sm:$0xff] %v11898_v46  ;;  %v14036_v49 = vld [vmem:[#allocation47_spill] sm:$0xff]  ;;  %v14039_v3 = vld [vmem:[#allocation50_spill] sm:$0xff] }
 0x3e5   : > { %v4748_v51 = vpop.f32.mrf.mxu1  ;;  %v4941_v42 = vpop.f32.mrf.mxu0 }
 0x3e6   : > { %v11895_v24 = vadd.f32 %v4941_v42, %v4748_v51  ;;  %v11912_v42 = vmax.bf16 %v13788_v25, %v2997_v10  ;;  %v3007_v10 = vadd.bf16 %v11091_v4, %v2774_v44  ;;  %v11946_v44 = vmax.bf16 %v13788_v25, %v3005_v58 }
 0x3e7   : > { %v4750_v61 = vpop.f32.mrf.mxu1  ;;  %v4943_v32 = vpop.f32.mrf.mxu0 }
 0x3e8   : > { %v11902_v39 = vadd.f32 %v4943_v32, %v4750_v61  ;;  %14017 = vst [vmem:[#allocation128_spill] sm:$0xff] %v11912_v42  ;;  %14023 = vst [vmem:[#allocation110_spill] sm:$0xff] %v11946_v44  ;;  %v11952_v14 = vmax.bf16 %v13788_v25, %v3007_v10 }
 0x3e9   : > { %v4752_v31 = vpop.f32.mrf.mxu1  ;;  %v4945_v51 = vpop.f32.mrf.mxu0 }
 0x3ea   : > { %v11916_v11 = vadd.f32 %v4945_v51, %v4752_v31  ;;  %v11934_v51 = vmax.bf16 %v13788_v25, %v2996_v16  ;;  %14024 = vst [vmem:[#allocation112_spill] sm:$0xff] %v11952_v14 }
 0x3eb   : > { %v4756_v41 = vpop.f32.mrf.mxu1  ;;  %5221 = vmatmul.mubr.bf16.gmra.mxu1 %v11898_v46  ;;  %v4949_v61 = vpop.f32.mrf.mxu0  ;;  %5414 = vmatmul.mubr.bf16.gmra.mxu0 %v11905_v34  ;;  %v14035_v46 = vld [vmem:[#allocation46_spill] sm:$0xff] }
 0x3ec   : > { %5230 = vmatprep.mubr.bf16.mxu1 %v11912_v42  ;;  %v11925_v56 = vadd.f32 %v4949_v61, %v4756_v41  ;;  %5423 = vmatprep.mubr.bf16.mxu0 %v11920_v17  ;;  %14019 = vst [vmem:[#allocation130_spill] sm:$0xff] %v11934_v51  ;;  %v2773_v17 = vpack.c.bf16 %v14022_v21, %v14021_v48 }
 0x3ed   : > { %v4758_v35 = vpop.f32.mrf.mxu1  ;;  %v4951_v53 = vpop.f32.mrf.mxu0  ;;  %v11964_v21 = vmax.bf16 %v13788_v25, %v3004_v20  ;;  %v14028_v20 = vld [vmem:[#allocation39_spill] sm:$0xff] }
 0x3ee   : > { %v11931_v47 = vadd.f32 %v4951_v53, %v4758_v35 }
 0x3ef   : > { %v4760_v32 = vpop.f32.mrf.mxu1  ;;  %v4953_v31 = vpop.f32.mrf.mxu0  ;;  %14025 = vst [vmem:[#allocation132_spill] sm:$0xff] %v11964_v21 }
 0x3f0   : > { %v11938_v41 = vadd.f32 %v4953_v31, %v4760_v32  ;;  %v3006_v32 = vadd.bf16 %v11141_v28, %v2773_v17  ;;  %v14027_v17 = vld [vmem:[#allocation38_spill] sm:$0xff] }
 0x3f1   : > { %v4762_v61 = vpop.f32.mrf.mxu1  ;;  %v4955_v4 = vpop.f32.mrf.mxu0 }
 0x3f2   : > { %v11948_v35 = vadd.f32 %v4955_v4, %v4762_v61  ;;  %v11969_v45 = vmax.bf16 %v13788_v25, %v3006_v32 }
 0x3f3   : > { %v4766_v16 = vpop.f32.mrf.mxu1  ;;  %5231 = vmatmul.mubr.bf16.gmra.mxu1 %v11934_v51  ;;  %v4959_v6 = vpop.f32.mrf.mxu0  ;;  %5424 = vmatmul.mubr.bf16.gmra.mxu0 %v11941_v2  ;;  %v14031_v51 = vld [vmem:[#allocation42_spill] sm:$0xff] }
 0x3f4   : > { %5240 = vmatprep.mubr.bf16.mxu1 %v11946_v44  ;;  %v11957_v53 = vadd.f32 %v4959_v6, %v4766_v16  ;;  %5433 = vmatprep.mubr.bf16.mxu0 %v11952_v14  ;;  %14026 = vst [vmem:[#allocation133_spill] sm:$0xff] %v11969_v45  ;;  %v8771_v14 = vld [vmem:[%s13607_s8 + $0x4c8] ss:$16 sps:$4 sm:$0xff]  }
 0x3f5   : > { %v4768_v58 = vpop.f32.mrf.mxu1  ;;  %v4961_v31 = vpop.f32.mrf.mxu0 }
 0x3f6   : > { %v11961_v61 = vadd.f32 %v4961_v31, %v4768_v58 }
 0x3f7   : > { %v4770_v48 = vpop.f32.mrf.mxu1  ;;  %v4963_v10 = vpop.f32.mrf.mxu0 }
 0x3f8   : > { %v11966_v4 = vadd.f32 %v4963_v10, %v4770_v48 }
 0x3f9   : > { %v4772_v44 = vpop.f32.mrf.mxu1  ;;  %v4965_v7 = vpop.f32.mrf.mxu0 }
 0x3fa   : > { %v11971_v16 = vadd.f32 %v4965_v7, %v4772_v44  ;;  %v8765_v44 = vld [vmem:[%s13607_s8 + $0x4e8] ss:$16 sps:$4 sm:$0xff]  }
 0x3fb   : > { %v4776_v6 = vpop.f32.mrf.mxu1  ;;  %5241 = vmatmul.mubr.bf16.gmra.mxu1 %v11964_v21  ;;  %v4969_v28 = vpop.f32.mrf.mxu0  ;;  %5434 = vmatmul.mubr.bf16.gmra.mxu0 %v11969_v45 }
 0x3fc   : > { %5476 = vmatprep.mubr.bf16.mxu1 %v14027_v17  ;;  %v11976_v58 = vadd.f32 %v4969_v28, %v4776_v6  ;;  %5669 = vmatprep.mubr.bf16.mxu0 %v14028_v20  ;;  %v8768_v6 = vld [vmem:[%s13607_s8 + $0x6e8] ss:$16 sps:$4 sm:$0xff]   ;;  %v8773_v28 = vld [vmem:[%s13607_s8 + $0x4cc] ss:$16 sps:$4 sm:$0xff]  }
 0x3fd   : > { %v4778_v31 = vpop.f32.mrf.mxu1  ;;  %v4971_v48 = vpop.f32.mrf.mxu0 }
 0x3fe   : > { %v11979_v10 = vadd.f32 %v4971_v48, %v4778_v31  ;;  %v14029_v31 = vld [vmem:[#allocation40_spill] sm:$0xff] }
 0x3ff   : > { %v4780_v32 = vpop.f32.mrf.mxu1  ;;  %v4973_v25 = vpop.f32.mrf.mxu0 }
 0x400   : > { %v11984_v7 = vadd.f32 %v4973_v25, %v4780_v32  ;;  %v8776_v25 = vld [vmem:[%s13607_s8 + $0x6cc] ss:$16 sps:$4 sm:$0xff]  }
 0x401   : > { %v4782_v21 = vpop.f32.mrf.mxu1  ;;  %v4975_v45 = vpop.f32.mrf.mxu0  ;;  %v14030_v32 = vld [vmem:[#allocation41_spill] sm:$0xff] }
 0x402   : > { %v11992_v17 = vadd.f32 %v4975_v45, %v4782_v21  ;;  %v14032_v21 = vld [vmem:[#allocation43_spill] sm:$0xff] }
 0x403   : > { %v4786_v20 = vpop.f32.mrf.mxu1  ;;  %5477 = vmatmul.mubr.bf16.vlgmr.msra.gmra.mxu1 %v14029_v31  ;;  %v4979_v48 = vpop.f32.mrf.mxu0  ;;  %5670 = vmatmul.mubr.bf16.vlgmr.msra.gmra.mxu0 %v14030_v32  ;;  %v8779_v31 = vld [vmem:[%s13607_s8 + $0x4ac] ss:$16 sps:$4 sm:$0xff]  }
 0x404   : > { %5831 = vmatpush1.bf16.msra.mxu1 %v8765_v44  ;;  %v12002_v2 = vadd.f32 %v4979_v48, %v4786_v20  ;;  %5486 = vmatprep.mubr.bf16.mxu1 %v14031_v51  ;;  %v8774_v44 = vld [vmem:[%s13607_s8 + $0x6c8] ss:$16 sps:$4 sm:$0xff]   ;;  %v8782_v51 = vld [vmem:[%s13607_s8 + $0x6ac] ss:$16 sps:$4 sm:$0xff]  }
 0x405   : > { %5679 = vmatprep.mubr.bf16.mxu0 %v14032_v21  ;;  %v4788_v45 = vpop.f32.mrf.mxu1  ;;  %v4981_v42 = vpop.f32.mrf.mxu0  ;;  %6024 = vmatpush1.bf16.msra.mxu0 %v8768_v6  ;;  %v8777_v6 = vld [vmem:[%s13607_s8 + $0x4a8] ss:$16 sps:$4 sm:$0xff]  }
 0x406   : > { %5832 = vmatprep.subr.bf16.mxu1 %v8773_v28  ;;  %v12012_v32 = vadd.f32 %v4981_v42, %v4788_v45  ;;  %6025 = vmatprep.subr.bf16.mxu0 %v8776_v25  ;;  %v8780_v42 = vld [vmem:[%s13607_s8 + $0x6a8] ss:$16 sps:$4 sm:$0xff]   ;;  %v8785_v25 = vld [vmem:[%s13607_s8 + $0x48c] ss:$16 sps:$4 sm:$0xff]  }
 0x407   : > { %v4790_v20 = vpop.f32.mrf.mxu1  ;;  %v4983_v48 = vpop.f32.mrf.mxu0 }
 0x408   : > { %5833 = vmatpush1.bf16.msra.mxu1 %v8771_v14  ;;  %v12017_v21 = vadd.f32 %v4983_v48, %v4790_v20  ;;  %v14033_v20 = vld [vmem:[#allocation44_spill] sm:$0xff] }
 0x409   : > { %v4792_v34 = vpop.f32.mrf.mxu1  ;;  %5834 = vmatprep.subr.bf16.mxu1 %v8779_v31  ;;  %v4985_v28 = vpop.f32.mrf.mxu0  ;;  %6026 = vmatpush1.bf16.msra.mxu0 %v8774_v44  ;;  %v8788_v31 = vld [vmem:[%s13607_s8 + $0x68c] ss:$16 sps:$4 sm:$0xff]  }
 0x40a   : > { %v12028_v45 = vadd.f32 %v4985_v28, %v4792_v34  ;;  %6027 = vmatprep.subr.bf16.mxu0 %v8782_v51  ;;  %v14034_v44 = vld [vmem:[#allocation45_spill] sm:$0xff] }
 0x40b   : > { %v4796_v14 = vpop.f32.mrf.mxu1  ;;  %5487 = vmatmul.mubr.bf16.gmra.mxu1 %v14033_v20  ;;  %v4989_v48 = vpop.f32.mrf.mxu0  ;;  %5680 = vmatmul.mubr.bf16.gmra.mxu0 %v14034_v44  ;;  %v8783_v34 = vld [vmem:[%s13607_s8 + $0x488] ss:$16 sps:$4 sm:$0xff]  }
 0x40c   : > { %5496 = vmatprep.mubr.bf16.mxu1 %v14035_v46  ;;  %v12036_v5 = vadd.f32 %v4989_v48, %v4796_v14  ;;  %5689 = vmatprep.mubr.bf16.mxu0 %v14036_v49  ;;  %v8786_v28 = vld [vmem:[%s13607_s8 + $0x688] ss:$16 sps:$4 sm:$0xff]   ;;  %v8791_v46 = vld [vmem:[%s13607_s8 + $0x46c] ss:$16 sps:$4 sm:$0xff]  }
 0x40d   : > { %v4798_v57 = vpop.f32.mrf.mxu1  ;;  %5835 = vmatpush1.bf16.msra.mxu1 %v8777_v6  ;;  %v4991_v51 = vpop.f32.mrf.mxu0  ;;  %6028 = vmatpush1.bf16.msra.mxu0 %v8780_v42  ;;  %v8794_v6 = vld [vmem:[%s13607_s8 + $0x66c] ss:$16 sps:$4 sm:$0xff]  }
 0x40e   : > { %5836 = vmatprep.subr.bf16.mxu1 %v8785_v25  ;;  %v12048_v14 = vadd.f32 %v4991_v51, %v4798_v57  ;;  %6029 = vmatprep.subr.bf16.mxu0 %v8788_v31  ;;  %v8789_v25 = vld [vmem:[%s13607_s8 + $0x468] ss:$16 sps:$4 sm:$0xff]   ;;  %v8797_v31 = vld [vmem:[%s13607_s8 + $0x44c] ss:$16 sps:$4 sm:$0xff]  }
 0x40f   : > { %v4800_v49 = vpop.f32.mrf.mxu1  ;;  %v4993_v20 = vpop.f32.mrf.mxu0  ;;  %v8792_v57 = vld [vmem:[%s13607_s8 + $0x668] ss:$16 sps:$4 sm:$0xff]  }
 0x410   : > { %v12053_v48 = vadd.f32 %v4993_v20, %v4800_v49  ;;  %v14037_v20 = vld [vmem:[#allocation48_spill] sm:$0xff] }
 0x411   : > { %v4802_v42 = vpop.f32.mrf.mxu1  ;;  %5837 = vmatpush1.bf16.msra.mxu1 %v8783_v34  ;;  %v4995_v44 = vpop.f32.mrf.mxu0  ;;  %6030 = vmatpush1.bf16.msra.mxu0 %v8786_v28  ;;  %v8800_v34 = vld [vmem:[%s13607_s8 + $0x64c] ss:$16 sps:$4 sm:$0xff]  }
 0x412   : > { %5838 = vmatprep.subr.bf16.mxu1 %v8791_v46  ;;  %v12064_v51 = vadd.f32 %v4995_v44, %v4802_v42  ;;  %6031 = vmatprep.subr.bf16.mxu0 %v8794_v6  ;;  %v14038_v46 = vld [vmem:[#allocation49_spill] sm:$0xff] }
 0x413   : > { %v4806_v49 = vpop.f32.mrf.mxu1  ;;  %5497 = vmatmul.mubr.bf16.gmra.mxu1 %v14037_v20  ;;  %v4999_v28 = vpop.f32.mrf.mxu0  ;;  %5690 = vmatmul.mubr.bf16.gmra.mxu0 %v14038_v46  ;;  %v8795_v42 = vld [vmem:[%s13607_s8 + $0x448] ss:$16 sps:$4 sm:$0xff]  }
 0x414   : > { %5506 = vmatprep.mubr.bf16.mxu1 %v14039_v3  ;;  %v12072_v18 = vadd.f32 %v4999_v28, %v4806_v49  ;;  %5699 = vmatprep.mubr.bf16.mxu0 %v14040_v38  ;;  %v8798_v44 = vld [vmem:[%s13607_s8 + $0x648] ss:$16 sps:$4 sm:$0xff]   ;;  %v8803_v3 = vld [vmem:[%s13607_s8 + $0x42c] ss:$16 sps:$4 sm:$0xff]  }
 0x415   : > { %v4808_v52 = vpop.f32.mrf.mxu1  ;;  %5839 = vmatpush1.bf16.msra.mxu1 %v8789_v25  ;;  %v5001_v6 = vpop.f32.mrf.mxu0  ;;  %6032 = vmatpush1.bf16.msra.mxu0 %v8792_v57  ;;  %v8806_v25 = vld [vmem:[%s13607_s8 + $0x62c] ss:$16 sps:$4 sm:$0xff]  }
 0x416   : > { %5840 = vmatprep.subr.bf16.mxu1 %v8797_v31  ;;  %v12084_v49 = vadd.f32 %v5001_v6, %v4808_v52  ;;  %6033 = vmatprep.subr.bf16.mxu0 %v8800_v34  ;;  %v8801_v31 = vld [vmem:[%s13607_s8 + $0x428] ss:$16 sps:$4 sm:$0xff]   ;;  %v8809_v34 = vld [vmem:[%s13607_s8 + $0x40c] ss:$16 sps:$4 sm:$0xff]  }
 0x417   : > { %v4810_v38 = vpop.f32.mrf.mxu1  ;;  %v5003_v20 = vpop.f32.mrf.mxu0  ;;  %v8804_v52 = vld [vmem:[%s13607_s8 + $0x628] ss:$16 sps:$4 sm:$0xff]  }
 0x418   : > { %v12089_v28 = vadd.f32 %v5003_v20, %v4810_v38  ;;  %v14041_v20 = vld [vmem:[#allocation52_spill] sm:$0xff] }
 0x419   : > { %v4812_v57 = vpop.f32.mrf.mxu1  ;;  %5841 = vmatpush1.bf16.msra.mxu1 %v8795_v42  ;;  %v5005_v46 = vpop.f32.mrf.mxu0  ;;  %6034 = vmatpush1.bf16.msra.mxu0 %v8798_v44  ;;  %v8812_v42 = vld [vmem:[%s13607_s8 + $0x60c] ss:$16 sps:$4 sm:$0xff]  }
 0x41a   : > { %5842 = vmatprep.subr.bf16.mxu1 %v8803_v3  ;;  %v12100_v6 = vadd.f32 %v5005_v46, %v4812_v57  ;;  %6035 = vmatprep.subr.bf16.mxu0 %v8806_v25  ;;  %v14042_v3 = vld [vmem:[#allocation53_spill] sm:$0xff] }
 0x41b   : > { %v4816_v38 = vpop.f32.mrf.mxu1  ;;  %5507 = vmatmul.mubr.bf16.gmra.mxu1 %v14041_v20  ;;  %v5009_v44 = vpop.f32.mrf.mxu0  ;;  %5700 = vmatmul.mubr.bf16.gmra.mxu0 %v14042_v3  ;;  %v8807_v57 = vld [vmem:[%s13607_s8 + $0x408] ss:$16 sps:$4 sm:$0xff]  }
 0x41c   : > { %5516 = vmatprep.mubr.bf16.mxu1 %v14043_v59  ;;  %v12108_v60 = vadd.f32 %v5009_v44, %v4816_v38  ;;  %5709 = vmatprep.mubr.bf16.mxu0 %v14044_v19  ;;  %v8810_v46 = vld [vmem:[%s13607_s8 + $0x608] ss:$16 sps:$4 sm:$0xff]   ;;  %v8815_v59 = vld [vmem:[%s13607_s8 + $0x5ec] ss:$16 sps:$4 sm:$0xff]  }
 0x41d   : > { %v4818_v33 = vpop.f32.mrf.mxu1  ;;  %5843 = vmatpush1.bf16.msra.mxu1 %v8801_v31  ;;  %v5011_v25 = vpop.f32.mrf.mxu0  ;;  %6036 = vmatpush1.bf16.msra.mxu0 %v8804_v52  ;;  %v8818_v31 = vld [vmem:[%s13607_s8 + $0x7ec] ss:$16 sps:$4 sm:$0xff]  }
 0x41e   : > { %5844 = vmatprep.subr.bf16.mxu1 %v8809_v34  ;;  %v12120_v38 = vadd.f32 %v5011_v25, %v4818_v33  ;;  %6037 = vmatprep.subr.bf16.mxu0 %v8812_v42  ;;  %v8813_v34 = vld [vmem:[%s13607_s8 + $0x5e8] ss:$16 sps:$4 sm:$0xff]   ;;  %v8821_v42 = vld [vmem:[%s13607_s8 + $0x5cc] ss:$16 sps:$4 sm:$0xff]  }
 0x41f   : > { %v4820_v19 = vpop.f32.mrf.mxu1  ;;  %v5013_v20 = vpop.f32.mrf.mxu0  ;;  %v8816_v33 = vld [vmem:[%s13607_s8 + $0x7e8] ss:$16 sps:$4 sm:$0xff]  }
 0x420   : > { %v12125_v44 = vadd.f32 %v5013_v20, %v4820_v19  ;;  %v14045_v20 = vld [vmem:[#allocation6_spill] sm:$0xff] }
 0x421   : > { %v4822_v52 = vpop.f32.mrf.mxu1  ;;  %5845 = vmatpush1.bf16.msra.mxu1 %v8807_v57  ;;  %v5015_v3 = vpop.f32.mrf.mxu0  ;;  %6038 = vmatpush1.bf16.msra.mxu0 %v8810_v46  ;;  %v8824_v57 = vld [vmem:[%s13607_s8 + $0x7cc] ss:$16 sps:$4 sm:$0xff]  }
 0x422   : > { %5846 = vmatprep.subr.bf16.mxu1 %v8815_v59  ;;  %v12136_v25 = vadd.f32 %v5015_v3, %v4822_v52  ;;  %6039 = vmatprep.subr.bf16.mxu0 %v8818_v31  ;;  %v14046_v59 = vld [vmem:[#allocation7_spill] sm:$0xff] }
 0x423   : > { %v4826_v19 = vpop.f32.mrf.mxu1  ;;  %5517 = vmatmul.mubr.bf16.gmra.mxu1 %v14045_v20  ;;  %v5019_v46 = vpop.f32.mrf.mxu0  ;;  %5710 = vmatmul.mubr.bf16.gmra.mxu0 %v14046_v59  ;;  %v8819_v52 = vld [vmem:[%s13607_s8 + $0x5c8] ss:$16 sps:$4 sm:$0xff]  }
 0x424   : > { %5526 = vmatprep.mubr.bf16.mxu1 %v14047_v8  ;;  %v12144_v54 = vadd.f32 %v5019_v46, %v4826_v19  ;;  %5719 = vmatprep.mubr.bf16.mxu0 %v14049_v29  ;;  %v8822_v3 = vld [vmem:[%s13607_s8 + $0x7c8] ss:$16 sps:$4 sm:$0xff]   ;;  %v8827_v8 = vld [vmem:[%s13607_s8 + $0x5ac] ss:$16 sps:$4 sm:$0xff]  }
 0x425   : > { %v4828_v37 = vpop.f32.mrf.mxu1  ;;  %5847 = vmatpush2.bf16.msra.mxu1 %v8813_v34  ;;  %v5021_v31 = vpop.f32.mrf.mxu0  ;;  %6040 = vmatpush2.bf16.msra.mxu0 %v8816_v33  ;;  %v8830_v34 = vld [vmem:[%s13607_s8 + $0x7ac] ss:$16 sps:$4 sm:$0xff]  }
 0x426   : > { %14048 = vst [vmem:[#allocation38_spill] sm:$0xff] %v12144_v54  ;;  %5848 = vmatprep.subr.bf16.mxu1 %v8821_v42  ;;  %v12156_v19 = vadd.f32 %v5021_v31, %v4828_v37  ;;  %6041 = vmatprep.subr.bf16.mxu0 %v8824_v57  ;;  %v8825_v42 = vld [vmem:[%s13607_s8 + $0x5a8] ss:$16 sps:$4 sm:$0xff]   ;;  %v8833_v57 = vld [vmem:[%s13607_s8 + $0x58c] ss:$16 sps:$4 sm:$0xff]  }
 0x427   : > { %v4830_v29 = vpop.f32.mrf.mxu1  ;;  %v5023_v20 = vpop.f32.mrf.mxu0  ;;  %v8828_v37 = vld [vmem:[%s13607_s8 + $0x7a8] ss:$16 sps:$4 sm:$0xff]  }
 0x428   : > { %14050 = vst [vmem:[#allocation39_spill] sm:$0xff] %v12156_v19  ;;  %v12161_v46 = vadd.f32 %v5023_v20, %v4830_v29  ;;  %v14053_v20 = vld [vmem:[#allocation10_spill] sm:$0xff] }
 0x429   : > { %v4832_v33 = vpop.f32.mrf.mxu1  ;;  %5849 = vmatpush2.bf16.msra.mxu1 %v8819_v52  ;;  %v5025_v59 = vpop.f32.mrf.mxu0  ;;  %6042 = vmatpush2.bf16.msra.mxu0 %v8822_v3  ;;  %v8836_v52 = vld [vmem:[%s13607_s8 + $0x78c] ss:$16 sps:$4 sm:$0xff]   ;;  %v14057_v19 = vld [vmem:[#allocation18_spill] sm:$0xff] }
 0x42a   : > { %14051 = vst [vmem:[#allocation40_spill] sm:$0xff] %v12161_v46  ;;  %5850 = vmatprep.subr.bf16.mxu1 %v8827_v8  ;;  %v12172_v31 = vadd.f32 %v5025_v59, %v4832_v33  ;;  %6043 = vmatprep.subr.bf16.mxu0 %v8830_v34  ;;  %v14054_v8 = vld [vmem:[#allocation15_spill] sm:$0xff] }
 0x42b   : > { %v4836_v29 = vpop.f32.mrf.mxu1  ;;  %5527 = vmatmul.mubr.bf16.gmra.mxu1 %v14053_v20  ;;  %v5029_v3 = vpop.f32.mrf.mxu0  ;;  %5720 = vmatmul.mubr.bf16.gmra.mxu0 %v14054_v8  ;;  %v8831_v33 = vld [vmem:[%s13607_s8 + $0x588] ss:$16 sps:$4 sm:$0xff]  }
 0x42c   : > { %14052 = vst [vmem:[#allocation41_spill] sm:$0xff] %v12172_v31  ;;  %5536 = vmatprep.mubr.bf16.mxu1 %v14055_v40  ;;  %v12180_v46 = vadd.f32 %v5029_v3, %v4836_v29  ;;  %5729 = vmatprep.mubr.bf16.mxu0 %v14057_v19  ;;  %v8834_v59 = vld [vmem:[%s13607_s8 + $0x788] ss:$16 sps:$4 sm:$0xff]   ;;  %v8839_v40 = vld [vmem:[%s13607_s8 + $0x56c] ss:$16 sps:$4 sm:$0xff]  }
 0x42d   : > { %v4838_v54 = vpop.f32.mrf.mxu1  ;;  %5851 = vmatpush2.bf16.msra.mxu1 %v8825_v42  ;;  %v5031_v34 = vpop.f32.mrf.mxu0  ;;  %6044 = vmatpush2.bf16.msra.mxu0 %v8828_v37  ;;  %v8842_v42 = vld [vmem:[%s13607_s8 + $0x76c] ss:$16 sps:$4 sm:$0xff]  }
 0x42e   : > { %14056 = vst [vmem:[#allocation42_spill] sm:$0xff] %v12180_v46  ;;  %5852 = vmatprep.subr.bf16.mxu1 %v8833_v57  ;;  %v12192_v29 = vadd.f32 %v5031_v34, %v4838_v54  ;;  %6045 = vmatprep.subr.bf16.mxu0 %v8836_v52  ;;  %v8837_v57 = vld [vmem:[%s13607_s8 + $0x568] ss:$16 sps:$4 sm:$0xff]   ;;  %v8845_v52 = vld [vmem:[%s13607_s8 + $0x54c] ss:$16 sps:$4 sm:$0xff]  }
 0x42f   : > { %v4840_v19 = vpop.f32.mrf.mxu1  ;;  %v5033_v20 = vpop.f32.mrf.mxu0  ;;  %v8840_v54 = vld [vmem:[%s13607_s8 + $0x768] ss:$16 sps:$4 sm:$0xff]  }
 0x430   : > { %14058 = vst [vmem:[#allocation43_spill] sm:$0xff] %v12192_v29  ;;  %v12197_v3 = vadd.f32 %v5033_v20, %v4840_v19  ;;  %v14061_v20 = vld [vmem:[#allocation9_spill] sm:$0xff] }
 0x431   : > { %v4842_v37 = vpop.f32.mrf.mxu1  ;;  %5853 = vmatpush2.bf16.msra.mxu1 %v8831_v33  ;;  %v5035_v8 = vpop.f32.mrf.mxu0  ;;  %6046 = vmatpush2.bf16.msra.mxu0 %v8834_v59  ;;  %v8848_v33 = vld [vmem:[%s13607_s8 + $0x74c] ss:$16 sps:$4 sm:$0xff]  }
 0x432   : > { %14059 = vst [vmem:[#allocation44_spill] sm:$0xff] %v12197_v3  ;;  %5854 = vmatprep.subr.bf16.mxu1 %v8839_v40  ;;  %v12208_v34 = vadd.f32 %v5035_v8, %v4842_v37  ;;  %6047 = vmatprep.subr.bf16.mxu0 %v8842_v42  ;;  %v14062_v40 = vld [vmem:[#allocation12_spill] sm:$0xff]  ;;  %v14065_v46 = vld [vmem:[#allocation13_spill] sm:$0xff] }
 0x433   : > { %v4846_v19 = vpop.f32.mrf.mxu1  ;;  %5537 = vmatmul.mubr.bf16.gmra.mxu1 %v14061_v20  ;;  %v5039_v59 = vpop.f32.mrf.mxu0  ;;  %5730 = vmatmul.mubr.bf16.gmra.mxu0 %v14062_v40  ;;  %v14063_v3 = vld [vmem:[#allocation20_spill] sm:$0xff]  ;;  %v8843_v37 = vld [vmem:[%s13607_s8 + $0x548] ss:$16 sps:$4 sm:$0xff]  }
 0x434   : > { %14060 = vst [vmem:[#allocation45_spill] sm:$0xff] %v12208_v34  ;;  %5546 = vmatprep.mubr.bf16.mxu1 %v14063_v3  ;;  %v12216_v29 = vadd.f32 %v5039_v59, %v4846_v19  ;;  %5739 = vmatprep.mubr.bf16.mxu0 %v14065_v46  ;;  %v8846_v8 = vld [vmem:[%s13607_s8 + $0x748] ss:$16 sps:$4 sm:$0xff]   ;;  %v8851_v3 = vld [vmem:[%s13607_s8 + $0x52c] ss:$16 sps:$4 sm:$0xff]  }
 0x435   : > { %v4848_v31 = vpop.f32.mrf.mxu1  ;;  %5855 = vmatpush2.bf16.msra.mxu1 %v8837_v57  ;;  %v5041_v42 = vpop.f32.mrf.mxu0  ;;  %6048 = vmatpush2.bf16.msra.mxu0 %v8840_v54  ;;  %v8854_v57 = vld [vmem:[%s13607_s8 + $0x72c] ss:$16 sps:$4 sm:$0xff]  }
 0x436   : > { %14064 = vst [vmem:[#allocation46_spill] sm:$0xff] %v12216_v29  ;;  %5856 = vmatprep.subr.bf16.mxu1 %v8845_v52  ;;  %v12228_v19 = vadd.f32 %v5041_v42, %v4848_v31  ;;  %6049 = vmatprep.subr.bf16.mxu0 %v8848_v33  ;;  %v8849_v52 = vld [vmem:[%s13607_s8 + $0x528] ss:$16 sps:$4 sm:$0xff]   ;;  %v8857_v33 = vld [vmem:[%s13607_s8 + $0x50c] ss:$16 sps:$4 sm:$0xff]  }
 0x437   : > { %v4850_v46 = vpop.f32.mrf.mxu1  ;;  %v5043_v20 = vpop.f32.mrf.mxu0  ;;  %v8852_v31 = vld [vmem:[%s13607_s8 + $0x728] ss:$16 sps:$4 sm:$0xff]  }
 0x438   : > { %14066 = vst [vmem:[#allocation47_spill] sm:$0xff] %v12228_v19  ;;  %v12233_v59 = vadd.f32 %v5043_v20, %v4850_v46  ;;  %v14069_v20 = vld [vmem:[#allocation21_spill] sm:$0xff]  ;;  %v14073_v29 = vld [vmem:[#allocation19_spill] sm:$0xff] }
 0x439   : > { %v4852_v54 = vpop.f32.mrf.mxu1  ;;  %5857 = vmatpush2.bf16.msra.mxu1 %v8843_v37  ;;  %v5045_v40 = vpop.f32.mrf.mxu0  ;;  %6050 = vmatpush2.bf16.msra.mxu0 %v8846_v8  ;;  %v8860_v37 = vld [vmem:[%s13607_s8 + $0x70c] ss:$16 sps:$4 sm:$0xff]  }
 0x43a   : > { %14067 = vst [vmem:[#allocation48_spill] sm:$0xff] %v12233_v59  ;;  %5858 = vmatprep.subr.bf16.mxu1 %v8851_v3  ;;  %v12244_v42 = vadd.f32 %v5045_v40, %v4852_v54  ;;  %6051 = vmatprep.subr.bf16.mxu0 %v8854_v57  ;;  %v14070_v3 = vld [vmem:[#allocation24_spill] sm:$0xff]  ;;  %v14071_v59 = vld [vmem:[#allocation23_spill] sm:$0xff] }
 0x43b   : > { %v4856_v46 = vpop.f32.mrf.mxu1  ;;  %5547 = vmatmul.mubr.bf16.gmra.mxu1 %v14069_v20  ;;  %v5049_v8 = vpop.f32.mrf.mxu0  ;;  %5740 = vmatmul.mubr.bf16.gmra.mxu0 %v14070_v3  ;;  %v8855_v54 = vld [vmem:[%s13607_s8 + $0x508] ss:$16 sps:$4 sm:$0xff]  }
 0x43c   : > { %14068 = vst [vmem:[#allocation49_spill] sm:$0xff] %v12244_v42  ;;  %5556 = vmatprep.mubr.bf16.mxu1 %v14071_v59  ;;  %v12252_v19 = vadd.f32 %v5049_v8, %v4856_v46  ;;  %5749 = vmatprep.mubr.bf16.mxu0 %v14073_v29  ;;  %v8858_v40 = vld [vmem:[%s13607_s8 + $0x708] ss:$16 sps:$4 sm:$0xff]   ;;  %v14081_v42 = vld [vmem:[#allocation26_spill] sm:$0xff] }
 0x43d   : > { %v4858_v34 = vpop.f32.mrf.mxu1  ;;  %5859 = vmatpush2.bf16.msra.mxu1 %v8849_v52  ;;  %v5051_v57 = vpop.f32.mrf.mxu0  ;;  %6052 = vmatpush2.bf16.msra.mxu0 %v8852_v31  ;;  %v14077_v31 = vld [vmem:[#allocation28_spill] sm:$0xff] }
 0x43e   : > { %14072 = vst [vmem:[#allocation50_spill] sm:$0xff] %v12252_v19  ;;  %5860 = vmatprep.subr.bf16.mxu1 %v8857_v33  ;;  %v12261_v20 = vadd.f32 %v5051_v57, %v4858_v34  ;;  %6053 = vmatprep.subr.bf16.mxu0 %v8860_v37  ;;  %v8863_v33 = vld [vmem:[%s13608_s9 + $0x74] ss:$8 sps:$4 sm:$0xff]  }
 0x43f   : > { %v4860_v59 = vpop.f32.mrf.mxu1  ;;  %v5053_v46 = vpop.f32.mrf.mxu0  ;;  %v14078_v37 = vld [vmem:[#allocation33_spill] sm:$0xff] }
 0x440   : > { %14074 = vst [vmem:[#allocation51_spill] sm:$0xff] %v12261_v20  ;;  %v12263_v8 = vadd.f32 %v5053_v46, %v4860_v59  ;;  %v14079_v59 = vld [vmem:[#allocation29_spill] sm:$0xff]  ;;  %v14080_v46 = vld [vmem:[#allocation34_spill] sm:$0xff] }
 0x441   : > { %v4862_v29 = vpop.f32.mrf.mxu1  ;;  %5861 = vmatpush2.bf16.msra.mxu1 %v8855_v54  ;;  %v5055_v52 = vpop.f32.mrf.mxu0  ;;  %6054 = vmatpush2.bf16.msra.mxu0 %v8858_v40 }
 0x442   : > { %14075 = vst [vmem:[#allocation52_spill] sm:$0xff] %v12263_v8  ;;  %v12265_v3 = vadd.f32 %v5055_v52, %v4862_v29  ;;  %6846 = vmatprep.subr.bf16.mxu1 %v8863_v33  ;;  %v14085_v33 = vld [vmem:[#allocation35_spill] sm:$0xff] }
 0x443   : > { %v5092_v19 = vpop.f32.mrf.mxu1  ;;  %5557 = vmatmul.mubr.bf16.gmra.mxu1 %v14077_v31  ;;  %v5285_v57 = vpop.f32.mrf.mxu0  ;;  %5750 = vmatmul.mubr.bf16.gmra.mxu0 %v14078_v37 }
 0x444   : > { %14076 = vst [vmem:[#allocation53_spill] sm:$0xff] %v12265_v3  ;;  %v5093_v34 = vadd.f32 %v5092_v19, %v11733_v36  ;;  %5566 = vmatprep.mubr.bf16.mxu1 %v14079_v59  ;;  %5759 = vmatprep.mubr.bf16.mxu0 %v14080_v46 }
 0x445   : > { %v5094_v54 = vpop.f32.mrf.mxu1  ;;  %v5287_v52 = vpop.f32.mrf.mxu0 }
 0x446   : > { %v12275_v40 = vadd.f32 %v5285_v57, %v5093_v34  ;;  %v5095_v29 = vadd.f32 %v5094_v54, %v11738_v63  ;;  %v14082_v54 = vld [vmem:[#allocation30_spill] sm:$0xff] }
 0x447   : > { %v5096_v31 = vpop.f32.mrf.mxu1  ;;  %v5289_v36 = vpop.f32.mrf.mxu0 }
 0x448   : > { %v12278_v3 = vadd.f32 %v5287_v52, %v5095_v29  ;;  %v5097_v8 = vadd.f32 %v5096_v31, %v11744_v13  ;;  %v14083_v13 = vld [vmem:[#allocation27_spill] sm:$0xff] }
 0x449   : > { %v5098_v19 = vpop.f32.mrf.mxu1  ;;  %v5291_v59 = vpop.f32.mrf.mxu0 }
 0x44a   : > { %v12281_v20 = vadd.f32 %v5289_v36, %v5097_v8  ;;  %v5099_v37 = vadd.f32 %v5098_v19, %v11761_v12  ;;  %v14084_v8 = vld [vmem:[#allocation31_spill] sm:$0xff] }
 0x44b   : > { %v5102_v46 = vpop.f32.mrf.mxu1  ;;  %5567 = vmatmul.mubr.bf16.gmra.mxu1 %v14081_v42  ;;  %v5295_v57 = vpop.f32.mrf.mxu0  ;;  %5760 = vmatmul.mubr.bf16.gmra.mxu0 %v14082_v54 }
 0x44c   : > { %v12287_v63 = vadd.f32 %v5291_v59, %v5099_v37  ;;  %v5103_v34 = vadd.f32 %v5102_v46, %v11778_v50  ;;  %5576 = vmatprep.mubr.bf16.mxu1 %v14083_v13  ;;  %5769 = vmatprep.mubr.bf16.mxu0 %v14084_v8 }
 0x44d   : > { %v5104_v29 = vpop.f32.mrf.mxu1  ;;  %v5297_v31 = vpop.f32.mrf.mxu0 }
 0x44e   : > { %v12295_v52 = vadd.f32 %v5295_v57, %v5103_v34  ;;  %v5105_v42 = vadd.f32 %v5104_v29, %v11786_v30 }
 0x44f   : > { %v5106_v36 = vpop.f32.mrf.mxu1  ;;  %v5299_v37 = vpop.f32.mrf.mxu0 }
 0x450   : > { %v12298_v19 = vadd.f32 %v5297_v31, %v5105_v42  ;;  %v5107_v50 = vadd.f32 %v5106_v36, %v11789_v22  ;;  %v14086_v42 = vld [vmem:[#allocation36_spill] sm:$0xff]  ;;  %v14087_v22 = vld [vmem:[#allocation37_spill] sm:$0xff] }
 0x451   : > { %v5108_v59 = vpop.f32.mrf.mxu1  ;;  %v5301_v13 = vpop.f32.mrf.mxu0  ;;  %v14088_v31 = vld [vmem:[#allocation56_spill] sm:$0xff] }
 0x452   : > { %v12301_v46 = vadd.f32 %v5299_v37, %v5107_v50  ;;  %v5109_v54 = vadd.f32 %v5108_v59, %v11803_v15  ;;  %v8878_v15 = vld [vmem:[%s13608_s9 + $0x174] ss:$8 sps:$4 sm:$0xff]  }
 0x453   : > { %v5112_v8 = vpop.f32.mrf.mxu1  ;;  %5577 = vmatmul.mubr.bf16.gmra.mxu1 %v14085_v33  ;;  %v5305_v29 = vpop.f32.mrf.mxu0  ;;  %5770 = vmatmul.mubr.bf16.gmra.mxu0 %v14086_v42  ;;  %v14089_v33 = vld [vmem:[#allocation57_spill] sm:$0xff] }
 0x454   : > { %v12307_v30 = vadd.f32 %v5301_v13, %v5109_v54  ;;  %v5113_v57 = vadd.f32 %v5112_v8, %v11814_v0  ;;  %5586 = vmatprep.mubr.bf16.mxu1 %v14087_v22  ;;  %5779 = vmatprep.mubr.bf16.mxu0 %v14088_v31 }
 0x455   : > { %v5114_v36 = vpop.f32.mrf.mxu1  ;;  %v5307_v0 = vpop.f32.mrf.mxu0  ;;  %7039 = vmatprep.subr.bf16.mxu0 %v8878_v15  ;;  %v14090_v15 = vld [vmem:[#allocation58_spill] sm:$0xff] }
 0x456   : > { %v12318_v50 = vadd.f32 %v5305_v29, %v5113_v57  ;;  %v5115_v37 = vadd.f32 %v5114_v36, %v11822_v9  ;;  %v14093_v9 = vld [vmem:[#allocation62_spill] sm:$0xff] }
 0x457   : > { %v5116_v59 = vpop.f32.mrf.mxu1  ;;  %v5309_v8 = vpop.f32.mrf.mxu0 }
 0x458   : > { %v12321_v54 = vadd.f32 %v5307_v0, %v5115_v37  ;;  %v5117_v13 = vadd.f32 %v5116_v59, %v11825_v43  ;;  %v14091_v43 = vld [vmem:[#allocation59_spill] sm:$0xff]  ;;  %v14092_v37 = vld [vmem:[#allocation60_spill] sm:$0xff] }
 0x459   : > { %v5118_v42 = vpop.f32.mrf.mxu1  ;;  %v5311_v34 = vpop.f32.mrf.mxu0 }
 0x45a   : > { %v12324_v22 = vadd.f32 %v5309_v8, %v5117_v13  ;;  %v5119_v31 = vadd.f32 %v5118_v42, %v11839_v55  ;;  %v14097_v55 = vld [vmem:[#allocation71_spill] sm:$0xff] }
 0x45b   : > { %v5122_v12 = vpop.f32.mrf.mxu1  ;;  %5587 = vmatmul.mubr.bf16.gmra.mxu1 %v14089_v33  ;;  %v5315_v36 = vpop.f32.mrf.mxu0  ;;  %5780 = vmatmul.mubr.bf16.gmra.mxu0 %v14090_v15 }
 0x45c   : > { %v12330_v57 = vadd.f32 %v5311_v34, %v5119_v31  ;;  %v5123_v29 = vadd.f32 %v5122_v12, %v11853_v26  ;;  %5596 = vmatprep.mubr.bf16.mxu1 %v14091_v43  ;;  %5789 = vmatprep.mubr.bf16.mxu0 %v14092_v37 }
 0x45d   : > { %v5124_v0 = vpop.f32.mrf.mxu1  ;;  %v5317_v13 = vpop.f32.mrf.mxu0 }
 0x45e   : > { %v12338_v59 = vadd.f32 %v5315_v36, %v5123_v29  ;;  %v5125_v33 = vadd.f32 %v5124_v0, %v11859_v1 }
 0x45f   : > { %v5126_v34 = vpop.f32.mrf.mxu1  ;;  %v5319_v12 = vpop.f32.mrf.mxu0 }
 0x460   : > { %v12341_v8 = vadd.f32 %v5317_v13, %v5125_v33  ;;  %v5127_v26 = vadd.f32 %v5126_v34, %v11866_v27  ;;  %v14094_v33 = vld [vmem:[#allocation63_spill] sm:$0xff]  ;;  %v14095_v27 = vld [vmem:[#allocation66_spill] sm:$0xff] }
 0x461   : > { %v5128_v42 = vpop.f32.mrf.mxu1  ;;  %v5321_v43 = vpop.f32.mrf.mxu0  ;;  %v14096_v13 = vld [vmem:[#allocation67_spill] sm:$0xff] }
 0x462   : > { %v12344_v31 = vadd.f32 %v5319_v12, %v5127_v26  ;;  %v5129_v15 = vadd.f32 %v5128_v42, %v11880_v23  ;;  %v14101_v23 = vld [vmem:[#allocation74_spill] sm:$0xff] }
 0x463   : > { %v5132_v37 = vpop.f32.mrf.mxu1  ;;  %5597 = vmatmul.mubr.bf16.gmra.mxu1 %v14093_v9  ;;  %v5325_v0 = vpop.f32.mrf.mxu0  ;;  %5790 = vmatmul.mubr.bf16.gmra.mxu0 %v14094_v33 }
 0x464   : > { %v12350_v1 = vadd.f32 %v5321_v43, %v5129_v15  ;;  %v5133_v36 = vadd.f32 %v5132_v37, %v11889_v62  ;;  %5606 = vmatprep.mubr.bf16.mxu1 %v14095_v27  ;;  %5799 = vmatprep.mubr.bf16.mxu0 %v14096_v13 }
 0x465   : > { %v5134_v34 = vpop.f32.mrf.mxu1  ;;  %v5327_v12 = vpop.f32.mrf.mxu0 }
 0x466   : > { %v12358_v26 = vadd.f32 %v5325_v0, %v5133_v36  ;;  %v5135_v9 = vadd.f32 %v5134_v34, %v11895_v24 }
 0x467   : > { %v5136_v42 = vpop.f32.mrf.mxu1  ;;  %v5329_v43 = vpop.f32.mrf.mxu0 }
 0x468   : > { %v12361_v15 = vadd.f32 %v5327_v12, %v5135_v9  ;;  %v5137_v62 = vadd.f32 %v5136_v42, %v11902_v39  ;;  %v14098_v9 = vld [vmem:[#allocation73_spill] sm:$0xff]  ;;  %v14100_v12 = vld [vmem:[#allocation16_spill] sm:$0xff] }
 0x469   : > { %v5138_v37 = vpop.f32.mrf.mxu1  ;;  %v5331_v13 = vpop.f32.mrf.mxu0  ;;  %v14099_v39 = vld [vmem:[#allocation25_spill] sm:$0xff] }
 0x46a   : > { %v12364_v33 = vadd.f32 %v5329_v43, %v5137_v62  ;;  %v5139_v27 = vadd.f32 %v5138_v37, %v11916_v11  ;;  %v14105_v11 = vld [vmem:[#allocation76_spill] sm:$0xff] }
 0x46b   : > { %v5142_v29 = vpop.f32.mrf.mxu1  ;;  %5607 = vmatmul.mubr.bf16.gmra.mxu1 %v14097_v55  ;;  %v5335_v34 = vpop.f32.mrf.mxu0  ;;  %5800 = vmatmul.mubr.bf16.gmra.mxu0 %v14098_v9 }
 0x46c   : > { %v12370_v24 = vadd.f32 %v5331_v13, %v5139_v27  ;;  %v5143_v0 = vadd.f32 %v5142_v29, %v11925_v56  ;;  %5616 = vmatprep.mubr.bf16.mxu1 %v14099_v39  ;;  %5809 = vmatprep.mubr.bf16.mxu0 %v14100_v12 }
 0x46d   : > { %v5144_v42 = vpop.f32.mrf.mxu1  ;;  %v5337_v43 = vpop.f32.mrf.mxu0 }
 0x46e   : > { %v12378_v62 = vadd.f32 %v5335_v34, %v5143_v0  ;;  %v5145_v55 = vadd.f32 %v5144_v42, %v11931_v47 }
 0x46f   : > { %v5146_v37 = vpop.f32.mrf.mxu1  ;;  %v5339_v29 = vpop.f32.mrf.mxu0 }
 0x470   : > { %v12381_v27 = vadd.f32 %v5337_v43, %v5145_v55  ;;  %v5147_v56 = vadd.f32 %v5146_v37, %v11938_v41  ;;  %v14102_v55 = vld [vmem:[#allocation75_spill] sm:$0xff]  ;;  %v14103_v41 = vld [vmem:[#allocation17_spill] sm:$0xff]  ;;  %v14104_v43 = vld [vmem:[#allocation22_spill] sm:$0xff] }
 0x471   : > { %v5148_v13 = vpop.f32.mrf.mxu1  ;;  %v5341_v12 = vpop.f32.mrf.mxu0 }
 0x472   : > { %v12384_v9 = vadd.f32 %v5339_v29, %v5147_v56  ;;  %v5149_v39 = vadd.f32 %v5148_v13, %v11948_v35 }
 0x473   : > { %v5152_v36 = vpop.f32.mrf.mxu1  ;;  %5617 = vmatmul.mubr.bf16.gmra.mxu1 %v14101_v23  ;;  %v5345_v42 = vpop.f32.mrf.mxu0  ;;  %5810 = vmatmul.mubr.bf16.gmra.mxu0 %v14102_v55 }
 0x474   : > { %v12390_v47 = vadd.f32 %v5341_v12, %v5149_v39  ;;  %v5153_v34 = vadd.f32 %v5152_v36, %v11957_v53  ;;  %5626 = vmatprep.mubr.bf16.mxu1 %v14103_v41  ;;  %5819 = vmatprep.mubr.bf16.mxu0 %v14104_v43 }
 0x475   : > { %v5154_v37 = vpop.f32.mrf.mxu1  ;;  %v5347_v29 = vpop.f32.mrf.mxu0 }
 0x476   : > { %v12398_v56 = vadd.f32 %v5345_v42, %v5153_v34  ;;  %v5155_v23 = vadd.f32 %v5154_v37, %v11961_v61 }
 0x477   : > { %v5156_v13 = vpop.f32.mrf.mxu1  ;;  %v5349_v36 = vpop.f32.mrf.mxu0 }
 0x478   : > { %v12401_v39 = vadd.f32 %v5347_v29, %v5155_v23  ;;  %v5157_v53 = vadd.f32 %v5156_v13, %v11966_v4  ;;  %v14106_v23 = vld [vmem:[#allocation77_spill] sm:$0xff]  ;;  %v14107_v4 = vld [vmem:[#allocation78_spill] sm:$0xff]  ;;  %v14108_v29 = vld [vmem:[#allocation79_spill] sm:$0xff] }
 0x479   : > { %v5158_v12 = vpop.f32.mrf.mxu1  ;;  %v5351_v43 = vpop.f32.mrf.mxu0 }
 0x47a   : > { %v12404_v55 = vadd.f32 %v5349_v36, %v5157_v53  ;;  %v5159_v41 = vadd.f32 %v5158_v12, %v11971_v16 }
 0x47b   : > { %v5162_v0 = vpop.f32.mrf.mxu1  ;;  %5627 = vmatmul.mubr.bf16.gmra.mxu1 %v14105_v11  ;;  %v5355_v37 = vpop.f32.mrf.mxu0  ;;  %5820 = vmatmul.mubr.bf16.gmra.mxu0 %v14106_v23  ;;  %v8861_v23 = vld [vmem:[%s13608_s9 + $0x70] ss:$8 sps:$4 sm:$0xff]  }
 0x47c   : > { %v12410_v61 = vadd.f32 %v5351_v43, %v5159_v41  ;;  %v5163_v42 = vadd.f32 %v5162_v0, %v11976_v58  ;;  %5862 = vmatprep.mubr.bf16.mxu1 %v14107_v4  ;;  %6055 = vmatprep.mubr.bf16.mxu0 %v14108_v29 }
 0x47d   : > { %v5164_v13 = vpop.f32.mrf.mxu1  ;;  %v5357_v36 = vpop.f32.mrf.mxu0 }
 0x47e   : > { %v12418_v53 = vadd.f32 %v5355_v37, %v5163_v42  ;;  %v5165_v11 = vadd.f32 %v5164_v13, %v11979_v10  ;;  %v8866_v10 = vld [vmem:[%s13608_s9 + $0x64] ss:$8 sps:$4 sm:$0xff]   ;;  %v14109_v13 = vld [vmem:[#allocation80_spill] sm:$0xff] }
 0x47f   : > { %v5166_v12 = vpop.f32.mrf.mxu1  ;;  %v5359_v0 = vpop.f32.mrf.mxu0 }
 0x480   : > { %v12421_v41 = vadd.f32 %v5357_v36, %v5165_v11  ;;  %v5167_v58 = vadd.f32 %v5166_v12, %v11984_v7  ;;  %v8876_v7 = vld [vmem:[%s13608_s9 + $0x170] ss:$8 sps:$4 sm:$0xff]  }
 0x481   : > { %v5168_v43 = vpop.f32.mrf.mxu1  ;;  %v5361_v42 = vpop.f32.mrf.mxu0 }
 0x482   : > { %v12427_v4 = vadd.f32 %v5359_v0, %v5167_v58  ;;  %v5169_v29 = vadd.f32 %v5168_v43, %v11992_v17  ;;  %v14110_v58 = vld [vmem:[#allocation81_spill] sm:$0xff]  ;;  %v14111_v0 = vld [vmem:[#allocation82_spill] sm:$0xff] }
 0x483   : > { %v5172_v37 = vpop.f32.mrf.mxu1  ;;  %5863 = vmatmul.mubr.bf16.vlgmr.msra.gmra.mxu1 %v14109_v13  ;;  %v5365_v17 = vpop.f32.mrf.mxu0  ;;  %6056 = vmatmul.mubr.bf16.vlgmr.msra.gmra.mxu0 %v14110_v58  ;;  %v8887_v43 = vld [vmem:[%s13608_s9 + $0x164] ss:$8 sps:$4 sm:$0xff]  }
 0x484   : > { %v12439_v36 = vadd.f32 %v5361_v42, %v5169_v29  ;;  %v5173_v12 = vadd.f32 %v5172_v37, %v12002_v2  ;;  %5872 = vmatprep.mubr.bf16.mxu1 %v14111_v0  ;;  %v14112_v13 = vld [vmem:[#allocation83_spill] sm:$0xff]  ;;  %6847 = vmatpush1.bf16.msra.mxu1 %v8861_v23  ;;  %v8869_v0 = vld [vmem:[%s13608_s9 + $0x54] ss:$8 sps:$4 sm:$0xff]  }
 0x485   : > { %6065 = vmatprep.mubr.bf16.mxu0 %v14112_v13  ;;  %v5174_v34 = vpop.f32.mrf.mxu1  ;;  %v8864_v29 = vld [vmem:[%s13608_s9 + $0x60] ss:$8 sps:$4 sm:$0xff]   ;;  %v5367_v58 = vpop.f32.mrf.mxu0  ;;  %6848 = vmatprep.subr.bf16.mxu1 %v8866_v10 }
 0x486   : > { %v12453_v42 = vadd.f32 %v5365_v17, %v5173_v12  ;;  %v5175_v37 = vadd.f32 %v5174_v34, %v12012_v32  ;;  %7040 = vmatpush1.bf16.msra.mxu0 %v8876_v7  ;;  %v8885_v23 = vld [vmem:[%s13608_s9 + $0x160] ss:$8 sps:$4 sm:$0xff]   ;;  %v8867_v32 = vld [vmem:[%s13608_s9 + $0x50] ss:$8 sps:$4 sm:$0xff]  }
 0x487   : > { %v5176_v13 = vpop.f32.mrf.mxu1  ;;  %v5369_v12 = vpop.f32.mrf.mxu0  ;;  %7041 = vmatprep.subr.bf16.mxu0 %v8887_v43  ;;  %v8896_v43 = vld [vmem:[%s13608_s9 + $0x154] ss:$8 sps:$4 sm:$0xff]  }
 0x488   : > { %14113 = vst [vmem:[#allocation54_spill] sm:$0xff] %v12453_v42  ;;  %v12462_v11 = vadd.f32 %v5367_v58, %v5175_v37  ;;  %v5177_v2 = vadd.f32 %v5176_v13, %v12017_v21  ;;  %6849 = vmatpush1.bf16.msra.mxu1 %v8864_v29  ;;  %v8872_v37 = vld [vmem:[%s13608_s9 + $0x44] ss:$8 sps:$4 sm:$0xff]   ;;  %v14114_v21 = vld [vmem:[#allocation84_spill] sm:$0xff]  ;;  %v14115_v13 = vld [vmem:[#allocation85_spill] sm:$0xff] }
 0x489   : > { %v5178_v17 = vpop.f32.mrf.mxu1  ;;  %v5371_v7 = vpop.f32.mrf.mxu0  ;;  %6850 = vmatprep.subr.bf16.mxu1 %v8869_v0 }
 0x48a   : > { %v12468_v34 = vadd.f32 %v5369_v12, %v5177_v2  ;;  %v5179_v10 = vadd.f32 %v5178_v17, %v12028_v45  ;;  %7042 = vmatpush1.bf16.msra.mxu0 %v8885_v23  ;;  %v14116_v12 = vld [vmem:[#allocation86_spill] sm:$0xff]  ;;  %v8894_v23 = vld [vmem:[%s13608_s9 + $0x150] ss:$8 sps:$4 sm:$0xff]   ;;  %v14117_v17 = vld [vmem:[#allocation87_spill] sm:$0xff] }
 0x48b   : > { %v5182_v58 = vpop.f32.mrf.mxu1  ;;  %5873 = vmatmul.mubr.bf16.gmra.mxu1 %v14114_v21  ;;  %v5375_v0 = vpop.f32.mrf.mxu0  ;;  %6066 = vmatmul.mubr.bf16.gmra.mxu0 %v14115_v13 }
 0x48c   : > { %v12480_v2 = vadd.f32 %v5371_v7, %v5179_v10  ;;  %v5183_v45 = vadd.f32 %v5182_v58, %v12036_v5  ;;  %5882 = vmatprep.mubr.bf16.mxu1 %v14116_v12  ;;  %6075 = vmatprep.mubr.bf16.mxu0 %v14117_v17  ;;  %v8870_v10 = vld [vmem:[%s13608_s9 + $0x40] ss:$8 sps:$4 sm:$0xff]   ;;  %v8905_v5 = vld [vmem:[%s13608_s9 + $0x144] ss:$8 sps:$4 sm:$0xff]  }
 0x48d   : > { %v5184_v21 = vpop.f32.mrf.mxu1  ;;  %6851 = vmatpush1.bf16.msra.mxu1 %v8867_v32  ;;  %v5377_v12 = vpop.f32.mrf.mxu0  ;;  %v8875_v32 = vld [vmem:[%s13608_s9 + $0x34] ss:$8 sps:$4 sm:$0xff]   ;;  %7043 = vmatprep.subr.bf16.mxu0 %v8896_v43  ;;  %v8881_v43 = vld [vmem:[%s13608_s9 + $0x24] ss:$8 sps:$4 sm:$0xff]  }
 0x48e   : > { %v12497_v58 = vadd.f32 %v5375_v0, %v5183_v45  ;;  %v5185_v13 = vadd.f32 %v5184_v21, %v12048_v14  ;;  %6852 = vmatprep.subr.bf16.mxu1 %v8872_v37  ;;  %7044 = vmatpush1.bf16.msra.mxu0 %v8894_v23  ;;  %v8873_v14 = vld [vmem:[%s13608_s9 + $0x30] ss:$8 sps:$4 sm:$0xff]   ;;  %v8903_v23 = vld [vmem:[%s13608_s9 + $0x140] ss:$8 sps:$4 sm:$0xff]  }
 0x48f   : > { %v5186_v17 = vpop.f32.mrf.mxu1  ;;  %v5379_v35 = vpop.f32.mrf.mxu0  ;;  %7045 = vmatprep.subr.bf16.mxu0 %v8905_v5  ;;  %v14118_v21 = vld [vmem:[#allocation89_spill] sm:$0xff] }
 0x490   : > { %v12503_v29 = vadd.f32 %v5377_v12, %v5185_v13  ;;  %v5187_v16 = vadd.f32 %v5186_v17, %v12053_v48  ;;  %v14120_v5 = vld [vmem:[#allocation69_spill] sm:$0xff]  ;;  %v14121_v12 = vld [vmem:[#allocation72_spill] sm:$0xff]  ;;  %v8879_v17 = vld [vmem:[%s13608_s9 + $0x20] ss:$8 sps:$4 sm:$0xff]  }
 0x491   : > { %v5188_v42 = vpop.f32.mrf.mxu1  ;;  %6853 = vmatpush1.bf16.msra.mxu1 %v8870_v10  ;;  %v5381_v0 = vpop.f32.mrf.mxu0  ;;  %v8914_v13 = vld [vmem:[%s13608_s9 + $0x134] ss:$8 sps:$4 sm:$0xff]  }
 0x492   : > { %v12509_v37 = vadd.f32 %v5379_v35, %v5187_v16  ;;  %v5189_v45 = vadd.f32 %v5188_v42, %v12064_v51  ;;  %6854 = vmatprep.subr.bf16.mxu1 %v8875_v32  ;;  %v14119_v42 = vld [vmem:[#allocation90_spill] sm:$0xff]  ;;  %7046 = vmatpush1.bf16.msra.mxu0 %v8903_v23 }
 0x493   : > { %v5192_v48 = vpop.f32.mrf.mxu1  ;;  %5883 = vmatmul.mubr.bf16.gmra.mxu1 %v14118_v21  ;;  %v5385_v16 = vpop.f32.mrf.mxu0  ;;  %6076 = vmatmul.mubr.bf16.gmra.mxu0 %v14119_v42  ;;  %v8884_v21 = vld [vmem:[%s13608_s9 + $0x14] ss:$8 sps:$4 sm:$0xff]  }
 0x494   : > { %v12521_v35 = vadd.f32 %v5381_v0, %v5189_v45  ;;  %v5193_v51 = vadd.f32 %v5192_v48, %v12072_v18  ;;  %5892 = vmatprep.mubr.bf16.mxu1 %v14120_v5  ;;  %6085 = vmatprep.mubr.bf16.mxu0 %v14121_v12 }
 0x495   : > { %v5194_v32 = vpop.f32.mrf.mxu1  ;;  %6855 = vmatpush1.bf16.msra.mxu1 %v8873_v14  ;;  %v5387_v48 = vpop.f32.mrf.mxu0  ;;  %v8912_v14 = vld [vmem:[%s13608_s9 + $0x130] ss:$8 sps:$4 sm:$0xff]   ;;  %7047 = vmatprep.subr.bf16.mxu0 %v8914_v13  ;;  %v8923_v13 = vld [vmem:[%s13608_s9 + $0x124] ss:$8 sps:$4 sm:$0xff]  }
 0x496   : > { %v12535_v45 = vadd.f32 %v5385_v16, %v5193_v51  ;;  %v5195_v0 = vadd.f32 %v5194_v32, %v12084_v49  ;;  %6856 = vmatprep.subr.bf16.mxu1 %v8881_v43  ;;  %v8882_v49 = vld [vmem:[%s13608_s9 + $0x10] ss:$8 sps:$4 sm:$0xff]   ;;  %7048 = vmatpush1.bf16.msra.mxu0 %v8912_v14  ;;  %v8921_v14 = vld [vmem:[%s13608_s9 + $0x120] ss:$8 sps:$4 sm:$0xff]  }
 0x497   : > { %v5196_v42 = vpop.f32.mrf.mxu1  ;;  %v5389_v51 = vpop.f32.mrf.mxu0  ;;  %7049 = vmatprep.subr.bf16.mxu0 %v8923_v13  ;;  %v8899_v13 = vld [vmem:[%s13608_s9 + $0xe4] ss:$8 sps:$4 sm:$0xff]  }
 0x498   : > { %14122 = vst [vmem:[#allocation55_spill] sm:$0xff] %v12535_v45  ;;  %v12544_v5 = vadd.f32 %v5387_v48, %v5195_v0  ;;  %v5197_v12 = vadd.f32 %v5196_v42, %v12089_v28  ;;  %v8890_v0 = vld [vmem:[%s13608_s9 + $0x4] ss:$8 sps:$4 sm:$0xff]   ;;  %v14124_v28 = vld [vmem:[#allocation93_spill] sm:$0xff] }
 0x499   : > { %v5198_v16 = vpop.f32.mrf.mxu1  ;;  %6857 = vmatpush1.bf16.msra.mxu1 %v8879_v17  ;;  %v5391_v32 = vpop.f32.mrf.mxu0 }
 0x49a   : > { %v12550_v43 = vadd.f32 %v5389_v51, %v5197_v12  ;;  %v5199_v23 = vadd.f32 %v5198_v16, %v12100_v6  ;;  %6858 = vmatprep.subr.bf16.mxu1 %v8884_v21  ;;  %v14125_v12 = vld [vmem:[#allocation64_spill] sm:$0xff]  ;;  %v14127_v16 = vld [vmem:[#allocation65_spill] sm:$0xff]  ;;  %7050 = vmatpush1.bf16.msra.mxu0 %v8921_v14 }
 0x49b   : > { %v5202_v48 = vpop.f32.mrf.mxu1  ;;  %5893 = vmatmul.mubr.bf16.gmra.mxu1 %v14124_v28  ;;  %v5395_v21 = vpop.f32.mrf.mxu0  ;;  %6086 = vmatmul.mubr.bf16.gmra.mxu0 %v14125_v12  ;;  %v14126_v51 = vld [vmem:[#allocation32_spill] sm:$0xff] }
 0x49c   : > { %14123 = vst [vmem:[#allocation6_spill] sm:$0xff] %v12550_v43  ;;  %v12562_v42 = vadd.f32 %v5391_v32, %v5199_v23  ;;  %v5203_v6 = vadd.f32 %v5202_v48, %v12108_v60  ;;  %5902 = vmatprep.mubr.bf16.mxu1 %v14126_v51  ;;  %6095 = vmatprep.mubr.bf16.mxu0 %v14127_v16  ;;  %v8888_v23 = vld [vmem:[%s13608_s9] ss:$8 sps:$4 sm:$0xff]   ;;  %v8929_v60 = vld [vmem:[%s13608_s9 + $0x114] ss:$8 sps:$4 sm:$0xff]  }
 0x49d   : > { %v5204_v28 = vpop.f32.mrf.mxu1  ;;  %6859 = vmatpush1.bf16.msra.mxu1 %v8882_v49  ;;  %v5397_v51 = vpop.f32.mrf.mxu0  ;;  %v8893_v49 = vld [vmem:[%s13608_s9 + $0xf4] ss:$8 sps:$4 sm:$0xff]   ;;  %7051 = vmatprep.subr.bf16.mxu0 %v8929_v60  ;;  %v8927_v14 = vld [vmem:[%s13608_s9 + $0x110] ss:$8 sps:$4 sm:$0xff]   ;;  %v14134_v60 = vld [vmem:[#allocation94_spill] sm:$0xff] }
 0x49e   : > { %v12579_v48 = vadd.f32 %v5395_v21, %v5203_v6  ;;  %v5205_v12 = vadd.f32 %v5204_v28, %v12120_v38  ;;  %6860 = vmatprep.subr.bf16.mxu1 %v8890_v0  ;;  %v8891_v38 = vld [vmem:[%s13608_s9 + $0xf0] ss:$8 sps:$4 sm:$0xff]   ;;  %v14131_v28 = vld [vmem:[#allocation70_spill] sm:$0xff]  ;;  %7052 = vmatpush1.bf16.msra.mxu0 %v8927_v14 }
 0x49f   : > { %v5206_v16 = vpop.f32.mrf.mxu1  ;;  %v5399_v18 = vpop.f32.mrf.mxu0  ;;  %v14140_v32 = vld [vmem:[#allocation40_spill] sm:$0xff] }
 0x4a0   : > { %14128 = vst [vmem:[#allocation7_spill] sm:$0xff] %v12579_v48  ;;  %v12585_v17 = vadd.f32 %v5397_v51, %v5205_v12  ;;  %v5207_v10 = vadd.f32 %v5206_v16, %v12125_v44  ;;  %v14135_v12 = vld [vmem:[#allocation95_spill] sm:$0xff] }
 0x4a1   : > { %v5208_v7 = vpop.f32.mrf.mxu1  ;;  %6861 = vmatpush1.bf16.msra.mxu1 %v8888_v23  ;;  %v5401_v21 = vpop.f32.mrf.mxu0  ;;  %v8932_v51 = vld [vmem:[%s13608_s9 + $0x104] ss:$8 sps:$4 sm:$0xff]  }
 0x4a2   : > { %14129 = vst [vmem:[#allocation8_spill] sm:$0xff] %v12585_v17  ;;  %v12591_v0 = vadd.f32 %v5399_v18, %v5207_v10  ;;  %v5209_v6 = vadd.f32 %v5208_v7, %v12136_v25  ;;  %6862 = vmatprep.subr.bf16.mxu1 %v8893_v49  ;;  %v14133_v18 = vld [vmem:[#allocation38_spill] sm:$0xff]  ;;  %v14136_v49 = vld [vmem:[#allocation96_spill] sm:$0xff]  ;;  %7053 = vmatprep.subr.bf16.mxu0 %v8932_v51 }
 0x4a3   : > { %v5212_v44 = vpop.f32.mrf.mxu1  ;;  %5903 = vmatmul.mubr.bf16.gmra.mxu1 %v14131_v28  ;;  %v5405_v7 = vpop.f32.mrf.mxu0  ;;  %6096 = vmatmul.mubr.bf16.gmra.mxu0 %v14134_v60  ;;  %v14138_v28 = vld [vmem:[#allocation39_spill] sm:$0xff]  ;;  %v8935_v51 = vld [vmem:[%s13608_s9 + $0x1f4] ss:$8 sps:$4 sm:$0xff]  }
 0x4a4   : > { %14130 = vst [vmem:[#allocation14_spill] sm:$0xff] %v12591_v0  ;;  %v12603_v10 = vadd.f32 %v5401_v21, %v5209_v6  ;;  %v5213_v25 = vadd.f32 %v5212_v44, %v14133_v18  ;;  %5912 = vmatprep.mubr.bf16.mxu1 %v14135_v12  ;;  %6105 = vmatprep.mubr.bf16.mxu0 %v14136_v49  ;;  %v8897_v6 = vld [vmem:[%s13608_s9 + $0xe0] ss:$8 sps:$4 sm:$0xff]   ;;  %v8902_v12 = vld [vmem:[%s13608_s9 + $0xd4] ss:$8 sps:$4 sm:$0xff]  }
 0x4a5   : > { %v5214_v16 = vpop.f32.mrf.mxu1  ;;  %6863 = vmatpush2.bf16.msra.mxu1 %v8891_v38  ;;  %v5407_v60 = vpop.f32.mrf.mxu0  ;;  %v8930_v38 = vld [vmem:[%s13608_s9 + $0x100] ss:$8 sps:$4 sm:$0xff]  }
 0x4a6   : > { %14132 = vst [vmem:[#allocation10_spill] sm:$0xff] %v12603_v10  ;;  %v12617_v44 = vadd.f32 %v5405_v7, %v5213_v25  ;;  %v5215_v18 = vadd.f32 %v5214_v16, %v14138_v28  ;;  %6864 = vmatprep.subr.bf16.mxu1 %v8899_v13  ;;  %v8900_v13 = vld [vmem:[%s13608_s9 + $0xd0] ss:$8 sps:$4 sm:$0xff]   ;;  %7054 = vmatpush1.bf16.msra.mxu0 %v8930_v38 }
 0x4a7   : > { %v5216_v49 = vpop.f32.mrf.mxu1  ;;  %v5409_v25 = vpop.f32.mrf.mxu0  ;;  %v14142_v28 = vld [vmem:[#allocation41_spill] sm:$0xff]  ;;  %7055 = vmatprep.subr.bf16.mxu0 %v8935_v51  ;;  %v8917_v51 = vld [vmem:[%s13608_s9 + $0xa4] ss:$8 sps:$4 sm:$0xff]  }
 0x4a8   : > { %14137 = vst [vmem:[#allocation15_spill] sm:$0xff] %v12617_v44  ;;  %v12626_v23 = vadd.f32 %v5407_v60, %v5215_v18  ;;  %v5217_v21 = vadd.f32 %v5216_v49, %v14140_v32  ;;  %v8908_v18 = vld [vmem:[%s13608_s9 + $0xc4] ss:$8 sps:$4 sm:$0xff]   ;;  %v14143_v32 = vld [vmem:[#allocation97_spill] sm:$0xff] }
 0x4a9   : > { %v5218_v7 = vpop.f32.mrf.mxu1  ;;  %6865 = vmatpush2.bf16.msra.mxu1 %v8897_v6  ;;  %v5411_v48 = vpop.f32.mrf.mxu0  ;;  %v14145_v49 = vld [vmem:[#allocation42_spill] sm:$0xff]  ;;  %v8933_v38 = vld [vmem:[%s13608_s9 + $0x1f0] ss:$8 sps:$4 sm:$0xff]  }
 0x4aa   : > { %14139 = vst [vmem:[#allocation11_spill] sm:$0xff] %v12626_v23  ;;  %v12632_v16 = vadd.f32 %v5409_v25, %v5217_v21  ;;  %v5219_v14 = vadd.f32 %v5218_v7, %v14142_v28  ;;  %6866 = vmatprep.subr.bf16.mxu1 %v8902_v12  ;;  %v14146_v7 = vld [vmem:[#allocation98_spill] sm:$0xff]  ;;  %v14147_v28 = vld [vmem:[#allocation99_spill] sm:$0xff]  ;;  %7056 = vmatpush2.bf16.msra.mxu0 %v8933_v38 }
 0x4ab   : > { %v5222_v60 = vpop.f32.mrf.mxu1  ;;  %5913 = vmatmul.mubr.bf16.gmra.mxu1 %v14143_v32  ;;  %v5415_v12 = vpop.f32.mrf.mxu0  ;;  %6106 = vmatmul.mubr.bf16.gmra.mxu0 %v14146_v7  ;;  %v14148_v32 = vld [vmem:[#allocation102_spill] sm:$0xff]  ;;  %v14150_v7 = vld [vmem:[#allocation43_spill] sm:$0xff] }
 0x4ac   : > { %14141 = vst [vmem:[#allocation18_spill] sm:$0xff] %v12632_v16  ;;  %v12644_v21 = vadd.f32 %v5411_v48, %v5219_v14  ;;  %v5223_v25 = vadd.f32 %v5222_v60, %v14145_v49  ;;  %5922 = vmatprep.mubr.bf16.mxu1 %v14147_v28  ;;  %6115 = vmatprep.mubr.bf16.mxu0 %v14148_v32  ;;  %v8906_v48 = vld [vmem:[%s13608_s9 + $0xc0] ss:$8 sps:$4 sm:$0xff]   ;;  %v8938_v14 = vld [vmem:[%s13608_s9 + $0x1e4] ss:$8 sps:$4 sm:$0xff]   ;;  %v14152_v16 = vld [vmem:[#allocation44_spill] sm:$0xff] }
 0x4ad   : > { %v5224_v0 = vpop.f32.mrf.mxu1  ;;  %6867 = vmatpush2.bf16.msra.mxu1 %v8900_v13  ;;  %v5417_v6 = vpop.f32.mrf.mxu0  ;;  %v8911_v13 = vld [vmem:[%s13608_s9 + $0xb4] ss:$8 sps:$4 sm:$0xff]   ;;  %7057 = vmatprep.subr.bf16.mxu0 %v8938_v14  ;;  %v8936_v38 = vld [vmem:[%s13608_s9 + $0x1e0] ss:$8 sps:$4 sm:$0xff]  }
 0x4ae   : > { %14144 = vst [vmem:[#allocation9_spill] sm:$0xff] %v12644_v21  ;;  %v12661_v49 = vadd.f32 %v5415_v12, %v5223_v25  ;;  %v5225_v28 = vadd.f32 %v5224_v0, %v14150_v7  ;;  %6868 = vmatprep.subr.bf16.mxu1 %v8908_v18  ;;  %v8909_v0 = vld [vmem:[%s13608_s9 + $0xb0] ss:$8 sps:$4 sm:$0xff]   ;;  %7058 = vmatpush2.bf16.msra.mxu0 %v8936_v38 }
 0x4af   : > { %v5226_v32 = vpop.f32.mrf.mxu1  ;;  %v5419_v10 = vpop.f32.mrf.mxu0  ;;  %v14154_v25 = vld [vmem:[#allocation45_spill] sm:$0xff] }
 0x4b0   : > { %14149 = vst [vmem:[#allocation12_spill] sm:$0xff] %v12661_v49  ;;  %v12667_v44 = vadd.f32 %v5417_v6, %v5225_v28  ;;  %v5227_v17 = vadd.f32 %v5226_v32, %v14152_v16  ;;  %v14155_v6 = vld [vmem:[#allocation103_spill] sm:$0xff]  ;;  %v14158_v28 = vld [vmem:[#allocation104_spill] sm:$0xff] }
 0x4b1   : > { %v5228_v45 = vpop.f32.mrf.mxu1  ;;  %6869 = vmatpush2.bf16.msra.mxu1 %v8906_v48  ;;  %v5421_v7 = vpop.f32.mrf.mxu0  ;;  %v8941_v32 = vld [vmem:[%s13608_s9 + $0x1d4] ss:$8 sps:$4 sm:$0xff]  }
 0x4b2   : > { %14151 = vst [vmem:[#allocation20_spill] sm:$0xff] %v12667_v44  ;;  %v12673_v18 = vadd.f32 %v5419_v10, %v5227_v17  ;;  %v5229_v12 = vadd.f32 %v5228_v45, %v14154_v25  ;;  %6870 = vmatprep.subr.bf16.mxu1 %v8911_v13  ;;  %v14157_v10 = vld [vmem:[#allocation46_spill] sm:$0xff]  ;;  %v14159_v13 = vld [vmem:[#allocation105_spill] sm:$0xff]  ;;  %v14164_v49 = vld [vmem:[#allocation48_spill] sm:$0xff]  ;;  %7059 = vmatprep.subr.bf16.mxu0 %v8941_v32 }
 0x4b3   : > { %v5232_v16 = vpop.f32.mrf.mxu1  ;;  %5923 = vmatmul.mubr.bf16.gmra.mxu1 %v14155_v6  ;;  %v5425_v14 = vpop.f32.mrf.mxu0  ;;  %6116 = vmatmul.mubr.bf16.gmra.mxu0 %v14158_v28  ;;  %v14160_v25 = vld [vmem:[#allocation106_spill] sm:$0xff]  ;;  %v8920_v48 = vld [vmem:[%s13608_s9 + $0x94] ss:$8 sps:$4 sm:$0xff]  }
 0x4b4   : > { %14153 = vst [vmem:[#allocation13_spill] sm:$0xff] %v12673_v18  ;;  %v12685_v17 = vadd.f32 %v5421_v7, %v5229_v12  ;;  %v5233_v45 = vadd.f32 %v5232_v16, %v14157_v10  ;;  %5932 = vmatprep.mubr.bf16.mxu1 %v14159_v13  ;;  %6125 = vmatprep.mubr.bf16.mxu0 %v14160_v25  ;;  %v8915_v12 = vld [vmem:[%s13608_s9 + $0xa0] ss:$8 sps:$4 sm:$0xff]   ;;  %v8944_v32 = vld [vmem:[%s13608_s9 + $0x1c4] ss:$8 sps:$4 sm:$0xff]  }
 0x4b5   : > { %v5234_v6 = vpop.f32.mrf.mxu1  ;;  %6871 = vmatpush2.bf16.msra.mxu1 %v8909_v0  ;;  %v14162_v10 = vld [vmem:[#allocation47_spill] sm:$0xff]  ;;  %v5427_v13 = vpop.f32.mrf.mxu0  ;;  %v8939_v0 = vld [vmem:[%s13608_s9 + $0x1d0] ss:$8 sps:$4 sm:$0xff]  }
 0x4b6   : > { %14156 = vst [vmem:[#allocation21_spill] sm:$0xff] %v12685_v17  ;;  %v12699_v16 = vadd.f32 %v5425_v14, %v5233_v45  ;;  %v5235_v28 = vadd.f32 %v5234_v6, %v14162_v10  ;;  %6872 = vmatprep.subr.bf16.mxu1 %v8917_v51  ;;  %v8918_v51 = vld [vmem:[%s13608_s9 + $0x90] ss:$8 sps:$4 sm:$0xff]   ;;  %7060 = vmatpush2.bf16.msra.mxu0 %v8939_v0  ;;  %v8942_v0 = vld [vmem:[%s13608_s9 + $0x1c0] ss:$8 sps:$4 sm:$0xff]  }
 0x4b7   : > { %v5236_v25 = vpop.f32.mrf.mxu1  ;;  %v5429_v45 = vpop.f32.mrf.mxu0  ;;  %v14166_v10 = vld [vmem:[#allocation49_spill] sm:$0xff]  ;;  %7061 = vmatprep.subr.bf16.mxu0 %v8944_v32  ;;  %v8950_v32 = vld [vmem:[%s13608_s9 + $0x1a4] ss:$8 sps:$4 sm:$0xff]  }
 0x4b8   : > { %14161 = vst [vmem:[#allocation24_spill] sm:$0xff] %v12699_v16  ;;  %v12708_v60 = vadd.f32 %v5427_v13, %v5235_v28  ;;  %v5237_v7 = vadd.f32 %v5236_v25, %v14164_v49  ;;  %v8926_v28 = vld [vmem:[%s13608_s9 + $0x84] ss:$8 sps:$4 sm:$0xff]   ;;  %v14176_v16 = vld [vmem:[#allocation52_spill] sm:$0xff] }
 0x4b9   : > { %v5238_v14 = vpop.f32.mrf.mxu1  ;;  %6873 = vmatpush2.bf16.msra.mxu1 %v8915_v12  ;;  %v5431_v18 = vpop.f32.mrf.mxu0  ;;  %v14167_v49 = vld [vmem:[#allocation107_spill] sm:$0xff]  ;;  %v14169_v25 = vld [vmem:[#allocation50_spill] sm:$0xff] }
 0x4ba   : > { %14163 = vst [vmem:[#allocation23_spill] sm:$0xff] %v12708_v60  ;;  %v12714_v6 = vadd.f32 %v5429_v45, %v5237_v7  ;;  %v5239_v38 = vadd.f32 %v5238_v14, %v14166_v10  ;;  %6874 = vmatprep.subr.bf16.mxu1 %v8920_v48  ;;  %v14170_v14 = vld [vmem:[#allocation108_spill] sm:$0xff]  ;;  %v14171_v10 = vld [vmem:[#allocation109_spill] sm:$0xff]  ;;  %7062 = vmatpush2.bf16.msra.mxu0 %v8942_v0 }
 0x4bb   : > { %v5242_v13 = vpop.f32.mrf.mxu1  ;;  %5933 = vmatmul.mubr.bf16.gmra.mxu1 %v14167_v49  ;;  %v5435_v48 = vpop.f32.mrf.mxu0  ;;  %6126 = vmatmul.mubr.bf16.gmra.mxu0 %v14170_v14  ;;  %v14172_v49 = vld [vmem:[#allocation111_spill] sm:$0xff] }
 0x4bc   : > { %14165 = vst [vmem:[#allocation19_spill] sm:$0xff] %v12714_v6  ;;  %v12726_v7 = vadd.f32 %v5431_v18, %v5239_v38  ;;  %v5243_v45 = vadd.f32 %v5242_v13, %v14169_v25  ;;  %5942 = vmatprep.mubr.bf16.mxu1 %v14171_v10  ;;  %6135 = vmatprep.mubr.bf16.mxu0 %v14172_v49  ;;  %v8924_v18 = vld [vmem:[%s13608_s9 + $0x80] ss:$8 sps:$4 sm:$0xff]   ;;  %v8947_v38 = vld [vmem:[%s13608_s9 + $0x1b4] ss:$8 sps:$4 sm:$0xff]  }
 0x4bd   : > { %v5244_v44 = vpop.f32.mrf.mxu1  ;;  %6875 = vmatpush2.bf16.msra.mxu1 %v8918_v51  ;;  %v14174_v14 = vld [vmem:[#allocation51_spill] sm:$0xff]  ;;  %v5437_v12 = vpop.f32.mrf.mxu0  ;;  %v8945_v13 = vld [vmem:[%s13608_s9 + $0x1b0] ss:$8 sps:$4 sm:$0xff]   ;;  %7063 = vmatprep.subr.bf16.mxu0 %v8947_v38 }
 0x4be   : > { %14168 = vst [vmem:[#allocation28_spill] sm:$0xff] %v12726_v7  ;;  %v12743_v25 = vadd.f32 %v5435_v48, %v5243_v45  ;;  %v5245_v10 = vadd.f32 %v5244_v44, %v14174_v14  ;;  %6876 = vmatprep.subr.bf16.mxu1 %v8926_v28  ;;  %v14178_v44 = vld [vmem:[#allocation53_spill] sm:$0xff]  ;;  %7064 = vmatpush2.bf16.msra.mxu0 %v8945_v13  ;;  %v14196_v7 = vld [vmem:[#allocation119_spill] sm:$0xff] }
 0x4bf   : > { %v5246_v49 = vpop.f32.mrf.mxu1  ;;  %v5439_v17 = vpop.f32.mrf.mxu0  ;;  %7065 = vmatprep.subr.bf16.mxu0 %v8950_v32 }
 0x4c0   : > { %14173 = vst [vmem:[#allocation33_spill] sm:$0xff] %v12743_v25  ;;  %v12746_v51 = vadd.f32 %v5437_v12, %v5245_v10  ;;  %v5247_v6 = vadd.f32 %v5246_v49, %v14176_v16  ;;  %v14179_v16 = vld [vmem:[#allocation113_spill] sm:$0xff]  ;;  %v14181_v10 = vld [vmem:[#allocation88_spill] sm:$0xff]  ;;  %v8948_v49 = vld [vmem:[%s13608_s9 + $0x1a0] ss:$8 sps:$4 sm:$0xff]  }
 0x4c1   : > { %v5248_v23 = vpop.f32.mrf.mxu1  ;;  %6877 = vmatpush2.bf16.msra.mxu1 %v8924_v18  ;;  %v5441_v28 = vpop.f32.mrf.mxu0 }
 0x4c2   : > { %14175 = vst [vmem:[#allocation29_spill] sm:$0xff] %v12746_v51  ;;  %v12752_v45 = vadd.f32 %v5439_v17, %v5247_v6  ;;  %v5249_v48 = vadd.f32 %v5248_v23, %v14178_v44  ;;  %v14182_v17 = vld [vmem:[#allocation114_spill] sm:$0xff]  ;;  %v14183_v23 = vld [vmem:[#allocation115_spill] sm:$0xff]  ;;  %7066 = vmatpush2.bf16.msra.mxu0 %v8948_v49  ;;  %v14184_v44 = vld [vmem:[#allocation116_spill] sm:$0xff] }
 0x4c3   : > { %v5478_v12 = vpop.f32.mrf.mxu1  ;;  %5943 = vmatmul.mubr.bf16.gmra.mxu1 %v14179_v16  ;;  %v5671_v14 = vpop.f32.mrf.mxu0  ;;  %6136 = vmatmul.mubr.bf16.gmra.mxu0 %v14181_v10 }
 0x4c4   : > { %14177 = vst [vmem:[#allocation34_spill] sm:$0xff] %v12752_v45  ;;  %v12761_v18 = vadd.f32 %v5441_v28, %v5249_v48  ;;  %5952 = vmatprep.mubr.bf16.mxu1 %v14182_v17  ;;  %v12765_v6 = vadd.f32 %v5671_v14, %v5478_v12  ;;  %6145 = vmatprep.mubr.bf16.mxu0 %v14183_v23  ;;  %v8953_v28 = vld [vmem:[%s13608_s9 + $0x194] ss:$8 sps:$4 sm:$0xff]   ;;  %v8951_v17 = vld [vmem:[%s13608_s9 + $0x190] ss:$8 sps:$4 sm:$0xff]  }
 0x4c5   : > { %v5480_v38 = vpop.f32.mrf.mxu1  ;;  %v5673_v48 = vpop.f32.mrf.mxu0  ;;  %7067 = vmatprep.subr.bf16.mxu0 %v8953_v28 }
 0x4c6   : > { %14180 = vst [vmem:[#allocation26_spill] sm:$0xff] %v12761_v18  ;;  %v12776_v16 = vadd.f32 %v5673_v48, %v5480_v38  ;;  %v14185_v38 = vld [vmem:[#allocation117_spill] sm:$0xff]  ;;  %7068 = vmatpush2.bf16.msra.mxu0 %v8951_v17  ;;  %v14194_v18 = vld [vmem:[#allocation118_spill] sm:$0xff] }
 0x4c7   : > { %v5482_v12 = vpop.f32.mrf.mxu1  ;;  %v5675_v14 = vpop.f32.mrf.mxu0  ;;  %v14186_v48 = vld [vmem:[#allocation61_spill] sm:$0xff] }
 0x4c8   : > { %v12778_v10 = vadd.f32 %v5675_v14, %v5482_v12  ;;  %v14188_v14 = vld [vmem:[#allocation91_spill] sm:$0xff] }
 0x4c9   : > { %v5484_v13 = vpop.f32.mrf.mxu1  ;;  %v5677_v23 = vpop.f32.mrf.mxu0 }
 0x4ca   : > { %v12783_v0 = vadd.f32 %v5677_v23, %v5484_v13  ;;  %v8956_v23 = vld [vmem:[%s13608_s9 + $0x184] ss:$8 sps:$4 sm:$0xff]  }
 0x4cb   : > { %v5488_v32 = vpop.f32.mrf.mxu1  ;;  %5953 = vmatmul.mubr.bf16.gmra.mxu1 %v14184_v44  ;;  %v5681_v25 = vpop.f32.mrf.mxu0  ;;  %6146 = vmatmul.mubr.bf16.gmra.mxu0 %v14185_v38  ;;  %v8954_v44 = vld [vmem:[%s13608_s9 + $0x180] ss:$8 sps:$4 sm:$0xff]  }
 0x4cc   : > { %5962 = vmatprep.mubr.bf16.mxu1 %v14186_v48  ;;  %v12788_v12 = vadd.f32 %v5681_v25, %v5488_v32  ;;  %6155 = vmatprep.mubr.bf16.mxu0 %v14188_v14 }
 0x4cd   : > { %v5490_v49 = vpop.f32.mrf.mxu1  ;;  %v5683_v45 = vpop.f32.mrf.mxu0  ;;  %7069 = vmatprep.subr.bf16.mxu0 %v8956_v23 }
 0x4ce   : > { %14187 = vst [vmem:[#allocation30_spill] sm:$0xff] %v12788_v12  ;;  %v12791_v51 = vadd.f32 %v5683_v45, %v5490_v49  ;;  %v14192_v45 = vld [vmem:[#allocation68_spill] sm:$0xff]  ;;  %7070 = vmatpush2.bf16.msra.mxu0 %v8954_v44 }
 0x4cf   : > { %v5492_v28 = vpop.f32.mrf.mxu1  ;;  %v5685_v13 = vpop.f32.mrf.mxu0  ;;  %v14193_v49 = vld [vmem:[#allocation92_spill] sm:$0xff] }
 0x4d0   : > { %14189 = vst [vmem:[#allocation27_spill] sm:$0xff] %v12791_v51  ;;  %v12799_v38 = vadd.f32 %v5685_v13, %v5492_v28  ;;  %v14220_v51 = vld [vmem:[#allocation128_spill] sm:$0xff] }
 0x4d1   : > { %v5494_v25 = vpop.f32.mrf.mxu1  ;;  %v5687_v32 = vpop.f32.mrf.mxu0 }
 0x4d2   : > { %14190 = vst [vmem:[#allocation31_spill] sm:$0xff] %v12799_v38  ;;  %v12801_v48 = vadd.f32 %v5687_v32, %v5494_v25  ;;  %v14200_v38 = vld [vmem:[#allocation120_spill] sm:$0xff] }
 0x4d3   : > { %v5498_v17 = vpop.f32.mrf.mxu1  ;;  %5963 = vmatmul.mubr.bf16.gmra.mxu1 %v14192_v45  ;;  %v5691_v14 = vpop.f32.mrf.mxu0  ;;  %6156 = vmatmul.mubr.bf16.gmra.mxu0 %v14193_v49 }
 0x4d4   : > { %14191 = vst [vmem:[#allocation35_spill] sm:$0xff] %v12801_v48  ;;  %5972 = vmatprep.mubr.bf16.mxu1 %v14194_v18  ;;  %v12806_v60 = vadd.f32 %v5691_v14, %v5498_v17  ;;  %6165 = vmatprep.mubr.bf16.mxu0 %v14196_v7  ;;  %v14201_v17 = vld [vmem:[#allocation121_spill] sm:$0xff]  ;;  %v14202_v7 = vld [vmem:[#allocation122_spill] sm:$0xff] }
 0x4d5   : > { %v5500_v28 = vpop.f32.mrf.mxu1  ;;  %v5693_v13 = vpop.f32.mrf.mxu0 }
 0x4d6   : > { %14195 = vst [vmem:[#allocation36_spill] sm:$0xff] %v12806_v60  ;;  %v12809_v21 = vadd.f32 %v5693_v13, %v5500_v28  ;;  %v14204_v28 = vld [vmem:[#allocation123_spill] sm:$0xff] }
 0x4d7   : > { %v5502_v23 = vpop.f32.mrf.mxu1  ;;  %v5695_v25 = vpop.f32.mrf.mxu0 }
 0x4d8   : > { %14197 = vst [vmem:[#allocation37_spill] sm:$0xff] %v12809_v21  ;;  %v12811_v32 = vadd.f32 %v5695_v25, %v5502_v23 }
 0x4d9   : > { %v5504_v45 = vpop.f32.mrf.mxu1  ;;  %v5697_v44 = vpop.f32.mrf.mxu0 }
 0x4da   : > { %14198 = vst [vmem:[#allocation56_spill] sm:$0xff] %v12811_v32  ;;  %v12813_v48 = vadd.f32 %v5697_v44, %v5504_v45 }
 0x4db   : > { %v5508_v49 = vpop.f32.mrf.mxu1  ;;  %5973 = vmatmul.mubr.bf16.gmra.mxu1 %v14200_v38  ;;  %v5701_v18 = vpop.f32.mrf.mxu0  ;;  %6166 = vmatmul.mubr.bf16.gmra.mxu0 %v14201_v17 }
 0x4dc   : > { %14199 = vst [vmem:[#allocation57_spill] sm:$0xff] %v12813_v48  ;;  %5982 = vmatprep.mubr.bf16.mxu1 %v14202_v7  ;;  %v12818_v14 = vadd.f32 %v5701_v18, %v5508_v49  ;;  %6175 = vmatprep.mubr.bf16.mxu0 %v14204_v28  ;;  %v14208_v18 = vld [vmem:[#allocation124_spill] sm:$0xff] }
 0x4dd   : > { %v5510_v13 = vpop.f32.mrf.mxu1  ;;  %v5703_v21 = vpop.f32.mrf.mxu0  ;;  %v14209_v28 = vld [vmem:[#allocation100_spill] sm:$0xff] }
 0x4de   : > { %14203 = vst [vmem:[#allocation58_spill] sm:$0xff] %v12818_v14  ;;  %v12822_v23 = vadd.f32 %v5703_v21, %v5510_v13  ;;  %v14210_v21 = vld [vmem:[#allocation101_spill] sm:$0xff]  ;;  %v12834_v13 = vld [vmem:[%s478_s23] sm:$0xf]  ;;  %s481_s23 = scalar_lea.vmem %s13612_s13, %s14358_s25 }
 0x4df   : > { %v5512_v25 = vpop.f32.mrf.mxu1  ;;  %v5705_v45 = vpop.f32.mrf.mxu0 }
 0x4e0   : > { %14205 = vst [vmem:[#allocation59_spill] sm:$0xff] %v12822_v23  ;;  %v12824_v44 = vadd.f32 %v5705_v45, %v5512_v25  ;;  %v14212_v45 = vld [vmem:[#allocation125_spill] sm:$0xff]  ;;  %v14213_v23 = vld [vmem:[#allocation3_spill] sm:$0xff] }
 0x4e1   : > { %v5514_v48 = vpop.f32.mrf.mxu1  ;;  %v5707_v38 = vpop.f32.mrf.mxu0  ;;  %v6289_v14 = vrot.slane %v12834_v13, %v14213_v23  ;;  %v14221_v23 = vld [vmem:[#allocation4_spill] sm:$0xff] }
 0x4e2   : > { %14206 = vst [vmem:[#allocation60_spill] sm:$0xff] %v12824_v44  ;;  %v12829_v17 = vadd.f32 %v5707_v38, %v5514_v48 }
 0x4e3   : > { %v5518_v49 = vpop.f32.mrf.mxu1  ;;  %5983 = vmatmul.mubr.bf16.gmra.mxu1 %v14208_v18  ;;  %v5711_v7 = vpop.f32.mrf.mxu0  ;;  %6176 = vmatmul.mubr.bf16.gmra.mxu0 %v14209_v28 }
 0x4e4   : > { %14207 = vst [vmem:[#allocation62_spill] sm:$0xff] %v12829_v17  ;;  %5992 = vmatprep.mubr.bf16.mxu1 %v14210_v21  ;;  %v12836_v25 = vadd.f32 %v5711_v7, %v5518_v49  ;;  %6185 = vmatprep.mubr.bf16.mxu0 %v14212_v45  ;;  %v6303_v21 = vpack.c.bf16 %v6289_v14, %v6289_v14  ;;  %v14218_v7 = vld [vmem:[#allocation126_spill] sm:$0xff] }
 0x4e5   : > { %v5520_v44 = vpop.f32.mrf.mxu1  ;;  %v5713_v48 = vpop.f32.mrf.mxu0 }
 0x4e6   : > { %14211 = vst [vmem:[#allocation63_spill] sm:$0xff] %v12836_v25  ;;  %v12841_v38 = vadd.f32 %v5713_v48, %v5520_v44  ;;  %v14219_v25 = vld [vmem:[#allocation127_spill] sm:$0xff]  ;;  %v6285_v44 = vrot.slane %v12834_v13, %v14221_v23 }
 0x4e7   : > { %v5522_v17 = vpop.f32.mrf.mxu1  ;;  %v5715_v18 = vpop.f32.mrf.mxu0 }
 0x4e8   : > { %14214 = vst [vmem:[#allocation66_spill] sm:$0xff] %v12841_v38  ;;  %v12843_v32 = vadd.f32 %v5715_v18, %v5522_v17  ;;  %v14222_v17 = vld [vmem:[#allocation129_spill] sm:$0xff] }
 0x4e9   : > { %v12845_v28 = vpop.f32.mrf.mxu1  ;;  %v12847_v60 = vpop.f32.mrf.mxu0 }
 0x4ea   : > { %14215 = vst [vmem:[#allocation67_spill] sm:$0xff] %v12843_v32  ;;  %14216 = vst [vmem:[#allocation71_spill] sm:$0xff] %v12845_v28  ;;  %v6314_v32 = vpack.i.b16 %v6303_v21, %v6303_v21  ;;  %v14228_v21 = vld [vmem:[#allocation131_spill] sm:$0xff] }
 0x4eb   : > { %14217 = vst [vmem:[#allocation73_spill] sm:$0xff] %v12847_v60  ;;  %v5528_v49 = vpop.f32.mrf.mxu1  ;;  %5993 = vmatmul.mubr.bf16.gmra.mxu1 %v14218_v7  ;;  %v5721_v45 = vpop.f32.mrf.mxu0  ;;  %6186 = vmatmul.mubr.bf16.gmra.mxu0 %v14219_v25  ;;  %v6302_v7 = vpack.c.bf16 %v6285_v44, %v6285_v44 }
 0x4ec   : > { %6002 = vmatprep.mubr.bf16.mxu1 %v14220_v51  ;;  %v12854_v48 = vadd.f32 %v5721_v45, %v5528_v49  ;;  %6195 = vmatprep.mubr.bf16.mxu0 %v14222_v17  ;;  %v12864_v51 = vrot.slane %v6314_v32, %v14221_v23  ;;  %v14227_v45 = vld [vmem:[#allocation130_spill] sm:$0xff]  ;;  %v14232_v32 = vpack.c.bf16 %v12287_v63, %v12278_v3  ;;  %v14237_v3 = vld [vmem:[#allocation132_spill] sm:$0xff] }
 0x4ed   : > { %v5530_v18 = vpop.f32.mrf.mxu1  ;;  %v5723_v14 = vpop.f32.mrf.mxu0 }
 0x4ee   : > { %v12857_v38 = vadd.f32 %v5723_v14, %v5530_v18  ;;  %v14229_v18 = vld [vmem:[#allocation110_spill] sm:$0xff]  ;;  %v6307_v14 = vpack.i.b16 %v6302_v7, %v6302_v7  ;;  %v6335_v44 = vadd.bf16 %v12864_v51, %v14232_v32  ;;  %v14238_v32 = vld [vmem:[#allocation133_spill] sm:$0xff] }
 0x4ef   : > { %v5532_v60 = vpop.f32.mrf.mxu1  ;;  %v5725_v28 = vpop.f32.mrf.mxu0 }
 0x4f0   : > { %14223 = vst [vmem:[#allocation25_spill] sm:$0xff] %v12857_v38  ;;  %v12859_v12 = vadd.f32 %v5725_v28, %v5532_v60  ;;  %v14231_v60 = vld [vmem:[#allocation112_spill] sm:$0xff] }
 0x4f1   : > { %v12861_v25 = vpop.f32.mrf.mxu1  ;;  %v12866_v43 = vpop.f32.mrf.mxu0 }
 0x4f2   : > { %14224 = vst [vmem:[#allocation16_spill] sm:$0xff] %v12859_v12  ;;  %14225 = vst [vmem:[#allocation74_spill] sm:$0xff] %v12861_v25 }
 0x4f3   : > { %14226 = vst [vmem:[#allocation75_spill] sm:$0xff] %v12866_v43  ;;  %v5538_v49 = vpop.f32.mrf.mxu1  ;;  %6003 = vmatmul.mubr.bf16.gmra.mxu1 %v14227_v45  ;;  %v5731_v17 = vpop.f32.mrf.mxu0  ;;  %6196 = vmatmul.mubr.bf16.gmra.mxu0 %v14228_v21  ;;  %v12881_v21 = vrot.slane %v6307_v14, %v14221_v23 }
 0x4f4   : > { %6012 = vmatprep.mubr.bf16.mxu1 %v14229_v18  ;;  %v12871_v38 = vadd.f32 %v5731_v17, %v5538_v49  ;;  %6205 = vmatprep.mubr.bf16.mxu0 %v14231_v60  ;;  %v14236_v17 = vmov 0  }
 0x4f5   : > { %v5540_v28 = vpop.f32.mrf.mxu1  ;;  %v5733_v12 = vpop.f32.mrf.mxu0  ;;  %v6399_v60 = vmax.bf16 %v14236_v17, %v6335_v44 }
 0x4f6   : > { %14230 = vst [vmem:[#allocation17_spill] sm:$0xff] %v12871_v38  ;;  %v12878_v43 = vadd.f32 %v5733_v12, %v5540_v28  ;;  %v14239_v12 = vpack.c.bf16 %v12281_v20, %v12275_v40 }
 0x4f7   : > { %v5542_v45 = vpop.f32.mrf.mxu1  ;;  %v5735_v25 = vpop.f32.mrf.mxu0 }
 0x4f8   : > { %14233 = vst [vmem:[#allocation22_spill] sm:$0xff] %v12878_v43  ;;  %v12883_v18 = vadd.f32 %v5735_v25, %v5542_v45  ;;  %v6334_v14 = vadd.bf16 %v12881_v21, %v14239_v12  ;;  %v14240_v45 = vpack.c.bf16 %v12307_v30, %v12298_v19  ;;  %v14242_v30 = vpack.c.bf16 %v12301_v46, %v12295_v52 }
 0x4f9   : > { %v12885_v7 = vpop.f32.mrf.mxu1  ;;  %v12887_v49 = vpop.f32.mrf.mxu0 }
 0x4fa   : > { %14234 = vst [vmem:[#allocation76_spill] sm:$0xff] %v12883_v18  ;;  %14235 = vst [vmem:[#allocation77_spill] sm:$0xff] %v12887_v49  ;;  %v6339_v44 = vadd.bf16 %v12864_v51, %v14240_v45 }
 0x4fb   : > { %v5548_v38 = vpop.f32.mrf.mxu1  ;;  %6013 = vmatmul.mubr.bf16.gmra.mxu1 %v14237_v3  ;;  %v5741_v63 = vpop.f32.mrf.mxu0  ;;  %6206 = vmatmul.mubr.bf16.gmra.mxu0 %v14238_v32 }
 0x4fc   : > { %6878 = vmatprep.mubr.bf16.mxu1 %v6399_v60  ;;  %v12896_v25 = vadd.f32 %v5741_v63, %v5548_v38  ;;  %v6398_v60 = vmax.bf16 %v14236_v17, %v6334_v14  ;;  %v6403_v38 = vmax.bf16 %v14236_v17, %v6339_v44 }
 0x4fd   : > { %v5550_v28 = vpop.f32.mrf.mxu1  ;;  %v5743_v18 = vpop.f32.mrf.mxu0 }
 0x4fe   : > { %v12902_v43 = vadd.f32 %v5743_v18, %v5550_v28  ;;  %v6338_v18 = vadd.bf16 %v12881_v21, %v14242_v30 }
 0x4ff   : > { %v5552_v3 = vpop.f32.mrf.mxu1  ;;  %v5745_v49 = vpop.f32.mrf.mxu0 }
 0x500   : > { %v12905_v32 = vadd.f32 %v5745_v49, %v5552_v3  ;;  %v14243_v49 = vpack.c.bf16 %v12330_v57, %v12321_v54  ;;  %v14245_v57 = vpack.c.bf16 %v12324_v22, %v12318_v50 }
 0x501   : > { %v12907_v20 = vpop.f32.mrf.mxu1  ;;  %v12909_v40 = vpop.f32.mrf.mxu0 }
 0x502   : > { %14241 = vst [vmem:[#allocation78_spill] sm:$0xff] %v12905_v32  ;;  %v6343_v28 = vadd.bf16 %v12864_v51, %v14243_v49  ;;  %v6342_v30 = vadd.bf16 %v12881_v21, %v14245_v57  ;;  %v14246_v49 = vpack.c.bf16 %v12350_v1, %v12341_v8  ;;  %v14248_v1 = vpack.c.bf16 %v12344_v31, %v12338_v59 }
 0x503   : > { %v5558_v63 = vpop.f32.mrf.mxu1  ;;  %6879 = vmatmul.mubr.bf16.vlgmr.msra.gmra.mxu1 %v6398_v60  ;;  %v5751_v19 = vpop.f32.mrf.mxu0 }
 0x504   : > { %6888 = vmatprep.mubr.bf16.mxu1 %v6403_v38  ;;  %v12916_v12 = vadd.f32 %v5751_v19, %v5558_v63  ;;  %v6402_v38 = vmax.bf16 %v14236_v17, %v6338_v18  ;;  %v6407_v63 = vmax.bf16 %v14236_v17, %v6343_v28  ;;  %v6346_v57 = vadd.bf16 %v12881_v21, %v14248_v1 }
 0x505   : > { %v5560_v14 = vpop.f32.mrf.mxu1  ;;  %v5753_v45 = vpop.f32.mrf.mxu0 }
 0x506   : > { %v12922_v3 = vadd.f32 %v5753_v45, %v5560_v14  ;;  %v6347_v45 = vadd.bf16 %v12864_v51, %v14246_v49  ;;  %v14249_v49 = vpack.c.bf16 %v12370_v24, %v12361_v15  ;;  %v14251_v24 = vpack.c.bf16 %v12364_v33, %v12358_v26 }
 0x507   : > { %v5562_v44 = vpop.f32.mrf.mxu1  ;;  %v5755_v60 = vpop.f32.mrf.mxu0 }
 0x508   : > { %v12925_v32 = vadd.f32 %v5755_v60, %v5562_v44  ;;  %v6350_v1 = vadd.bf16 %v12881_v21, %v14251_v24 }
 0x509   : > { %v12927_v52 = vpop.f32.mrf.mxu1  ;;  %v12929_v46 = vpop.f32.mrf.mxu0 }
 0x50a   : > { %14244 = vst [vmem:[#allocation79_spill] sm:$0xff] %v12925_v32 }
 0x50b   : > { %v5568_v19 = vpop.f32.mrf.mxu1  ;;  %6889 = vmatmul.mubr.bf16.gmra.mxu1 %v6402_v38  ;;  %v5761_v54 = vpop.f32.mrf.mxu0 }
 0x50c   : > { %6898 = vmatprep.mubr.bf16.mxu1 %v6407_v63  ;;  %v12936_v14 = vadd.f32 %v5761_v54, %v5568_v19  ;;  %v6406_v63 = vmax.bf16 %v14236_v17, %v6342_v30  ;;  %v6411_v19 = vmax.bf16 %v14236_v17, %v6347_v45 }
 0x50d   : > { %v5570_v18 = vpop.f32.mrf.mxu1  ;;  %v5763_v44 = vpop.f32.mrf.mxu0 }
 0x50e   : > { %v12942_v60 = vadd.f32 %v5763_v44, %v5570_v18  ;;  %v6351_v44 = vadd.bf16 %v12864_v51, %v14249_v49  ;;  %v14252_v49 = vpack.c.bf16 %v12390_v47, %v12381_v27  ;;  %v14253_v47 = vpack.c.bf16 %v12384_v9, %v12378_v62  ;;  %v8958_v62 = vld [vmem:[%s13610_s11 + $0x38] sm:$0xff]  }
 0x50f   : > { %v5572_v28 = vpop.f32.mrf.mxu1  ;;  %v5765_v38 = vpop.f32.mrf.mxu0 }
 0x510   : > { %v12945_v32 = vadd.f32 %v5765_v38, %v5572_v28  ;;  %v6354_v24 = vadd.bf16 %v12881_v21, %v14253_v47 }
 0x511   : > { %v12947_v50 = vpop.f32.mrf.mxu1  ;;  %v12949_v22 = vpop.f32.mrf.mxu0 }
 0x512   : > { %14247 = vst [vmem:[#allocation80_spill] sm:$0xff] %v12945_v32  ;;  %v6418_v9 = vmax.bf16 %v14236_v17, %v6354_v24 }
 0x513   : > { %v5578_v54 = vpop.f32.mrf.mxu1  ;;  %6899 = vmatmul.mubr.bf16.gmra.mxu1 %v6406_v63  ;;  %v5771_v8 = vpop.f32.mrf.mxu0 }
 0x514   : > { %6908 = vmatprep.mubr.bf16.mxu1 %v6411_v19  ;;  %v12956_v18 = vadd.f32 %v5771_v8, %v5578_v54  ;;  %v6410_v19 = vmax.bf16 %v14236_v17, %v6346_v57  ;;  %v6415_v54 = vmax.bf16 %v14236_v17, %v6351_v44 }
 0x515   : > { %v5580_v30 = vpop.f32.mrf.mxu1  ;;  %v5773_v28 = vpop.f32.mrf.mxu0 }
 0x516   : > { %v12962_v38 = vadd.f32 %v5773_v28, %v5580_v30  ;;  %v6355_v28 = vadd.bf16 %v12864_v51, %v14252_v49  ;;  %v14254_v49 = vpack.c.bf16 %v12410_v61, %v12401_v39 }
 0x517   : > { %v5582_v45 = vpop.f32.mrf.mxu1  ;;  %v5775_v63 = vpop.f32.mrf.mxu0 }
 0x518   : > { %v12965_v32 = vadd.f32 %v5775_v63, %v5582_v45 }
 0x519   : > { %v12967_v59 = vpop.f32.mrf.mxu1  ;;  %v12969_v31 = vpop.f32.mrf.mxu0 }
 0x51a   : > { %14250 = vst [vmem:[#allocation81_spill] sm:$0xff] %v12965_v32 }
 0x51b   : > { %v5588_v8 = vpop.f32.mrf.mxu1  ;;  %6909 = vmatmul.mubr.bf16.gmra.mxu1 %v6410_v19  ;;  %v5781_v15 = vpop.f32.mrf.mxu0 }
 0x51c   : > { %6918 = vmatprep.mubr.bf16.mxu1 %v6415_v54  ;;  %v12976_v30 = vadd.f32 %v5781_v15, %v5588_v8  ;;  %v6414_v54 = vmax.bf16 %v14236_v17, %v6350_v1  ;;  %v6419_v8 = vmax.bf16 %v14236_v17, %v6355_v28 }
 0x51d   : > { %v5590_v57 = vpop.f32.mrf.mxu1  ;;  %v5783_v45 = vpop.f32.mrf.mxu0 }
 0x51e   : > { %v12982_v63 = vadd.f32 %v5783_v45, %v5590_v57  ;;  %v6359_v45 = vadd.bf16 %v12864_v51, %v14254_v49  ;;  %v14257_v49 = vpack.c.bf16 %v12404_v55, %v12398_v56 }
 0x51f   : > { %v5592_v44 = vpop.f32.mrf.mxu1  ;;  %v5785_v19 = vpop.f32.mrf.mxu0 }
 0x520   : > { %v12985_v32 = vadd.f32 %v5785_v19, %v5592_v44 }
 0x521   : > { %v12987_v26 = vpop.f32.mrf.mxu1  ;;  %v12989_v33 = vpop.f32.mrf.mxu0 }
 0x523   : > { %v5598_v15 = vpop.f32.mrf.mxu1  ;;  %6919 = vmatmul.mubr.bf16.gmra.mxu1 %v6414_v54  ;;  %v5791_v27 = vpop.f32.mrf.mxu0 }
 0x524   : > { %6928 = vmatprep.mubr.bf16.mxu1 %v6419_v8  ;;  %v12996_v57 = vadd.f32 %v5791_v27, %v5598_v15  ;;  %v8957_v8 = vld [vmem:[%s13610_s11 + $0x78] sm:$0xff]   ;;  %v6423_v27 = vmax.bf16 %v14236_v17, %v6359_v45 }
 0x525   : > { %v5600_v1 = vpop.f32.mrf.mxu1  ;;  %v5793_v44 = vpop.f32.mrf.mxu0  ;;  %8227 = vmatprep.subr.bf16.mxu1 %v8957_v8 }
 0x526   : > { %v13002_v19 = vadd.f32 %v5793_v44, %v5600_v1  ;;  %8228 = vmatpush3.bf16.msra.mxu1 %v8958_v62  ;;  %v6358_v44 = vadd.bf16 %v12881_v21, %v14257_v49 }
 0x527   : > { %v5602_v28 = vpop.f32.mrf.mxu1  ;;  %v5795_v54 = vpop.f32.mrf.mxu0 }
 0x528   : > { %14255 = vst [vmem:[#allocation82_spill] sm:$0xff] %v13002_v19  ;;  %v13011_v15 = vadd.f32 %v5795_v54, %v5602_v28  ;;  %v14258_v54 = vpack.c.bf16 %v12439_v36, %v12421_v41  ;;  %v6422_v62 = vmax.bf16 %v14236_v17, %v6358_v44  ;;  %v14259_v36 = vpack.c.bf16 %v12427_v4, %v12418_v53  ;;  %v8960_v53 = vld [vmem:[%s13610_s11 + $0x30] sm:$0xff]  }
 0x529   : > { %v13013_v39 = vpop.f32.mrf.mxu1  ;;  %v13015_v61 = vpop.f32.mrf.mxu0 }
 0x52a   : > { %14256 = vst [vmem:[#allocation83_spill] sm:$0xff] %v13011_v15  ;;  %v6363_v15 = vadd.bf16 %v12864_v51, %v14258_v54  ;;  %v6362_v49 = vadd.bf16 %v12881_v21, %v14259_v36 }
 0x52b   : > { %v5608_v47 = vpop.f32.mrf.mxu1  ;;  %6929 = vmatmul.mubr.bf16.gmra.mxu1 %v6418_v9  ;;  %v5801_v1 = vpop.f32.mrf.mxu0 }
 0x52c   : > { %6938 = vmatprep.mubr.bf16.mxu1 %v6423_v27  ;;  %v13022_v24 = vadd.f32 %v5801_v1, %v5608_v47  ;;  %v6427_v47 = vmax.bf16 %v14236_v17, %v6363_v15  ;;  %v6426_v4 = vmax.bf16 %v14236_v17, %v6362_v49 }
 0x52d   : > { %v5610_v28 = vpop.f32.mrf.mxu1  ;;  %v5803_v45 = vpop.f32.mrf.mxu0 }
 0x52e   : > { %v13028_v8 = vadd.f32 %v5803_v45, %v5610_v28 }
 0x52f   : > { %v5612_v9 = vpop.f32.mrf.mxu1  ;;  %v5805_v19 = vpop.f32.mrf.mxu0 }
 0x530   : > { %v13031_v27 = vadd.f32 %v5805_v19, %v5612_v9  ;;  %v14260_v19 = vpack.c.bf16 %v12480_v2, %v12462_v11 }
 0x531   : > { %v13033_v56 = vpop.f32.mrf.mxu1  ;;  %v13035_v55 = vpop.f32.mrf.mxu0 }
 0x532   : > { %v6367_v54 = vadd.bf16 %v12864_v51, %v14260_v19  ;;  %v14265_v19 = vld [vmem:[#allocation54_spill] sm:$0xff] }
 0x533   : > { %v5618_v1 = vpop.f32.mrf.mxu1  ;;  %6939 = vmatmul.mubr.bf16.gmra.mxu1 %v6422_v62  ;;  %v5811_v41 = vpop.f32.mrf.mxu0 }
 0x534   : > { %6948 = vmatprep.mubr.bf16.mxu1 %v6427_v47  ;;  %v13042_v28 = vadd.f32 %v5811_v41, %v5618_v1  ;;  %v8959_v47 = vld [vmem:[%s13610_s11 + $0x70] sm:$0xff]   ;;  %v6431_v41 = vmax.bf16 %v14236_v17, %v6367_v54 }
 0x535   : > { %v5620_v44 = vpop.f32.mrf.mxu1  ;;  %v5813_v45 = vpop.f32.mrf.mxu0  ;;  %8229 = vmatprep.subr.bf16.mxu1 %v8959_v47 }
 0x536   : > { %v13048_v9 = vadd.f32 %v5813_v45, %v5620_v44  ;;  %8230 = vmatpush3.bf16.msra.mxu1 %v8960_v53  ;;  %v14266_v45 = vpack.c.bf16 %v12468_v34, %v14265_v19 }
 0x537   : > { %v5622_v15 = vpop.f32.mrf.mxu1  ;;  %v5815_v62 = vpop.f32.mrf.mxu0 }
 0x538   : > { %14261 = vst [vmem:[#allocation84_spill] sm:$0xff] %v13048_v9  ;;  %v13057_v1 = vadd.f32 %v5815_v62, %v5622_v15  ;;  %v6366_v9 = vadd.bf16 %v12881_v21, %v14266_v45  ;;  %v14268_v62 = vpack.c.bf16 %v12521_v35, %v12503_v29 }
 0x539   : > { %v13059_v11 = vpop.f32.mrf.mxu1  ;;  %v13061_v2 = vpop.f32.mrf.mxu0 }
 0x53a   : > { %14262 = vst [vmem:[#allocation85_spill] sm:$0xff] %v13057_v1  ;;  %14263 = vst [vmem:[#allocation86_spill] sm:$0xff] %v13059_v11  ;;  %v6371_v1 = vadd.bf16 %v12864_v51, %v14268_v62 }
 0x53b   : > { %14264 = vst [vmem:[#allocation87_spill] sm:$0xff] %v13061_v2  ;;  %v5628_v36 = vpop.f32.mrf.mxu1  ;;  %6949 = vmatmul.mubr.bf16.gmra.mxu1 %v6426_v4  ;;  %v5821_v44 = vpop.f32.mrf.mxu0  ;;  %v14270_v2 = vld [vmem:[#allocation5_spill] sm:$0xff] }
 0x53c   : > { %6958 = vmatprep.mubr.bf16.mxu1 %v6431_v41  ;;  %v13068_v49 = vadd.f32 %v5821_v44, %v5628_v36  ;;  %v6293_v53 = vrot.slane %v12834_v13, %v14270_v2  ;;  %v14271_v41 = vld [vmem:[#allocation2_spill] sm:$0xff]  ;;  %v6430_v36 = vmax.bf16 %v14236_v17, %v6366_v9  ;;  %v6435_v35 = vmax.bf16 %v14236_v17, %v6371_v1 }
 0x53d   : > { %v5630_v15 = vpop.f32.mrf.mxu1  ;;  %v5823_v54 = vpop.f32.mrf.mxu0  ;;  %v14272_v11 = vsub.s32 3, %v14271_v41 }
 0x53e   : > { %14267 = vst [vmem:[#allocation89_spill] sm:$0xff] %v13068_v49  ;;  %v13074_v47 = vadd.f32 %v5823_v54, %v5630_v15  ;;  %v6304_v62 = vpack.c.bf16 %v6293_v53, %v6293_v53 }
 0x53f   : > { %v5632_v4 = vpop.f32.mrf.mxu1  ;;  %v6297_v34 = vrot.slane %v12834_v13, %v14272_v11  ;;  %v5825_v19 = vpop.f32.mrf.mxu0  ;;  %v14276_v13 = vpack.c.bf16 %v12509_v37, %v12497_v58  ;;  %v8961_v58 = vld [vmem:[%s13610_s11 + $0x68] sm:$0xff]  }
 0x540   : > { %14269 = vst [vmem:[#allocation90_spill] sm:$0xff] %v13074_v47  ;;  %v13082_v44 = vadd.f32 %v5825_v19, %v5632_v4  ;;  %v14277_v4 = vpack.c.bf16 %v12562_v42, %v12544_v5  ;;  %v8962_v37 = vld [vmem:[%s13610_s11 + $0x28] sm:$0xff]   ;;  %8231 = vmatprep.subr.bf16.mxu1 %v8961_v58 }
 0x541   : > { %v13084_v45 = vpop.f32.mrf.mxu1  ;;  %v13086_v29 = vpop.f32.mrf.mxu0  ;;  %v6305_v54 = vpack.c.bf16 %v6297_v34, %v6297_v34  ;;  %v6370_v11 = vadd.bf16 %v12881_v21, %v14276_v13  ;;  %8232 = vmatpush3.bf16.msra.mxu1 %v8962_v37 }
 0x542   : > { %14273 = vst [vmem:[#allocation69_spill] sm:$0xff] %v13082_v44  ;;  %14274 = vst [vmem:[#allocation72_spill] sm:$0xff] %v13084_v45  ;;  %v6375_v41 = vadd.bf16 %v12864_v51, %v14277_v4  ;;  %v14299_v45 = vld [vmem:[#allocation15_spill] sm:$0xff] }
 0x543   : > { %14275 = vst [vmem:[#allocation93_spill] sm:$0xff] %v13086_v29  ;;  %v5864_v15 = vpop.f32.mrf.mxu1  ;;  %6959 = vmatmul.mubr.bf16.gmra.mxu1 %v6430_v36  ;;  %v6057_v2 = vpop.f32.mrf.mxu0  ;;  %v6321_v36 = vpack.i.b16 %v6304_v62, %v6304_v62  ;;  %v6328_v53 = vpack.i.b16 %v6305_v54, %v6305_v54  ;;  %v6434_v5 = vmax.bf16 %v14236_v17, %v6370_v11 }
 0x544   : > { %6968 = vmatprep.mubr.bf16.mxu1 %v6435_v35  ;;  %v5865_v19 = vadd.f32 %v5864_v15, %v12765_v6 }
 0x545   : > { %v5866_v9 = vpop.f32.mrf.mxu1  ;;  %v6059_v1 = vpop.f32.mrf.mxu0 }
 0x546   : > { %v5867_v34 = vadd.f32 %v5866_v9, %v12776_v16  ;;  %v6058_v6 = vadd.f32 %v6057_v2, %v5865_v19  ;;  %v6439_v16 = vmax.bf16 %v14236_v17, %v6375_v41  ;;  %v14281_v19 = vld [vmem:[#allocation10_spill] sm:$0xff] }
 0x547   : > { %v5868_v44 = vpop.f32.mrf.mxu1  ;;  %v6061_v47 = vpop.f32.mrf.mxu0 }
 0x548   : > { %v5869_v35 = vadd.f32 %v5868_v44, %v12778_v10  ;;  %v13110_v10 = vrot.slane %v6321_v36, %v14221_v23  ;;  %v13113_v44 = vrot.slane %v6328_v53, %v14221_v23  ;;  %v6060_v9 = vadd.f32 %v6059_v1, %v5867_v34  ;;  %v14284_v23 = vld [vmem:[#allocation30_spill] sm:$0xff] }
 0x549   : > { %v5870_v42 = vpop.f32.mrf.mxu1  ;;  %v6063_v54 = vpop.f32.mrf.mxu0 }
 0x54a   : > { %v6062_v15 = vadd.f32 %v6061_v47, %v5869_v35  ;;  %v5871_v62 = vadd.f32 %v5870_v42, %v12783_v0  ;;  %v14278_v47 = vld [vmem:[#allocation6_spill] sm:$0xff]  ;;  %v14279_v0 = vld [vmem:[#allocation55_spill] sm:$0xff]  ;;  %v14282_v35 = vld [vmem:[#allocation8_spill] sm:$0xff] }
 0x54b   : > { %v5874_v13 = vpop.f32.mrf.mxu1  ;;  %6969 = vmatmul.mubr.bf16.gmra.mxu1 %v6434_v5  ;;  %v6067_v29 = vpop.f32.mrf.mxu0  ;;  %v14280_v2 = vpack.c.bf16 %v14278_v47, %v14279_v0  ;;  %v14283_v36 = vpack.c.bf16 %v14281_v19, %v14282_v35 }
 0x54c   : > { %v6219_v4 = vpack.c.bf16 %v6062_v15, %v6058_v6  ;;  %v6064_v11 = vadd.f32 %v6063_v54, %v5871_v62  ;;  %6978 = vmatprep.mubr.bf16.mxu1 %v6439_v16  ;;  %v5875_v5 = vadd.f32 %v5874_v13, %v14284_v23  ;;  %v14285_v15 = vld [vmem:[#allocation27_spill] sm:$0xff] }
 0x54d   : > { %v6374_v41 = vadd.bf16 %v12881_v21, %v14280_v2  ;;  %v6379_v58 = vadd.bf16 %v12864_v51, %v14283_v36  ;;  %v5876_v53 = vpop.f32.mrf.mxu1  ;;  %v6069_v1 = vpop.f32.mrf.mxu0  ;;  %v14286_v54 = vld [vmem:[#allocation31_spill] sm:$0xff] }
 0x54e   : > { %v6220_v42 = vpack.c.bf16 %v6064_v11, %v6060_v9  ;;  %v6336_v34 = vadd.bf16 %v13110_v10, %v6219_v4  ;;  %v5877_v62 = vadd.f32 %v5876_v53, %v14285_v15  ;;  %v6068_v35 = vadd.f32 %v6067_v29, %v5875_v5  ;;  %v14287_v11 = vld [vmem:[#allocation35_spill] sm:$0xff]  ;;  %v8963_v53 = vld [vmem:[%s13610_s11 + $0x60] sm:$0xff]  }
 0x54f   : > { %v5878_v6 = vpop.f32.mrf.mxu1  ;;  %v6071_v47 = vpop.f32.mrf.mxu0  ;;  %v6438_v0 = vmax.bf16 %v14236_v17, %v6374_v41  ;;  %v6443_v19 = vmax.bf16 %v14236_v17, %v6379_v58  ;;  %v14288_v29 = vld [vmem:[#allocation14_spill] sm:$0xff]  ;;  %v14289_v58 = vld [vmem:[#allocation7_spill] sm:$0xff]  ;;  %8233 = vmatprep.subr.bf16.mxu1 %v8963_v53 }
 0x550   : > { %v6337_v37 = vadd.bf16 %v13113_v44, %v6220_v42  ;;  %v5879_v16 = vadd.f32 %v5878_v6, %v14286_v54  ;;  %v6400_v36 = vmax.bf16 %v14236_v17, %v6336_v34  ;;  %v6070_v6 = vadd.f32 %v6069_v1, %v5877_v62  ;;  %v8964_v1 = vld [vmem:[%s13610_s11 + $0x20] sm:$0xff]  }
 0x551   : > { %v5880_v2 = vpop.f32.mrf.mxu1  ;;  %v6073_v13 = vpop.f32.mrf.mxu0  ;;  %v14290_v5 = vpack.c.bf16 %v14288_v29, %v14289_v58  ;;  %8234 = vmatpush3.bf16.msra.mxu1 %v8964_v1  ;;  %v14296_v58 = vld [vmem:[#allocation56_spill] sm:$0xff] }
 0x552   : > { %v6072_v9 = vadd.f32 %v6071_v47, %v5879_v16  ;;  %v5881_v23 = vadd.f32 %v5880_v2, %v14287_v11  ;;  %v6401_v4 = vmax.bf16 %v14236_v17, %v6337_v37  ;;  %v14291_v37 = vld [vmem:[#allocation9_spill] sm:$0xff]  ;;  %v14292_v47 = vld [vmem:[#allocation11_spill] sm:$0xff] }
 0x553   : > { %v5884_v42 = vpop.f32.mrf.mxu1  ;;  %6979 = vmatmul.mubr.bf16.gmra.mxu1 %v6438_v0  ;;  %v6077_v54 = vpop.f32.mrf.mxu0  ;;  %v6378_v16 = vadd.bf16 %v12881_v21, %v14290_v5  ;;  %v14293_v34 = vpack.c.bf16 %v14291_v37, %v14292_v47 }
 0x554   : > { %v6223_v41 = vpack.c.bf16 %v6072_v9, %v6068_v35  ;;  %v6074_v15 = vadd.f32 %v6073_v13, %v5881_v23  ;;  %6988 = vmatprep.mubr.bf16.mxu1 %v6443_v19  ;;  %7071 = vmatprep.mubr.bf16.mxu0 %v6401_v4  ;;  %v14294_v19 = vld [vmem:[#allocation36_spill] sm:$0xff]  ;;  %v14295_v4 = vld [vmem:[#allocation37_spill] sm:$0xff] }
 0x555   : > { %v6383_v0 = vadd.bf16 %v12864_v51, %v14293_v34  ;;  %v5886_v2 = vpop.f32.mrf.mxu1  ;;  %7072 = vmatmul.mubr.bf16.vlgmr.msra.gmra.mxu0 %v6400_v36  ;;  %v5885_v35 = vadd.f32 %v5884_v42, %v14294_v19  ;;  %v6079_v9 = vpop.f32.mrf.mxu0  ;;  %v6442_v53 = vmax.bf16 %v14236_v17, %v6378_v16  ;;  %v14297_v42 = vld [vmem:[#allocation57_spill] sm:$0xff]  ;;  %v14298_v16 = vld [vmem:[#allocation18_spill] sm:$0xff] }
 0x556   : > { %v6224_v62 = vpack.c.bf16 %v6074_v15, %v6070_v6  ;;  %v6340_v11 = vadd.bf16 %v13110_v10, %v6223_v41  ;;  %v5887_v29 = vadd.f32 %v5886_v2, %v14295_v4 }
 0x557   : > { %v5888_v23 = vpop.f32.mrf.mxu1  ;;  %v6081_v36 = vpop.f32.mrf.mxu0  ;;  %v6447_v47 = vmax.bf16 %v14236_v17, %v6383_v0  ;;  %v6078_v6 = vadd.f32 %v6077_v54, %v5885_v35  ;;  %v14300_v0 = vpack.c.bf16 %v14298_v16, %v14299_v45  ;;  %v14301_v35 = vld [vmem:[#allocation21_spill] sm:$0xff] }
 0x558   : > { %v6341_v13 = vadd.bf16 %v13113_v44, %v6224_v62  ;;  %v5889_v5 = vadd.f32 %v5888_v23, %v14296_v58  ;;  %v6404_v1 = vmax.bf16 %v14236_v17, %v6340_v11  ;;  %v6080_v2 = vadd.f32 %v6079_v9, %v5887_v29 }
 0x559   : > { %v5890_v37 = vpop.f32.mrf.mxu1  ;;  %v6083_v19 = vpop.f32.mrf.mxu0  ;;  %v6382_v54 = vadd.bf16 %v12881_v21, %v14300_v0 }
 0x55a   : > { %v6082_v15 = vadd.f32 %v6081_v36, %v5889_v5  ;;  %v5891_v34 = vadd.f32 %v5890_v37, %v14297_v42  ;;  %v6405_v41 = vmax.bf16 %v14236_v17, %v6341_v13  ;;  %v14302_v5 = vld [vmem:[#allocation20_spill] sm:$0xff]  ;;  %v14305_v42 = vld [vmem:[#allocation59_spill] sm:$0xff] }
 0x55b   : > { %v5894_v62 = vpop.f32.mrf.mxu1  ;;  %6989 = vmatmul.mubr.bf16.gmra.mxu1 %v6442_v53  ;;  %v6087_v58 = vpop.f32.mrf.mxu0  ;;  %v14303_v36 = vpack.c.bf16 %v14301_v35, %v14302_v5  ;;  %v14304_v53 = vld [vmem:[#allocation58_spill] sm:$0xff]  ;;  %v6446_v16 = vmax.bf16 %v14236_v17, %v6382_v54 }
 0x55c   : > { %v6227_v4 = vpack.c.bf16 %v6082_v15, %v6078_v6  ;;  %v6084_v23 = vadd.f32 %v6083_v19, %v5891_v34  ;;  %6998 = vmatprep.mubr.bf16.mxu1 %v6447_v47  ;;  %7081 = vmatprep.mubr.bf16.mxu0 %v6405_v41  ;;  %v5895_v9 = vadd.f32 %v5894_v62, %v14304_v53  ;;  %v14306_v34 = vld [vmem:[#allocation60_spill] sm:$0xff] }
 0x55d   : > { %v6387_v13 = vadd.bf16 %v12864_v51, %v14303_v36  ;;  %v5896_v37 = vpop.f32.mrf.mxu1  ;;  %7082 = vmatmul.mubr.bf16.gmra.mxu0 %v6404_v1  ;;  %v6089_v29 = vpop.f32.mrf.mxu0 }
 0x55e   : > { %v6228_v11 = vpack.c.bf16 %v6084_v23, %v6080_v2  ;;  %v6344_v6 = vadd.bf16 %v13110_v10, %v6227_v4  ;;  %v5897_v45 = vadd.f32 %v5896_v37, %v14305_v42  ;;  %v6088_v1 = vadd.f32 %v6087_v58, %v5895_v9  ;;  %v14307_v23 = vld [vmem:[#allocation62_spill] sm:$0xff]  ;;  %v8965_v37 = vld [vmem:[%s13610_s11 + $0x58] sm:$0xff]  }
 0x55f   : > { %v5898_v47 = vpop.f32.mrf.mxu1  ;;  %v6091_v41 = vpop.f32.mrf.mxu0  ;;  %v6451_v35 = vmax.bf16 %v14236_v17, %v6387_v13  ;;  %v14308_v58 = vld [vmem:[#allocation13_spill] sm:$0xff]  ;;  %v14309_v13 = vld [vmem:[#allocation12_spill] sm:$0xff]  ;;  %8235 = vmatprep.subr.bf16.mxu1 %v8965_v37  ;;  %v14318_v37 = vld [vmem:[#allocation67_spill] sm:$0xff] }
 0x560   : > { %v6345_v15 = vadd.bf16 %v13113_v44, %v6228_v11  ;;  %v5899_v19 = vadd.f32 %v5898_v47, %v14306_v34  ;;  %v6408_v36 = vmax.bf16 %v14236_v17, %v6344_v6  ;;  %v6090_v53 = vadd.f32 %v6089_v29, %v5897_v45  ;;  %v8966_v29 = vld [vmem:[%s13610_s11 + $0x18] sm:$0xff]  }
 0x561   : > { %v5900_v0 = vpop.f32.mrf.mxu1  ;;  %v6093_v5 = vpop.f32.mrf.mxu0  ;;  %v14310_v9 = vpack.c.bf16 %v14308_v58, %v14309_v13  ;;  %8236 = vmatpush3.bf16.msra.mxu1 %v8966_v29  ;;  %v14317_v13 = vld [vmem:[#allocation66_spill] sm:$0xff] }
 0x562   : > { %v6092_v2 = vadd.f32 %v6091_v41, %v5899_v19  ;;  %v5901_v62 = vadd.f32 %v5900_v0, %v14307_v23  ;;  %v6409_v4 = vmax.bf16 %v14236_v17, %v6345_v15  ;;  %v14311_v15 = vld [vmem:[#allocation28_spill] sm:$0xff]  ;;  %v14312_v19 = vld [vmem:[#allocation23_spill] sm:$0xff] }
 0x563   : > { %v5904_v11 = vpop.f32.mrf.mxu1  ;;  %6999 = vmatmul.mubr.bf16.gmra.mxu1 %v6446_v16  ;;  %v6097_v42 = vpop.f32.mrf.mxu0  ;;  %v6386_v34 = vadd.bf16 %v12881_v21, %v14310_v9  ;;  %v14313_v6 = vpack.c.bf16 %v14311_v15, %v14312_v19  ;;  %v14314_v0 = vld [vmem:[#allocation63_spill] sm:$0xff] }
 0x564   : > { %v6231_v54 = vpack.c.bf16 %v6092_v2, %v6088_v1  ;;  %v6094_v47 = vadd.f32 %v6093_v5, %v5901_v62  ;;  %7008 = vmatprep.mubr.bf16.mxu1 %v6451_v35  ;;  %7091 = vmatprep.mubr.bf16.mxu0 %v6409_v4  ;;  %v5905_v35 = vadd.f32 %v5904_v11, %v14314_v0  ;;  %v14315_v62 = vld [vmem:[#allocation71_spill] sm:$0xff]  ;;  %v14316_v5 = vld [vmem:[#allocation73_spill] sm:$0xff] }
 0x565   : > { %v6391_v41 = vadd.bf16 %v12864_v51, %v14313_v6  ;;  %v5906_v16 = vpop.f32.mrf.mxu1  ;;  %7092 = vmatmul.mubr.bf16.gmra.mxu0 %v6408_v36  ;;  %v6099_v1 = vpop.f32.mrf.mxu0  ;;  %v5718_v4 = vadd.f32 %v14316_v5, %v14315_v62  ;;  %v6450_v19 = vmax.bf16 %v14236_v17, %v6386_v34  ;;  %v14319_v34 = vld [vmem:[#allocation19_spill] sm:$0xff] }
 0x566   : > { %v6232_v45 = vpack.c.bf16 %v6094_v47, %v6090_v53  ;;  %v6348_v2 = vadd.bf16 %v13110_v10, %v6231_v54  ;;  %v5907_v36 = vadd.f32 %v5906_v16, %v14317_v13  ;;  %v6098_v47 = vadd.f32 %v6097_v42, %v5905_v35  ;;  %v14323_v35 = vld [vmem:[#allocation29_spill] sm:$0xff] }
 0x567   : > { %v5908_v23 = vpop.f32.mrf.mxu1  ;;  %v6101_v15 = vpop.f32.mrf.mxu0  ;;  %v6455_v11 = vmax.bf16 %v14236_v17, %v6391_v41  ;;  %v14322_v41 = vld [vmem:[#allocation26_spill] sm:$0xff] }
 0x568   : > { %v6349_v58 = vadd.bf16 %v13113_v44, %v6232_v45  ;;  %v5909_v9 = vadd.f32 %v5908_v23, %v14318_v37  ;;  %v6412_v62 = vmax.bf16 %v14236_v17, %v6348_v2  ;;  %v6100_v45 = vadd.f32 %v6099_v1, %v5907_v36  ;;  %v14320_v37 = vld [vmem:[#allocation24_spill] sm:$0xff] }
 0x569   : > { %v5910_v53 = vpop.f32.mrf.mxu1  ;;  %v6103_v0 = vpop.f32.mrf.mxu0  ;;  %v14321_v49 = vpack.c.bf16 %v14319_v34, %v14320_v37 }
 0x56a   : > { %v6102_v6 = vadd.f32 %v6101_v15, %v5909_v9  ;;  %v5911_v54 = vadd.f32 %v5910_v53, %v5718_v4  ;;  %v6413_v29 = vmax.bf16 %v14236_v17, %v6349_v58  ;;  %v14324_v4 = vpack.c.bf16 %v14322_v41, %v14323_v35  ;;  %v14325_v53 = vld [vmem:[#allocation74_spill] sm:$0xff] }
 0x56b   : > { %v5914_v5 = vpop.f32.mrf.mxu1  ;;  %7009 = vmatmul.mubr.bf16.gmra.mxu1 %v6450_v19  ;;  %v6107_v23 = vpop.f32.mrf.mxu0  ;;  %v6390_v42 = vadd.bf16 %v12881_v21, %v14321_v49  ;;  %v14327_v49 = vld [vmem:[#allocation25_spill] sm:$0xff] }
 0x56c   : > { %v6235_v16 = vpack.c.bf16 %v6102_v6, %v6098_v47  ;;  %v6104_v13 = vadd.f32 %v6103_v0, %v5911_v54  ;;  %7018 = vmatprep.mubr.bf16.mxu1 %v6455_v11  ;;  %7101 = vmatprep.mubr.bf16.mxu0 %v6413_v29  ;;  %v6395_v58 = vadd.bf16 %v12864_v51, %v14324_v4  ;;  %v14326_v11 = vld [vmem:[#allocation75_spill] sm:$0xff]  ;;  %v14328_v0 = vld [vmem:[#allocation16_spill] sm:$0xff] }
 0x56d   : > { %v5916_v9 = vpop.f32.mrf.mxu1  ;;  %7102 = vmatmul.mubr.bf16.gmra.mxu0 %v6412_v62  ;;  %v5915_v1 = vadd.f32 %v5914_v5, %v12854_v48  ;;  %v6109_v36 = vpop.f32.mrf.mxu0  ;;  %v5728_v47 = vadd.f32 %v14326_v11, %v14325_v53  ;;  %v6454_v51 = vmax.bf16 %v14236_v17, %v6390_v42  ;;  %v8967_v4 = vld [vmem:[%s13610_s11 + $0x50] sm:$0xff]  }
 0x56e   : > { %v6236_v2 = vpack.c.bf16 %v6104_v13, %v6100_v45  ;;  %v6352_v15 = vadd.bf16 %v13110_v10, %v6235_v16  ;;  %v5917_v54 = vadd.f32 %v5916_v9, %v14327_v49  ;;  %v6459_v45 = vmax.bf16 %v14236_v17, %v6395_v58  ;;  %v14330_v58 = vld [vmem:[#allocation33_spill] sm:$0xff]  ;;  %8237 = vmatprep.subr.bf16.mxu1 %v8967_v4 }
 0x56f   : > { %v5918_v19 = vpop.f32.mrf.mxu1  ;;  %v6111_v34 = vpop.f32.mrf.mxu0  ;;  %v6108_v48 = vadd.f32 %v6107_v23, %v5915_v1  ;;  %v14329_v23 = vld [vmem:[#allocation34_spill] sm:$0xff] }
 0x570   : > { %v6353_v6 = vadd.bf16 %v13113_v44, %v6236_v2  ;;  %v5919_v29 = vadd.f32 %v5918_v19, %v14328_v0  ;;  %v6416_v41 = vmax.bf16 %v14236_v17, %v6352_v15  ;;  %v6110_v9 = vadd.f32 %v6109_v36, %v5917_v54  ;;  %v8968_v15 = vld [vmem:[%s13610_s11 + $0x10] sm:$0xff]  }
 0x571   : > { %v5920_v62 = vpop.f32.mrf.mxu1  ;;  %v6113_v16 = vpop.f32.mrf.mxu0  ;;  %v14331_v1 = vpack.c.bf16 %v14329_v23, %v14330_v58  ;;  %8238 = vmatpush3.bf16.msra.mxu1 %v8968_v15 }
 0x572   : > { %v6112_v5 = vadd.f32 %v6111_v34, %v5919_v29  ;;  %v5921_v13 = vadd.f32 %v5920_v62, %v5728_v47  ;;  %v6417_v37 = vmax.bf16 %v14236_v17, %v6353_v6  ;;  %v14332_v6 = vld [vmem:[#allocation17_spill] sm:$0xff] }
 0x573   : > { %v5924_v35 = vpop.f32.mrf.mxu1  ;;  %7019 = vmatmul.mubr.bf16.gmra.mxu1 %v6454_v51  ;;  %v6117_v19 = vpop.f32.mrf.mxu0  ;;  %v6394_v53 = vadd.bf16 %v12881_v21, %v14331_v1  ;;  %v14333_v29 = vld [vmem:[#allocation77_spill] sm:$0xff]  ;;  %v14334_v51 = vld [vmem:[#allocation22_spill] sm:$0xff] }
 0x574   : > { %v6239_v2 = vpack.c.bf16 %v6112_v5, %v6108_v48  ;;  %v6114_v42 = vadd.f32 %v6113_v16, %v5921_v13  ;;  %7028 = vmatprep.mubr.bf16.mxu1 %v6459_v45  ;;  %7111 = vmatprep.mubr.bf16.mxu0 %v6417_v37  ;;  %v5925_v36 = vadd.f32 %v5924_v35, %v14332_v6  ;;  %v14335_v45 = vld [vmem:[#allocation76_spill] sm:$0xff] }
 0x575   : > { %v5926_v11 = vpop.f32.mrf.mxu1  ;;  %7112 = vmatmul.mubr.bf16.gmra.mxu0 %v6416_v41  ;;  %v6119_v49 = vpop.f32.mrf.mxu0  ;;  %v5738_v34 = vadd.f32 %v14333_v29, %v12885_v7  ;;  %v6458_v13 = vmax.bf16 %v14236_v17, %v6394_v53 }
 0x576   : > { %v6240_v47 = vpack.c.bf16 %v6114_v42, %v6110_v9  ;;  %v6356_v54 = vadd.bf16 %v13110_v10, %v6239_v2  ;;  %v5927_v62 = vadd.f32 %v5926_v11, %v14334_v51  ;;  %v6118_v37 = vadd.f32 %v6117_v19, %v5925_v36 }
 0x577   : > { %v5928_v0 = vpop.f32.mrf.mxu1  ;;  %v6121_v5 = vpop.f32.mrf.mxu0  ;;  %v5748_v36 = vadd.f32 %v12909_v40, %v12907_v20  ;;  %v8969_v20 = vld [vmem:[%s13610_s11 + $0x48] sm:$0xff]  }
 0x578   : > { %v6357_v21 = vadd.bf16 %v13113_v44, %v6240_v47  ;;  %v5929_v48 = vadd.f32 %v5928_v0, %v14335_v45  ;;  %v6420_v2 = vmax.bf16 %v14236_v17, %v6356_v54  ;;  %v6120_v7 = vadd.f32 %v6119_v49, %v5927_v62  ;;  %v14336_v0 = vld [vmem:[#allocation78_spill] sm:$0xff]  ;;  %8239 = vmatprep.subr.bf16.mxu1 %v8969_v20  ;;  %v14338_v20 = vld [vmem:[#allocation80_spill] sm:$0xff] }
 0x579   : > { %v5930_v16 = vpop.f32.mrf.mxu1  ;;  %v6123_v4 = vpop.f32.mrf.mxu0 }
 0x57a   : > { %v6122_v41 = vadd.f32 %v6121_v5, %v5929_v48  ;;  %v5931_v35 = vadd.f32 %v5930_v16, %v5738_v34  ;;  %v6421_v9 = vmax.bf16 %v14236_v17, %v6357_v21 }
 0x57b   : > { %v5934_v42 = vpop.f32.mrf.mxu1  ;;  %7029 = vmatmul.mubr.bf16.gmra.mxu1 %v6458_v13  ;;  %v6127_v1 = vpop.f32.mrf.mxu0 }
 0x57c   : > { %v6243_v23 = vpack.c.bf16 %v6122_v41, %v6118_v37  ;;  %v6124_v58 = vadd.f32 %v6123_v4, %v5931_v35  ;;  %7121 = vmatprep.mubr.bf16.mxu0 %v6421_v9  ;;  %v5935_v53 = vadd.f32 %v5934_v42, %v12896_v25  ;;  %v8970_v35 = vld [vmem:[%s13610_s11 + $0x8] sm:$0xff]  }
 0x57d   : > { %v5936_v11 = vpop.f32.mrf.mxu1  ;;  %7122 = vmatmul.mubr.bf16.gmra.mxu0 %v6420_v2  ;;  %v6129_v19 = vpop.f32.mrf.mxu0  ;;  %8240 = vmatpush3.bf16.msra.mxu1 %v8970_v35 }
 0x57e   : > { %v6244_v15 = vpack.c.bf16 %v6124_v58, %v6120_v7  ;;  %v6360_v47 = vadd.bf16 %v13110_v10, %v6243_v23  ;;  %v5937_v49 = vadd.f32 %v5936_v11, %v12902_v43  ;;  %v6128_v51 = vadd.f32 %v6127_v1, %v5935_v53  ;;  %v14337_v11 = vld [vmem:[#allocation79_spill] sm:$0xff] }
 0x57f   : > { %v5938_v6 = vpop.f32.mrf.mxu1  ;;  %v6131_v34 = vpop.f32.mrf.mxu0  ;;  %v5758_v23 = vadd.f32 %v12929_v46, %v12927_v52 }
 0x580   : > { %v6361_v54 = vadd.bf16 %v13113_v44, %v6244_v15  ;;  %v5939_v29 = vadd.f32 %v5938_v6, %v14336_v0  ;;  %v6424_v5 = vmax.bf16 %v14236_v17, %v6360_v47  ;;  %v6130_v40 = vadd.f32 %v6129_v19, %v5937_v49 }
 0x581   : > { %v5940_v21 = vpop.f32.mrf.mxu1  ;;  %v6133_v48 = vpop.f32.mrf.mxu0 }
 0x582   : > { %v6132_v62 = vadd.f32 %v6131_v34, %v5939_v29  ;;  %v5941_v45 = vadd.f32 %v5940_v21, %v5748_v36  ;;  %v6425_v25 = vmax.bf16 %v14236_v17, %v6361_v54 }
 0x583   : > { %v5944_v13 = vpop.f32.mrf.mxu1  ;;  %v6137_v37 = vpop.f32.mrf.mxu0 }
 0x584   : > { %v6247_v16 = vpack.c.bf16 %v6132_v62, %v6128_v51  ;;  %v6134_v43 = vadd.f32 %v6133_v48, %v5941_v45  ;;  %7131 = vmatprep.mubr.bf16.mxu0 %v6425_v25  ;;  %v5945_v9 = vadd.f32 %v5944_v13, %v12916_v12  ;;  %v5768_v25 = vadd.f32 %v12949_v22, %v12947_v50  ;;  %v8971_v50 = vld [vmem:[%s13610_s11 + $0x40] sm:$0xff]  }
 0x585   : > { %v5946_v41 = vpop.f32.mrf.mxu1  ;;  %7132 = vmatmul.mubr.bf16.gmra.mxu0 %v6424_v5  ;;  %v6139_v2 = vpop.f32.mrf.mxu0  ;;  %8241 = vmatprep.subr.bf16.mxu1 %v8971_v50 }
 0x586   : > { %v6248_v4 = vpack.c.bf16 %v6134_v43, %v6130_v40  ;;  %v6364_v42 = vadd.bf16 %v13110_v10, %v6247_v16  ;;  %v5947_v1 = vadd.f32 %v5946_v41, %v12922_v3  ;;  %v6138_v47 = vadd.f32 %v6137_v37, %v5945_v9 }
 0x587   : > { %v5948_v7 = vpop.f32.mrf.mxu1  ;;  %v6141_v53 = vpop.f32.mrf.mxu0 }
 0x588   : > { %v6365_v58 = vadd.bf16 %v13113_v44, %v6248_v4  ;;  %v5949_v15 = vadd.f32 %v5948_v7, %v14337_v11  ;;  %v6428_v49 = vmax.bf16 %v14236_v17, %v6364_v42  ;;  %v6140_v29 = vadd.f32 %v6139_v2, %v5947_v1 }
 0x589   : > { %v5950_v19 = vpop.f32.mrf.mxu1  ;;  %v6143_v12 = vpop.f32.mrf.mxu0 }
 0x58a   : > { %v6142_v6 = vadd.f32 %v6141_v53, %v5949_v15  ;;  %v5951_v36 = vadd.f32 %v5950_v19, %v5758_v23  ;;  %v6429_v54 = vmax.bf16 %v14236_v17, %v6365_v58  ;;  %v8972_v15 = vld [vmem:[%s13610_s11] sm:$0xff]  }
 0x58b   : > { %v5954_v0 = vpop.f32.mrf.mxu1  ;;  %v6147_v46 = vpop.f32.mrf.mxu0  ;;  %8242 = vmatpush3.bf16.msra.mxu1 %v8972_v15  ;;  %v14340_v15 = vld [vmem:[#allocation82_spill] sm:$0xff] }
 0x58c   : > { %v6251_v34 = vpack.c.bf16 %v6142_v6, %v6138_v47  ;;  %v6144_v52 = vadd.f32 %v6143_v12, %v5951_v36  ;;  %7141 = vmatprep.mubr.bf16.mxu0 %v6429_v54  ;;  %v5955_v51 = vadd.f32 %v5954_v0, %v12936_v14  ;;  %v5778_v47 = vadd.f32 %v12969_v31, %v12967_v59  ;;  %v14339_v12 = vld [vmem:[#allocation81_spill] sm:$0xff] }
 0x58d   : > { %v5956_v21 = vpop.f32.mrf.mxu1  ;;  %7142 = vmatmul.mubr.bf16.gmra.mxu0 %v6428_v49  ;;  %v6149_v62 = vpop.f32.mrf.mxu0 }
 0x58e   : > { %v6252_v3 = vpack.c.bf16 %v6144_v52, %v6140_v29  ;;  %v6368_v45 = vadd.bf16 %v13110_v10, %v6251_v34  ;;  %v5957_v13 = vadd.f32 %v5956_v21, %v12942_v60  ;;  %v6148_v37 = vadd.f32 %v6147_v46, %v5955_v51 }
 0x58f   : > { %v5958_v48 = vpop.f32.mrf.mxu1  ;;  %v6151_v16 = vpop.f32.mrf.mxu0 }
 0x590   : > { %v6369_v5 = vadd.bf16 %v13113_v44, %v6252_v3  ;;  %v5959_v40 = vadd.f32 %v5958_v48, %v14338_v20  ;;  %v6432_v9 = vmax.bf16 %v14236_v17, %v6368_v45  ;;  %v6150_v22 = vadd.f32 %v6149_v62, %v5957_v13 }
 0x591   : > { %v5960_v43 = vpop.f32.mrf.mxu1  ;;  %v6153_v4 = vpop.f32.mrf.mxu0  ;;  %v5788_v20 = vadd.f32 %v12989_v33, %v12987_v26 }
 0x592   : > { %v6152_v41 = vadd.f32 %v6151_v16, %v5959_v40  ;;  %v5961_v35 = vadd.f32 %v5960_v43, %v5768_v25  ;;  %v6433_v14 = vmax.bf16 %v14236_v17, %v6369_v5 }
 0x593   : > { %v5964_v2 = vpop.f32.mrf.mxu1  ;;  %v6157_v7 = vpop.f32.mrf.mxu0 }
 0x594   : > { %v6255_v42 = vpack.c.bf16 %v6152_v41, %v6148_v37  ;;  %v6154_v60 = vadd.f32 %v6153_v4, %v5961_v35  ;;  %7151 = vmatprep.mubr.bf16.mxu0 %v6433_v14  ;;  %v5965_v1 = vadd.f32 %v5964_v2, %v12956_v18 }
 0x595   : > { %v5966_v23 = vpop.f32.mrf.mxu1  ;;  %7152 = vmatmul.mubr.bf16.gmra.mxu0 %v6432_v9  ;;  %v6159_v11 = vpop.f32.mrf.mxu0 }
 0x596   : > { %v6256_v58 = vpack.c.bf16 %v6154_v60, %v6150_v22  ;;  %v6372_v53 = vadd.bf16 %v13110_v10, %v6255_v42  ;;  %v5967_v36 = vadd.f32 %v5966_v23, %v12962_v38  ;;  %v6158_v0 = vadd.f32 %v6157_v7, %v5965_v1 }
 0x597   : > { %v5968_v19 = vpop.f32.mrf.mxu1  ;;  %v6161_v49 = vpop.f32.mrf.mxu0  ;;  %v5798_v1 = vadd.f32 %v13015_v61, %v13013_v39 }
 0x598   : > { %v6373_v6 = vadd.bf16 %v13113_v44, %v6256_v58  ;;  %v5969_v54 = vadd.f32 %v5968_v19, %v14339_v12  ;;  %v6436_v21 = vmax.bf16 %v14236_v17, %v6372_v53  ;;  %v6160_v51 = vadd.f32 %v6159_v11, %v5967_v36  ;;  %v14341_v19 = vld [vmem:[#allocation83_spill] sm:$0xff] }
 0x599   : > { %v5970_v18 = vpop.f32.mrf.mxu1  ;;  %v6163_v52 = vpop.f32.mrf.mxu0 }
 0x59a   : > { %v6162_v29 = vadd.f32 %v6161_v49, %v5969_v54  ;;  %v5971_v34 = vadd.f32 %v5970_v18, %v5778_v47  ;;  %v6437_v46 = vmax.bf16 %v14236_v17, %v6373_v6 }
 0x59b   : > { %v5974_v3 = vpop.f32.mrf.mxu1  ;;  %v6167_v62 = vpop.f32.mrf.mxu0 }
 0x59c   : > { %v6259_v59 = vpack.c.bf16 %v6162_v29, %v6158_v0  ;;  %v6164_v31 = vadd.f32 %v6163_v52, %v5971_v34  ;;  %7161 = vmatprep.mubr.bf16.mxu0 %v6437_v46  ;;  %v5975_v48 = vadd.f32 %v5974_v3, %v12976_v30 }
 0x59d   : > { %v5976_v38 = vpop.f32.mrf.mxu1  ;;  %7162 = vmatmul.mubr.bf16.gmra.mxu0 %v6436_v21  ;;  %v6169_v25 = vpop.f32.mrf.mxu0 }
 0x59e   : > { %v6260_v45 = vpack.c.bf16 %v6164_v31, %v6160_v51  ;;  %v6376_v5 = vadd.bf16 %v13110_v10, %v6259_v59  ;;  %v5977_v16 = vadd.f32 %v5976_v38, %v12982_v63  ;;  %v6168_v35 = vadd.f32 %v6167_v62, %v5975_v48 }
 0x59f   : > { %v5978_v13 = vpop.f32.mrf.mxu1  ;;  %v6171_v37 = vpop.f32.mrf.mxu0  ;;  %v5808_v62 = vadd.f32 %v13035_v55, %v13033_v56 }
 0x5a0   : > { %v6377_v40 = vadd.bf16 %v13113_v44, %v6260_v45  ;;  %v5979_v43 = vadd.f32 %v5978_v13, %v12985_v32  ;;  %v6440_v2 = vmax.bf16 %v14236_v17, %v6376_v5  ;;  %v6170_v22 = vadd.f32 %v6169_v25, %v5977_v16 }
 0x5a1   : > { %v5980_v41 = vpop.f32.mrf.mxu1  ;;  %v6173_v9 = vpop.f32.mrf.mxu0 }
 0x5a2   : > { %v6172_v4 = vadd.f32 %v6171_v37, %v5979_v43  ;;  %v5981_v14 = vadd.f32 %v5980_v41, %v5788_v20  ;;  %v6441_v30 = vmax.bf16 %v14236_v17, %v6377_v40 }
 0x5a3   : > { %v5984_v50 = vpop.f32.mrf.mxu1  ;;  %v6177_v33 = vpop.f32.mrf.mxu0 }
 0x5a4   : > { %v6263_v42 = vpack.c.bf16 %v6172_v4, %v6168_v35  ;;  %v6174_v26 = vadd.f32 %v6173_v9, %v5981_v14  ;;  %7171 = vmatprep.mubr.bf16.mxu0 %v6441_v30  ;;  %v5985_v32 = vadd.f32 %v5984_v50, %v12996_v57  ;;  %v14343_v50 = vld [vmem:[#allocation87_spill] sm:$0xff] }
 0x5a5   : > { %v5986_v60 = vpop.f32.mrf.mxu1  ;;  %7172 = vmatmul.mubr.bf16.gmra.mxu0 %v6440_v2  ;;  %v6179_v7 = vpop.f32.mrf.mxu0  ;;  %v14342_v2 = vld [vmem:[#allocation86_spill] sm:$0xff] }
 0x5a6   : > { %v6264_v63 = vpack.c.bf16 %v6174_v26, %v6170_v22  ;;  %v6380_v23 = vadd.bf16 %v13110_v10, %v6263_v42  ;;  %v5987_v53 = vadd.f32 %v5986_v60, %v14340_v15  ;;  %v6178_v12 = vadd.f32 %v6177_v33, %v5985_v32  ;;  %v14344_v26 = vld [vmem:[#allocation84_spill] sm:$0xff]  ;;  %v14345_v60 = vld [vmem:[#allocation85_spill] sm:$0xff] }
 0x5a7   : > { %v5988_v58 = vpop.f32.mrf.mxu1  ;;  %v6181_v6 = vpop.f32.mrf.mxu0  ;;  %v5818_v22 = vadd.f32 %v14343_v50, %v14342_v2 }
 0x5a8   : > { %v6381_v11 = vadd.bf16 %v13113_v44, %v6264_v63  ;;  %v5989_v47 = vadd.f32 %v5988_v58, %v14341_v19  ;;  %v6444_v0 = vmax.bf16 %v14236_v17, %v6380_v23  ;;  %v6180_v34 = vadd.f32 %v6179_v7, %v5987_v53 }
 0x5a9   : > { %v5990_v36 = vpop.f32.mrf.mxu1  ;;  %v6183_v18 = vpop.f32.mrf.mxu0 }
 0x5aa   : > { %v6182_v54 = vadd.f32 %v6181_v6, %v5989_v47  ;;  %v5991_v49 = vadd.f32 %v5990_v36, %v5798_v1  ;;  %v6445_v57 = vmax.bf16 %v14236_v17, %v6381_v11 }
 0x5ab   : > { %v5994_v29 = vpop.f32.mrf.mxu1  ;;  %v6187_v61 = vpop.f32.mrf.mxu0 }
 0x5ac   : > { %v6267_v52 = vpack.c.bf16 %v6182_v54, %v6178_v12  ;;  %v6184_v39 = vadd.f32 %v6183_v18, %v5991_v49  ;;  %7181 = vmatprep.mubr.bf16.mxu0 %v6445_v57  ;;  %v5995_v3 = vadd.f32 %v5994_v29, %v13022_v24  ;;  %v14346_v49 = vld [vmem:[#allocation89_spill] sm:$0xff] }
 0x5ad   : > { %v5996_v46 = vpop.f32.mrf.mxu1  ;;  %7182 = vmatmul.mubr.bf16.gmra.mxu0 %v6444_v0  ;;  %v6189_v51 = vpop.f32.mrf.mxu0 }
 0x5ae   : > { %v6268_v21 = vpack.c.bf16 %v6184_v39, %v6180_v34  ;;  %v6384_v59 = vadd.bf16 %v13110_v10, %v6267_v52  ;;  %v5997_v45 = vadd.f32 %v5996_v46, %v13028_v8  ;;  %v6188_v13 = vadd.f32 %v6187_v61, %v5995_v3  ;;  %v14347_v34 = vld [vmem:[#allocation72_spill] sm:$0xff]  ;;  %v14348_v52 = vld [vmem:[#allocation93_spill] sm:$0xff]  ;;  %v14349_v46 = vld [vmem:[#allocation90_spill] sm:$0xff] }
 0x5af   : > { %v5998_v31 = vpop.f32.mrf.mxu1  ;;  %v6191_v25 = vpop.f32.mrf.mxu0  ;;  %v5828_v39 = vadd.f32 %v14348_v52, %v14347_v34  ;;  %v14350_v3 = vld [vmem:[#allocation69_spill] sm:$0xff] }
 0x5b0   : > { %v6385_v38 = vadd.bf16 %v13113_v44, %v6268_v21  ;;  %v5999_v48 = vadd.f32 %v5998_v31, %v13031_v27  ;;  %v6448_v43 = vmax.bf16 %v14236_v17, %v6384_v59  ;;  %v6190_v41 = vadd.f32 %v6189_v51, %v5997_v45 }
 0x5b1   : > { %v6000_v5 = vpop.f32.mrf.mxu1  ;;  %v6193_v16 = vpop.f32.mrf.mxu0 }
 0x5b2   : > { %v6192_v20 = vadd.f32 %v6191_v25, %v5999_v48  ;;  %v6001_v40 = vadd.f32 %v6000_v5, %v5808_v62  ;;  %v6449_v24 = vmax.bf16 %v14236_v17, %v6385_v38 }
 0x5b3   : > { %v6004_v37 = vpop.f32.mrf.mxu1  ;;  %v6197_v55 = vpop.f32.mrf.mxu0 }
 0x5b4   : > { %v6271_v35 = vpack.c.bf16 %v6192_v20, %v6188_v13  ;;  %v6194_v56 = vadd.f32 %v6193_v16, %v6001_v40  ;;  %7191 = vmatprep.mubr.bf16.mxu0 %v6449_v24  ;;  %v6005_v27 = vadd.f32 %v6004_v37, %v13042_v28 }
 0x5b5   : > { %v6006_v4 = vpop.f32.mrf.mxu1  ;;  %7192 = vmatmul.mubr.bf16.gmra.mxu0 %v6448_v43  ;;  %v6199_v14 = vpop.f32.mrf.mxu0 }
 0x5b6   : > { %v6272_v8 = vpack.c.bf16 %v6194_v56, %v6190_v41  ;;  %v6388_v9 = vadd.bf16 %v13110_v10, %v6271_v35  ;;  %v6007_v33 = vadd.f32 %v6006_v4, %v14344_v26  ;;  %v6198_v23 = vadd.f32 %v6197_v55, %v6005_v27 }
 0x5b7   : > { %v6008_v30 = vpop.f32.mrf.mxu1  ;;  %v6201_v32 = vpop.f32.mrf.mxu0 }
 0x5b8   : > { %v6389_v42 = vadd.bf16 %v13113_v44, %v6272_v8  ;;  %v6009_v63 = vadd.f32 %v6008_v30, %v14345_v60  ;;  %v6452_v15 = vmax.bf16 %v14236_v17, %v6388_v9  ;;  %v6200_v19 = vadd.f32 %v6199_v14, %v6007_v33 }
 0x5b9   : > { %v6010_v7 = vpop.f32.mrf.mxu1  ;;  %v6203_v11 = vpop.f32.mrf.mxu0 }
 0x5ba   : > { %v6202_v58 = vadd.f32 %v6201_v32, %v6009_v63  ;;  %v6011_v1 = vadd.f32 %v6010_v7, %v5818_v22  ;;  %v6453_v28 = vmax.bf16 %v14236_v17, %v6389_v42 }
 0x5bb   : > { %v6014_v53 = vpop.f32.mrf.mxu1  ;;  %v6207_v36 = vpop.f32.mrf.mxu0 }
 0x5bc   : > { %v6275_v47 = vpack.c.bf16 %v6202_v58, %v6198_v23  ;;  %v6204_v6 = vadd.f32 %v6203_v11, %v6011_v1  ;;  %7201 = vmatprep.mubr.bf16.mxu0 %v6453_v28  ;;  %v6015_v18 = vadd.f32 %v6014_v53, %v14346_v49  ;;  %v14352_v49 = vld [vmem:[#allocation3_spill] sm:$0xff] }
 0x5bd   : > { %v6016_v12 = vpop.f32.mrf.mxu1  ;;  %7202 = vmatmul.mubr.bf16.gmra.mxu0 %v6452_v15  ;;  %v6209_v57 = vpop.f32.mrf.mxu0 }
 0x5be   : > { %v6276_v54 = vpack.c.bf16 %v6204_v6, %v6200_v19  ;;  %v6392_v0 = vadd.bf16 %v13110_v10, %v6275_v47  ;;  %v6017_v21 = vadd.f32 %v6016_v12, %v14349_v46  ;;  %v6208_v62 = vadd.f32 %v6207_v36, %v6015_v18  ;;  %v7232_v6 = vld [vmem:[%s13609_s10] sm:$0x3]  ;;  %v14351_v12 = vld [vmem:[#allocation4_spill] sm:$0xff] }
 0x5bf   : > { %v6018_v29 = vpop.f32.mrf.mxu1  ;;  %v6211_v59 = vpop.f32.mrf.mxu0  ;;  %v7273_v18 = vrot.slane %v7232_v6, %v14352_v49 }
 0x5c0   : > { %v6393_v61 = vadd.bf16 %v13113_v44, %v6276_v54  ;;  %v6019_v51 = vadd.f32 %v6018_v29, %v14350_v3  ;;  %v6456_v25 = vmax.bf16 %v14236_v17, %v6392_v0  ;;  %v6210_v20 = vadd.f32 %v6209_v57, %v6017_v21 }
 0x5c1   : > { %v6020_v31 = vpop.f32.mrf.mxu1  ;;  %v6213_v5 = vpop.f32.mrf.mxu0  ;;  %v7269_v54 = vrot.slane %v7232_v6, %v14351_v12  ;;  %v7277_v29 = vpack.c.bf16 %v7273_v18, %v7273_v18 }
 0x5c2   : > { %v6212_v38 = vadd.f32 %v6211_v59, %v6019_v51  ;;  %v6021_v45 = vadd.f32 %v6020_v31, %v5828_v39  ;;  %v6457_v48 = vmax.bf16 %v14236_v17, %v6393_v61 }
 0x5c3   : > { %v6880_v13 = vpop.f32.mrf.mxu1  ;;  %v7276_v0 = vpack.c.bf16 %v7269_v54, %v7269_v54  ;;  %v7286_v46 = vpack.i.b16 %v7277_v29, %v7277_v29 }
 0x5c4   : > { %v6279_v40 = vpack.c.bf16 %v6212_v38, %v6208_v62  ;;  %v6214_v16 = vadd.f32 %v6213_v5, %v6021_v45  ;;  %7211 = vmatprep.mubr.bf16.mxu0 %v6457_v48 }
 0x5c5   : > { %v6882_v24 = vpop.f32.mrf.mxu1  ;;  %7212 = vmatmul.mubr.bf16.gmra.mxu0 %v6456_v25  ;;  %v7279_v61 = vpack.i.b16 %v7276_v0, %v7276_v0  ;;  %v13397_v25 = vrot.slane %v7286_v46, %v14351_v12 }
 0x5c6   : > { %v6280_v43 = vpack.c.bf16 %v6214_v16, %v6210_v20  ;;  %v6396_v37 = vadd.bf16 %v13110_v10, %v6279_v40 }
 0x5c7   : > { %v6884_v41 = vpop.f32.mrf.mxu1  ;;  %v13394_v31 = vrot.slane %v7279_v61, %v14351_v12 }
 0x5c8   : > { %v6397_v35 = vadd.bf16 %v13113_v44, %v6280_v43  ;;  %v6460_v4 = vmax.bf16 %v14236_v17, %v6396_v37 }
 0x5c9   : > { %v6886_v56 = vpop.f32.mrf.mxu1 }
 0x5ca   : > { %v6461_v55 = vmax.bf16 %v14236_v17, %v6397_v35 }
 0x5cb   : > { %v6890_v8 = vpop.f32.mrf.mxu1 }
 0x5cc   : > { %7221 = vmatprep.mubr.bf16.mxu0 %v6461_v55 }
 0x5cd   : > { %v6892_v27 = vpop.f32.mrf.mxu1  ;;  %7222 = vmatmul.mubr.bf16.gmra.mxu0 %v6460_v4 }
 0x5cf   : > { %v6894_v14 = vpop.f32.mrf.mxu1 }
 0x5d1   : > { %v6896_v9 = vpop.f32.mrf.mxu1 }
 0x5d3   : > { %v13336_v30 = vpop.f32.mrf.mxu1 }
 0x5d5   : > { %v13338_v2 = vpop.f32.mrf.mxu1 }
 0x5d7   : > { %v13340_v50 = vpop.f32.mrf.mxu1 }
 0x5d9   : > { %v13342_v10 = vpop.f32.mrf.mxu1 }
 0x5db   : > { %v13344_v44 = vpop.f32.mrf.mxu1 }
 0x5dd   : > { %v13346_v22 = vpop.f32.mrf.mxu1 }
 0x5df   : > { %v13348_v42 = vpop.f32.mrf.mxu1 }
 0x5e1   : > { %v13350_v26 = vpop.f32.mrf.mxu1 }
 0x5e3   : > { %v13352_v33 = vpop.f32.mrf.mxu1 }
 0x5e5   : > { %v13354_v60 = vpop.f32.mrf.mxu1 }
 0x5e7   : > { %v13356_v63 = vpop.f32.mrf.mxu1 }
 0x5e9   : > { %v13358_v32 = vpop.f32.mrf.mxu1 }
 0x5eb   : > { %v13360_v7 = vpop.f32.mrf.mxu1 }
 0x5ed   : > { %v13362_v23 = vpop.f32.mrf.mxu1 }
 0x5ef   : > { %v13364_v58 = vpop.f32.mrf.mxu1 }
 0x5f1   : > { %v13366_v1 = vpop.f32.mrf.mxu1 }
 0x5f3   : > { %v13368_v11 = vpop.f32.mrf.mxu1 }
 0x5f5   : > { %v13370_v28 = vpop.f32.mrf.mxu1 }
 0x5f7   : > { %v13372_v15 = vpop.f32.mrf.mxu1 }
 0x5f9   : > { %v13374_v53 = vpop.f32.mrf.mxu1 }
 0x5fb   : > { %v13376_v19 = vpop.f32.mrf.mxu1 }
 0x5fd   : > { %v13378_v47 = vpop.f32.mrf.mxu1 }
 0x5ff   : > { %v13383_v36 = vpop.f32.mrf.mxu1 }
 0x601   : > { %v13387_v57 = vpop.f32.mrf.mxu1 }
 0x603   : > { %v13389_v52 = vpop.f32.mrf.mxu1 }
 0x605   : > { %v13391_v59 = vpop.f32.mrf.mxu1 }
 0x607   : > { %v13399_v40 = vpop.f32.mrf.mxu1 }
 0x615   : > { %v7073_v34 = vpop.f32.mrf.mxu0 }
 0x616   : > { %v7074_v3 = vadd.f32 %v7073_v34, %v6880_v13 }
 0x617   : > { %v7075_v39 = vpop.f32.mrf.mxu0 }
 0x618   : > { %v7076_v38 = vadd.f32 %v7075_v39, %v6882_v24  ;;  %v13404_v24 = vpop.f32.mrf.mxu1 }
 0x619   : > { %v7077_v21 = vpop.f32.mrf.mxu0 }
 0x61a   : > { %v7078_v51 = vadd.f32 %v7077_v21, %v6884_v41  ;;  %v13407_v0 = vpop.f32.mrf.mxu1 }
 0x61b   : > { %v7079_v62 = vpop.f32.mrf.mxu0 }
 0x61c   : > { %v7233_v45 = vpack.c.bf16 %v7078_v51, %v7074_v3  ;;  %v7080_v48 = vadd.f32 %v7079_v62, %v6886_v56  ;;  %v13414_v46 = vpop.f32.mrf.mxu1 }
 0x61d   : > { %v7083_v5 = vpop.f32.mrf.mxu0 }
 0x61e   : > { %v7234_v20 = vpack.c.bf16 %v7080_v48, %v7076_v38  ;;  %v7292_v16 = vadd.bf16 %v13394_v31, %v7233_v45  ;;  %v7084_v41 = vadd.f32 %v7083_v5, %v6890_v8  ;;  %v13419_v48 = vpop.f32.mrf.mxu1 }
 0x61f   : > { %v7085_v13 = vpop.f32.mrf.mxu0 }
 0x620   : > { %v7293_v43 = vadd.bf16 %v13397_v25, %v7234_v20  ;;  %v7324_v56 = vmax.bf16 %v14236_v17, %v7292_v16  ;;  %v7086_v6 = vadd.f32 %v7085_v13, %v6892_v27 }
 0x621   : > { %v7087_v37 = vpop.f32.mrf.mxu0 }
 0x622   : > { %v7088_v35 = vadd.f32 %v7087_v37, %v6894_v14  ;;  %v7325_v55 = vmax.bf16 %v14236_v17, %v7293_v43  ;;  %v13426_v43 = vpop.f32.mrf.mxu1 }
 0x623   : > { %v7089_v4 = vpop.f32.mrf.mxu0 }
 0x624   : > { %v7235_v12 = vpack.c.bf16 %v7088_v35, %v7084_v41  ;;  %v7090_v54 = vadd.f32 %v7089_v4, %v6896_v9  ;;  %7523 = vmatprep.mubr.bf16.mxu1 %v7325_v55 }
 0x625   : > { %v7093_v49 = vpop.f32.mrf.mxu0  ;;  %7524 = vmatmul.mubr.bf16.vlgmr.msra.gmra.mxu1 %v7324_v56 }
 0x626   : > { %v7236_v18 = vpack.c.bf16 %v7090_v54, %v7086_v6  ;;  %v7294_v29 = vadd.bf16 %v13394_v31, %v7235_v12  ;;  %v7094_v39 = vadd.f32 %v7093_v49, %v13336_v30  ;;  %v13431_v6 = vpop.f32.mrf.mxu1 }
 0x627   : > { %v7095_v8 = vpop.f32.mrf.mxu0 }
 0x628   : > { %v7295_v14 = vadd.bf16 %v13397_v25, %v7236_v18  ;;  %v7326_v9 = vmax.bf16 %v14236_v17, %v7294_v29  ;;  %v7096_v3 = vadd.f32 %v7095_v8, %v13338_v2  ;;  %v13438_v29 = vpop.f32.mrf.mxu1 }
 0x629   : > { %v7097_v34 = vpop.f32.mrf.mxu0 }
 0x62a   : > { %v7098_v61 = vadd.f32 %v7097_v34, %v13340_v50  ;;  %v7327_v27 = vmax.bf16 %v14236_v17, %v7295_v14 }
 0x62b   : > { %v7099_v21 = vpop.f32.mrf.mxu0 }
 0x62c   : > { %v7237_v51 = vpack.c.bf16 %v7098_v61, %v7094_v39  ;;  %v7100_v62 = vadd.f32 %v7099_v21, %v13342_v10  ;;  %7531 = vmatprep.mubr.bf16.mxu1 %v7327_v27 }
 0x62d   : > { %v7103_v38 = vpop.f32.mrf.mxu0  ;;  %7532 = vmatmul.mubr.bf16.gmra.mxu1 %v7326_v9  ;;  %v13443_v9 = vpop.f32.mrf.mxu1 }
 0x62e   : > { %v7238_v45 = vpack.c.bf16 %v7100_v62, %v7096_v3  ;;  %v7296_v30 = vadd.bf16 %v13394_v31, %v7237_v51  ;;  %v7104_v16 = vadd.f32 %v7103_v38, %v13344_v44 }
 0x62f   : > { %v7105_v50 = vpop.f32.mrf.mxu0  ;;  %v13450_v38 = vpop.f32.mrf.mxu1 }
 0x630   : > { %v7297_v5 = vadd.bf16 %v13397_v25, %v7238_v45  ;;  %v7328_v10 = vmax.bf16 %v14236_v17, %v7296_v30  ;;  %v7106_v41 = vadd.f32 %v7105_v50, %v13346_v22 }
 0x631   : > { %v7107_v20 = vpop.f32.mrf.mxu0 }
 0x632   : > { %v7108_v13 = vadd.f32 %v7107_v20, %v13348_v42  ;;  %v7329_v2 = vmax.bf16 %v14236_v17, %v7297_v5 }
 0x633   : > { %v7109_v37 = vpop.f32.mrf.mxu0 }
 0x634   : > { %v7239_v35 = vpack.c.bf16 %v7108_v13, %v7104_v16  ;;  %v7110_v55 = vadd.f32 %v7109_v37, %v13350_v26  ;;  %7539 = vmatprep.mubr.bf16.mxu1 %v7329_v2  ;;  %v13455_v13 = vpop.f32.mrf.mxu1 }
 0x635   : > { %v7113_v56 = vpop.f32.mrf.mxu0  ;;  %7540 = vmatmul.mubr.bf16.gmra.mxu1 %v7328_v10 }
 0x636   : > { %v7240_v4 = vpack.c.bf16 %v7110_v55, %v7106_v41  ;;  %v7298_v44 = vadd.bf16 %v13394_v31, %v7239_v35  ;;  %v7114_v49 = vadd.f32 %v7113_v56, %v13352_v33  ;;  %v13462_v35 = vpop.f32.mrf.mxu1 }
 0x637   : > { %v7115_v42 = vpop.f32.mrf.mxu0 }
 0x638   : > { %v7299_v12 = vadd.bf16 %v13397_v25, %v7240_v4  ;;  %v7330_v26 = vmax.bf16 %v14236_v17, %v7298_v44  ;;  %v7116_v14 = vadd.f32 %v7115_v42, %v13354_v60 }
 0x639   : > { %v7117_v54 = vpop.f32.mrf.mxu0 }
 0x63a   : > { %v7118_v18 = vadd.f32 %v7117_v54, %v13356_v63  ;;  %v7331_v22 = vmax.bf16 %v14236_v17, %v7299_v12  ;;  %v13467_v54 = vpop.f32.mrf.mxu1 }
 0x63b   : > { %v7119_v8 = vpop.f32.mrf.mxu0 }
 0x63c   : > { %v7241_v34 = vpack.c.bf16 %v7118_v18, %v7114_v49  ;;  %v7120_v39 = vadd.f32 %v7119_v8, %v13358_v32  ;;  %7547 = vmatprep.mubr.bf16.mxu1 %v7331_v22  ;;  %v13474_v8 = vpop.f32.mrf.mxu1 }
 0x63d   : > { %v7123_v61 = vpop.f32.mrf.mxu0  ;;  %7548 = vmatmul.mubr.bf16.gmra.mxu1 %v7330_v26 }
 0x63e   : > { %v7242_v27 = vpack.c.bf16 %v7120_v39, %v7116_v14  ;;  %v7300_v33 = vadd.bf16 %v13394_v31, %v7241_v34  ;;  %v7124_v51 = vadd.f32 %v7123_v61, %v13360_v7 }
 0x63f   : > { %v7125_v63 = vpop.f32.mrf.mxu0 }
 0x640   : > { %v7301_v21 = vadd.bf16 %v13397_v25, %v7242_v27  ;;  %v7332_v32 = vmax.bf16 %v14236_v17, %v7300_v33  ;;  %v7126_v30 = vadd.f32 %v7125_v63, %v13362_v23  ;;  %v13479_v63 = vpop.f32.mrf.mxu1 }
 0x641   : > { %v7127_v3 = vpop.f32.mrf.mxu0 }
 0x642   : > { %v7128_v62 = vadd.f32 %v7127_v3, %v13364_v58  ;;  %v7333_v60 = vmax.bf16 %v14236_v17, %v7301_v21 }
 0x643   : > { %v7129_v45 = vpop.f32.mrf.mxu0 }
 0x644   : > { %v7243_v50 = vpack.c.bf16 %v7128_v62, %v7124_v51  ;;  %v7130_v5 = vadd.f32 %v7129_v45, %v13366_v1  ;;  %7555 = vmatprep.mubr.bf16.mxu1 %v7333_v60  ;;  %v13486_v60 = vpop.f32.mrf.mxu1 }
 0x645   : > { %v7133_v20 = vpop.f32.mrf.mxu0  ;;  %7556 = vmatmul.mubr.bf16.gmra.mxu1 %v7332_v32 }
 0x646   : > { %v7244_v16 = vpack.c.bf16 %v7130_v5, %v7126_v30  ;;  %v7302_v7 = vadd.bf16 %v13394_v31, %v7243_v50  ;;  %v7134_v37 = vadd.f32 %v7133_v20, %v13368_v11 }
 0x647   : > { %v7135_v58 = vpop.f32.mrf.mxu0 }
 0x648   : > { %v7303_v2 = vadd.bf16 %v13397_v25, %v7244_v16  ;;  %v7334_v1 = vmax.bf16 %v14236_v17, %v7302_v7  ;;  %v7136_v56 = vadd.f32 %v7135_v58, %v13370_v28  ;;  %v7004_v16 = vpop.f32.mrf.mxu1 }
 0x649   : > { %v7137_v10 = vpop.f32.mrf.mxu0 }
 0x64a   : > { %v7138_v41 = vadd.f32 %v7137_v10, %v13372_v15  ;;  %v7335_v23 = vmax.bf16 %v14236_v17, %v7303_v2 }
 0x64b   : > { %v7139_v55 = vpop.f32.mrf.mxu0 }
 0x64c   : > { %v7245_v4 = vpack.c.bf16 %v7138_v41, %v7134_v37  ;;  %v7140_v44 = vadd.f32 %v7139_v55, %v13374_v53  ;;  %7563 = vmatprep.mubr.bf16.mxu1 %v7335_v23  ;;  %v7006_v37 = vpop.f32.mrf.mxu1 }
 0x64d   : > { %v7143_v42 = vpop.f32.mrf.mxu0  ;;  %7564 = vmatmul.mubr.bf16.gmra.mxu1 %v7334_v1 }
 0x64e   : > { %v7246_v12 = vpack.c.bf16 %v7140_v44, %v7136_v56  ;;  %v7304_v11 = vadd.bf16 %v13394_v31, %v7245_v4  ;;  %v7144_v22 = vadd.f32 %v7143_v42, %v13376_v19  ;;  %v7010_v44 = vpop.f32.mrf.mxu1 }
 0x64f   : > { %v7145_v15 = vpop.f32.mrf.mxu0 }
 0x650   : > { %v7305_v49 = vadd.bf16 %v13397_v25, %v7246_v12  ;;  %v7336_v53 = vmax.bf16 %v14236_v17, %v7304_v11  ;;  %v7146_v34 = vadd.f32 %v7145_v15, %v13378_v47 }
 0x651   : > { %v7147_v18 = vpop.f32.mrf.mxu0 }
 0x652   : > { %v7148_v26 = vadd.f32 %v7147_v18, %v13383_v36  ;;  %v7337_v28 = vmax.bf16 %v14236_v17, %v7305_v49  ;;  %v7012_v49 = vpop.f32.mrf.mxu1 }
 0x653   : > { %v7149_v14 = vpop.f32.mrf.mxu0 }
 0x654   : > { %v7247_v39 = vpack.c.bf16 %v7148_v26, %v7144_v22  ;;  %v7150_v61 = vadd.f32 %v7149_v14, %v13387_v57  ;;  %7571 = vmatprep.mubr.bf16.mxu1 %v7337_v28 }
 0x655   : > { %v7153_v27 = vpop.f32.mrf.mxu0  ;;  %7572 = vmatmul.mubr.bf16.gmra.mxu1 %v7336_v53 }
 0x656   : > { %v7248_v33 = vpack.c.bf16 %v7150_v61, %v7146_v34  ;;  %v7306_v19 = vadd.bf16 %v13394_v31, %v7247_v39  ;;  %v7154_v51 = vadd.f32 %v7153_v27, %v13389_v52  ;;  %v7014_v34 = vpop.f32.mrf.mxu1 }
 0x657   : > { %v7155_v36 = vpop.f32.mrf.mxu0 }
 0x658   : > { %v7307_v21 = vadd.bf16 %v13397_v25, %v7248_v33  ;;  %v7338_v57 = vmax.bf16 %v14236_v17, %v7306_v19  ;;  %v7156_v45 = vadd.f32 %v7155_v36, %v13391_v59  ;;  %v7016_v19 = vpop.f32.mrf.mxu1 }
 0x659   : > { %v7157_v3 = vpop.f32.mrf.mxu0 }
 0x65a   : > { %v7158_v62 = vadd.f32 %v7157_v3, %v13399_v40  ;;  %v7339_v47 = vmax.bf16 %v14236_v17, %v7307_v21 }
 0x65b   : > { %v7159_v32 = vpop.f32.mrf.mxu0 }
 0x65c   : > { %v7249_v30 = vpack.c.bf16 %v7158_v62, %v7154_v51  ;;  %v7160_v50 = vadd.f32 %v7159_v32, %v13404_v24  ;;  %7579 = vmatprep.mubr.bf16.mxu1 %v7339_v47 }
 0x65d   : > { %v7163_v5 = vpop.f32.mrf.mxu0  ;;  %7580 = vmatmul.mubr.bf16.gmra.mxu1 %v7338_v57  ;;  %v7020_v57 = vpop.f32.mrf.mxu1 }
 0x65e   : > { %v7250_v20 = vpack.c.bf16 %v7160_v50, %v7156_v45  ;;  %v7308_v52 = vadd.bf16 %v13394_v31, %v7249_v30  ;;  %v7164_v2 = vadd.f32 %v7163_v5, %v13407_v0 }
 0x65f   : > { %v7165_v40 = vpop.f32.mrf.mxu0 }
 0x660   : > { %v7309_v7 = vadd.bf16 %v13397_v25, %v7250_v20  ;;  %v7340_v24 = vmax.bf16 %v14236_v17, %v7308_v52  ;;  %v7166_v23 = vadd.f32 %v7165_v40, %v13414_v46 }
 0x661   : > { %v7167_v58 = vpop.f32.mrf.mxu0 }
 0x662   : > { %v7168_v10 = vadd.f32 %v7167_v58, %v13419_v48  ;;  %v7341_v59 = vmax.bf16 %v14236_v17, %v7309_v7 }
 0x663   : > { %v7169_v41 = vpop.f32.mrf.mxu0 }
 0x664   : > { %v7251_v1 = vpack.c.bf16 %v7168_v10, %v7164_v2  ;;  %v7170_v55 = vadd.f32 %v7169_v41, %v13426_v43  ;;  %7587 = vmatprep.mubr.bf16.mxu1 %v7341_v59 }
 0x665   : > { %v7173_v56 = vpop.f32.mrf.mxu0  ;;  %7588 = vmatmul.mubr.bf16.gmra.mxu1 %v7340_v24 }
 0x666   : > { %v7252_v4 = vpack.c.bf16 %v7170_v55, %v7166_v23  ;;  %v7310_v0 = vadd.bf16 %v13394_v31, %v7251_v1  ;;  %v7174_v11 = vadd.f32 %v7173_v56, %v13431_v6 }
 0x667   : > { %v7175_v42 = vpop.f32.mrf.mxu0 }
 0x668   : > { %v7311_v48 = vadd.bf16 %v13397_v25, %v7252_v4  ;;  %v7342_v43 = vmax.bf16 %v14236_v17, %v7310_v0  ;;  %v7176_v22 = vadd.f32 %v7175_v42, %v13438_v29 }
 0x669   : > { %v7177_v12 = vpop.f32.mrf.mxu0 }
 0x66a   : > { %v7178_v15 = vadd.f32 %v7177_v12, %v13443_v9  ;;  %v7343_v46 = vmax.bf16 %v14236_v17, %v7311_v48 }
 0x66b   : > { %v7179_v18 = vpop.f32.mrf.mxu0 }
 0x66c   : > { %v7253_v26 = vpack.c.bf16 %v7178_v15, %v7174_v11  ;;  %v7180_v28 = vadd.f32 %v7179_v18, %v13450_v38  ;;  %7595 = vmatprep.mubr.bf16.mxu1 %v7343_v46 }
 0x66d   : > { %v7183_v53 = vpop.f32.mrf.mxu0  ;;  %7596 = vmatmul.mubr.bf16.gmra.mxu1 %v7342_v43 }
 0x66e   : > { %v7254_v14 = vpack.c.bf16 %v7180_v28, %v7176_v22  ;;  %v7312_v6 = vadd.bf16 %v13394_v31, %v7253_v26  ;;  %v7184_v27 = vadd.f32 %v7183_v53, %v13455_v13 }
 0x66f   : > { %v7185_v39 = vpop.f32.mrf.mxu0 }
 0x670   : > { %v7313_v9 = vadd.bf16 %v13397_v25, %v7254_v14  ;;  %v7344_v38 = vmax.bf16 %v14236_v17, %v7312_v6  ;;  %v7186_v21 = vadd.f32 %v7185_v39, %v13462_v35  ;;  %v7022_v35 = vpop.f32.mrf.mxu1 }
 0x671   : > { %v7187_v61 = vpop.f32.mrf.mxu0 }
 0x672   : > { %v7188_v33 = vadd.f32 %v7187_v61, %v13467_v54  ;;  %v7345_v29 = vmax.bf16 %v14236_v17, %v7313_v9  ;;  %v7024_v10 = vpop.f32.mrf.mxu1 }
 0x673   : > { %v7189_v36 = vpop.f32.mrf.mxu0 }
 0x674   : > { %v7255_v3 = vpack.c.bf16 %v7188_v33, %v7184_v27  ;;  %v7190_v51 = vadd.f32 %v7189_v36, %v13474_v8  ;;  %7603 = vmatprep.mubr.bf16.mxu1 %v7345_v29  ;;  %v7026_v55 = vpop.f32.mrf.mxu1 }
 0x675   : > { %v7193_v62 = vpop.f32.mrf.mxu0  ;;  %7604 = vmatmul.mubr.bf16.gmra.mxu1 %v7344_v38 }
 0x676   : > { %v7256_v47 = vpack.c.bf16 %v7190_v51, %v7186_v21  ;;  %v7314_v13 = vadd.bf16 %v13394_v31, %v7255_v3  ;;  %v7194_v30 = vadd.f32 %v7193_v62, %v13479_v63  ;;  %v7030_v12 = vpop.f32.mrf.mxu1 }
 0x677   : > { %v7195_v32 = vpop.f32.mrf.mxu0 }
 0x678   : > { %v7315_v54 = vadd.bf16 %v13397_v25, %v7256_v47  ;;  %v7346_v20 = vmax.bf16 %v14236_v17, %v7314_v13  ;;  %v7196_v52 = vadd.f32 %v7195_v32, %v13486_v60  ;;  %v7032_v26 = vpop.f32.mrf.mxu1 }
 0x679   : > { %v7197_v45 = vpop.f32.mrf.mxu0 }
 0x67a   : > { %v7198_v50 = vadd.f32 %v7197_v45, %v7004_v16  ;;  %v7347_v5 = vmax.bf16 %v14236_v17, %v7315_v54  ;;  %v7034_v9 = vpop.f32.mrf.mxu1 }
 0x67b   : > { %v7199_v8 = vpop.f32.mrf.mxu0 }
 0x67c   : > { %v7257_v40 = vpack.c.bf16 %v7198_v50, %v7194_v30  ;;  %v7200_v7 = vadd.f32 %v7199_v8, %v7006_v37  ;;  %7611 = vmatprep.mubr.bf16.mxu1 %v7347_v5  ;;  %v7036_v21 = vpop.f32.mrf.mxu1 }
 0x67d   : > { %v7203_v58 = vpop.f32.mrf.mxu0  ;;  %7612 = vmatmul.mubr.bf16.gmra.mxu1 %v7346_v20 }
 0x67e   : > { %v7258_v2 = vpack.c.bf16 %v7200_v7, %v7196_v52  ;;  %v7316_v59 = vadd.bf16 %v13394_v31, %v7257_v40  ;;  %v7204_v41 = vadd.f32 %v7203_v58, %v7010_v44 }
 0x67f   : > { %v7205_v24 = vpop.f32.mrf.mxu0 }
 0x680   : > { %v7317_v63 = vadd.bf16 %v13397_v25, %v7258_v2  ;;  %v7348_v60 = vmax.bf16 %v14236_v17, %v7316_v59  ;;  %v7206_v37 = vadd.f32 %v7205_v24, %v7012_v49 }
 0x681   : > { %v7207_v16 = vpop.f32.mrf.mxu0 }
 0x682   : > { %v7208_v23 = vadd.f32 %v7207_v16, %v7014_v34  ;;  %v7349_v1 = vmax.bf16 %v14236_v17, %v7317_v63 }
 0x683   : > { %v7209_v56 = vpop.f32.mrf.mxu0 }
 0x684   : > { %v7259_v4 = vpack.c.bf16 %v7208_v23, %v7204_v41  ;;  %v7210_v0 = vadd.f32 %v7209_v56, %v7016_v19  ;;  %7619 = vmatprep.mubr.bf16.mxu1 %v7349_v1 }
 0x685   : > { %v7213_v42 = vpop.f32.mrf.mxu0  ;;  %7620 = vmatmul.mubr.bf16.gmra.mxu1 %v7348_v60 }
 0x686   : > { %v7260_v48 = vpack.c.bf16 %v7210_v0, %v7206_v37  ;;  %v7318_v11 = vadd.bf16 %v13394_v31, %v7259_v4  ;;  %v7214_v43 = vadd.f32 %v7213_v42, %v7020_v57 }
 0x687   : > { %v7215_v15 = vpop.f32.mrf.mxu0 }
 0x688   : > { %v7319_v44 = vadd.bf16 %v13397_v25, %v7260_v48  ;;  %v7350_v49 = vmax.bf16 %v14236_v17, %v7318_v11  ;;  %v7216_v53 = vadd.f32 %v7215_v15, %v7022_v35 }
 0x689   : > { %v7217_v46 = vpop.f32.mrf.mxu0 }
 0x68a   : > { %v7218_v18 = vadd.f32 %v7217_v46, %v7024_v10  ;;  %v7351_v22 = vmax.bf16 %v14236_v17, %v7319_v44 }
 0x68b   : > { %v7219_v28 = vpop.f32.mrf.mxu0 }
 0x68c   : > { %v7261_v14 = vpack.c.bf16 %v7218_v18, %v7214_v43  ;;  %v7220_v34 = vadd.f32 %v7219_v28, %v7026_v55  ;;  %7627 = vmatprep.mubr.bf16.mxu1 %v7351_v22 }
 0x68d   : > { %v7223_v6 = vpop.f32.mrf.mxu0  ;;  %7628 = vmatmul.mubr.bf16.gmra.mxu1 %v7350_v49 }
 0x68e   : > { %v7262_v39 = vpack.c.bf16 %v7220_v34, %v7216_v53  ;;  %v7320_v61 = vadd.bf16 %v13394_v31, %v7261_v14  ;;  %v7224_v19 = vadd.f32 %v7223_v6, %v7030_v12 }
 0x68f   : > { %v7225_v27 = vpop.f32.mrf.mxu0 }
 0x690   : > { %v7321_v33 = vadd.bf16 %v13397_v25, %v7262_v39  ;;  %v7352_v3 = vmax.bf16 %v14236_v17, %v7320_v61  ;;  %v7226_v62 = vadd.f32 %v7225_v27, %v7032_v26 }
 0x691   : > { %v7227_v29 = vpop.f32.mrf.mxu0 }
 0x692   : > { %v7228_v38 = vadd.f32 %v7227_v29, %v7034_v9  ;;  %v7353_v36 = vmax.bf16 %v14236_v17, %v7321_v33 }
 0x693   : > { %v7229_v51 = vpop.f32.mrf.mxu0 }
 0x694   : > { %v7263_v47 = vpack.c.bf16 %v7228_v38, %v7224_v19  ;;  %v7230_v57 = vadd.f32 %v7229_v51, %v7036_v21  ;;  %7635 = vmatprep.mubr.bf16.mxu1 %v7353_v36 }
 0x695   : > { %7636 = vmatmul.mubr.bf16.gmra.mxu1 %v7352_v3 }
 0x696   : > { %v7264_v13 = vpack.c.bf16 %v7230_v57, %v7226_v62  ;;  %v7322_v32 = vadd.bf16 %v13394_v31, %v7263_v47 }
 0x698   : > { %v7323_v54 = vadd.bf16 %v13397_v25, %v7264_v13  ;;  %v7354_v30 = vmax.bf16 %v14236_v17, %v7322_v32  ;;  %v13540_v25 = vld [vmem:[%s13611_s12] ss:$0 sm:$0xff] }
 0x69a   : > { %v7355_v45 = vmax.bf16 %v14236_v17, %v7323_v54 }
 0x69c   : > { %7643 = vmatprep.mubr.bf16.mxu1 %v7355_v45 }
 0x69d   : > { %7644 = vmatmul.mubr.bf16.gmra.mxu1 %v7354_v30 }
 0x6e5   : > { %v8243_v50 = vpop.f32.mrf.mxu1 }
 0x6e7   : > { %v8244_v5 = vpop.f32.mrf.mxu1 }
 0x6e8   : > { %v8245_v35 = vadd.f32 %v8244_v5, %v8243_v50 }
 0x6e9   : > { %v8246_v20 = vpop.f32.mrf.mxu1 }
 0x6ea   : > { %v7526_v16 = vadd.f32 %v8245_v35, %v13540_v25 }
 0x6eb   : > { %v8247_v8 = vpop.f32.mrf.mxu1 }
 0x6ec   : > { %v8248_v52 = vadd.f32 %v8247_v8, %v8246_v20 }
 0x6ed   : > { %v8249_v40 = vpop.f32.mrf.mxu1 }
 0x6ee   : > { %v7529_v56 = vadd.f32 %v8248_v52, %v13540_v25 }
 0x6ef   : > { %v8250_v7 = vpop.f32.mrf.mxu1 }
 0x6f0   : > { %v8251_v58 = vadd.f32 %v8250_v7, %v8249_v40 }
 0x6f1   : > { %v8252_v2 = vpop.f32.mrf.mxu1 }
 0x6f2   : > { %v7534_v12 = vadd.f32 %v8251_v58, %v13540_v25 }
 0x6f3   : > { %v8253_v10 = vpop.f32.mrf.mxu1 }
 0x6f4   : > { %v8254_v31 = vadd.f32 %v8253_v10, %v8252_v2 }
 0x6f5   : > { %v8255_v59 = vpop.f32.mrf.mxu1 }
 0x6f6   : > { %v7537_v18 = vadd.f32 %v8254_v31, %v13540_v25 }
 0x6f7   : > { %v8256_v17 = vpop.f32.mrf.mxu1 }
 0x6f8   : > { %v8257_v24 = vadd.f32 %v8256_v17, %v8255_v59 }
 0x6f9   : > { %v8258_v63 = vpop.f32.mrf.mxu1 }
 0x6fa   : > { %v7542_v41 = vadd.f32 %v8257_v24, %v13540_v25 }
 0x6fb   : > { %v8259_v23 = vpop.f32.mrf.mxu1 }
 0x6fc   : > { %v7652_v1 = vmax.f32 %v7526_v16, %v7542_v41  ;;  %v8260_v55 = vadd.f32 %v8259_v23, %v8258_v63 }
 0x6fd   : > { %v8261_v60 = vpop.f32.mrf.mxu1 }
 0x6fe   : > { %v7545_v37 = vadd.f32 %v8260_v55, %v13540_v25 }
 0x6ff   : > { %v8262_v4 = vpop.f32.mrf.mxu1 }
 0x700   : > { %v7653_v0 = vmax.f32 %v7529_v56, %v7545_v37  ;;  %v8263_v42 = vadd.f32 %v8262_v4, %v8261_v60 }
 0x701   : > { %v8264_v48 = vpop.f32.mrf.mxu1 }
 0x702   : > { %v7550_v11 = vadd.f32 %v8263_v42, %v13540_v25 }
 0x703   : > { %v8265_v15 = vpop.f32.mrf.mxu1 }
 0x704   : > { %v7654_v44 = vmax.f32 %v7534_v12, %v7550_v11  ;;  %v8266_v46 = vadd.f32 %v8265_v15, %v8264_v48 }
 0x705   : > { %v8267_v43 = vpop.f32.mrf.mxu1 }
 0x706   : > { %v7553_v22 = vadd.f32 %v8266_v46, %v13540_v25 }
 0x707   : > { %v8268_v26 = vpop.f32.mrf.mxu1 }
 0x708   : > { %v7655_v49 = vmax.f32 %v7537_v18, %v7553_v22  ;;  %v8269_v28 = vadd.f32 %v8268_v26, %v8267_v43 }
 0x709   : > { %v8270_v53 = vpop.f32.mrf.mxu1 }
 0x70a   : > { %v7558_v14 = vadd.f32 %v8269_v28, %v13540_v25 }
 0x70b   : > { %v8271_v34 = vpop.f32.mrf.mxu1 }
 0x70c   : > { %v13551_v6 = vmax.f32 %v7652_v1, %v7558_v14  ;;  %v8272_v39 = vadd.f32 %v8271_v34, %v8270_v53 }
 0x70d   : > { %v8273_v9 = vpop.f32.mrf.mxu1 }
 0x70e   : > { %v7561_v61 = vadd.f32 %v8272_v39, %v13540_v25 }
 0x70f   : > { %v8274_v27 = vpop.f32.mrf.mxu1 }
 0x710   : > { %v13554_v33 = vmax.f32 %v7653_v0, %v7561_v61  ;;  %v8275_v29 = vadd.f32 %v8274_v27, %v8273_v9 }
 0x711   : > { %v8276_v19 = vpop.f32.mrf.mxu1 }
 0x712   : > { %v7566_v38 = vadd.f32 %v8275_v29, %v13540_v25 }
 0x713   : > { %v8277_v36 = vpop.f32.mrf.mxu1 }
 0x714   : > { %v13557_v21 = vmax.f32 %v7654_v44, %v7566_v38  ;;  %v8278_v3 = vadd.f32 %v8277_v36, %v8276_v19 }
 0x715   : > { %v8279_v51 = vpop.f32.mrf.mxu1 }
 0x716   : > { %v7569_v62 = vadd.f32 %v8278_v3, %v13540_v25 }
 0x717   : > { %v8280_v47 = vpop.f32.mrf.mxu1 }
 0x718   : > { %v13560_v57 = vmax.f32 %v7655_v49, %v7569_v62  ;;  %v8281_v13 = vadd.f32 %v8280_v47, %v8279_v51 }
 0x719   : > { %v8282_v32 = vpop.f32.mrf.mxu1 }
 0x71a   : > { %v7574_v54 = vadd.f32 %v8281_v13, %v13540_v25 }
 0x71b   : > { %v8283_v45 = vpop.f32.mrf.mxu1 }
 0x71c   : > { %v7660_v30 = vmax.f32 %v13551_v6, %v7574_v54  ;;  %v8284_v50 = vadd.f32 %v8283_v45, %v8282_v32 }
 0x71d   : > { %v8285_v5 = vpop.f32.mrf.mxu1 }
 0x71e   : > { %v7577_v35 = vadd.f32 %v8284_v50, %v13540_v25 }
 0x71f   : > { %v8286_v20 = vpop.f32.mrf.mxu1 }
 0x720   : > { %v7661_v8 = vmax.f32 %v13554_v33, %v7577_v35  ;;  %v8287_v14 = vadd.f32 %v8286_v20, %v8285_v5 }
 0x721   : > { %v8288_v52 = vpop.f32.mrf.mxu1 }
 0x722   : > { %v7582_v51 = vadd.f32 %v8287_v14, %v13540_v25 }
 0x723   : > { %v8289_v40 = vpop.f32.mrf.mxu1 }
 0x724   : > { %v8290_v34 = vadd.f32 %v8289_v40, %v8288_v52 }
 0x725   : > { %v8291_v7 = vpop.f32.mrf.mxu1 }
 0x726   : > { %v7585_v62 = vadd.f32 %v8290_v34, %v13540_v25 }
 0x727   : > { %v8292_v58 = vpop.f32.mrf.mxu1 }
 0x728   : > { %v8293_v11 = vadd.f32 %v8292_v58, %v8291_v7 }
 0x729   : > { %v8294_v2 = vpop.f32.mrf.mxu1 }
 0x72a   : > { %v7590_v22 = vadd.f32 %v8293_v11, %v13540_v25 }
 0x72b   : > { %v8295_v10 = vpop.f32.mrf.mxu1 }
 0x72c   : > { %v8296_v44 = vadd.f32 %v8295_v10, %v8294_v2  ;;  %v7664_v27 = vmax.f32 %v7660_v30, %v7590_v22  ;;  %v7662_v2 = vmax.f32 %v13557_v21, %v7582_v51  ;;  %v7663_v10 = vmax.f32 %v13560_v57, %v7585_v62 }
 0x72d   : > { %v8297_v31 = vpop.f32.mrf.mxu1 }
 0x72e   : > { %v7593_v28 = vadd.f32 %v8296_v44, %v13540_v25 }
 0x72f   : > { %v8298_v59 = vpop.f32.mrf.mxu1 }
 0x730   : > { %v8299_v33 = vadd.f32 %v8298_v59, %v8297_v31  ;;  %v7665_v36 = vmax.f32 %v7661_v8, %v7593_v28 }
 0x731   : > { %v8300_v17 = vpop.f32.mrf.mxu1 }
 0x732   : > { %v7598_v5 = vadd.f32 %v8299_v33, %v13540_v25 }
 0x733   : > { %v8301_v24 = vpop.f32.mrf.mxu1 }
 0x734   : > { %v8302_v29 = vadd.f32 %v8301_v24, %v8300_v17 }
 0x735   : > { %v8303_v63 = vpop.f32.mrf.mxu1 }
 0x736   : > { %v7601_v35 = vadd.f32 %v8302_v29, %v13540_v25 }
 0x737   : > { %v8304_v16 = vpop.f32.mrf.mxu1 }
 0x738   : > { %v8305_v46 = vadd.f32 %v8304_v16, %v8303_v63 }
 0x739   : > { %v8306_v41 = vpop.f32.mrf.mxu1 }
 0x73a   : > { %v7606_v6 = vadd.f32 %v8305_v46, %v13540_v25 }
 0x73b   : > { %v8307_v23 = vpop.f32.mrf.mxu1 }
 0x73c   : > { %v8308_v18 = vadd.f32 %v8307_v23, %v8306_v41  ;;  %v7668_v47 = vmax.f32 %v7664_v27, %v7606_v6  ;;  %v7666_v41 = vmax.f32 %v7662_v2, %v7598_v5 }
 0x73d   : > { %v8309_v1 = vpop.f32.mrf.mxu1 }
 0x73e   : > { %v7609_v9 = vadd.f32 %v8308_v18, %v13540_v25 }
 0x73f   : > { %v8310_v55 = vpop.f32.mrf.mxu1 }
 0x740   : > { %v8311_v13 = vadd.f32 %v8310_v55, %v8309_v1  ;;  %v7669_v54 = vmax.f32 %v7665_v36, %v7609_v9  ;;  %v7667_v1 = vmax.f32 %v7663_v10, %v7601_v35 }
 0x741   : > { %v8312_v60 = vpop.f32.mrf.mxu1 }
 0x742   : > { %v7614_v31 = vadd.f32 %v8311_v13, %v13540_v25 }
 0x743   : > { %v8313_v56 = vpop.f32.mrf.mxu1 }
 0x744   : > { %v8314_v45 = vadd.f32 %v8313_v56, %v8312_v60  ;;  %v7670_v21 = vmax.f32 %v7666_v41, %v7614_v31 }
 0x745   : > { %v8315_v37 = vpop.f32.mrf.mxu1 }
 0x746   : > { %v7617_v17 = vadd.f32 %v8314_v45, %v13540_v25 }
 0x747   : > { %v8316_v4 = vpop.f32.mrf.mxu1 }
 0x748   : > { %v8317_v26 = vadd.f32 %v8316_v4, %v8315_v37  ;;  %v7671_v57 = vmax.f32 %v7667_v1, %v7617_v17 }
 0x749   : > { %v8318_v0 = vpop.f32.mrf.mxu1 }
 0x74a   : > { %v7622_v19 = vadd.f32 %v8317_v26, %v13540_v25 }
 0x74b   : > { %v8319_v42 = vpop.f32.mrf.mxu1 }
 0x74c   : > { %v8320_v53 = vadd.f32 %v8319_v42, %v8318_v0  ;;  %v7672_v20 = vmax.f32 %v7668_v47, %v7622_v19 }
 0x74d   : > { %v8321_v48 = vpop.f32.mrf.mxu1 }
 0x74e   : > { %v7625_v3 = vadd.f32 %v8320_v53, %v13540_v25 }
 0x74f   : > { %v8322_v12 = vpop.f32.mrf.mxu1 }
 0x750   : > { %v7673_v52 = vmax.f32 %v7669_v54, %v7625_v3  ;;  %v8323_v40 = vadd.f32 %v8322_v12, %v8321_v48 }
 0x751   : > { %v8324_v15 = vpop.f32.mrf.mxu1 }
 0x752   : > { %v7630_v55 = vadd.f32 %v8323_v40, %v13540_v25 }
 0x753   : > { %v8325_v43 = vpop.f32.mrf.mxu1 }
 0x754   : > { %v8326_v7 = vadd.f32 %v8325_v43, %v8324_v15  ;;  %v7674_v42 = vmax.f32 %v7670_v21, %v7630_v55 }
 0x755   : > { %v8327_v49 = vpop.f32.mrf.mxu1 }
 0x756   : > { %v7633_v60 = vadd.f32 %v8326_v7, %v13540_v25 }
 0x757   : > { %v8328_v39 = vpop.f32.mrf.mxu1 }
 0x758   : > { %v8329_v61 = vadd.f32 %v8328_v39, %v8327_v49  ;;  %v7675_v48 = vmax.f32 %v7671_v57, %v7633_v60 }
 0x759   : > { %v8330_v38 = vpop.f32.mrf.mxu1 }
 0x75a   : > { %v7638_v50 = vadd.f32 %v8329_v61, %v13540_v25 }
 0x75b   : > { %v8331_v32 = vpop.f32.mrf.mxu1 }
 0x75c   : > { %v8332_v30 = vadd.f32 %v8331_v32, %v8330_v38  ;;  %v7676_v24 = vmax.f32 %v7672_v20, %v7638_v50 }
 0x75d   : > { %v8333_v8 = vpop.f32.mrf.mxu1 }
 0x75e   : > { %v7641_v58 = vadd.f32 %v8332_v30, %v13540_v25 }
 0x75f   : > { %v8334_v59 = vpop.f32.mrf.mxu1 }
 0x760   : > { %v7677_v63 = vmax.f32 %v7673_v52, %v7641_v58  ;;  %v8335_v16 = vadd.f32 %v8334_v59, %v8333_v8 }
 0x761   : > { %v8336_v23 = vpop.f32.mrf.mxu1 }
 0x762   : > { %v7680_v56 = vmax.f32 %v7676_v24, %v7677_v63  ;;  %v7646_v4 = vadd.f32 %v8335_v16, %v13540_v25 }
 0x763   : > { %v8337_v37 = vpop.f32.mrf.mxu1 }
 0x764   : > { %v8338_v0 = vadd.f32 %v8337_v37, %v8336_v23  ;;  %v7678_v11 = vmax.f32 %v7674_v42, %v7646_v4 }
 0x766   : > { %v7649_v12 = vadd.f32 %v8338_v0, %v13540_v25 }
 0x768   : > { %v7679_v15 = vmax.f32 %v7675_v48, %v7649_v12 }
 0x76a   : > { %v7681_v44 = vmax.f32 %v7678_v11, %v7679_v15 }
 0x76c   : > { %v7682_v46 = vmax.f32 %v7680_v56, %v7681_v44 }
 0x76e   : > { %v7683_v43 = vrot.slane %v7682_v46, 4 }
 0x770   : > { %v7684_v18 = vmax.f32 %v7682_v46, %v7683_v43 }
 0x772   : > { %v7685_v22 = vrot.slane %v7684_v18, 2 }
 0x774   : > { %v7686_v26 = vmax.f32 %v7684_v18, %v7685_v22 }
 0x776   : > { %v7687_v49 = vrot.slane %v7686_v26, 1 }
 0x778   : > { %v7688_v28 = vmax.f32 %v7686_v26, %v7687_v49 }
 0x77a   : > { %7693 = vst [vmem:[%s481_s23] sm:$0x1] %v7688_v28 }
 0x77b PF: > { %s23_s27 = sadd.s32 1, %s8995_s27   ;;  %s14353_s25 = smov %s8991_s26 }
 0x77c   : > { %p20_p5 = scmp.ge.s32.totalorder %s23_s27, 6   ;;  %s14354_s26 = smov %s14356_s28 }
 0x77e   :  { %22 = sbr.rel (!%p20_p5) target bundleno = 2 (0x2), region = 113 }

</bundles_post_ra>
